<compile_context>
chip_gen: v6e
topology: v6e:2x2x1
jax: 0.10.0
libtpu: 0.0.40
codegen_flags: <defaults>
</compile_context>

<pallas_src>
import math

import jax
import jax.numpy as jnp
from jax import lax
from jax.experimental import pallas as pl
from jax.experimental.pallas import tpu as pltpu

WEIGHT_DTYPE = jnp.float32   # jnp.bfloat16: half weight DMA, 2x MXU rate on v6e/v7x


# ----------------------------------------------------------------------------
# Small helpers (used inside kernels)
# ----------------------------------------------------------------------------

def _round_up(x, m):
    return ((x + m - 1) // m) * m


def _mm(a, w):
    """MXU matmul with f32 accumulation; activations match the weight dtype."""
    return jnp.dot(a.astype(w.dtype), w, preferred_element_type=jnp.float32)


def _ln(x, g, b, eps=1e-5):
    mu = jnp.mean(x, axis=-1, keepdims=True)
    xc = x - mu
    var = jnp.mean(xc * xc, axis=-1, keepdims=True)
    return xc * lax.rsqrt(var + eps) * g + b


def _softmax_last(s):
    m = jnp.max(s, axis=-1, keepdims=True)
    p = jnp.exp(s - m)
    return p * pl.reciprocal(jnp.sum(p, axis=-1, keepdims=True), approx=True)


def _stacked_spec(a):
    # (L, r, c) weight stacked over layers -> one (1, r, c) block per grid step.
    return pl.BlockSpec((1,) + a.shape[1:], lambda l: (l, 0, 0))


def _const_spec(a):
    # 2-D array resident across the whole layer grid (constant block index).
    return pl.BlockSpec(a.shape, lambda l: (0, 0))


# ----------------------------------------------------------------------------
# Kernel 1: image encoder  (patch embed -> relu -> mean pool -> proj), one call
# ----------------------------------------------------------------------------

def image_encoder_fwd(images, p):
    # TODO(synk): WorldModel is not provided in the reference source; implemented
    # here as a patch-embedding encoder producing one (embed_dim,) vector per image.
    B, C, H, W = images.shape
    patch = 4
    Ph, Pw = H // patch, W // patch
    P = Ph * Pw
    x = images.reshape(B, C, Ph, patch, Pw, patch)
    x = x.transpose(0, 2, 4, 1, 3, 5).reshape(B * P, C * patch * patch)
    # block-diagonal mean-pool matrix: (B, B*P), row b averages rows b*P:(b+1)*P
    pool = jnp.repeat(jnp.eye(B, dtype=jnp.float32), P, axis=1) / float(P)

    def kernel(x_ref, pw_ref, pb_ref, pool_ref, qw_ref, qb_ref, o_ref):
        h = jnp.maximum(_mm(x_ref[...], pw_ref[...]) + pb_ref[...], 0.0)
        g = jnp.dot(pool_ref[...], h, preferred_element_type=jnp.float32)
        o_ref[...] = _mm(g, qw_ref[...]) + qb_ref[...]

    E = p["proj_w"].shape[1]
    return pl.pallas_call(
        kernel,
        out_shape=jax.ShapeDtypeStruct((B, E), jnp.float32),
    )(x, p["patch_w"], p["patch_b"], pool, p["proj_w"], p["proj_b"])


# ----------------------------------------------------------------------------
# Kernel 2: all main EncoderLayers stacked on one grid axis
# ----------------------------------------------------------------------------

def main_encoder_stack(x0, ctx, lp, *, B, S, H):
    L = lp["wqkv"].shape[0]
    BS, d = x0.shape
    dh = d // H
    scale = 1.0 / math.sqrt(dh)

    def kernel(x0_ref, ctx_ref,
               n1g, n1b, wqkv, bqkv, wo, bo,
               wv, bv, woc, boc,
               n3g, n3b, w1, b1, w2, b2,
               xo_ref):
        l = pl.program_id(0)

        @pl.when(l == 0)
        def _():
            xo_ref[...] = x0_ref[...]

        x = xo_ref[...]                                   # (B*S, d), VMEM-resident
        # --- self-attention (pre-LN), all heads / batch elems in-kernel ---
        xn = _ln(x, n1g[0], n1b[0])
        qkv = _mm(xn, wqkv[0]) + bqkv[0]                  # (B*S, 3d)
        rows = []
        for b in range(B):
            r0 = b * S
            heads = []
            for h in range(H):
                c0 = h * dh
                q = qkv[r0:r0 + S, c0:c0 + dh]
                k = qkv[r0:r0 + S, d + c0:d + c0 + dh]
                v = qkv[r0:r0 + S, 2 * d + c0:2 * d + c0 + dh]
                s = lax.dot_general(q, k, (((1,), (1,)), ((), ())),
                                    preferred_element_type=jnp.float32) * scale
                p = _softmax_last(s)
                heads.append(jnp.dot(p, v, preferred_element_type=jnp.float32))
            rows.append(jnp.concatenate(heads, axis=-1))
        attn = jnp.concatenate(rows, axis=0)              # (B*S, d)
        x = x + _mm(attn, wo[0]) + bo[0]
        # --- cross-attention over S identical context rows collapses to
        #     out_proj(v_proj(ctx_row)), independent of the query (exact) ---
        cr = _mm(_mm(ctx_ref[...], wv[0]) + bv[0], woc[0]) + boc[0]     # (B, d)
        x = (x.reshape(B, S, d) + cr[:, None, :]).reshape(BS, d)
        # --- feed-forward (pre-LN) ---
        xn = _ln(x, n3g[0], n3b[0])
        hid = jnp.maximum(_mm(xn, w1[0]) + b1[0], 0.0)
        x = x + _mm(hid, w2[0]) + b2[0]
        xo_ref[...] = x

    names = ["n1g", "n1b", "wqkv", "bqkv", "wo", "bo",
             "wv", "bv", "woc", "boc",
             "n3g", "n3b", "w1", "b1", "w2", "b2"]
    w_args = [lp[n] for n in names]
    in_specs = [_const_spec(x0), _const_spec(ctx)] + [_stacked_spec(a) for a in w_args]
    return pl.pallas_call(
        kernel,
        out_shape=jax.ShapeDtypeStruct((BS, d), jnp.float32),
        grid=(L,),
        in_specs=in_specs,
        out_specs=pl.BlockSpec((BS, d), lambda l: (0, 0)),
        compiler_params=pltpu.CompilerParams(dimension_semantics=("arbitrary",)),
    )(x0, ctx, *w_args)


# ----------------------------------------------------------------------------
# Kernel 4: detection-head encoder (6 torch encoder layers), collapsed to M=1
# ----------------------------------------------------------------------------

def det_encoder_stack(lp, d):
    L = lp["wv"].shape[0]

    def kernel(wv, bv, wo, bo, n1g, n1b, w1, b1, w2, b2, n2g, n2b, xo_ref):
        l = pl.program_id(0)

        @pl.when(l == 0)
        def _():
            # src = zeros_like(query) in the reference -> all rows identical zero
            xo_ref[...] = jnp.zeros_like(xo_ref)

        x = xo_ref[...]                                   # (1, d)
        # self-attn over identical rows -> out_proj(v_proj(row))  (exact)
        sa = _mm(_mm(x, wv[0]) + bv[0], wo[0]) + bo[0]
        x = _ln(x + sa, n1g[0], n1b[0])
        hid = jnp.maximum(_mm(x, w1[0]) + b1[0], 0.0)
        x = _ln(x + _mm(hid, w2[0]) + b2[0], n2g[0], n2b[0])
        xo_ref[...] = x

    names = ["wv", "bv", "wo", "bo", "n1g", "n1b",
             "w1", "b1", "w2", "b2", "n2g", "n2b"]
    w_args = [lp[n] for n in names]
    return pl.pallas_call(
        kernel,
        out_shape=jax.ShapeDtypeStruct((1, d), jnp.float32),
        grid=(L,),
        in_specs=[_stacked_spec(a) for a in w_args],
        out_specs=pl.BlockSpec((1, d), lambda l: (0, 0)),
        compiler_params=pltpu.CompilerParams(dimension_semantics=("arbitrary",)),
    )(*w_args)


# ----------------------------------------------------------------------------
# Kernel 5: detection-head decoder (6 torch decoder layers), collapsed to M=B
# ----------------------------------------------------------------------------

def det_decoder_stack(y0, mem_raw, enc_g, enc_b, lp):
    L = lp["wv_s"].shape[0]
    B, d = y0.shape

    def kernel(y0_ref, mem_ref, eg_ref, eb_ref,
               wv_s, bv_s, wo_s, bo_s, n1g, n1b,
               wv_c, bv_c, wo_c, bo_c, n2g, n2b,
               w1, b1, w2, b2, n3g, n3b,
               yo_ref):
        l = pl.program_id(0)

        @pl.when(l == 0)
        def _():
            yo_ref[...] = y0_ref[...]

        y = yo_ref[...]                                   # (B, d)
        mem = _ln(mem_ref[...], eg_ref[...], eb_ref[...])  # encoder final norm, (1, d)
        # decoder self-attn over identical rows -> out_proj(v_proj(row))  (exact)
        sa = _mm(_mm(y, wv_s[0]) + bv_s[0], wo_s[0]) + bo_s[0]
        y = _ln(y + sa, n1g[0], n1b[0])
        # cross-attn over identical encoder-memory rows -> out_proj(v_proj(mem))
        ca = _mm(_mm(mem, wv_c[0]) + bv_c[0], wo_c[0]) + bo_c[0]        # (1, d)
        y = _ln(y + ca, n2g[0], n2b[0])
        hid = jnp.maximum(_mm(y, w1[0]) + b1[0], 0.0)
        y = _ln(y + _mm(hid, w2[0]) + b2[0], n3g[0], n3b[0])
        yo_ref[...] = y

    names = ["wv_s", "bv_s", "wo_s", "bo_s", "n1g", "n1b",
             "wv_c", "bv_c", "wo_c", "bo_c", "n2g", "n2b",
             "w1", "b1", "w2", "b2", "n3g", "n3b"]
    w_args = [lp[n] for n in names]
    in_specs = ([_const_spec(y0), _const_spec(mem_raw),
                 _const_spec(enc_g), _const_spec(enc_b)]
                + [_stacked_spec(a) for a in w_args])
    return pl.pallas_call(
        kernel,
        out_shape=jax.ShapeDtypeStruct((B, d), jnp.float32),
        grid=(L,),
        in_specs=in_specs,
        out_specs=pl.BlockSpec((B, d), lambda l: (0, 0)),
        compiler_params=pltpu.CompilerParams(dimension_semantics=("arbitrary",)),
    )(y0, mem_raw, enc_g, enc_b, *w_args)


# ----------------------------------------------------------------------------
# Kernels 3 & 6: small lane-padded linear heads (optional fused pre-LayerNorm)
# ----------------------------------------------------------------------------

def linear_padded(x2d, w, b, ln=None):
    M = x2d.shape[0]
    N = w.shape[1]
    if ln is None:
        def kernel(x_ref, w_ref, b_ref, o_ref):
            o_ref[...] = _mm(x_ref[...], w_ref[...]) + b_ref[...]
        args = (x2d, w, b)
    else:
        g, bb = ln
        def kernel(x_ref, g_ref, bb_ref, w_ref, b_ref, o_ref):
            xn = _ln(x_ref[...], g_ref[...], bb_ref[...])
            o_ref[...] = _mm(xn, w_ref[...]) + b_ref[...]
        args = (x2d, g, bb, w, b)
    return pl.pallas_call(
        kernel,
        out_shape=jax.ShapeDtypeStruct((M, N), jnp.float32),
    )(*args)


# ----------------------------------------------------------------------------
# Forward pass (semantics of MultimodalTransformer.forward, eval mode)
# ----------------------------------------------------------------------------

def multimodal_transformer_fwd(params, text, images, cfg):
    d = cfg["d_model"]
    assert cfg["embed_dim"] == d, "cross-attention requires embed_dim == d_model"
    B, S = text.shape

    # text embedding + positional encoding (XLA glue under the single jit)
    text_emb = jnp.take(params["text_embedding"], text, axis=0) * math.sqrt(d)
    text_emb = text_emb + params["pe_text"][None, :S, :]

    # image path: one fused kernel, then positional encoding of the single token
    img_emb = image_encoder_fwd(images, params["image_encoder"])          # (B, E)
    ctx = img_emb + params["pe_image"][:1, :]                             # the context row

    # main encoder: all layers in one pallas_call (activation resident in VMEM)
    x = main_encoder_stack(text_emb.reshape(B * S, d), ctx, params["layers"],
                           B=B, S=S, H=cfg["num_heads"])                  # (B*S, d)

    # classifier (lane-padded to 128, sliced back)
    logits = linear_padded(x, params["cls_w"], params["cls_b"])[:, :cfg["vocab_size"]]
    logits = logits.reshape(B, S, cfg["vocab_size"])

    # object-detection head:
    #  * nn.Transformer src is all-zeros (tgt = zeros_like(query)) -> encoder rows
    #    identical -> run encoder at M=1 (independent of num_queries / batch).
    #  * decoder target is `memory` = S identical copies of ctx per batch element,
    #    and its cross-attn memory is the identical-row encoder output -> decoder
    #    rows stay identical per batch element -> run at M=B and broadcast over S.
    #    (query_embed only contributes its shape in the reference forward.)
    oh = params["obj_head"]
    mem = det_encoder_stack(oh["enc_layers"], d)                          # (1, d)
    y = det_decoder_stack(ctx, mem, oh["enc_norm_g"], oh["enc_norm_b"],
                          oh["dec_layers"])                               # (B, d)
    head = linear_padded(y, oh["head_w"], oh["head_b"],
                         ln=(oh["dec_norm_g"], oh["dec_norm_b"]))         # (B, 128)

    n_cls = cfg["num_classes"] + 1
    bboxes = jnp.broadcast_to(head[:, None, :4], (B, S, 4))
    classes = jnp.broadcast_to(head[:, None, 4:4 + n_cls], (B, S, n_cls))
    return logits, bboxes, classes


# ----------------------------------------------------------------------------
# Deterministic synthetic parameters
# ----------------------------------------------------------------------------

class ParamGen:
    def __init__(self, seed=0):
        self._key = jax.random.PRNGKey(seed)

    def _next(self):
        self._key, sub = jax.random.split(self._key)
        return sub

    def normal(self, *shape, scale=0.02):
        return (scale * jax.random.normal(self._next(), shape)).astype(jnp.float32)

    def w(self, *shape):
        return self.normal(*shape).astype(WEIGHT_DTYPE)


def make_positional_encoding(max_len, d):
    pos = jnp.arange(max_len, dtype=jnp.float32)[:, None]
    div = jnp.exp(jnp.arange(0, d, 2, dtype=jnp.float32) * (-math.log(10000.0) / d))
    pe = jnp.zeros((max_len, d), jnp.float32)
    pe = pe.at[:, 0::2].set(jnp.sin(pos * div))
    pe = pe.at[:, 1::2].set(jnp.cos(pos * div))
    return pe


def _ones(shape):
    return jnp.ones(shape, jnp.float32)


def _zeros(shape):
    return jnp.zeros(shape, jnp.float32)


def _pad_cols(w, b, lane=128):
    n = w.shape[1]
    total = _round_up(max(n, lane), lane)
    wp = jnp.zeros((w.shape[0], total), jnp.float32).at[:, :n].set(w).astype(WEIGHT_DTYPE)
    bp = jnp.zeros((1, total), jnp.float32).at[:, :n].set(b.reshape(1, n))
    return wp, bp


def init_main_layers(pg, L, d, d_ff):
    return dict(
        n1g=_ones((L, 1, d)), n1b=_zeros((L, 1, d)),
        wqkv=pg.w(L, d, 3 * d), bqkv=pg.normal(L, 1, 3 * d),
        wo=pg.w(L, d, d), bo=pg.normal(L, 1, d),
        # cross-attention: only V / out projections influence the output
        wv=pg.w(L, d, d), bv=pg.normal(L, 1, d),
        woc=pg.w(L, d, d), boc=pg.normal(L, 1, d),
        n3g=_ones((L, 1, d)), n3b=_zeros((L, 1, d)),
        w1=pg.w(L, d, d_ff), b1=pg.normal(L, 1, d_ff),
        w2=pg.w(L, d_ff, d), b2=pg.normal(L, 1, d),
    )


def init_det_enc_layers(pg, L, d, dff):
    return dict(
        wv=pg.w(L, d, d), bv=pg.normal(L, 1, d),
        wo=pg.w(L, d, d), bo=pg.normal(L, 1, d),
        n1g=_ones((L, 1, d)), n1b=_zeros((L, 1, d)),
        w1=pg.w(L, d, dff), b1=pg.normal(L, 1, dff),
        w2=pg.w(L, dff, d), b2=pg.normal(L, 1, d),
        n2g=_ones((L, 1, d)), n2b=_zeros((L, 1, d)),
    )


def init_det_dec_layers(pg, L, d, dff):
    return dict(
        wv_s=pg.w(L, d, d), bv_s=pg.normal(L, 1, d),
        wo_s=pg.w(L, d, d), bo_s=pg.normal(L, 1, d),
        n1g=_ones((L, 1, d)), n1b=_zeros((L, 1, d)),
        wv_c=pg.w(L, d, d), bv_c=pg.normal(L, 1, d),
        wo_c=pg.w(L, d, d), bo_c=pg.normal(L, 1, d),
        n2g=_ones((L, 1, d)), n2b=_zeros((L, 1, d)),
        w1=pg.w(L, d, dff), b1=pg.normal(L, 1, dff),
        w2=pg.w(L, dff, d), b2=pg.normal(L, 1, d),
        n3g=_ones((L, 1, d)), n3b=_zeros((L, 1, d)),
    )


def init_params(cfg, seed=0):
    pg = ParamGen(seed)
    d = cfg["d_model"]
    E = cfg["embed_dim"]
    vocab = cfg["vocab_size"]
    patch = 4

    params = {
        "text_embedding": pg.normal(vocab, d),
        "pe_text": make_positional_encoding(cfg["max_seq_length"], d),
        "pe_image": make_positional_encoding(64, E),
        "image_encoder": dict(
            patch_w=pg.w(cfg["img_channels"] * patch * patch, E),
            patch_b=pg.normal(1, E),
            proj_w=pg.w(E, E),
            proj_b=pg.normal(1, E),
        ),
        "layers": init_main_layers(pg, cfg["num_layers"], d, cfg["d_ff"]),
    }
    params["cls_w"], params["cls_b"] = _pad_cols(pg.normal(d, vocab), pg.normal(vocab))

    n_cls = cfg["num_classes"] + 1
    det_w = jnp.concatenate([pg.normal(d, 4), pg.normal(d, n_cls)], axis=1)
    det_b = jnp.concatenate([pg.normal(4), pg.normal(n_cls)])
    head_w, head_b = _pad_cols(det_w, det_b)

    dff = cfg["transformer_dim_feedforward"]
    params["obj_head"] = dict(
        # query_embed only contributes its shape in the reference forward (tgt = zeros_like)
        query_embed=pg.normal(cfg["num_queries"], d),
        enc_layers=init_det_enc_layers(pg, 6, d, dff),
        enc_norm_g=_ones((1, d)), enc_norm_b=_zeros((1, d)),
        dec_layers=init_det_dec_layers(pg, 6, d, dff),
        dec_norm_g=_ones((1, d)), dec_norm_b=_zeros((1, d)),
        head_w=head_w, head_b=head_b,
    )
    return params


# ----------------------------------------------------------------------------
# Demo
# ----------------------------------------------------------------------------

if __name__ == "__main__":
    cfg = dict(
        num_layers=2,
        vocab_size=50,
        d_model=64,
        num_heads=4,
        d_ff=128,
        max_seq_length=16,
        img_channels=3,
        embed_dim=64,              # must equal d_model (cross-attention type-check)
        num_classes=10,
        num_queries=100,           # ObjectDetectionHead default
        transformer_nhead=8,       # nn.Transformer defaults
        transformer_dim_feedforward=2048,
    )

    params = init_params(cfg, seed=0)

    key = jax.random.PRNGKey(0)
    k_text, k_img = jax.random.split(key)
    B, S = 2, 8
    text = jax.random.randint(k_text, (B, S), 0, cfg["vocab_size"], dtype=jnp.int32)
    images = jax.random.normal(k_img, (B, cfg["img_channels"], 16, 16), dtype=jnp.float32)

    # single jit over the whole forward: 6 pallas_calls + a little XLA glue
    forward = jax.jit(lambda p, t, im: multimodal_transformer_fwd(p, t, im, cfg))
    logits, bboxes, classes = forward(params, text, images)
    jax.block_until_ready((logits, bboxes, classes))

    assert logits.shape == (B, S, cfg["vocab_size"])
    assert bboxes.shape == (B, S, 4)
    assert classes.shape == (B, S, cfg["num_classes"] + 1)
    assert bool(jnp.isfinite(logits).all())
    assert bool(jnp.isfinite(bboxes).all())
    assert bool(jnp.isfinite(classes).all())
    print("KERNEL_OK")
</pallas_src>

<mosaic_0001>
module attributes {stable_mosaic.version = 11 : i64} {
  func.func @kernel(%arg0: memref<32x48xf32, #tpu.memory_space<vmem>>, %arg1: memref<48x64xf32, #tpu.memory_space<vmem>>, %arg2: memref<1x64xf32, #tpu.memory_space<vmem>>, %arg3: memref<2x32xf32, #tpu.memory_space<vmem>>, %arg4: memref<64x64xf32, #tpu.memory_space<vmem>>, %arg5: memref<1x64xf32, #tpu.memory_space<vmem>>, %arg6: memref<2x64xf32, #tpu.memory_space<vmem>>) attributes {dimension_semantics = [], scalar_prefetch = 0 : i64, scratch_operands = 0 : i64, tpu.core_type = #tpu.core_type<tc>} {
    %c0 = arith.constant 0 : index
    %c0_0 = arith.constant 0 : index
    %0 = vector.load %arg0[%c0, %c0_0] : memref<32x48xf32, #tpu.memory_space<vmem>>, vector<32x48xf32>
    %c0_1 = arith.constant 0 : index
    %c0_2 = arith.constant 0 : index
    %1 = vector.load %arg1[%c0_1, %c0_2] : memref<48x64xf32, #tpu.memory_space<vmem>>, vector<48x64xf32>
    %cst = arith.constant dense<0.000000e+00> : vector<32x64xf32>
    %2 = tpu.matmul %0, %1, %cst {dimension_numbers = #tpu.dot_dimension_numbers<[1], [0], [0], [1], [0, 0, 1, 1], [], []>} : vector<32x48xf32>, vector<48x64xf32>, vector<32x64xf32> -> vector<32x64xf32>
    %c0_3 = arith.constant 0 : index
    %c0_4 = arith.constant 0 : index
    %3 = vector.load %arg2[%c0_3, %c0_4] : memref<1x64xf32, #tpu.memory_space<vmem>>, vector<1x64xf32>
    %4 = vector.broadcast %3 : vector<1x64xf32> to vector<32x64xf32>
    %5 = arith.addf %2, %4 : vector<32x64xf32>
    %cst_5 = arith.constant 0.000000e+00 : f32
    %6 = vector.broadcast %cst_5 : f32 to vector<32x64xf32>
    %7 = arith.maximumf %5, %6 : vector<32x64xf32>
    %c0_6 = arith.constant 0 : index
    %c0_7 = arith.constant 0 : index
    %8 = vector.load %arg3[%c0_6, %c0_7] : memref<2x32xf32, #tpu.memory_space<vmem>>, vector<2x32xf32>
    %cst_8 = arith.constant dense<0.000000e+00> : vector<2x64xf32>
    %9 = tpu.matmul %8, %7, %cst_8 {dimension_numbers = #tpu.dot_dimension_numbers<[1], [0], [0], [1], [0, 0, 1, 1], [], []>} : vector<2x32xf32>, vector<32x64xf32>, vector<2x64xf32> -> vector<2x64xf32>
    %c0_9 = arith.constant 0 : index
    %c0_10 = arith.constant 0 : index
    %10 = vector.load %arg4[%c0_9, %c0_10] : memref<64x64xf32, #tpu.memory_space<vmem>>, vector<64x64xf32>
    %cst_11 = arith.constant dense<0.000000e+00> : vector<2x64xf32>
    %11 = tpu.matmul %9, %10, %cst_11 {dimension_numbers = #tpu.dot_dimension_numbers<[1], [0], [0], [1], [0, 0, 1, 1], [], []>} : vector<2x64xf32>, vector<64x64xf32>, vector<2x64xf32> -> vector<2x64xf32>
    %c0_12 = arith.constant 0 : index
    %c0_13 = arith.constant 0 : index
    %12 = vector.load %arg5[%c0_12, %c0_13] : memref<1x64xf32, #tpu.memory_space<vmem>>, vector<1x64xf32>
    %13 = vector.broadcast %12 : vector<1x64xf32> to vector<2x64xf32>
    %14 = arith.addf %11, %13 : vector<2x64xf32>
    %c0_14 = arith.constant 0 : index
    %c0_15 = arith.constant 0 : index
    %15 = vector.load %arg6[%c0_14, %c0_15] : memref<2x64xf32, #tpu.memory_space<vmem>>, vector<2x64xf32>
    tpu.vector_store %arg6[%c0_14, %c0_15], %14 {strides = array<i32>} : memref<2x64xf32, #tpu.memory_space<vmem>>, vector<2x64xf32>,
    return
  }
}

module attributes {stable_mosaic.version = 11 : i64} {
  func.func @kernel(%arg0: i32, %arg1: memref<1x64x64xf32, #tpu.memory_space<vmem>>, %arg2: memref<1x1x64xf32, #tpu.memory_space<vmem>>, %arg3: memref<1x64x64xf32, #tpu.memory_space<vmem>>, %arg4: memref<1x1x64xf32, #tpu.memory_space<vmem>>, %arg5: memref<1x1x64xf32, #tpu.memory_space<vmem>>, %arg6: memref<1x1x64xf32, #tpu.memory_space<vmem>>, %arg7: memref<1x64x2048xf32, #tpu.memory_space<vmem>>, %arg8: memref<1x1x2048xf32, #tpu.memory_space<vmem>>, %arg9: memref<1x2048x64xf32, #tpu.memory_space<vmem>>, %arg10: memref<1x1x64xf32, #tpu.memory_space<vmem>>, %arg11: memref<1x1x64xf32, #tpu.memory_space<vmem>>, %arg12: memref<1x1x64xf32, #tpu.memory_space<vmem>>, %arg13: memref<1x64xf32, #tpu.memory_space<vmem>>) attributes {dimension_semantics = [#tpu.dimension_semantics<arbitrary>], iteration_bounds = array<i64: 6>, scalar_prefetch = 0 : i64, scratch_operands = 0 : i64, tpu.core_type = #tpu.core_type<tc>, window_params = [{transform_indices = @transform_0, window_bounds = array<i64: 1, 64, 64>}, {transform_indices = @transform_1, window_bounds = array<i64: 1, 1, 64>}, {transform_indices = @transform_2, window_bounds = array<i64: 1, 64, 64>}, {transform_indices = @transform_3, window_bounds = array<i64: 1, 1, 64>}, {transform_indices = @transform_4, window_bounds = array<i64: 1, 1, 64>}, {transform_indices = @transform_5, window_bounds = array<i64: 1, 1, 64>}, {transform_indices = @transform_6, window_bounds = array<i64: 1, 64, 2048>}, {transform_indices = @transform_7, window_bounds = array<i64: 1, 1, 2048>}, {transform_indices = @transform_8, window_bounds = array<i64: 1, 2048, 64>}, {transform_indices = @transform_9, window_bounds = array<i64: 1, 1, 64>}, {transform_indices = @transform_10, window_bounds = array<i64: 1, 1, 64>}, {transform_indices = @transform_11, window_bounds = array<i64: 1, 1, 64>}, {pipeline_mode = #tpu.pipeline_mode<synchronous>, transform_indices = @transform_12, window_bounds = array<i64: 1, 64>}]} {
    %c0_i32 = arith.constant 0 : i32
    %0 = arith.cmpi eq, %arg0, %c0_i32 : i32
    %1 = arith.extui %0 : i1 to i32
    %c0_i32_0 = arith.constant 0 : i32
    %2 = arith.cmpi ne, %1, %c0_i32_0 : i32
    scf.if %2 {
      %cst_54 = arith.constant 0.000000e+00 : f32
      %77 = vector.broadcast %cst_54 : f32 to vector<1x64xf32>
      %c0_55 = arith.constant 0 : index
      %c0_56 = arith.constant 0 : index
      %78 = vector.load %arg13[%c0_55, %c0_56] : memref<1x64xf32, #tpu.memory_space<vmem>>, vector<1x64xf32>
      tpu.vector_store %arg13[%c0_55, %c0_56], %77 {strides = array<i32>} : memref<1x64xf32, #tpu.memory_space<vmem>>, vector<1x64xf32>,
    } else {
    }
    %c0 = arith.constant 0 : index
    %c0_1 = arith.constant 0 : index
    %3 = vector.load %arg13[%c0, %c0_1] : memref<1x64xf32, #tpu.memory_space<vmem>>, vector<1x64xf32>
    %c0_2 = arith.constant 0 : index
    %c0_3 = arith.constant 0 : index
    %c0_4 = arith.constant 0 : index
    %4 = vector.load %arg1[%c0_2, %c0_3, %c0_4] : memref<1x64x64xf32, #tpu.memory_space<vmem>>, vector<1x64x64xf32>
    %5 = vector.shape_cast %4 : vector<1x64x64xf32> to vector<64x64xf32>
    %cst = arith.constant dense<0.000000e+00> : vector<1x64xf32>
    %6 = tpu.matmul %3, %5, %cst {dimension_numbers = #tpu.dot_dimension_numbers<[1], [0], [0], [1], [0, 0, 1, 1], [], []>} : vector<1x64xf32>, vector<64x64xf32>, vector<1x64xf32> -> vector<1x64xf32>
    %c0_5 = arith.constant 0 : index
    %c0_6 = arith.constant 0 : index
    %c0_7 = arith.constant 0 : index
    %7 = vector.load %arg2[%c0_5, %c0_6, %c0_7] : memref<1x1x64xf32, #tpu.memory_space<vmem>>, vector<1x1x64xf32>
    %8 = vector.shape_cast %7 : vector<1x1x64xf32> to vector<1x64xf32>
    %9 = arith.addf %6, %8 : vector<1x64xf32>
    %c0_8 = arith.constant 0 : index
    %c0_9 = arith.constant 0 : index
    %c0_10 = arith.constant 0 : index
    %10 = vector.load %arg3[%c0_8, %c0_9, %c0_10] : memref<1x64x64xf32, #tpu.memory_space<vmem>>, vector<1x64x64xf32>
    %11 = vector.shape_cast %10 : vector<1x64x64xf32> to vector<64x64xf32>
    %cst_11 = arith.constant dense<0.000000e+00> : vector<1x64xf32>
    %12 = tpu.matmul %9, %11, %cst_11 {dimension_numbers = #tpu.dot_dimension_numbers<[1], [0], [0], [1], [0, 0, 1, 1], [], []>} : vector<1x64xf32>, vector<64x64xf32>, vector<1x64xf32> -> vector<1x64xf32>
    %c0_12 = arith.constant 0 : index
    %c0_13 = arith.constant 0 : index
    %c0_14 = arith.constant 0 : index
    %13 = vector.load %arg4[%c0_12, %c0_13, %c0_14] : memref<1x1x64xf32, #tpu.memory_space<vmem>>, vector<1x1x64xf32>
    %14 = vector.shape_cast %13 : vector<1x1x64xf32> to vector<1x64xf32>
    %15 = arith.addf %12, %14 : vector<1x64xf32>
    %16 = arith.addf %3, %15 : vector<1x64xf32>
    %c0_15 = arith.constant 0 : index
    %c0_16 = arith.constant 0 : index
    %c0_17 = arith.constant 0 : index
    %17 = vector.load %arg5[%c0_15, %c0_16, %c0_17] : memref<1x1x64xf32, #tpu.memory_space<vmem>>, vector<1x1x64xf32>
    %18 = vector.shape_cast %17 : vector<1x1x64xf32> to vector<1x64xf32>
    %c0_18 = arith.constant 0 : index
    %c0_19 = arith.constant 0 : index
    %c0_20 = arith.constant 0 : index
    %19 = vector.load %arg6[%c0_18, %c0_19, %c0_20] : memref<1x1x64xf32, #tpu.memory_space<vmem>>, vector<1x1x64xf32>
    %20 = vector.shape_cast %19 : vector<1x1x64xf32> to vector<1x64xf32>
    %cst_21 = arith.constant dense<0.000000e+00> : vector<1xf32>
    %21 = vector.multi_reduction <add>, %16, %cst_21 [1] : vector<1x64xf32> to vector<1xf32>
    %22 = vector.shape_cast %21 : vector<1xf32> to vector<1x1xf32>
    %cst_22 = arith.constant 6.400000e+01 : f32
    %23 = vector.broadcast %cst_22 : f32 to vector<1x1xf32>
    %24 = arith.divf %22, %23 : vector<1x1xf32>
    %25 = vector.broadcast %24 : vector<1x1xf32> to vector<1x64xf32>
    %26 = arith.subf %16, %25 : vector<1x64xf32>
    %27 = arith.mulf %26, %26 : vector<1x64xf32>
    %cst_23 = arith.constant dense<0.000000e+00> : vector<1xf32>
    %28 = vector.multi_reduction <add>, %27, %cst_23 [1] : vector<1x64xf32> to vector<1xf32>
    %29 = vector.shape_cast %28 : vector<1xf32> to vector<1x1xf32>
    %cst_24 = arith.constant 6.400000e+01 : f32
    %30 = vector.broadcast %cst_24 : f32 to vector<1x1xf32>
    %31 = arith.divf %29, %30 : vector<1x1xf32>
    %cst_25 = arith.constant 9.99999974E-6 : f32
    %32 = vector.broadcast %cst_25 : f32 to vector<1x1xf32>
    %33 = arith.addf %31, %32 : vector<1x1xf32>
    %34 = math.rsqrt %33 : vector<1x1xf32>
    %35 = vector.broadcast %34 : vector<1x1xf32> to vector<1x64xf32>
    %36 = arith.mulf %26, %35 : vector<1x64xf32>
    %37 = arith.mulf %36, %18 : vector<1x64xf32>
    %38 = arith.addf %37, %20 : vector<1x64xf32>
    %c0_26 = arith.constant 0 : index
    %c0_27 = arith.constant 0 : index
    %c0_28 = arith.constant 0 : index
    %39 = vector.load %arg7[%c0_26, %c0_27, %c0_28] : memref<1x64x2048xf32, #tpu.memory_space<vmem>>, vector<1x64x2048xf32>
    %40 = vector.shape_cast %39 : vector<1x64x2048xf32> to vector<64x2048xf32>
    %cst_29 = arith.constant dense<0.000000e+00> : vector<1x2048xf32>
    %41 = tpu.matmul %38, %40, %cst_29 {dimension_numbers = #tpu.dot_dimension_numbers<[1], [0], [0], [1], [0, 0, 1, 1], [], []>} : vector<1x64xf32>, vector<64x2048xf32>, vector<1x2048xf32> -> vector<1x2048xf32>
    %c0_30 = arith.constant 0 : index
    %c0_31 = arith.constant 0 : index
    %c0_32 = arith.constant 0 : index
    %42 = vector.load %arg8[%c0_30, %c0_31, %c0_32] : memref<1x1x2048xf32, #tpu.memory_space<vmem>>, vector<1x1x2048xf32>
    %43 = vector.shape_cast %42 : vector<1x1x2048xf32> to vector<1x2048xf32>
    %44 = arith.addf %41, %43 : vector<1x2048xf32>
    %cst_33 = arith.constant 0.000000e+00 : f32
    %45 = vector.broadcast %cst_33 : f32 to vector<1x2048xf32>
    %46 = arith.maximumf %44, %45 : vector<1x2048xf32>
    %c0_34 = arith.constant 0 : index
    %c0_35 = arith.constant 0 : index
    %c0_36 = arith.constant 0 : index
    %47 = vector.load %arg9[%c0_34, %c0_35, %c0_36] : memref<1x2048x64xf32, #tpu.memory_space<vmem>>, vector<1x2048x64xf32>
    %48 = vector.shape_cast %47 : vector<1x2048x64xf32> to vector<2048x64xf32>
    %cst_37 = arith.constant dense<0.000000e+00> : vector<1x64xf32>
    %49 = tpu.matmul %46, %48, %cst_37 {dimension_numbers = #tpu.dot_dimension_numbers<[1], [0], [0], [1], [0, 0, 1, 1], [], []>} : vector<1x2048xf32>, vector<2048x64xf32>, vector<1x64xf32> -> vector<1x64xf32>
    %50 = arith.addf %38, %49 : vector<1x64xf32>
    %c0_38 = arith.constant 0 : index
    %c0_39 = arith.constant 0 : index
    %c0_40 = arith.constant 0 : index
    %51 = vector.load %arg10[%c0_38, %c0_39, %c0_40] : memref<1x1x64xf32, #tpu.memory_space<vmem>>, vector<1x1x64xf32>
    %52 = vector.shape_cast %51 : vector<1x1x64xf32> to vector<1x64xf32>
    %53 = arith.addf %50, %52 : vector<1x64xf32>
    %c0_41 = arith.constant 0 : index
    %c0_42 = arith.constant 0 : index
    %c0_43 = arith.constant 0 : index
    %54 = vector.load %arg11[%c0_41, %c0_42, %c0_43] : memref<1x1x64xf32, #tpu.memory_space<vmem>>, vector<1x1x64xf32>
    %55 = vector.shape_cast %54 : vector<1x1x64xf32> to vector<1x64xf32>
    %c0_44 = arith.constant 0 : index
    %c0_45 = arith.constant 0 : index
    %c0_46 = arith.constant 0 : index
    %56 = vector.load %arg12[%c0_44, %c0_45, %c0_46] : memref<1x1x64xf32, #tpu.memory_space<vmem>>, vector<1x1x64xf32>
    %57 = vector.shape_cast %56 : vector<1x1x64xf32> to vector<1x64xf32>
    %cst_47 = arith.constant dense<0.000000e+00> : vector<1xf32>
    %58 = vector.multi_reduction <add>, %53, %cst_47 [1] : vector<1x64xf32> to vector<1xf32>
    %59 = vector.shape_cast %58 : vector<1xf32> to vector<1x1xf32>
    %cst_48 = arith.constant 6.400000e+01 : f32
    %60 = vector.broadcast %cst_48 : f32 to vector<1x1xf32>
    %61 = arith.divf %59, %60 : vector<1x1xf32>
    %62 = vector.broadcast %61 : vector<1x1xf32> to vector<1x64xf32>
    %63 = arith.subf %53, %62 : vector<1x64xf32>
    %64 = arith.mulf %63, %63 : vector<1x64xf32>
    %cst_49 = arith.constant dense<0.000000e+00> : vector<1xf32>
    %65 = vector.multi_reduction <add>, %64, %cst_49 [1] : vector<1x64xf32> to vector<1xf32>
    %66 = vector.shape_cast %65 : vector<1xf32> to vector<1x1xf32>
    %cst_50 = arith.constant 6.400000e+01 : f32
    %67 = vector.broadcast %cst_50 : f32 to vector<1x1xf32>
    %68 = arith.divf %66, %67 : vector<1x1xf32>
    %cst_51 = arith.constant 9.99999974E-6 : f32
    %69 = vector.broadcast %cst_51 : f32 to vector<1x1xf32>
    %70 = arith.addf %68, %69 : vector<1x1xf32>
    %71 = math.rsqrt %70 : vector<1x1xf32>
    %72 = vector.broadcast %71 : vector<1x1xf32> to vector<1x64xf32>
    %73 = arith.mulf %63, %72 : vector<1x64xf32>
    %74 = arith.mulf %73, %55 : vector<1x64xf32>
    %75 = arith.addf %74, %57 : vector<1x64xf32>
    %c0_52 = arith.constant 0 : index
    %c0_53 = arith.constant 0 : index
    %76 = vector.load %arg13[%c0_52, %c0_53] : memref<1x64xf32, #tpu.memory_space<vmem>>, vector<1x64xf32>
    tpu.vector_store %arg13[%c0_52, %c0_53], %75 {strides = array<i32>} : memref<1x64xf32, #tpu.memory_space<vmem>>, vector<1x64xf32>,
    return
  }
  func.func @transform_0(%arg0: i32) -> (i32, i32, i32) {
    %c0_i32 = arith.constant 0 : i32
    %c0_i32_0 = arith.constant 0 : i32
    %c0_i32_1 = arith.constant 0 : i32
    return %arg0, %c0_i32, %c0_i32_0 : i32, i32, i32
  }
  func.func @transform_1(%arg0: i32) -> (i32, i32, i32) {
    %c0_i32 = arith.constant 0 : i32
    %c0_i32_0 = arith.constant 0 : i32
    %c0_i32_1 = arith.constant 0 : i32
    return %arg0, %c0_i32, %c0_i32_0 : i32, i32, i32
  }
  func.func @transform_2(%arg0: i32) -> (i32, i32, i32) {
    %c0_i32 = arith.constant 0 : i32
    %c0_i32_0 = arith.constant 0 : i32
    %c0_i32_1 = arith.constant 0 : i32
    return %arg0, %c0_i32, %c0_i32_0 : i32, i32, i32
  }
  func.func @transform_3(%arg0: i32) -> (i32, i32, i32) {
    %c0_i32 = arith.constant 0 : i32
    %c0_i32_0 = arith.constant 0 : i32
    %c0_i32_1 = arith.constant 0 : i32
    return %arg0, %c0_i32, %c0_i32_0 : i32, i32, i32
  }
  func.func @transform_4(%arg0: i32) -> (i32, i32, i32) {
    %c0_i32 = arith.constant 0 : i32
    %c0_i32_0 = arith.constant 0 : i32
    %c0_i32_1 = arith.constant 0 : i32
    return %arg0, %c0_i32, %c0_i32_0 : i32, i32, i32
  }
  func.func @transform_5(%arg0: i32) -> (i32, i32, i32) {
    %c0_i32 = arith.constant 0 : i32
    %c0_i32_0 = arith.constant 0 : i32
    %c0_i32_1 = arith.constant 0 : i32
    return %arg0, %c0_i32, %c0_i32_0 : i32, i32, i32
  }
  func.func @transform_6(%arg0: i32) -> (i32, i32, i32) {
    %c0_i32 = arith.constant 0 : i32
    %c0_i32_0 = arith.constant 0 : i32
    %c0_i32_1 = arith.constant 0 : i32
    return %arg0, %c0_i32, %c0_i32_0 : i32, i32, i32
  }
  func.func @transform_7(%arg0: i32) -> (i32, i32, i32) {
    %c0_i32 = arith.constant 0 : i32
    %c0_i32_0 = arith.constant 0 : i32
    %c0_i32_1 = arith.constant 0 : i32
    return %arg0, %c0_i32, %c0_i32_0 : i32, i32, i32
  }
  func.func @transform_8(%arg0: i32) -> (i32, i32, i32) {
    %c0_i32 = arith.constant 0 : i32
    %c0_i32_0 = arith.constant 0 : i32
    %c0_i32_1 = arith.constant 0 : i32
    return %arg0, %c0_i32, %c0_i32_0 : i32, i32, i32
  }
  func.func @transform_9(%arg0: i32) -> (i32, i32, i32) {
    %c0_i32 = arith.constant 0 : i32
    %c0_i32_0 = arith.constant 0 : i32
    %c0_i32_1 = arith.constant 0 : i32
    return %arg0, %c0_i32, %c0_i32_0 : i32, i32, i32
  }
  func.func @transform_10(%arg0: i32) -> (i32, i32, i32) {
    %c0_i32 = arith.constant 0 : i32
    %c0_i32_0 = arith.constant 0 : i32
    %c0_i32_1 = arith.constant 0 : i32
    return %arg0, %c0_i32, %c0_i32_0 : i32, i32, i32
  }
  func.func @transform_11(%arg0: i32) -> (i32, i32, i32) {
    %c0_i32 = arith.constant 0 : i32
    %c0_i32_0 = arith.constant 0 : i32
    %c0_i32_1 = arith.constant 0 : i32
    return %arg0, %c0_i32, %c0_i32_0 : i32, i32, i32
  }
  func.func @transform_12(%arg0: i32) -> (i32, i32) {
    %c0_i32 = arith.constant 0 : i32
    %c0_i32_0 = arith.constant 0 : i32
    %c0_i32_1 = arith.constant 0 : i32
    return %c0_i32, %c0_i32_0 : i32, i32
  }
}

module attributes {stable_mosaic.version = 11 : i64} {
  func.func @kernel(%arg0: i32, %arg1: memref<2x64xf32, #tpu.memory_space<vmem>>, %arg2: memref<1x64xf32, #tpu.memory_space<vmem>>, %arg3: memref<1x64xf32, #tpu.memory_space<vmem>>, %arg4: memref<1x64xf32, #tpu.memory_space<vmem>>, %arg5: memref<1x64x64xf32, #tpu.memory_space<vmem>>, %arg6: memref<1x1x64xf32, #tpu.memory_space<vmem>>, %arg7: memref<1x64x64xf32, #tpu.memory_space<vmem>>, %arg8: memref<1x1x64xf32, #tpu.memory_space<vmem>>, %arg9: memref<1x1x64xf32, #tpu.memory_space<vmem>>, %arg10: memref<1x1x64xf32, #tpu.memory_space<vmem>>, %arg11: memref<1x64x64xf32, #tpu.memory_space<vmem>>, %arg12: memref<1x1x64xf32, #tpu.memory_space<vmem>>, %arg13: memref<1x64x64xf32, #tpu.memory_space<vmem>>, %arg14: memref<1x1x64xf32, #tpu.memory_space<vmem>>, %arg15: memref<1x1x64xf32, #tpu.memory_space<vmem>>, %arg16: memref<1x1x64xf32, #tpu.memory_space<vmem>>, %arg17: memref<1x64x2048xf32, #tpu.memory_space<vmem>>, %arg18: memref<1x1x2048xf32, #tpu.memory_space<vmem>>, %arg19: memref<1x2048x64xf32, #tpu.memory_space<vmem>>, %arg20: memref<1x1x64xf32, #tpu.memory_space<vmem>>, %arg21: memref<1x1x64xf32, #tpu.memory_space<vmem>>, %arg22: memref<1x1x64xf32, #tpu.memory_space<vmem>>, %arg23: memref<2x64xf32, #tpu.memory_space<vmem>>) attributes {dimension_semantics = [#tpu.dimension_semantics<arbitrary>], iteration_bounds = array<i64: 6>, scalar_prefetch = 0 : i64, scratch_operands = 0 : i64, tpu.core_type = #tpu.core_type<tc>, window_params = [{pipeline_mode = #tpu.pipeline_mode<synchronous>, transform_indices = @transform_0, window_bounds = array<i64: 2, 64>}, {pipeline_mode = #tpu.pipeline_mode<synchronous>, transform_indices = @transform_1, window_bounds = array<i64: 1, 64>}, {pipeline_mode = #tpu.pipeline_mode<synchronous>, transform_indices = @transform_2, window_bounds = array<i64: 1, 64>}, {pipeline_mode = #tpu.pipeline_mode<synchronous>, transform_indices = @transform_3, window_bounds = array<i64: 1, 64>}, {transform_indices = @transform_4, window_bounds = array<i64: 1, 64, 64>}, {transform_indices = @transform_5, window_bounds = array<i64: 1, 1, 64>}, {transform_indices = @transform_6, window_bounds = array<i64: 1, 64, 64>}, {transform_indices = @transform_7, window_bounds = array<i64: 1, 1, 64>}, {transform_indices = @transform_8, window_bounds = array<i64: 1, 1, 64>}, {transform_indices = @transform_9, window_bounds = array<i64: 1, 1, 64>}, {transform_indices = @transform_10, window_bounds = array<i64: 1, 64, 64>}, {transform_indices = @transform_11, window_bounds = array<i64: 1, 1, 64>}, {transform_indices = @transform_12, window_bounds = array<i64: 1, 64, 64>}, {transform_indices = @transform_13, window_bounds = array<i64: 1, 1, 64>}, {transform_indices = @transform_14, window_bounds = array<i64: 1, 1, 64>}, {transform_indices = @transform_15, window_bounds = array<i64: 1, 1, 64>}, {transform_indices = @transform_16, window_bounds = array<i64: 1, 64, 2048>}, {transform_indices = @transform_17, window_bounds = array<i64: 1, 1, 2048>}, {transform_indices = @transform_18, window_bounds = array<i64: 1, 2048, 64>}, {transform_indices = @transform_19, window_bounds = array<i64: 1, 1, 64>}, {transform_indices = @transform_20, window_bounds = array<i64: 1, 1, 64>}, {transform_indices = @transform_21, window_bounds = array<i64: 1, 1, 64>}, {pipeline_mode = #tpu.pipeline_mode<synchronous>, transform_indices = @transform_22, window_bounds = array<i64: 2, 64>}]} {
    %c0_i32 = arith.constant 0 : i32
    %0 = arith.cmpi eq, %arg0, %c0_i32 : i32
    %1 = arith.extui %0 : i1 to i32
    %c0_i32_0 = arith.constant 0 : i32
    %2 = arith.cmpi ne, %1, %c0_i32_0 : i32
    scf.if %2 {
      %c0_90 = arith.constant 0 : index
      %c0_91 = arith.constant 0 : index
      %144 = vector.load %arg1[%c0_90, %c0_91] : memref<2x64xf32, #tpu.memory_space<vmem>>, vector<2x64xf32>
      %c0_92 = arith.constant 0 : index
      %c0_93 = arith.constant 0 : index
      %145 = vector.load %arg23[%c0_92, %c0_93] : memref<2x64xf32, #tpu.memory_space<vmem>>, vector<2x64xf32>
      tpu.vector_store %arg23[%c0_92, %c0_93], %144 {strides = array<i32>} : memref<2x64xf32, #tpu.memory_space<vmem>>, vector<2x64xf32>,
    } else {
    }
    %c0 = arith.constant 0 : index
    %c0_1 = arith.constant 0 : index
    %3 = vector.load %arg23[%c0, %c0_1] : memref<2x64xf32, #tpu.memory_space<vmem>>, vector<2x64xf32>
    %c0_2 = arith.constant 0 : index
    %c0_3 = arith.constant 0 : index
    %4 = vector.load %arg2[%c0_2, %c0_3] : memref<1x64xf32, #tpu.memory_space<vmem>>, vector<1x64xf32>
    %c0_4 = arith.constant 0 : index
    %c0_5 = arith.constant 0 : index
    %5 = vector.load %arg3[%c0_4, %c0_5] : memref<1x64xf32, #tpu.memory_space<vmem>>, vector<1x64xf32>
    %c0_6 = arith.constant 0 : index
    %c0_7 = arith.constant 0 : index
    %6 = vector.load %arg4[%c0_6, %c0_7] : memref<1x64xf32, #tpu.memory_space<vmem>>, vector<1x64xf32>
    %cst = arith.constant dense<0.000000e+00> : vector<1xf32>
    %7 = vector.multi_reduction <add>, %4, %cst [1] : vector<1x64xf32> to vector<1xf32>
    %8 = vector.shape_cast %7 : vector<1xf32> to vector<1x1xf32>
    %cst_8 = arith.constant 6.400000e+01 : f32
    %9 = vector.broadcast %cst_8 : f32 to vector<1x1xf32>
    %10 = arith.divf %8, %9 : vector<1x1xf32>
    %11 = vector.broadcast %10 : vector<1x1xf32> to vector<1x64xf32>
    %12 = arith.subf %4, %11 : vector<1x64xf32>
    %13 = arith.mulf %12, %12 : vector<1x64xf32>
    %cst_9 = arith.constant dense<0.000000e+00> : vector<1xf32>
    %14 = vector.multi_reduction <add>, %13, %cst_9 [1] : vector<1x64xf32> to vector<1xf32>
    %15 = vector.shape_cast %14 : vector<1xf32> to vector<1x1xf32>
    %cst_10 = arith.constant 6.400000e+01 : f32
    %16 = vector.broadcast %cst_10 : f32 to vector<1x1xf32>
    %17 = arith.divf %15, %16 : vector<1x1xf32>
    %cst_11 = arith.constant 9.99999974E-6 : f32
    %18 = vector.broadcast %cst_11 : f32 to vector<1x1xf32>
    %19 = arith.addf %17, %18 : vector<1x1xf32>
    %20 = math.rsqrt %19 : vector<1x1xf32>
    %21 = vector.broadcast %20 : vector<1x1xf32> to vector<1x64xf32>
    %22 = arith.mulf %12, %21 : vector<1x64xf32>
    %23 = arith.mulf %22, %5 : vector<1x64xf32>
    %24 = arith.addf %23, %6 : vector<1x64xf32>
    %c0_12 = arith.constant 0 : index
    %c0_13 = arith.constant 0 : index
    %c0_14 = arith.constant 0 : index
    %25 = vector.load %arg5[%c0_12, %c0_13, %c0_14] : memref<1x64x64xf32, #tpu.memory_space<vmem>>, vector<1x64x64xf32>
    %26 = vector.shape_cast %25 : vector<1x64x64xf32> to vector<64x64xf32>
    %cst_15 = arith.constant dense<0.000000e+00> : vector<2x64xf32>
    %27 = tpu.matmul %3, %26, %cst_15 {dimension_numbers = #tpu.dot_dimension_numbers<[1], [0], [0], [1], [0, 0, 1, 1], [], []>} : vector<2x64xf32>, vector<64x64xf32>, vector<2x64xf32> -> vector<2x64xf32>
    %c0_16 = arith.constant 0 : index
    %c0_17 = arith.constant 0 : index
    %c0_18 = arith.constant 0 : index
    %28 = vector.load %arg6[%c0_16, %c0_17, %c0_18] : memref<1x1x64xf32, #tpu.memory_space<vmem>>, vector<1x1x64xf32>
    %29 = vector.shape_cast %28 : vector<1x1x64xf32> to vector<1x64xf32>
    %30 = vector.broadcast %29 : vector<1x64xf32> to vector<2x64xf32>
    %31 = arith.addf %27, %30 : vector<2x64xf32>
    %c0_19 = arith.constant 0 : index
    %c0_20 = arith.constant 0 : index
    %c0_21 = arith.constant 0 : index
    %32 = vector.load %arg7[%c0_19, %c0_20, %c0_21] : memref<1x64x64xf32, #tpu.memory_space<vmem>>, vector<1x64x64xf32>
    %33 = vector.shape_cast %32 : vector<1x64x64xf32> to vector<64x64xf32>
    %cst_22 = arith.constant dense<0.000000e+00> : vector<2x64xf32>
    %34 = tpu.matmul %31, %33, %cst_22 {dimension_numbers = #tpu.dot_dimension_numbers<[1], [0], [0], [1], [0, 0, 1, 1], [], []>} : vector<2x64xf32>, vector<64x64xf32>, vector<2x64xf32> -> vector<2x64xf32>
    %c0_23 = arith.constant 0 : index
    %c0_24 = arith.constant 0 : index
    %c0_25 = arith.constant 0 : index
    %35 = vector.load %arg8[%c0_23, %c0_24, %c0_25] : memref<1x1x64xf32, #tpu.memory_space<vmem>>, vector<1x1x64xf32>
    %36 = vector.shape_cast %35 : vector<1x1x64xf32> to vector<1x64xf32>
    %37 = vector.broadcast %36 : vector<1x64xf32> to vector<2x64xf32>
    %38 = arith.addf %34, %37 : vector<2x64xf32>
    %39 = arith.addf %3, %38 : vector<2x64xf32>
    %c0_26 = arith.constant 0 : index
    %c0_27 = arith.constant 0 : index
    %c0_28 = arith.constant 0 : index
    %40 = vector.load %arg9[%c0_26, %c0_27, %c0_28] : memref<1x1x64xf32, #tpu.memory_space<vmem>>, vector<1x1x64xf32>
    %41 = vector.shape_cast %40 : vector<1x1x64xf32> to vector<1x64xf32>
    %c0_29 = arith.constant 0 : index
    %c0_30 = arith.constant 0 : index
    %c0_31 = arith.constant 0 : index
    %42 = vector.load %arg10[%c0_29, %c0_30, %c0_31] : memref<1x1x64xf32, #tpu.memory_space<vmem>>, vector<1x1x64xf32>
    %43 = vector.shape_cast %42 : vector<1x1x64xf32> to vector<1x64xf32>
    %cst_32 = arith.constant dense<0.000000e+00> : vector<2xf32>
    %44 = vector.multi_reduction <add>, %39, %cst_32 [1] : vector<2x64xf32> to vector<2xf32>
    %45 = vector.shape_cast %44 : vector<2xf32> to vector<2x1xf32>
    %cst_33 = arith.constant 6.400000e+01 : f32
    %46 = vector.broadcast %cst_33 : f32 to vector<2x1xf32>
    %47 = arith.divf %45, %46 : vector<2x1xf32>
    %48 = vector.broadcast %47 : vector<2x1xf32> to vector<2x64xf32>
    %49 = arith.subf %39, %48 : vector<2x64xf32>
    %50 = arith.mulf %49, %49 : vector<2x64xf32>
    %cst_34 = arith.constant dense<0.000000e+00> : vector<2xf32>
    %51 = vector.multi_reduction <add>, %50, %cst_34 [1] : vector<2x64xf32> to vector<2xf32>
    %52 = vector.shape_cast %51 : vector<2xf32> to vector<2x1xf32>
    %cst_35 = arith.constant 6.400000e+01 : f32
    %53 = vector.broadcast %cst_35 : f32 to vector<2x1xf32>
    %54 = arith.divf %52, %53 : vector<2x1xf32>
    %cst_36 = arith.constant 9.99999974E-6 : f32
    %55 = vector.broadcast %cst_36 : f32 to vector<2x1xf32>
    %56 = arith.addf %54, %55 : vector<2x1xf32>
    %57 = math.rsqrt %56 : vector<2x1xf32>
    %58 = vector.broadcast %57 : vector<2x1xf32> to vector<2x64xf32>
    %59 = arith.mulf %49, %58 : vector<2x64xf32>
    %60 = vector.broadcast %41 : vector<1x64xf32> to vector<2x64xf32>
    %61 = arith.mulf %59, %60 : vector<2x64xf32>
    %62 = vector.broadcast %43 : vector<1x64xf32> to vector<2x64xf32>
    %63 = arith.addf %61, %62 : vector<2x64xf32>
    %c0_37 = arith.constant 0 : index
    %c0_38 = arith.constant 0 : index
    %c0_39 = arith.constant 0 : index
    %64 = vector.load %arg11[%c0_37, %c0_38, %c0_39] : memref<1x64x64xf32, #tpu.memory_space<vmem>>, vector<1x64x64xf32>
    %65 = vector.shape_cast %64 : vector<1x64x64xf32> to vector<64x64xf32>
    %cst_40 = arith.constant dense<0.000000e+00> : vector<1x64xf32>
    %66 = tpu.matmul %24, %65, %cst_40 {dimension_numbers = #tpu.dot_dimension_numbers<[1], [0], [0], [1], [0, 0, 1, 1], [], []>} : vector<1x64xf32>, vector<64x64xf32>, vector<1x64xf32> -> vector<1x64xf32>
    %c0_41 = arith.constant 0 : index
    %c0_42 = arith.constant 0 : index
    %c0_43 = arith.constant 0 : index
    %67 = vector.load %arg12[%c0_41, %c0_42, %c0_43] : memref<1x1x64xf32, #tpu.memory_space<vmem>>, vector<1x1x64xf32>
    %68 = vector.shape_cast %67 : vector<1x1x64xf32> to vector<1x64xf32>
    %69 = arith.addf %66, %68 : vector<1x64xf32>
    %c0_44 = arith.constant 0 : index
    %c0_45 = arith.constant 0 : index
    %c0_46 = arith.constant 0 : index
    %70 = vector.load %arg13[%c0_44, %c0_45, %c0_46] : memref<1x64x64xf32, #tpu.memory_space<vmem>>, vector<1x64x64xf32>
    %71 = vector.shape_cast %70 : vector<1x64x64xf32> to vector<64x64xf32>
    %cst_47 = arith.constant dense<0.000000e+00> : vector<1x64xf32>
    %72 = tpu.matmul %69, %71, %cst_47 {dimension_numbers = #tpu.dot_dimension_numbers<[1], [0], [0], [1], [0, 0, 1, 1], [], []>} : vector<1x64xf32>, vector<64x64xf32>, vector<1x64xf32> -> vector<1x64xf32>
    %c0_48 = arith.constant 0 : index
    %c0_49 = arith.constant 0 : index
    %c0_50 = arith.constant 0 : index
    %73 = vector.load %arg14[%c0_48, %c0_49, %c0_50] : memref<1x1x64xf32, #tpu.memory_space<vmem>>, vector<1x1x64xf32>
    %74 = vector.shape_cast %73 : vector<1x1x64xf32> to vector<1x64xf32>
    %75 = arith.addf %72, %74 : vector<1x64xf32>
    %76 = vector.broadcast %75 : vector<1x64xf32> to vector<2x64xf32>
    %77 = arith.addf %63, %76 : vector<2x64xf32>
    %c0_51 = arith.constant 0 : index
    %c0_52 = arith.constant 0 : index
    %c0_53 = arith.constant 0 : index
    %78 = vector.load %arg15[%c0_51, %c0_52, %c0_53] : memref<1x1x64xf32, #tpu.memory_space<vmem>>, vector<1x1x64xf32>
    %79 = vector.shape_cast %78 : vector<1x1x64xf32> to vector<1x64xf32>
    %c0_54 = arith.constant 0 : index
    %c0_55 = arith.constant 0 : index
    %c0_56 = arith.constant 0 : index
    %80 = vector.load %arg16[%c0_54, %c0_55, %c0_56] : memref<1x1x64xf32, #tpu.memory_space<vmem>>, vector<1x1x64xf32>
    %81 = vector.shape_cast %80 : vector<1x1x64xf32> to vector<1x64xf32>
    %cst_57 = arith.constant dense<0.000000e+00> : vector<2xf32>
    %82 = vector.multi_reduction <add>, %77, %cst_57 [1] : vector<2x64xf32> to vector<2xf32>
    %83 = vector.shape_cast %82 : vector<2xf32> to vector<2x1xf32>
    %cst_58 = arith.constant 6.400000e+01 : f32
    %84 = vector.broadcast %cst_58 : f32 to vector<2x1xf32>
    %85 = arith.divf %83, %84 : vector<2x1xf32>
    %86 = vector.broadcast %85 : vector<2x1xf32> to vector<2x64xf32>
    %87 = arith.subf %77, %86 : vector<2x64xf32>
    %88 = arith.mulf %87, %87 : vector<2x64xf32>
    %cst_59 = arith.constant dense<0.000000e+00> : vector<2xf32>
    %89 = vector.multi_reduction <add>, %88, %cst_59 [1] : vector<2x64xf32> to vector<2xf32>
    %90 = vector.shape_cast %89 : vector<2xf32> to vector<2x1xf32>
    %cst_60 = arith.constant 6.400000e+01 : f32
    %91 = vector.broadcast %cst_60 : f32 to vector<2x1xf32>
    %92 = arith.divf %90, %91 : vector<2x1xf32>
    %cst_61 = arith.constant 9.99999974E-6 : f32
    %93 = vector.broadcast %cst_61 : f32 to vector<2x1xf32>
    %94 = arith.addf %92, %93 : vector<2x1xf32>
    %95 = math.rsqrt %94 : vector<2x1xf32>
    %96 = vector.broadcast %95 : vector<2x1xf32> to vector<2x64xf32>
    %97 = arith.mulf %87, %96 : vector<2x64xf32>
    %98 = vector.broadcast %79 : vector<1x64xf32> to vector<2x64xf32>
    %99 = arith.mulf %97, %98 : vector<2x64xf32>
    %100 = vector.broadcast %81 : vector<1x64xf32> to vector<2x64xf32>
    %101 = arith.addf %99, %100 : vector<2x64xf32>
    %c0_62 = arith.constant 0 : index
    %c0_63 = arith.constant 0 : index
    %c0_64 = arith.constant 0 : index
    %102 = vector.load %arg17[%c0_62, %c0_63, %c0_64] : memref<1x64x2048xf32, #tpu.memory_space<vmem>>, vector<1x64x2048xf32>
    %103 = vector.shape_cast %102 : vector<1x64x2048xf32> to vector<64x2048xf32>
    %cst_65 = arith.constant dense<0.000000e+00> : vector<2x2048xf32>
    %104 = tpu.matmul %101, %103, %cst_65 {dimension_numbers = #tpu.dot_dimension_numbers<[1], [0], [0], [1], [0, 0, 1, 1], [], []>} : vector<2x64xf32>, vector<64x2048xf32>, vector<2x2048xf32> -> vector<2x2048xf32>
    %c0_66 = arith.constant 0 : index
    %c0_67 = arith.constant 0 : index
    %c0_68 = arith.constant 0 : index
    %105 = vector.load %arg18[%c0_66, %c0_67, %c0_68] : memref<1x1x2048xf32, #tpu.memory_space<vmem>>, vector<1x1x2048xf32>
    %106 = vector.shape_cast %105 : vector<1x1x2048xf32> to vector<1x2048xf32>
    %107 = vector.broadcast %106 : vector<1x2048xf32> to vector<2x2048xf32>
    %108 = arith.addf %104, %107 : vector<2x2048xf32>
    %cst_69 = arith.constant 0.000000e+00 : f32
    %109 = vector.broadcast %cst_69 : f32 to vector<2x2048xf32>
    %110 = arith.maximumf %108, %109 : vector<2x2048xf32>
    %c0_70 = arith.constant 0 : index
    %c0_71 = arith.constant 0 : index
    %c0_72 = arith.constant 0 : index
    %111 = vector.load %arg19[%c0_70, %c0_71, %c0_72] : memref<1x2048x64xf32, #tpu.memory_space<vmem>>, vector<1x2048x64xf32>
    %112 = vector.shape_cast %111 : vector<1x2048x64xf32> to vector<2048x64xf32>
    %cst_73 = arith.constant dense<0.000000e+00> : vector<2x64xf32>
    %113 = tpu.matmul %110, %112, %cst_73 {dimension_numbers = #tpu.dot_dimension_numbers<[1], [0], [0], [1], [0, 0, 1, 1], [], []>} : vector<2x2048xf32>, vector<2048x64xf32>, vector<2x64xf32> -> vector<2x64xf32>
    %114 = arith.addf %101, %113 : vector<2x64xf32>
    %c0_74 = arith.constant 0 : index
    %c0_75 = arith.constant 0 : index
    %c0_76 = arith.constant 0 : index
    %115 = vector.load %arg20[%c0_74, %c0_75, %c0_76] : memref<1x1x64xf32, #tpu.memory_space<vmem>>, vector<1x1x64xf32>
    %116 = vector.shape_cast %115 : vector<1x1x64xf32> to vector<1x64xf32>
    %117 = vector.broadcast %116 : vector<1x64xf32> to vector<2x64xf32>
    %118 = arith.addf %114, %117 : vector<2x64xf32>
    %c0_77 = arith.constant 0 : index
    %c0_78 = arith.constant 0 : index
    %c0_79 = arith.constant 0 : index
    %119 = vector.load %arg21[%c0_77, %c0_78, %c0_79] : memref<1x1x64xf32, #tpu.memory_space<vmem>>, vector<1x1x64xf32>
    %120 = vector.shape_cast %119 : vector<1x1x64xf32> to vector<1x64xf32>
    %c0_80 = arith.constant 0 : index
    %c0_81 = arith.constant 0 : index
    %c0_82 = arith.constant 0 : index
    %121 = vector.load %arg22[%c0_80, %c0_81, %c0_82] : memref<1x1x64xf32, #tpu.memory_space<vmem>>, vector<1x1x64xf32>
    %122 = vector.shape_cast %121 : vector<1x1x64xf32> to vector<1x64xf32>
    %cst_83 = arith.constant dense<0.000000e+00> : vector<2xf32>
    %123 = vector.multi_reduction <add>, %118, %cst_83 [1] : vector<2x64xf32> to vector<2xf32>
    %124 = vector.shape_cast %123 : vector<2xf32> to vector<2x1xf32>
    %cst_84 = arith.constant 6.400000e+01 : f32
    %125 = vector.broadcast %cst_84 : f32 to vector<2x1xf32>
    %126 = arith.divf %124, %125 : vector<2x1xf32>
    %127 = vector.broadcast %126 : vector<2x1xf32> to vector<2x64xf32>
    %128 = arith.subf %118, %127 : vector<2x64xf32>
    %129 = arith.mulf %128, %128 : vector<2x64xf32>
    %cst_85 = arith.constant dense<0.000000e+00> : vector<2xf32>
    %130 = vector.multi_reduction <add>, %129, %cst_85 [1] : vector<2x64xf32> to vector<2xf32>
    %131 = vector.shape_cast %130 : vector<2xf32> to vector<2x1xf32>
    %cst_86 = arith.constant 6.400000e+01 : f32
    %132 = vector.broadcast %cst_86 : f32 to vector<2x1xf32>
    %133 = arith.divf %131, %132 : vector<2x1xf32>
    %cst_87 = arith.constant 9.99999974E-6 : f32
    %134 = vector.broadcast %cst_87 : f32 to vector<2x1xf32>
    %135 = arith.addf %133, %134 : vector<2x1xf32>
    %136 = math.rsqrt %135 : vector<2x1xf32>
    %137 = vector.broadcast %136 : vector<2x1xf32> to vector<2x64xf32>
    %138 = arith.mulf %128, %137 : vector<2x64xf32>
    %139 = vector.broadcast %120 : vector<1x64xf32> to vector<2x64xf32>
    %140 = arith.mulf %138, %139 : vector<2x64xf32>
    %141 = vector.broadcast %122 : vector<1x64xf32> to vector<2x64xf32>
    %142 = arith.addf %140, %141 : vector<2x64xf32>
    %c0_88 = arith.constant 0 : index
    %c0_89 = arith.constant 0 : index
    %143 = vector.load %arg23[%c0_88, %c0_89] : memref<2x64xf32, #tpu.memory_space<vmem>>, vector<2x64xf32>
    tpu.vector_store %arg23[%c0_88, %c0_89], %142 {strides = array<i32>} : memref<2x64xf32, #tpu.memory_space<vmem>>, vector<2x64xf32>,
    return
  }
  func.func @transform_0(%arg0: i32) -> (i32, i32) {
    %c0_i32 = arith.constant 0 : i32
    %c0_i32_0 = arith.constant 0 : i32
    %c0_i32_1 = arith.constant 0 : i32
    return %c0_i32, %c0_i32_0 : i32, i32
  }
  func.func @transform_1(%arg0: i32) -> (i32, i32) {
    %c0_i32 = arith.constant 0 : i32
    %c0_i32_0 = arith.constant 0 : i32
    %c0_i32_1 = arith.constant 0 : i32
    return %c0_i32, %c0_i32_0 : i32, i32
  }
  func.func @transform_2(%arg0: i32) -> (i32, i32) {
    %c0_i32 = arith.constant 0 : i32
    %c0_i32_0 = arith.constant 0 : i32
    %c0_i32_1 = arith.constant 0 : i32
    return %c0_i32, %c0_i32_0 : i32, i32
  }
  func.func @transform_3(%arg0: i32) -> (i32, i32) {
    %c0_i32 = arith.constant 0 : i32
    %c0_i32_0 = arith.constant 0 : i32
    %c0_i32_1 = arith.constant 0 : i32
    return %c0_i32, %c0_i32_0 : i32, i32
  }
  func.func @transform_4(%arg0: i32) -> (i32, i32, i32) {
    %c0_i32 = arith.constant 0 : i32
    %c0_i32_0 = arith.constant 0 : i32
    %c0_i32_1 = arith.constant 0 : i32
    return %arg0, %c0_i32, %c0_i32_0 : i32, i32, i32
  }
  func.func @transform_5(%arg0: i32) -> (i32, i32, i32) {
    %c0_i32 = arith.constant 0 : i32
    %c0_i32_0 = arith.constant 0 : i32
    %c0_i32_1 = arith.constant 0 : i32
    return %arg0, %c0_i32, %c0_i32_0 : i32, i32, i32
  }
  func.func @transform_6(%arg0: i32) -> (i32, i32, i32) {
    %c0_i32 = arith.constant 0 : i32
    %c0_i32_0 = arith.constant 0 : i32
    %c0_i32_1 = arith.constant 0 : i32
    return %arg0, %c0_i32, %c0_i32_0 : i32, i32, i32
  }
  func.func @transform_7(%arg0: i32) -> (i32, i32, i32) {
    %c0_i32 = arith.constant 0 : i32
    %c0_i32_0 = arith.constant 0 : i32
    %c0_i32_1 = arith.constant 0 : i32
    return %arg0, %c0_i32, %c0_i32_0 : i32, i32, i32
  }
  func.func @transform_8(%arg0: i32) -> (i32, i32, i32) {
    %c0_i32 = arith.constant 0 : i32
    %c0_i32_0 = arith.constant 0 : i32
    %c0_i32_1 = arith.constant 0 : i32
    return %arg0, %c0_i32, %c0_i32_0 : i32, i32, i32
  }
  func.func @transform_9(%arg0: i32) -> (i32, i32, i32) {
    %c0_i32 = arith.constant 0 : i32
    %c0_i32_0 = arith.constant 0 : i32
    %c0_i32_1 = arith.constant 0 : i32
    return %arg0, %c0_i32, %c0_i32_0 : i32, i32, i32
  }
  func.func @transform_10(%arg0: i32) -> (i32, i32, i32) {
    %c0_i32 = arith.constant 0 : i32
    %c0_i32_0 = arith.constant 0 : i32
    %c0_i32_1 = arith.constant 0 : i32
    return %arg0, %c0_i32, %c0_i32_0 : i32, i32, i32
  }
  func.func @transform_11(%arg0: i32) -> (i32, i32, i32) {
    %c0_i32 = arith.constant 0 : i32
    %c0_i32_0 = arith.constant 0 : i32
    %c0_i32_1 = arith.constant 0 : i32
    return %arg0, %c0_i32, %c0_i32_0 : i32, i32, i32
  }
  func.func @transform_12(%arg0: i32) -> (i32, i32, i32) {
    %c0_i32 = arith.constant 0 : i32
    %c0_i32_0 = arith.constant 0 : i32
    %c0_i32_1 = arith.constant 0 : i32
    return %arg0, %c0_i32, %c0_i32_0 : i32, i32, i32
  }
  func.func @transform_13(%arg0: i32) -> (i32, i32, i32) {
    %c0_i32 = arith.constant 0 : i32
    %c0_i32_0 = arith.constant 0 : i32
    %c0_i32_1 = arith.constant 0 : i32
    return %arg0, %c0_i32, %c0_i32_0 : i32, i32, i32
  }
  func.func @transform_14(%arg0: i32) -> (i32, i32, i32) {
    %c0_i32 = arith.constant 0 : i32
    %c0_i32_0 = arith.constant 0 : i32
    %c0_i32_1 = arith.constant 0 : i32
    return %arg0, %c0_i32, %c0_i32_0 : i32, i32, i32
  }
  func.func @transform_15(%arg0: i32) -> (i32, i32, i32) {
    %c0_i32 = arith.constant 0 : i32
    %c0_i32_0 = arith.constant 0 : i32
    %c0_i32_1 = arith.constant 0 : i32
    return %arg0, %c0_i32, %c0_i32_0 : i32, i32, i32
  }
  func.func @transform_16(%arg0: i32) -> (i32, i32, i32) {
    %c0_i32 = arith.constant 0 : i32
    %c0_i32_0 = arith.constant 0 : i32
    %c0_i32_1 = arith.constant 0 : i32
    return %arg0, %c0_i32, %c0_i32_0 : i32, i32, i32
  }
  func.func @transform_17(%arg0: i32) -> (i32, i32, i32) {
    %c0_i32 = arith.constant 0 : i32
    %c0_i32_0 = arith.constant 0 : i32
    %c0_i32_1 = arith.constant 0 : i32
    return %arg0, %c0_i32, %c0_i32_0 : i32, i32, i32
  }
  func.func @transform_18(%arg0: i32) -> (i32, i32, i32) {
    %c0_i32 = arith.constant 0 : i32
    %c0_i32_0 = arith.constant 0 : i32
    %c0_i32_1 = arith.constant 0 : i32
    return %arg0, %c0_i32, %c0_i32_0 : i32, i32, i32
  }
  func.func @transform_19(%arg0: i32) -> (i32, i32, i32) {
    %c0_i32 = arith.constant 0 : i32
    %c0_i32_0 = arith.constant 0 : i32
    %c0_i32_1 = arith.constant 0 : i32
    return %arg0, %c0_i32, %c0_i32_0 : i32, i32, i32
  }
  func.func @transform_20(%arg0: i32) -> (i32, i32, i32) {
    %c0_i32 = arith.constant 0 : i32
    %c0_i32_0 = arith.constant 0 : i32
    %c0_i32_1 = arith.constant 0 : i32
    return %arg0, %c0_i32, %c0_i32_0 : i32, i32, i32
  }
  func.func @transform_21(%arg0: i32) -> (i32, i32, i32) {
    %c0_i32 = arith.constant 0 : i32
    %c0_i32_0 = arith.constant 0 : i32
    %c0_i32_1 = arith.constant 0 : i32
    return %arg0, %c0_i32, %c0_i32_0 : i32, i32, i32
  }
  func.func @transform_22(%arg0: i32) -> (i32, i32) {
    %c0_i32 = arith.constant 0 : i32
    %c0_i32_0 = arith.constant 0 : i32
    %c0_i32_1 = arith.constant 0 : i32
    return %c0_i32, %c0_i32_0 : i32, i32
  }
}

module attributes {stable_mosaic.version = 11 : i64} {
  func.func @kernel(%arg0: memref<2x64xf32, #tpu.memory_space<vmem>>, %arg1: memref<1x64xf32, #tpu.memory_space<vmem>>, %arg2: memref<1x64xf32, #tpu.memory_space<vmem>>, %arg3: memref<64x128xf32, #tpu.memory_space<vmem>>, %arg4: memref<1x128xf32, #tpu.memory_space<vmem>>, %arg5: memref<2x128xf32, #tpu.memory_space<vmem>>) attributes {dimension_semantics = [], scalar_prefetch = 0 : i64, scratch_operands = 0 : i64, tpu.core_type = #tpu.core_type<tc>} {
    %c0 = arith.constant 0 : index
    %c0_0 = arith.constant 0 : index
    %0 = vector.load %arg0[%c0, %c0_0] : memref<2x64xf32, #tpu.memory_space<vmem>>, vector<2x64xf32>
    %c0_1 = arith.constant 0 : index
    %c0_2 = arith.constant 0 : index
    %1 = vector.load %arg1[%c0_1, %c0_2] : memref<1x64xf32, #tpu.memory_space<vmem>>, vector<1x64xf32>
    %c0_3 = arith.constant 0 : index
    %c0_4 = arith.constant 0 : index
    %2 = vector.load %arg2[%c0_3, %c0_4] : memref<1x64xf32, #tpu.memory_space<vmem>>, vector<1x64xf32>
    %cst = arith.constant dense<0.000000e+00> : vector<2xf32>
    %3 = vector.multi_reduction <add>, %0, %cst [1] : vector<2x64xf32> to vector<2xf32>
    %4 = vector.shape_cast %3 : vector<2xf32> to vector<2x1xf32>
    %cst_5 = arith.constant 6.400000e+01 : f32
    %5 = vector.broadcast %cst_5 : f32 to vector<2x1xf32>
    %6 = arith.divf %4, %5 : vector<2x1xf32>
    %7 = vector.broadcast %6 : vector<2x1xf32> to vector<2x64xf32>
    %8 = arith.subf %0, %7 : vector<2x64xf32>
    %9 = arith.mulf %8, %8 : vector<2x64xf32>
    %cst_6 = arith.constant dense<0.000000e+00> : vector<2xf32>
    %10 = vector.multi_reduction <add>, %9, %cst_6 [1] : vector<2x64xf32> to vector<2xf32>
    %11 = vector.shape_cast %10 : vector<2xf32> to vector<2x1xf32>
    %cst_7 = arith.constant 6.400000e+01 : f32
    %12 = vector.broadcast %cst_7 : f32 to vector<2x1xf32>
    %13 = arith.divf %11, %12 : vector<2x1xf32>
    %cst_8 = arith.constant 9.99999974E-6 : f32
    %14 = vector.broadcast %cst_8 : f32 to vector<2x1xf32>
    %15 = arith.addf %13, %14 : vector<2x1xf32>
    %16 = math.rsqrt %15 : vector<2x1xf32>
    %17 = vector.broadcast %16 : vector<2x1xf32> to vector<2x64xf32>
    %18 = arith.mulf %8, %17 : vector<2x64xf32>
    %19 = vector.broadcast %1 : vector<1x64xf32> to vector<2x64xf32>
    %20 = arith.mulf %18, %19 : vector<2x64xf32>
    %21 = vector.broadcast %2 : vector<1x64xf32> to vector<2x64xf32>
    %22 = arith.addf %20, %21 : vector<2x64xf32>
    %c0_9 = arith.constant 0 : index
    %c0_10 = arith.constant 0 : index
    %23 = vector.load %arg3[%c0_9, %c0_10] : memref<64x128xf32, #tpu.memory_space<vmem>>, vector<64x128xf32>
    %cst_11 = arith.constant dense<0.000000e+00> : vector<2x128xf32>
    %24 = tpu.matmul %22, %23, %cst_11 {dimension_numbers = #tpu.dot_dimension_numbers<[1], [0], [0], [1], [0, 0, 1, 1], [], []>} : vector<2x64xf32>, vector<64x128xf32>, vector<2x128xf32> -> vector<2x128xf32>
    %c0_12 = arith.constant 0 : index
    %c0_13 = arith.constant 0 : index
    %25 = vector.load %arg4[%c0_12, %c0_13] : memref<1x128xf32, #tpu.memory_space<vmem>>, vector<1x128xf32>
    %26 = vector.broadcast %25 : vector<1x128xf32> to vector<2x128xf32>
    %27 = arith.addf %24, %26 : vector<2x128xf32>
    %c0_14 = arith.constant 0 : index
    %c0_15 = arith.constant 0 : index
    %28 = vector.load %arg5[%c0_14, %c0_15] : memref<2x128xf32, #tpu.memory_space<vmem>>, vector<2x128xf32>
    tpu.vector_store %arg5[%c0_14, %c0_15], %27 {strides = array<i32>} : memref<2x128xf32, #tpu.memory_space<vmem>>, vector<2x128xf32>,
    return
  }
}

module attributes {stable_mosaic.version = 11 : i64} {
  func.func @kernel(%arg0: memref<16x64xf32, #tpu.memory_space<vmem>>, %arg1: memref<64x128xf32, #tpu.memory_space<vmem>>, %arg2: memref<1x128xf32, #tpu.memory_space<vmem>>, %arg3: memref<16x128xf32, #tpu.memory_space<vmem>>) attributes {dimension_semantics = [], scalar_prefetch = 0 : i64, scratch_operands = 0 : i64, tpu.core_type = #tpu.core_type<tc>} {
    %c0 = arith.constant 0 : index
    %c0_0 = arith.constant 0 : index
    %0 = vector.load %arg0[%c0, %c0_0] : memref<16x64xf32, #tpu.memory_space<vmem>>, vector<16x64xf32>
    %c0_1 = arith.constant 0 : index
    %c0_2 = arith.constant 0 : index
    %1 = vector.load %arg1[%c0_1, %c0_2] : memref<64x128xf32, #tpu.memory_space<vmem>>, vector<64x128xf32>
    %cst = arith.constant dense<0.000000e+00> : vector<16x128xf32>
    %2 = tpu.matmul %0, %1, %cst {dimension_numbers = #tpu.dot_dimension_numbers<[1], [0], [0], [1], [0, 0, 1, 1], [], []>} : vector<16x64xf32>, vector<64x128xf32>, vector<16x128xf32> -> vector<16x128xf32>
    %c0_3 = arith.constant 0 : index
    %c0_4 = arith.constant 0 : index
    %3 = vector.load %arg2[%c0_3, %c0_4] : memref<1x128xf32, #tpu.memory_space<vmem>>, vector<1x128xf32>
    %4 = vector.broadcast %3 : vector<1x128xf32> to vector<16x128xf32>
    %5 = arith.addf %2, %4 : vector<16x128xf32>
    %c0_5 = arith.constant 0 : index
    %c0_6 = arith.constant 0 : index
    %6 = vector.load %arg3[%c0_5, %c0_6] : memref<16x128xf32, #tpu.memory_space<vmem>>, vector<16x128xf32>
    tpu.vector_store %arg3[%c0_5, %c0_6], %5 {strides = array<i32>} : memref<16x128xf32, #tpu.memory_space<vmem>>, vector<16x128xf32>,
    return
  }
}

module attributes {stable_mosaic.version = 11 : i64} {
  func.func @kernel(%arg0: i32, %arg1: memref<16x64xf32, #tpu.memory_space<vmem>>, %arg2: memref<2x64xf32, #tpu.memory_space<vmem>>, %arg3: memref<1x1x64xf32, #tpu.memory_space<vmem>>, %arg4: memref<1x1x64xf32, #tpu.memory_space<vmem>>, %arg5: memref<1x64x192xf32, #tpu.memory_space<vmem>>, %arg6: memref<1x1x192xf32, #tpu.memory_space<vmem>>, %arg7: memref<1x64x64xf32, #tpu.memory_space<vmem>>, %arg8: memref<1x1x64xf32, #tpu.memory_space<vmem>>, %arg9: memref<1x64x64xf32, #tpu.memory_space<vmem>>, %arg10: memref<1x1x64xf32, #tpu.memory_space<vmem>>, %arg11: memref<1x64x64xf32, #tpu.memory_space<vmem>>, %arg12: memref<1x1x64xf32, #tpu.memory_space<vmem>>, %arg13: memref<1x1x64xf32, #tpu.memory_space<vmem>>, %arg14: memref<1x1x64xf32, #tpu.memory_space<vmem>>, %arg15: memref<1x64x128xf32, #tpu.memory_space<vmem>>, %arg16: memref<1x1x128xf32, #tpu.memory_space<vmem>>, %arg17: memref<1x128x64xf32, #tpu.memory_space<vmem>>, %arg18: memref<1x1x64xf32, #tpu.memory_space<vmem>>, %arg19: memref<16x64xf32, #tpu.memory_space<vmem>>) attributes {dimension_semantics = [#tpu.dimension_semantics<arbitrary>], iteration_bounds = array<i64: 2>, scalar_prefetch = 0 : i64, scratch_operands = 0 : i64, tpu.core_type = #tpu.core_type<tc>, window_params = [{pipeline_mode = #tpu.pipeline_mode<synchronous>, transform_indices = @transform_0, window_bounds = array<i64: 16, 64>}, {pipeline_mode = #tpu.pipeline_mode<synchronous>, transform_indices = @transform_1, window_bounds = array<i64: 2, 64>}, {transform_indices = @transform_2, window_bounds = array<i64: 1, 1, 64>}, {transform_indices = @transform_3, window_bounds = array<i64: 1, 1, 64>}, {transform_indices = @transform_4, window_bounds = array<i64: 1, 64, 192>}, {transform_indices = @transform_5, window_bounds = array<i64: 1, 1, 192>}, {transform_indices = @transform_6, window_bounds = array<i64: 1, 64, 64>}, {transform_indices = @transform_7, window_bounds = array<i64: 1, 1, 64>}, {transform_indices = @transform_8, window_bounds = array<i64: 1, 64, 64>}, {transform_indices = @transform_9, window_bounds = array<i64: 1, 1, 64>}, {transform_indices = @transform_10, window_bounds = array<i64: 1, 64, 64>}, {transform_indices = @transform_11, window_bounds = array<i64: 1, 1, 64>}, {transform_indices = @transform_12, window_bounds = array<i64: 1, 1, 64>}, {transform_indices = @transform_13, window_bounds = array<i64: 1, 1, 64>}, {transform_indices = @transform_14, window_bounds = array<i64: 1, 64, 128>}, {transform_indices = @transform_15, window_bounds = array<i64: 1, 1, 128>}, {transform_indices = @transform_16, window_bounds = array<i64: 1, 128, 64>}, {transform_indices = @transform_17, window_bounds = array<i64: 1, 1, 64>}, {pipeline_mode = #tpu.pipeline_mode<synchronous>, transform_indices = @transform_18, window_bounds = array<i64: 16, 64>}]} {
    %c0_i32 = arith.constant 0 : i32
    %0 = arith.cmpi eq, %arg0, %c0_i32 : i32
    %1 = arith.extui %0 : i1 to i32
    %c0_i32_0 = arith.constant 0 : i32
    %2 = arith.cmpi ne, %1, %c0_i32_0 : i32
    scf.if %2 {
      %c0_110 = arith.constant 0 : index
      %c0_111 = arith.constant 0 : index
      %244 = vector.load %arg1[%c0_110, %c0_111] : memref<16x64xf32, #tpu.memory_space<vmem>>, vector<16x64xf32>
      %c0_112 = arith.constant 0 : index
      %c0_113 = arith.constant 0 : index
      %245 = vector.load %arg19[%c0_112, %c0_113] : memref<16x64xf32, #tpu.memory_space<vmem>>, vector<16x64xf32>
      tpu.vector_store %arg19[%c0_112, %c0_113], %244 {strides = array<i32>} : memref<16x64xf32, #tpu.memory_space<vmem>>, vector<16x64xf32>,
    } else {
    }
    %c0 = arith.constant 0 : index
    %c0_1 = arith.constant 0 : index
    %3 = vector.load %arg19[%c0, %c0_1] : memref<16x64xf32, #tpu.memory_space<vmem>>, vector<16x64xf32>
    %c0_2 = arith.constant 0 : index
    %c0_3 = arith.constant 0 : index
    %c0_4 = arith.constant 0 : index
    %4 = vector.load %arg3[%c0_2, %c0_3, %c0_4] : memref<1x1x64xf32, #tpu.memory_space<vmem>>, vector<1x1x64xf32>
    %5 = vector.shape_cast %4 : vector<1x1x64xf32> to vector<1x64xf32>
    %c0_5 = arith.constant 0 : index
    %c0_6 = arith.constant 0 : index
    %c0_7 = arith.constant 0 : index
    %6 = vector.load %arg4[%c0_5, %c0_6, %c0_7] : memref<1x1x64xf32, #tpu.memory_space<vmem>>, vector<1x1x64xf32>
    %7 = vector.shape_cast %6 : vector<1x1x64xf32> to vector<1x64xf32>
    %cst = arith.constant dense<0.000000e+00> : vector<16xf32>
    %8 = vector.multi_reduction <add>, %3, %cst [1] : vector<16x64xf32> to vector<16xf32>
    %9 = vector.shape_cast %8 : vector<16xf32> to vector<16x1xf32>
    %cst_8 = arith.constant 6.400000e+01 : f32
    %10 = vector.broadcast %cst_8 : f32 to vector<16x1xf32>
    %11 = arith.divf %9, %10 : vector<16x1xf32>
    %12 = vector.broadcast %11 : vector<16x1xf32> to vector<16x64xf32>
    %13 = arith.subf %3, %12 : vector<16x64xf32>
    %14 = arith.mulf %13, %13 : vector<16x64xf32>
    %cst_9 = arith.constant dense<0.000000e+00> : vector<16xf32>
    %15 = vector.multi_reduction <add>, %14, %cst_9 [1] : vector<16x64xf32> to vector<16xf32>
    %16 = vector.shape_cast %15 : vector<16xf32> to vector<16x1xf32>
    %cst_10 = arith.constant 6.400000e+01 : f32
    %17 = vector.broadcast %cst_10 : f32 to vector<16x1xf32>
    %18 = arith.divf %16, %17 : vector<16x1xf32>
    %cst_11 = arith.constant 9.99999974E-6 : f32
    %19 = vector.broadcast %cst_11 : f32 to vector<16x1xf32>
    %20 = arith.addf %18, %19 : vector<16x1xf32>
    %21 = math.rsqrt %20 : vector<16x1xf32>
    %22 = vector.broadcast %21 : vector<16x1xf32> to vector<16x64xf32>
    %23 = arith.mulf %13, %22 : vector<16x64xf32>
    %24 = vector.broadcast %5 : vector<1x64xf32> to vector<16x64xf32>
    %25 = arith.mulf %23, %24 : vector<16x64xf32>
    %26 = vector.broadcast %7 : vector<1x64xf32> to vector<16x64xf32>
    %27 = arith.addf %25, %26 : vector<16x64xf32>
    %c0_12 = arith.constant 0 : index
    %c0_13 = arith.constant 0 : index
    %c0_14 = arith.constant 0 : index
    %28 = vector.load %arg5[%c0_12, %c0_13, %c0_14] : memref<1x64x192xf32, #tpu.memory_space<vmem>>, vector<1x64x192xf32>
    %29 = vector.shape_cast %28 : vector<1x64x192xf32> to vector<64x192xf32>
    %cst_15 = arith.constant dense<0.000000e+00> : vector<16x192xf32>
    %30 = tpu.matmul %27, %29, %cst_15 {dimension_numbers = #tpu.dot_dimension_numbers<[1], [0], [0], [1], [0, 0, 1, 1], [], []>} : vector<16x64xf32>, vector<64x192xf32>, vector<16x192xf32> -> vector<16x192xf32>
    %c0_16 = arith.constant 0 : index
    %c0_17 = arith.constant 0 : index
    %c0_18 = arith.constant 0 : index
    %31 = vector.load %arg6[%c0_16, %c0_17, %c0_18] : memref<1x1x192xf32, #tpu.memory_space<vmem>>, vector<1x1x192xf32>
    %32 = vector.shape_cast %31 : vector<1x1x192xf32> to vector<1x192xf32>
    %33 = vector.broadcast %32 : vector<1x192xf32> to vector<16x192xf32>
    %34 = arith.addf %30, %33 : vector<16x192xf32>
    %35 = vector.extract_strided_slice %34 {offsets = [0, 0], sizes = [8, 16], strides = [1, 1]} : vector<16x192xf32> to vector<8x16xf32>
    %36 = vector.extract_strided_slice %34 {offsets = [0, 64], sizes = [8, 16], strides = [1, 1]} : vector<16x192xf32> to vector<8x16xf32>
    %37 = vector.extract_strided_slice %34 {offsets = [0, 128], sizes = [8, 16], strides = [1, 1]} : vector<16x192xf32> to vector<8x16xf32>
    %cst_19 = arith.constant dense<0.000000e+00> : vector<8x8xf32>
    %38 = tpu.matmul %35, %36, %cst_19 {dimension_numbers = #tpu.dot_dimension_numbers<[1], [1], [0], [0], [0, 0, 1, 0], [], []>} : vector<8x16xf32>, vector<8x16xf32>, vector<8x8xf32> -> vector<8x8xf32>
    %cst_20 = arith.constant 2.500000e-01 : f32
    %39 = vector.broadcast %cst_20 : f32 to vector<8x8xf32>
    %40 = arith.mulf %38, %39 : vector<8x8xf32>
    %cst_21 = arith.constant dense<0xFF800000> : vector<8xf32>
    %41 = vector.multi_reduction <maximumf>, %40, %cst_21 [1] : vector<8x8xf32> to vector<8xf32>
    %42 = vector.shape_cast %41 : vector<8xf32> to vector<8x1xf32>
    %43 = vector.broadcast %42 : vector<8x1xf32> to vector<8x8xf32>
    %44 = arith.subf %40, %43 : vector<8x8xf32>
    %45 = math.exp %44 : vector<8x8xf32>
    %cst_22 = arith.constant dense<0.000000e+00> : vector<8xf32>
    %46 = vector.multi_reduction <add>, %45, %cst_22 [1] : vector<8x8xf32> to vector<8xf32>
    %47 = vector.shape_cast %46 : vector<8xf32> to vector<8x1xf32>
    %48 = tpu.reciprocal %47 {approx = true} : vector<8x1xf32> -> vector<8x1xf32>
    %49 = vector.broadcast %48 : vector<8x1xf32> to vector<8x8xf32>
    %50 = arith.mulf %45, %49 : vector<8x8xf32>
    %cst_23 = arith.constant dense<0.000000e+00> : vector<8x16xf32>
    %51 = tpu.matmul %50, %37, %cst_23 {dimension_numbers = #tpu.dot_dimension_numbers<[1], [0], [0], [1], [0, 0, 1, 1], [], []>} : vector<8x8xf32>, vector<8x16xf32>, vector<8x16xf32> -> vector<8x16xf32>
    %52 = vector.extract_strided_slice %34 {offsets = [0, 16], sizes = [8, 16], strides = [1, 1]} : vector<16x192xf32> to vector<8x16xf32>
    %53 = vector.extract_strided_slice %34 {offsets = [0, 80], sizes = [8, 16], strides = [1, 1]} : vector<16x192xf32> to vector<8x16xf32>
    %54 = vector.extract_strided_slice %34 {offsets = [0, 144], sizes = [8, 16], strides = [1, 1]} : vector<16x192xf32> to vector<8x16xf32>
    %cst_24 = arith.constant dense<0.000000e+00> : vector<8x8xf32>
    %55 = tpu.matmul %52, %53, %cst_24 {dimension_numbers = #tpu.dot_dimension_numbers<[1], [1], [0], [0], [0, 0, 1, 0], [], []>} : vector<8x16xf32>, vector<8x16xf32>, vector<8x8xf32> -> vector<8x8xf32>
    %cst_25 = arith.constant 2.500000e-01 : f32
    %56 = vector.broadcast %cst_25 : f32 to vector<8x8xf32>
    %57 = arith.mulf %55, %56 : vector<8x8xf32>
    %cst_26 = arith.constant dense<0xFF800000> : vector<8xf32>
    %58 = vector.multi_reduction <maximumf>, %57, %cst_26 [1] : vector<8x8xf32> to vector<8xf32>
    %59 = vector.shape_cast %58 : vector<8xf32> to vector<8x1xf32>
    %60 = vector.broadcast %59 : vector<8x1xf32> to vector<8x8xf32>
    %61 = arith.subf %57, %60 : vector<8x8xf32>
    %62 = math.exp %61 : vector<8x8xf32>
    %cst_27 = arith.constant dense<0.000000e+00> : vector<8xf32>
    %63 = vector.multi_reduction <add>, %62, %cst_27 [1] : vector<8x8xf32> to vector<8xf32>
    %64 = vector.shape_cast %63 : vector<8xf32> to vector<8x1xf32>
    %65 = tpu.reciprocal %64 {approx = true} : vector<8x1xf32> -> vector<8x1xf32>
    %66 = vector.broadcast %65 : vector<8x1xf32> to vector<8x8xf32>
    %67 = arith.mulf %62, %66 : vector<8x8xf32>
    %cst_28 = arith.constant dense<0.000000e+00> : vector<8x16xf32>
    %68 = tpu.matmul %67, %54, %cst_28 {dimension_numbers = #tpu.dot_dimension_numbers<[1], [0], [0], [1], [0, 0, 1, 1], [], []>} : vector<8x8xf32>, vector<8x16xf32>, vector<8x16xf32> -> vector<8x16xf32>
    %69 = vector.extract_strided_slice %34 {offsets = [0, 32], sizes = [8, 16], strides = [1, 1]} : vector<16x192xf32> to vector<8x16xf32>
    %70 = vector.extract_strided_slice %34 {offsets = [0, 96], sizes = [8, 16], strides = [1, 1]} : vector<16x192xf32> to vector<8x16xf32>
    %71 = vector.extract_strided_slice %34 {offsets = [0, 160], sizes = [8, 16], strides = [1, 1]} : vector<16x192xf32> to vector<8x16xf32>
    %cst_29 = arith.constant dense<0.000000e+00> : vector<8x8xf32>
    %72 = tpu.matmul %69, %70, %cst_29 {dimension_numbers = #tpu.dot_dimension_numbers<[1], [1], [0], [0], [0, 0, 1, 0], [], []>} : vector<8x16xf32>, vector<8x16xf32>, vector<8x8xf32> -> vector<8x8xf32>
    %cst_30 = arith.constant 2.500000e-01 : f32
    %73 = vector.broadcast %cst_30 : f32 to vector<8x8xf32>
    %74 = arith.mulf %72, %73 : vector<8x8xf32>
    %cst_31 = arith.constant dense<0xFF800000> : vector<8xf32>
    %75 = vector.multi_reduction <maximumf>, %74, %cst_31 [1] : vector<8x8xf32> to vector<8xf32>
    %76 = vector.shape_cast %75 : vector<8xf32> to vector<8x1xf32>
    %77 = vector.broadcast %76 : vector<8x1xf32> to vector<8x8xf32>
    %78 = arith.subf %74, %77 : vector<8x8xf32>
    %79 = math.exp %78 : vector<8x8xf32>
    %cst_32 = arith.constant dense<0.000000e+00> : vector<8xf32>
    %80 = vector.multi_reduction <add>, %79, %cst_32 [1] : vector<8x8xf32> to vector<8xf32>
    %81 = vector.shape_cast %80 : vector<8xf32> to vector<8x1xf32>
    %82 = tpu.reciprocal %81 {approx = true} : vector<8x1xf32> -> vector<8x1xf32>
    %83 = vector.broadcast %82 : vector<8x1xf32> to vector<8x8xf32>
    %84 = arith.mulf %79, %83 : vector<8x8xf32>
    %cst_33 = arith.constant dense<0.000000e+00> : vector<8x16xf32>
    %85 = tpu.matmul %84, %71, %cst_33 {dimension_numbers = #tpu.dot_dimension_numbers<[1], [0], [0], [1], [0, 0, 1, 1], [], []>} : vector<8x8xf32>, vector<8x16xf32>, vector<8x16xf32> -> vector<8x16xf32>
    %86 = vector.extract_strided_slice %34 {offsets = [0, 48], sizes = [8, 16], strides = [1, 1]} : vector<16x192xf32> to vector<8x16xf32>
    %87 = vector.extract_strided_slice %34 {offsets = [0, 112], sizes = [8, 16], strides = [1, 1]} : vector<16x192xf32> to vector<8x16xf32>
    %88 = vector.extract_strided_slice %34 {offsets = [0, 176], sizes = [8, 16], strides = [1, 1]} : vector<16x192xf32> to vector<8x16xf32>
    %cst_34 = arith.constant dense<0.000000e+00> : vector<8x8xf32>
    %89 = tpu.matmul %86, %87, %cst_34 {dimension_numbers = #tpu.dot_dimension_numbers<[1], [1], [0], [0], [0, 0, 1, 0], [], []>} : vector<8x16xf32>, vector<8x16xf32>, vector<8x8xf32> -> vector<8x8xf32>
    %cst_35 = arith.constant 2.500000e-01 : f32
    %90 = vector.broadcast %cst_35 : f32 to vector<8x8xf32>
    %91 = arith.mulf %89, %90 : vector<8x8xf32>
    %cst_36 = arith.constant dense<0xFF800000> : vector<8xf32>
    %92 = vector.multi_reduction <maximumf>, %91, %cst_36 [1] : vector<8x8xf32> to vector<8xf32>
    %93 = vector.shape_cast %92 : vector<8xf32> to vector<8x1xf32>
    %94 = vector.broadcast %93 : vector<8x1xf32> to vector<8x8xf32>
    %95 = arith.subf %91, %94 : vector<8x8xf32>
    %96 = math.exp %95 : vector<8x8xf32>
    %cst_37 = arith.constant dense<0.000000e+00> : vector<8xf32>
    %97 = vector.multi_reduction <add>, %96, %cst_37 [1] : vector<8x8xf32> to vector<8xf32>
    %98 = vector.shape_cast %97 : vector<8xf32> to vector<8x1xf32>
    %99 = tpu.reciprocal %98 {approx = true} : vector<8x1xf32> -> vector<8x1xf32>
    %100 = vector.broadcast %99 : vector<8x1xf32> to vector<8x8xf32>
    %101 = arith.mulf %96, %100 : vector<8x8xf32>
    %cst_38 = arith.constant dense<0.000000e+00> : vector<8x16xf32>
    %102 = tpu.matmul %101, %88, %cst_38 {dimension_numbers = #tpu.dot_dimension_numbers<[1], [0], [0], [1], [0, 0, 1, 1], [], []>} : vector<8x8xf32>, vector<8x16xf32>, vector<8x16xf32> -> vector<8x16xf32>
    %103 = tpu.concatenate %51, %68, %85, %102 in 1 : vector<8x16xf32>, vector<8x16xf32>, vector<8x16xf32>, vector<8x16xf32> -> vector<8x64xf32>
    %104 = vector.extract_strided_slice %34 {offsets = [8, 0], sizes = [8, 16], strides = [1, 1]} : vector<16x192xf32> to vector<8x16xf32>
    %105 = vector.extract_strided_slice %34 {offsets = [8, 64], sizes = [8, 16], strides = [1, 1]} : vector<16x192xf32> to vector<8x16xf32>
    %106 = vector.extract_strided_slice %34 {offsets = [8, 128], sizes = [8, 16], strides = [1, 1]} : vector<16x192xf32> to vector<8x16xf32>
    %cst_39 = arith.constant dense<0.000000e+00> : vector<8x8xf32>
    %107 = tpu.matmul %104, %105, %cst_39 {dimension_numbers = #tpu.dot_dimension_numbers<[1], [1], [0], [0], [0, 0, 1, 0], [], []>} : vector<8x16xf32>, vector<8x16xf32>, vector<8x8xf32> -> vector<8x8xf32>
    %cst_40 = arith.constant 2.500000e-01 : f32
    %108 = vector.broadcast %cst_40 : f32 to vector<8x8xf32>
    %109 = arith.mulf %107, %108 : vector<8x8xf32>
    %cst_41 = arith.constant dense<0xFF800000> : vector<8xf32>
    %110 = vector.multi_reduction <maximumf>, %109, %cst_41 [1] : vector<8x8xf32> to vector<8xf32>
    %111 = vector.shape_cast %110 : vector<8xf32> to vector<8x1xf32>
    %112 = vector.broadcast %111 : vector<8x1xf32> to vector<8x8xf32>
    %113 = arith.subf %109, %112 : vector<8x8xf32>
    %114 = math.exp %113 : vector<8x8xf32>
    %cst_42 = arith.constant dense<0.000000e+00> : vector<8xf32>
    %115 = vector.multi_reduction <add>, %114, %cst_42 [1] : vector<8x8xf32> to vector<8xf32>
    %116 = vector.shape_cast %115 : vector<8xf32> to vector<8x1xf32>
    %117 = tpu.reciprocal %116 {approx = true} : vector<8x1xf32> -> vector<8x1xf32>
    %118 = vector.broadcast %117 : vector<8x1xf32> to vector<8x8xf32>
    %119 = arith.mulf %114, %118 : vector<8x8xf32>
    %cst_43 = arith.constant dense<0.000000e+00> : vector<8x16xf32>
    %120 = tpu.matmul %119, %106, %cst_43 {dimension_numbers = #tpu.dot_dimension_numbers<[1], [0], [0], [1], [0, 0, 1, 1], [], []>} : vector<8x8xf32>, vector<8x16xf32>, vector<8x16xf32> -> vector<8x16xf32>
    %121 = vector.extract_strided_slice %34 {offsets = [8, 16], sizes = [8, 16], strides = [1, 1]} : vector<16x192xf32> to vector<8x16xf32>
    %122 = vector.extract_strided_slice %34 {offsets = [8, 80], sizes = [8, 16], strides = [1, 1]} : vector<16x192xf32> to vector<8x16xf32>
    %123 = vector.extract_strided_slice %34 {offsets = [8, 144], sizes = [8, 16], strides = [1, 1]} : vector<16x192xf32> to vector<8x16xf32>
    %cst_44 = arith.constant dense<0.000000e+00> : vector<8x8xf32>
    %124 = tpu.matmul %121, %122, %cst_44 {dimension_numbers = #tpu.dot_dimension_numbers<[1], [1], [0], [0], [0, 0, 1, 0], [], []>} : vector<8x16xf32>, vector<8x16xf32>, vector<8x8xf32> -> vector<8x8xf32>
    %cst_45 = arith.constant 2.500000e-01 : f32
    %125 = vector.broadcast %cst_45 : f32 to vector<8x8xf32>
    %126 = arith.mulf %124, %125 : vector<8x8xf32>
    %cst_46 = arith.constant dense<0xFF800000> : vector<8xf32>
    %127 = vector.multi_reduction <maximumf>, %126, %cst_46 [1] : vector<8x8xf32> to vector<8xf32>
    %128 = vector.shape_cast %127 : vector<8xf32> to vector<8x1xf32>
    %129 = vector.broadcast %128 : vector<8x1xf32> to vector<8x8xf32>
    %130 = arith.subf %126, %129 : vector<8x8xf32>
    %131 = math.exp %130 : vector<8x8xf32>
    %cst_47 = arith.constant dense<0.000000e+00> : vector<8xf32>
    %132 = vector.multi_reduction <add>, %131, %cst_47 [1] : vector<8x8xf32> to vector<8xf32>
    %133 = vector.shape_cast %132 : vector<8xf32> to vector<8x1xf32>
    %134 = tpu.reciprocal %133 {approx = true} : vector<8x1xf32> -> vector<8x1xf32>
    %135 = vector.broadcast %134 : vector<8x1xf32> to vector<8x8xf32>
    %136 = arith.mulf %131, %135 : vector<8x8xf32>
    %cst_48 = arith.constant dense<0.000000e+00> : vector<8x16xf32>
    %137 = tpu.matmul %136, %123, %cst_48 {dimension_numbers = #tpu.dot_dimension_numbers<[1], [0], [0], [1], [0, 0, 1, 1], [], []>} : vector<8x8xf32>, vector<8x16xf32>, vector<8x16xf32> -> vector<8x16xf32>
    %138 = vector.extract_strided_slice %34 {offsets = [8, 32], sizes = [8, 16], strides = [1, 1]} : vector<16x192xf32> to vector<8x16xf32>
    %139 = vector.extract_strided_slice %34 {offsets = [8, 96], sizes = [8, 16], strides = [1, 1]} : vector<16x192xf32> to vector<8x16xf32>
    %140 = vector.extract_strided_slice %34 {offsets = [8, 160], sizes = [8, 16], strides = [1, 1]} : vector<16x192xf32> to vector<8x16xf32>
    %cst_49 = arith.constant dense<0.000000e+00> : vector<8x8xf32>
    %141 = tpu.matmul %138, %139, %cst_49 {dimension_numbers = #tpu.dot_dimension_numbers<[1], [1], [0], [0], [0, 0, 1, 0], [], []>} : vector<8x16xf32>, vector<8x16xf32>, vector<8x8xf32> -> vector<8x8xf32>
    %cst_50 = arith.constant 2.500000e-01 : f32
    %142 = vector.broadcast %cst_50 : f32 to vector<8x8xf32>
    %143 = arith.mulf %141, %142 : vector<8x8xf32>
    %cst_51 = arith.constant dense<0xFF800000> : vector<8xf32>
    %144 = vector.multi_reduction <maximumf>, %143, %cst_51 [1] : vector<8x8xf32> to vector<8xf32>
    %145 = vector.shape_cast %144 : vector<8xf32> to vector<8x1xf32>
    %146 = vector.broadcast %145 : vector<8x1xf32> to vector<8x8xf32>
    %147 = arith.subf %143, %146 : vector<8x8xf32>
    %148 = math.exp %147 : vector<8x8xf32>
    %cst_52 = arith.constant dense<0.000000e+00> : vector<8xf32>
    %149 = vector.multi_reduction <add>, %148, %cst_52 [1] : vector<8x8xf32> to vector<8xf32>
    %150 = vector.shape_cast %149 : vector<8xf32> to vector<8x1xf32>
    %151 = tpu.reciprocal %150 {approx = true} : vector<8x1xf32> -> vector<8x1xf32>
    %152 = vector.broadcast %151 : vector<8x1xf32> to vector<8x8xf32>
    %153 = arith.mulf %148, %152 : vector<8x8xf32>
    %cst_53 = arith.constant dense<0.000000e+00> : vector<8x16xf32>
    %154 = tpu.matmul %153, %140, %cst_53 {dimension_numbers = #tpu.dot_dimension_numbers<[1], [0], [0], [1], [0, 0, 1, 1], [], []>} : vector<8x8xf32>, vector<8x16xf32>, vector<8x16xf32> -> vector<8x16xf32>
    %155 = vector.extract_strided_slice %34 {offsets = [8, 48], sizes = [8, 16], strides = [1, 1]} : vector<16x192xf32> to vector<8x16xf32>
    %156 = vector.extract_strided_slice %34 {offsets = [8, 112], sizes = [8, 16], strides = [1, 1]} : vector<16x192xf32> to vector<8x16xf32>
    %157 = vector.extract_strided_slice %34 {offsets = [8, 176], sizes = [8, 16], strides = [1, 1]} : vector<16x192xf32> to vector<8x16xf32>
    %cst_54 = arith.constant dense<0.000000e+00> : vector<8x8xf32>
    %158 = tpu.matmul %155, %156, %cst_54 {dimension_numbers = #tpu.dot_dimension_numbers<[1], [1], [0], [0], [0, 0, 1, 0], [], []>} : vector<8x16xf32>, vector<8x16xf32>, vector<8x8xf32> -> vector<8x8xf32>
    %cst_55 = arith.constant 2.500000e-01 : f32
    %159 = vector.broadcast %cst_55 : f32 to vector<8x8xf32>
    %160 = arith.mulf %158, %159 : vector<8x8xf32>
    %cst_56 = arith.constant dense<0xFF800000> : vector<8xf32>
    %161 = vector.multi_reduction <maximumf>, %160, %cst_56 [1] : vector<8x8xf32> to vector<8xf32>
    %162 = vector.shape_cast %161 : vector<8xf32> to vector<8x1xf32>
    %163 = vector.broadcast %162 : vector<8x1xf32> to vector<8x8xf32>
    %164 = arith.subf %160, %163 : vector<8x8xf32>
    %165 = math.exp %164 : vector<8x8xf32>
    %cst_57 = arith.constant dense<0.000000e+00> : vector<8xf32>
    %166 = vector.multi_reduction <add>, %165, %cst_57 [1] : vector<8x8xf32> to vector<8xf32>
    %167 = vector.shape_cast %166 : vector<8xf32> to vector<8x1xf32>
    %168 = tpu.reciprocal %167 {approx = true} : vector<8x1xf32> -> vector<8x1xf32>
    %169 = vector.broadcast %168 : vector<8x1xf32> to vector<8x8xf32>
    %170 = arith.mulf %165, %169 : vector<8x8xf32>
    %cst_58 = arith.constant dense<0.000000e+00> : vector<8x16xf32>
    %171 = tpu.matmul %170, %157, %cst_58 {dimension_numbers = #tpu.dot_dimension_numbers<[1], [0], [0], [1], [0, 0, 1, 1], [], []>} : vector<8x8xf32>, vector<8x16xf32>, vector<8x16xf32> -> vector<8x16xf32>
    %172 = tpu.concatenate %120, %137, %154, %171 in 1 : vector<8x16xf32>, vector<8x16xf32>, vector<8x16xf32>, vector<8x16xf32> -> vector<8x64xf32>
    %173 = tpu.concatenate %103, %172 in 0 : vector<8x64xf32>, vector<8x64xf32> -> vector<16x64xf32>
    %c0_59 = arith.constant 0 : index
    %c0_60 = arith.constant 0 : index
    %c0_61 = arith.constant 0 : index
    %174 = vector.load %arg7[%c0_59, %c0_60, %c0_61] : memref<1x64x64xf32, #tpu.memory_space<vmem>>, vector<1x64x64xf32>
    %175 = vector.shape_cast %174 : vector<1x64x64xf32> to vector<64x64xf32>
    %cst_62 = arith.constant dense<0.000000e+00> : vector<16x64xf32>
    %176 = tpu.matmul %173, %175, %cst_62 {dimension_numbers = #tpu.dot_dimension_numbers<[1], [0], [0], [1], [0, 0, 1, 1], [], []>} : vector<16x64xf32>, vector<64x64xf32>, vector<16x64xf32> -> vector<16x64xf32>
    %177 = arith.addf %3, %176 : vector<16x64xf32>
    %c0_63 = arith.constant 0 : index
    %c0_64 = arith.constant 0 : index
    %c0_65 = arith.constant 0 : index
    %178 = vector.load %arg8[%c0_63, %c0_64, %c0_65] : memref<1x1x64xf32, #tpu.memory_space<vmem>>, vector<1x1x64xf32>
    %179 = vector.shape_cast %178 : vector<1x1x64xf32> to vector<1x64xf32>
    %180 = vector.broadcast %179 : vector<1x64xf32> to vector<16x64xf32>
    %181 = arith.addf %177, %180 : vector<16x64xf32>
    %c0_66 = arith.constant 0 : index
    %c0_67 = arith.constant 0 : index
    %182 = vector.load %arg2[%c0_66, %c0_67] : memref<2x64xf32, #tpu.memory_space<vmem>>, vector<2x64xf32>
    %c0_68 = arith.constant 0 : index
    %c0_69 = arith.constant 0 : index
    %c0_70 = arith.constant 0 : index
    %183 = vector.load %arg9[%c0_68, %c0_69, %c0_70] : memref<1x64x64xf32, #tpu.memory_space<vmem>>, vector<1x64x64xf32>
    %184 = vector.shape_cast %183 : vector<1x64x64xf32> to vector<64x64xf32>
    %cst_71 = arith.constant dense<0.000000e+00> : vector<2x64xf32>
    %185 = tpu.matmul %182, %184, %cst_71 {dimension_numbers = #tpu.dot_dimension_numbers<[1], [0], [0], [1], [0, 0, 1, 1], [], []>} : vector<2x64xf32>, vector<64x64xf32>, vector<2x64xf32> -> vector<2x64xf32>
    %c0_72 = arith.constant 0 : index
    %c0_73 = arith.constant 0 : index
    %c0_74 = arith.constant 0 : index
    %186 = vector.load %arg10[%c0_72, %c0_73, %c0_74] : memref<1x1x64xf32, #tpu.memory_space<vmem>>, vector<1x1x64xf32>
    %187 = vector.shape_cast %186 : vector<1x1x64xf32> to vector<1x64xf32>
    %188 = vector.broadcast %187 : vector<1x64xf32> to vector<2x64xf32>
    %189 = arith.addf %185, %188 : vector<2x64xf32>
    %c0_75 = arith.constant 0 : index
    %c0_76 = arith.constant 0 : index
    %c0_77 = arith.constant 0 : index
    %190 = vector.load %arg11[%c0_75, %c0_76, %c0_77] : memref<1x64x64xf32, #tpu.memory_space<vmem>>, vector<1x64x64xf32>
    %191 = vector.shape_cast %190 : vector<1x64x64xf32> to vector<64x64xf32>
    %cst_78 = arith.constant dense<0.000000e+00> : vector<2x64xf32>
    %192 = tpu.matmul %189, %191, %cst_78 {dimension_numbers = #tpu.dot_dimension_numbers<[1], [0], [0], [1], [0, 0, 1, 1], [], []>} : vector<2x64xf32>, vector<64x64xf32>, vector<2x64xf32> -> vector<2x64xf32>
    %c0_79 = arith.constant 0 : index
    %c0_80 = arith.constant 0 : index
    %c0_81 = arith.constant 0 : index
    %193 = vector.load %arg12[%c0_79, %c0_80, %c0_81] : memref<1x1x64xf32, #tpu.memory_space<vmem>>, vector<1x1x64xf32>
    %194 = vector.shape_cast %193 : vector<1x1x64xf32> to vector<1x64xf32>
    %195 = vector.broadcast %194 : vector<1x64xf32> to vector<2x64xf32>
    %196 = arith.addf %192, %195 : vector<2x64xf32>
    %197 = vector.shape_cast %181 : vector<16x64xf32> to vector<2x8x64xf32>
    %198 = vector.shape_cast %196 : vector<2x64xf32> to vector<2x1x64xf32>
    %199 = vector.broadcast %198 : vector<2x1x64xf32> to vector<2x8x64xf32>
    %200 = arith.addf %197, %199 : vector<2x8x64xf32>
    %201 = vector.shape_cast %200 : vector<2x8x64xf32> to vector<16x64xf32>
    %c0_82 = arith.constant 0 : index
    %c0_83 = arith.constant 0 : index
    %c0_84 = arith.constant 0 : index
    %202 = vector.load %arg13[%c0_82, %c0_83, %c0_84] : memref<1x1x64xf32, #tpu.memory_space<vmem>>, vector<1x1x64xf32>
    %203 = vector.shape_cast %202 : vector<1x1x64xf32> to vector<1x64xf32>
    %c0_85 = arith.constant 0 : index
    %c0_86 = arith.constant 0 : index
    %c0_87 = arith.constant 0 : index
    %204 = vector.load %arg14[%c0_85, %c0_86, %c0_87] : memref<1x1x64xf32, #tpu.memory_space<vmem>>, vector<1x1x64xf32>
    %205 = vector.shape_cast %204 : vector<1x1x64xf32> to vector<1x64xf32>
    %cst_88 = arith.constant dense<0.000000e+00> : vector<16xf32>
    %206 = vector.multi_reduction <add>, %201, %cst_88 [1] : vector<16x64xf32> to vector<16xf32>
    %207 = vector.shape_cast %206 : vector<16xf32> to vector<16x1xf32>
    %cst_89 = arith.constant 6.400000e+01 : f32
    %208 = vector.broadcast %cst_89 : f32 to vector<16x1xf32>
    %209 = arith.divf %207, %208 : vector<16x1xf32>
    %210 = vector.broadcast %209 : vector<16x1xf32> to vector<16x64xf32>
    %211 = arith.subf %201, %210 : vector<16x64xf32>
    %212 = arith.mulf %211, %211 : vector<16x64xf32>
    %cst_90 = arith.constant dense<0.000000e+00> : vector<16xf32>
    %213 = vector.multi_reduction <add>, %212, %cst_90 [1] : vector<16x64xf32> to vector<16xf32>
    %214 = vector.shape_cast %213 : vector<16xf32> to vector<16x1xf32>
    %cst_91 = arith.constant 6.400000e+01 : f32
    %215 = vector.broadcast %cst_91 : f32 to vector<16x1xf32>
    %216 = arith.divf %214, %215 : vector<16x1xf32>
    %cst_92 = arith.constant 9.99999974E-6 : f32
    %217 = vector.broadcast %cst_92 : f32 to vector<16x1xf32>
    %218 = arith.addf %216, %217 : vector<16x1xf32>
    %219 = math.rsqrt %218 : vector<16x1xf32>
    %220 = vector.broadcast %219 : vector<16x1xf32> to vector<16x64xf32>
    %221 = arith.mulf %211, %220 : vector<16x64xf32>
    %222 = vector.broadcast %203 : vector<1x64xf32> to vector<16x64xf32>
    %223 = arith.mulf %221, %222 : vector<16x64xf32>
    %224 = vector.broadcast %205 : vector<1x64xf32> to vector<16x64xf32>
    %225 = arith.addf %223, %224 : vector<16x64xf32>
    %c0_93 = arith.constant 0 : index
    %c0_94 = arith.constant 0 : index
    %c0_95 = arith.constant 0 : index
    %226 = vector.load %arg15[%c0_93, %c0_94, %c0_95] : memref<1x64x128xf32, #tpu.memory_space<vmem>>, vector<1x64x128xf32>
    %227 = vector.shape_cast %226 : vector<1x64x128xf32> to vector<64x128xf32>
    %cst_96 = arith.constant dense<0.000000e+00> : vector<16x128xf32>
    %228 = tpu.matmul %225, %227, %cst_96 {dimension_numbers = #tpu.dot_dimension_numbers<[1], [0], [0], [1], [0, 0, 1, 1], [], []>} : vector<16x64xf32>, vector<64x128xf32>, vector<16x128xf32> -> vector<16x128xf32>
    %c0_97 = arith.constant 0 : index
    %c0_98 = arith.constant 0 : index
    %c0_99 = arith.constant 0 : index
    %229 = vector.load %arg16[%c0_97, %c0_98, %c0_99] : memref<1x1x128xf32, #tpu.memory_space<vmem>>, vector<1x1x128xf32>
    %230 = vector.shape_cast %229 : vector<1x1x128xf32> to vector<1x128xf32>
    %231 = vector.broadcast %230 : vector<1x128xf32> to vector<16x128xf32>
    %232 = arith.addf %228, %231 : vector<16x128xf32>
    %cst_100 = arith.constant 0.000000e+00 : f32
    %233 = vector.broadcast %cst_100 : f32 to vector<16x128xf32>
    %234 = arith.maximumf %232, %233 : vector<16x128xf32>
    %c0_101 = arith.constant 0 : index
    %c0_102 = arith.constant 0 : index
    %c0_103 = arith.constant 0 : index
    %235 = vector.load %arg17[%c0_101, %c0_102, %c0_103] : memref<1x128x64xf32, #tpu.memory_space<vmem>>, vector<1x128x64xf32>
    %236 = vector.shape_cast %235 : vector<1x128x64xf32> to vector<128x64xf32>
    %cst_104 = arith.constant dense<0.000000e+00> : vector<16x64xf32>
    %237 = tpu.matmul %234, %236, %cst_104 {dimension_numbers = #tpu.dot_dimension_numbers<[1], [0], [0], [1], [0, 0, 1, 1], [], []>} : vector<16x128xf32>, vector<128x64xf32>, vector<16x64xf32> -> vector<16x64xf32>
    %238 = arith.addf %201, %237 : vector<16x64xf32>
    %c0_105 = arith.constant 0 : index
    %c0_106 = arith.constant 0 : index
    %c0_107 = arith.constant 0 : index
    %239 = vector.load %arg18[%c0_105, %c0_106, %c0_107] : memref<1x1x64xf32, #tpu.memory_space<vmem>>, vector<1x1x64xf32>
    %240 = vector.shape_cast %239 : vector<1x1x64xf32> to vector<1x64xf32>
    %241 = vector.broadcast %240 : vector<1x64xf32> to vector<16x64xf32>
    %242 = arith.addf %238, %241 : vector<16x64xf32>
    %c0_108 = arith.constant 0 : index
    %c0_109 = arith.constant 0 : index
    %243 = vector.load %arg19[%c0_108, %c0_109] : memref<16x64xf32, #tpu.memory_space<vmem>>, vector<16x64xf32>
    tpu.vector_store %arg19[%c0_108, %c0_109], %242 {strides = array<i32>} : memref<16x64xf32, #tpu.memory_space<vmem>>, vector<16x64xf32>,
    return
  }
  func.func @transform_0(%arg0: i32) -> (i32, i32) {
    %c0_i32 = arith.constant 0 : i32
    %c0_i32_0 = arith.constant 0 : i32
    %c0_i32_1 = arith.constant 0 : i32
    return %c0_i32, %c0_i32_0 : i32, i32
  }
  func.func @transform_1(%arg0: i32) -> (i32, i32) {
    %c0_i32 = arith.constant 0 : i32
    %c0_i32_0 = arith.constant 0 : i32
    %c0_i32_1 = arith.constant 0 : i32
    return %c0_i32, %c0_i32_0 : i32, i32
  }
  func.func @transform_2(%arg0: i32) -> (i32, i32, i32) {
    %c0_i32 = arith.constant 0 : i32
    %c0_i32_0 = arith.constant 0 : i32
    %c0_i32_1 = arith.constant 0 : i32
    return %arg0, %c0_i32, %c0_i32_0 : i32, i32, i32
  }
  func.func @transform_3(%arg0: i32) -> (i32, i32, i32) {
    %c0_i32 = arith.constant 0 : i32
    %c0_i32_0 = arith.constant 0 : i32
    %c0_i32_1 = arith.constant 0 : i32
    return %arg0, %c0_i32, %c0_i32_0 : i32, i32, i32
  }
  func.func @transform_4(%arg0: i32) -> (i32, i32, i32) {
    %c0_i32 = arith.constant 0 : i32
    %c0_i32_0 = arith.constant 0 : i32
    %c0_i32_1 = arith.constant 0 : i32
    return %arg0, %c0_i32, %c0_i32_0 : i32, i32, i32
  }
  func.func @transform_5(%arg0: i32) -> (i32, i32, i32) {
    %c0_i32 = arith.constant 0 : i32
    %c0_i32_0 = arith.constant 0 : i32
    %c0_i32_1 = arith.constant 0 : i32
    return %arg0, %c0_i32, %c0_i32_0 : i32, i32, i32
  }
  func.func @transform_6(%arg0: i32) -> (i32, i32, i32) {
    %c0_i32 = arith.constant 0 : i32
    %c0_i32_0 = arith.constant 0 : i32
    %c0_i32_1 = arith.constant 0 : i32
    return %arg0, %c0_i32, %c0_i32_0 : i32, i32, i32
  }
  func.func @transform_7(%arg0: i32) -> (i32, i32, i32) {
    %c0_i32 = arith.constant 0 : i32
    %c0_i32_0 = arith.constant 0 : i32
    %c0_i32_1 = arith.constant 0 : i32
    return %arg0, %c0_i32, %c0_i32_0 : i32, i32, i32
  }
  func.func @transform_8(%arg0: i32) -> (i32, i32, i32) {
    %c0_i32 = arith.constant 0 : i32
    %c0_i32_0 = arith.constant 0 : i32
    %c0_i32_1 = arith.constant 0 : i32
    return %arg0, %c0_i32, %c0_i32_0 : i32, i32, i32
  }
  func.func @transform_9(%arg0: i32) -> (i32, i32, i32) {
    %c0_i32 = arith.constant 0 : i32
    %c0_i32_0 = arith.constant 0 : i32
    %c0_i32_1 = arith.constant 0 : i32
    return %arg0, %c0_i32, %c0_i32_0 : i32, i32, i32
  }
  func.func @transform_10(%arg0: i32) -> (i32, i32, i32) {
    %c0_i32 = arith.constant 0 : i32
    %c0_i32_0 = arith.constant 0 : i32
    %c0_i32_1 = arith.constant 0 : i32
    return %arg0, %c0_i32, %c0_i32_0 : i32, i32, i32
  }
  func.func @transform_11(%arg0: i32) -> (i32, i32, i32) {
    %c0_i32 = arith.constant 0 : i32
    %c0_i32_0 = arith.constant 0 : i32
    %c0_i32_1 = arith.constant 0 : i32
    return %arg0, %c0_i32, %c0_i32_0 : i32, i32, i32
  }
  func.func @transform_12(%arg0: i32) -> (i32, i32, i32) {
    %c0_i32 = arith.constant 0 : i32
    %c0_i32_0 = arith.constant 0 : i32
    %c0_i32_1 = arith.constant 0 : i32
    return %arg0, %c0_i32, %c0_i32_0 : i32, i32, i32
  }
  func.func @transform_13(%arg0: i32) -> (i32, i32, i32) {
    %c0_i32 = arith.constant 0 : i32
    %c0_i32_0 = arith.constant 0 : i32
    %c0_i32_1 = arith.constant 0 : i32
    return %arg0, %c0_i32, %c0_i32_0 : i32, i32, i32
  }
  func.func @transform_14(%arg0: i32) -> (i32, i32, i32) {
    %c0_i32 = arith.constant 0 : i32
    %c0_i32_0 = arith.constant 0 : i32
    %c0_i32_1 = arith.constant 0 : i32
    return %arg0, %c0_i32, %c0_i32_0 : i32, i32, i32
  }
  func.func @transform_15(%arg0: i32) -> (i32, i32, i32) {
    %c0_i32 = arith.constant 0 : i32
    %c0_i32_0 = arith.constant 0 : i32
    %c0_i32_1 = arith.constant 0 : i32
    return %arg0, %c0_i32, %c0_i32_0 : i32, i32, i32
  }
  func.func @transform_16(%arg0: i32) -> (i32, i32, i32) {
    %c0_i32 = arith.constant 0 : i32
    %c0_i32_0 = arith.constant 0 : i32
    %c0_i32_1 = arith.constant 0 : i32
    return %arg0, %c0_i32, %c0_i32_0 : i32, i32, i32
  }
  func.func @transform_17(%arg0: i32) -> (i32, i32, i32) {
    %c0_i32 = arith.constant 0 : i32
    %c0_i32_0 = arith.constant 0 : i32
    %c0_i32_1 = arith.constant 0 : i32
    return %arg0, %c0_i32, %c0_i32_0 : i32, i32, i32
  }
  func.func @transform_18(%arg0: i32) -> (i32, i32) {
    %c0_i32 = arith.constant 0 : i32
    %c0_i32_0 = arith.constant 0 : i32
    %c0_i32_1 = arith.constant 0 : i32
    return %c0_i32, %c0_i32_0 : i32, i32
  }
}

</mosaic_0001>

<bundles_post_ra>
// kernel: _lambda_.6
= control target key start
LH: loop header
LB: loop body
LE: loop exit
PB: predicated region body
PF: predicated region fallthrough
CT: control target
= control target key end

     0   :  { %11 = vsyncpa [#allocation3], 0  ;;  %s617_s0 = inlined_call_operand.vmem [shape: f32[32,48], index: 0, kind: input, shape index: {}]   ;;  %s618_s1 = inlined_call_operand.hbm [shape: f32[48,64], index: 1, kind: input, shape index: {}]   ;;  %s619_s2 = inlined_call_operand.hbm [shape: f32[1,64], index: 2, kind: input, shape index: {}]   ;;  %s620_s3 = inlined_call_operand.vmem [shape: f32[2,32], index: 3, kind: input, shape index: {}]   ;;  %s621_s4 = inlined_call_operand.hbm [shape: f32[64,64], index: 4, kind: input, shape index: {}]   ;;  %s622_s5 = inlined_call_operand.hbm [shape: f32[1,64], index: 5, kind: input, shape index: {}]   ;;  %s623_s6 = inlined_call_operand.vmem [shape: f32[2,64], index: 6, kind: output, shape index: {}]  }
   0x1   :  { %12 = vsyncpa [#allocation5], 0 }
   0x2   :  { %13 = vsyncpa [#allocation8], 0  ;;  %s540_s21 = smov [#allocation4]   ;;  %s541_s23 = smov [#allocation2]  }
   0x3   :  { %s34_s22 = sshll.u32 %s540_s21, 4  ;;  %s21_s24 = sshll.u32 %s541_s23, 4  ;;  %s35_s22 = int_to_ptr.vmem [resolvable:$true] %s34_s22  ;;  %s22_s24 = int_to_ptr.vmem [resolvable:$true] %s21_s24 }
   0x4   :  { %s462_s25 = scalar_lea.vmem %s35_s22, 16  ;;  %s466_s26 = scalar_lea.vmem %s35_s22, 32 }
   0x5   :  { %p463_p0 = scmp.ne.s32.totalorder %s35_s22, %s462_s25  ;;  %p467_p1 = scmp.lt.s32.totalorder %s35_s22, %s35_s22 }
   0x6   :  { %p468_p2 = scmp.lt.s32.totalorder %s466_s26, %s462_s25 }
   0x8   :  { %p469_p3 = por %p468_p2, %p467_p1 }
   0xa   :  { %p470_p4 = pnand %p469_p3, %p463_p0 }
   0xc   :  { %473 = shalt.err (!%p470_p4)
}
   0xd   :  { %37 = dma.hbm_to_vmem [thread:$0]  %s619_s2, 16, %s35_s22, [#allocation5]  }
   0xe   :  { %s482_s29 = scalar_lea.vmem %s22_s24, 768  ;;  %p487_p6 = scmp.lt.s32.totalorder %s22_s24, %s22_s24 }
   0xf   :  { %p483_p5 = scmp.ne.s32.totalorder %s22_s24, %s482_s29  ;;  %p488_p7 = scmp.lt.s32.totalorder %s482_s29, %s482_s29 }
  0x11   :  { %p489_p8 = por %p488_p7, %p487_p6 }
  0x13   :  { %p490_p9 = pnand %p489_p8, %p483_p5 }
  0x15   :  { %493 = shalt.err (!%p490_p9)
}
  0x16   :  { %s542_s30 = smov 128   ;;  %s543_s7 = smov 8  }
  0x17   :  { %27 = dma.hbm_to_vmem [thread:$0]  %s618_s1, 768, %s22_s24, [#allocation3], %s542_s30, %s542_s30, %s543_s7  }
  0x18   :  { %s544_s10 = smov [#allocation6]   ;;  %s545_s12 = smov [#allocation7]  }
  0x19   :  { %s45_s11 = sshll.u32 %s544_s10, 4  ;;  %s58_s13 = sshll.u32 %s545_s12, 4  ;;  %s46_s11 = int_to_ptr.vmem [resolvable:$true] %s45_s11  ;;  %s59_s13 = int_to_ptr.vmem [resolvable:$true] %s58_s13 }
  0x1a   :  { %s502_s2 = scalar_lea.vmem %s46_s11, 1024  ;;  %p507_p11 = scmp.lt.s32.totalorder %s46_s11, %s46_s11 }
  0x1b   :  { %p503_p10 = scmp.ne.s32.totalorder %s46_s11, %s502_s2  ;;  %p508_p12 = scmp.lt.s32.totalorder %s502_s2, %s502_s2 }
  0x1d   :  { %p509_p13 = por %p508_p12, %p507_p11 }
  0x1f   :  { %p510_p0 = pnand %p509_p13, %p503_p10 }
  0x21   :  { %513 = shalt.err (!%p510_p0)
}
  0x22   :  { %51 = dma.hbm_to_vmem [thread:$0]  %s621_s4, 1024, %s46_s11, [#allocation5], %s542_s30, %s542_s30, %s543_s7  }
  0x23   :  { %s522_s16 = scalar_lea.vmem %s59_s13, 16  ;;  %s526_s1 = scalar_lea.vmem %s59_s13, 32 }
  0x24   :  { %p523_p1 = scmp.ne.s32.totalorder %s59_s13, %s522_s16  ;;  %p527_p2 = scmp.lt.s32.totalorder %s59_s13, %s59_s13 }
  0x25   :  { %p528_p3 = scmp.lt.s32.totalorder %s526_s1, %s522_s16 }
  0x27   :  { %p529_p4 = por %p528_p3, %p527_p2 }
  0x29   :  { %p530_p5 = pnand %p529_p4, %p523_p1 }
  0x2b   :  { %533 = shalt.err (!%p530_p5)
}
  0x2c   :  { %61 = dma.hbm_to_vmem [thread:$0]  %s622_s5, 16, %s59_s13, [#allocation8]  }
  0x2d   :  { %534 = dma.done.wait [#allocation3], 768  }
  0x2e   :  { %535 = vsyncadd [#allocation3], 4294966528 }
  0x2f   :  { %536 = dma.done.wait [#allocation5], 1040  }
  0x30   :  { %537 = vsyncadd [#allocation5], 4294966256 }
  0x31   :  { %538 = dma.done.wait [#allocation8], 16  }
  0x32   :  { %539 = vsyncadd [#allocation8], 4294967280  ;;  %v83_v0 = vld [vmem:[#allocation2 + $0x28] sm:$0xff]  ;;  %v82_v1 = vld [vmem:[#allocation2 + $0x20] sm:$0xff]  ;;  %vm91_vm0 = vcmask 392192   ;;  %v546_v10 = vmov 0.0  }
  0x33   :  { %398 = vmatprep.subr.mxu0 %v83_v0  ;;  %v81_v2 = vld [vmem:[#allocation2 + $0x18] sm:$0xff]  ;;  %v74_v3 = vld [vmem:[%s617_s0] sm:$0xff]  ;;  %v80_v4 = vld [vmem:[#allocation2 + $0x10] sm:$0xff]  ;;  %427 = vmatprep.subr.mxu1 %v546_v10  ;;  %vm547_vm1 = vmmov 0   ;;  %vm194_vm2 = vcmask 261120   ;;  %vm283_vm3 = vcmask 523264  }
  0x34   :  { %399 = vmatpush3.msra.mxu0 %v83_v0  ;;  %410 = vmatprep.mubr.msk.f32.mxu0 %vm91_vm0, %v74_v3  ;;  %v79_v5 = vld [vmem:[#allocation2 + $0x8] sm:$0xff]  ;;  %v78_v6 = vld [vmem:[#allocation2] sm:$0xff]  ;;  %v76_v8 = vld [vmem:[%s617_s0 + $0x10] sm:$0xff]  ;;  %vm357_vm4 = vcmask 517120  }
  0x35   :  { %400 = vmatprep.subr.mxu0 %v82_v1  ;;  %v75_v7 = vld [vmem:[%s617_s0 + $0x8] sm:$0xff]  ;;  %v77_v9 = vld [vmem:[%s617_s0 + $0x18] sm:$0xff]  ;;  %443 = vmatprep.mubr.msk.f32.mxu1 %vm547_vm1, %v546_v10  ;;  %v366_v20 = vld [vmem:[#allocation4] ss:$0 sm:$0xff] }
  0x36   :  { %401 = vmatpush3.msra.mxu0 %v82_v1  ;;  %v275_v11 = vld [vmem:[#allocation6 + $0x38] sm:$0xff]  ;;  %v274_v12 = vld [vmem:[#allocation6 + $0x30] sm:$0xff]  ;;  %v273_v13 = vld [vmem:[#allocation6 + $0x28] sm:$0xff] }
  0x37   :  { %402 = vmatprep.subr.mxu0 %v81_v2  ;;  %428 = vmatpush3.msra.mxu1 %v275_v11  ;;  %v272_v14 = vld [vmem:[#allocation6 + $0x20] sm:$0xff]  ;;  %v271_v15 = vld [vmem:[#allocation6 + $0x18] sm:$0xff]  ;;  %v270_v16 = vld [vmem:[#allocation6 + $0x10] sm:$0xff] }
  0x38   :  { %403 = vmatpush3.msra.mxu0 %v81_v2  ;;  %429 = vmatprep.subr.mxu1 %v546_v10  ;;  %v269_v17 = vld [vmem:[#allocation6 + $0x8] sm:$0xff]  ;;  %v268_v32 = vld [vmem:[#allocation6] sm:$0xff] }
  0x39   :  { %404 = vmatprep.subr.mxu0 %v80_v4  ;;  %430 = vmatpush3.msra.mxu1 %v274_v12  ;;  %v193_v31 = vld [vmem:[%s620_s3] sm:$0x3]  ;;  %v372_v35 = vld [vmem:[#allocation7] ss:$0 sm:$0xff] }
  0x3a   :  { %405 = vmatpush3.msra.mxu0 %v80_v4  ;;  %431 = vmatprep.subr.mxu1 %v546_v10 }
  0x3b   :  { %406 = vmatprep.subr.mxu0 %v79_v5  ;;  %432 = vmatpush3.msra.mxu1 %v273_v13 }
  0x3c   :  { %407 = vmatpush3.msra.mxu0 %v79_v5  ;;  %433 = vmatprep.subr.mxu1 %v546_v10 }
  0x3d   :  { %408 = vmatprep.subr.mxu0 %v78_v6  ;;  %434 = vmatpush3.msra.mxu1 %v272_v14 }
  0x3e   :  { %409 = vmatpush3.msra.mxu0 %v78_v6  ;;  %435 = vmatprep.subr.mxu1 %v546_v10 }
  0x3f   :  { %411 = vmatmul.mubr.msk.f32.vlgmr.msra.gmra.mxu0 %vm91_vm0, %v75_v7  ;;  %416 = vmatprep.subr.mxu0 %v546_v10 }
  0x40   :  { %413 = vmatprep.mubr.msk.f32.mxu0 %vm91_vm0, %v76_v8  ;;  %436 = vmatpush3.msra.mxu1 %v271_v15 }
  0x41   :  { %437 = vmatprep.subr.mxu1 %v546_v10 }
  0x42   :  { %438 = vmatpush3.msra.mxu1 %v270_v16 }
  0x43   :  { %414 = vmatmul.mubr.msk.f32.gmra.mxu0 %vm91_vm0, %v77_v9  ;;  %439 = vmatprep.subr.mxu1 %v546_v10 }
  0x44   :  { %424 = vmatprep.mubr.msk.f32.mxu0 %vm547_vm1, %v546_v10  ;;  %440 = vmatpush3.msra.mxu1 %v269_v17 }
  0x45   :  { %441 = vmatprep.subr.mxu1 %v546_v10 }
  0x46   :  { %442 = vmatpush3.msra.mxu1 %v268_v32 }
  0xff   :  { %v412_v18 = vpop.f32.mrf.mxu0 }
 0x100   :  { %v176_v24 = vadd.f32 %v412_v18, %v366_v20 }
 0x101   :  { %v170_v19 = vpop.f32.mrf.mxu0 }
 0x102   :  { %v171_v27 = vadd.f32 %v366_v20, %v170_v19  ;;  %v190_v29 = vmax.f32 %v176_v24, 0.0 }
 0x103   :  { %v415_v21 = vpop.f32.mrf.mxu0 }
 0x104   :  { %v186_v22 = vadd.f32 %v415_v21, %v366_v20  ;;  %v189_v30 = vmax.f32 %v171_v27, 0.0 }
 0x105   :  { %v180_v23 = vpop.f32.mrf.mxu0 }
 0x106   :  { %v192_v25 = vmax.f32 %v186_v22, 0.0  ;;  %v181_v26 = vadd.f32 %v366_v20, %v180_v23 }
 0x108   :  { %v191_v28 = vmax.f32 %v181_v26, 0.0  ;;  %417 = vmatpush3.msra.mxu0 %v192_v25 }
 0x109   :  { %418 = vmatprep.subr.mxu0 %v546_v10 }
 0x10a   :  { %419 = vmatpush3.msra.mxu0 %v191_v28 }
 0x10b   :  { %420 = vmatprep.subr.mxu0 %v546_v10 }
 0x10c   :  { %421 = vmatpush3.msra.mxu0 %v190_v29 }
 0x10d   :  { %422 = vmatprep.subr.mxu0 %v546_v10 }
 0x10e   :  { %423 = vmatpush3.msra.mxu0 %v189_v30 }
 0x10f   :  { %425 = vmatmul.mubr.msk.f32.vlgmr.msra.gmra.mxu0 %vm194_vm2, %v193_v31 }
 0x1cf   :  { %v264_v33 = vpop.f32.mrf.mxu0 }
 0x1d0   :  { %444 = vmatmul.mubr.msk.f32.vlgmr.msra.gmra.mxu1 %vm283_vm3, %v264_v33 }
 0x1d1   :  { %v426_v34 = vpop.f32.mrf.mxu0 }
 0x290   :  { %v353_v36 = vpop.f32.mrf.mxu1 }
 0x291   :  { %v354_v37 = vadd.f32 %v372_v35, %v353_v36 }
 0x292   :  { %v445_v38 = vpop.f32.mrf.mxu1 }
 0x293   :  { %358 = vst.msk [vmem:[%s623_s6] sm:$0x3] %vm357_vm4, %v354_v37 }
 0x294   :  { %363 = vsyncpa [#allocation3], 1 }
 0x295   :  { %364 = vsyncpa [#allocation5], 1 }
 0x296   :  { %365 = vsyncpa [#allocation8], 1 }

// kernel: _lambda_.9
= control target key start
LH: loop header
LB: loop body
LE: loop exit
PB: predicated region body
PF: predicated region fallthrough
CT: control target
= control target key end

     0   :  { %s2998_s21 = smov 0   ;;  %s3657_s0 = inlined_call_operand.vmem [shape: f32[6,64,64], index: 0, kind: input, shape index: {}]   ;;  %s3658_s1 = inlined_call_operand.vmem [shape: f32[6,1,64], index: 1, kind: input, shape index: {}]   ;;  %s3659_s2 = inlined_call_operand.vmem [shape: f32[6,64,64], index: 2, kind: input, shape index: {}]   ;;  %s3660_s3 = inlined_call_operand.vmem [shape: f32[6,1,64], index: 3, kind: input, shape index: {}]   ;;  %s3661_s4 = inlined_call_operand.vmem [shape: f32[6,1,64], index: 4, kind: input, shape index: {}]   ;;  %s3662_s5 = inlined_call_operand.vmem [shape: f32[6,1,64], index: 5, kind: input, shape index: {}]   ;;  %s3663_s6 = inlined_call_operand.vmem [shape: f32[6,64,2048], index: 6, kind: input, shape index: {}]   ;;  %s3664_s7 = inlined_call_operand.vmem [shape: f32[6,1,2048], index: 7, kind: input, shape index: {}]   ;;  %s3665_s8 = inlined_call_operand.vmem [shape: f32[6,2048,64], index: 8, kind: input, shape index: {}]   ;;  %s3666_s9 = inlined_call_operand.vmem [shape: f32[6,1,64], index: 9, kind: input, shape index: {}]   ;;  %s3667_s10 = inlined_call_operand.vmem [shape: f32[6,1,64], index: 10, kind: input, shape index: {}]   ;;  %s3668_s11 = inlined_call_operand.vmem [shape: f32[6,1,64], index: 11, kind: input, shape index: {}]   ;;  %s3669_s12 = inlined_call_operand.vmem [shape: f32[1,64], index: 12, kind: output, shape index: {}]  }
   0x1   :  { %3671 = sst [smem:[#allocation3_spill]] %s3657_s0 }
   0x2   :  { %3672 = sst [smem:[#allocation4_spill]] %s3658_s1 }
   0x3   :  { %3673 = sst [smem:[#allocation5_spill]] %s3659_s2 }
   0x4 LB: > { %3674 = sst [smem:[#allocation2_spill]] %s2928_s21  ;;  %s2541_s22 = sadd.s32 4294967295, %s2928_s21   ;;  %s2928_s21 = sphi %s2998_s21, %s22_s21  }
   0x5   : > { %p2544_p0 = scmp.ge.s32.totalorder %s2928_s21, 1  ;;  %p452_p1 = scmp.lt.s32.totalorder %s2928_s21, 7 }
   0x7   : > { %p453_p2 = pnand %p2544_p0, %p452_p1 }
   0x8   : > { %p529_p3 = scmp.lt.s32.totalorder (!%p453_p2), %s2541_s22, 5  ;;  %s3676_s0 = sld [smem:[#allocation3_spill]] (!%p453_p2) }
   0x9   : > { %456 = sbr.rel (%p453_p2) target bundleno = 1561 (0x619), region = 68  ;;  %s3677_s2 = sld [smem:[#allocation5_spill]] (!%p453_p2) }
   0xa   : > { %p2554_p4 = scmp.ne.s32.totalorder (!%p453_p2), %s2541_s22, 0 }
   0xe   : > { %s3006_s23 = scalar_select %p529_p3, %s2541_s22, 5 }
  0x10   : > { %s2567_s24 = sshll.u32 %s3006_s23, 6  ;;  %s2569_s28 = sshll.u32 %s3006_s23, 10 }
  0x11   : > { %s3016_s30 = scalar_lea.vmem %s3676_s0, %s2567_s24  ;;  %s3021_s15 = scalar_lea.vmem %s3677_s2, %s2567_s24 }
  0x12   : > { %s3039_s1 = scalar_lea.vmem %s3663_s6, %s2569_s28  ;;  %s2551_s24 = sshll.u32 %s3006_s23, 4 }
  0x13   : > { %s3045_s16 = scalar_lea.vmem %s3664_s7, %s2551_s24  ;;  %s2570_s17 = sshll.u32 %s3006_s23, 11 }
  0x14   : > { %s3051_s20 = scalar_lea.vmem %s3665_s8, %s2570_s17  ;;  %s567_s27 = scalar_lea.vmem %s3666_s9, %s3006_s23 }
  0x15   : > { %s570_s28 = scalar_lea.vmem %s3667_s10, %s3006_s23  ;;  %s573_s13 = scalar_lea.vmem %s3668_s11, %s3006_s23 }
  0x16   : > { %577 = sbr.rel (%p2554_p4) target bundleno = 29 (0x1d), region = 72 }
  0x1b   : > { %vm578_vm0 = vcmask 516096   ;;  %v2930_v0 = vmov 0.0  }
  0x1c   : > { %579 = vst.msk [vmem:[%s3669_s12] sm:$0x1] %vm578_vm0, %v2930_v0 }
  0x1d PF: > { %v588_v1 = vld [vmem:[%s3016_s30 + $0x38] sm:$0xff]  ;;  %v2931_v2 = vmov 0.0   ;;  %v587_v3 = vld [vmem:[%s3016_s30 + $0x30] sm:$0xff]  ;;  %vm2932_vm1 = vmmov 0   ;;  %v586_v4 = vld [vmem:[%s3016_s30 + $0x28] sm:$0xff]  ;;  %vm590_vm2 = vcmask 523264   ;;  %s3680_s26 = scalar_lea.vmem %s3660_s3, %s3006_s23  ;;  %s3681_s29 = scalar_lea.vmem %s3661_s4, %s3006_s23 }
  0x1e   : > { %2869 = vmatprep.subr.mxu0 %v2931_v2  ;;  %2885 = vmatprep.mubr.msk.f32.mxu0 %vm2932_vm1, %v2931_v2  ;;  %v671_v5 = vld [vmem:[%s3021_s15 + $0x38] sm:$0xff]  ;;  %v670_v6 = vld [vmem:[%s3021_s15 + $0x30] sm:$0xff]  ;;  %v585_v7 = vld [vmem:[%s3016_s30 + $0x20] sm:$0xff]  ;;  %s3678_s14 = sld [smem:[#allocation4_spill]]  ;;  %vm749_vm3 = vcmask 516096   ;;  %s3682_s2 = scalar_lea.vmem %s3662_s5, %s3006_s23 }
  0x1f   : > { %2870 = vmatpush3.msra.mxu0 %v588_v1  ;;  %2888 = vmatprep.subr.mxu1 %v2931_v2  ;;  %v669_v8 = vld [vmem:[%s3021_s15 + $0x28] sm:$0xff]  ;;  %v584_v9 = vld [vmem:[%s3016_s30 + $0x18] sm:$0xff]  ;;  %v668_v10 = vld [vmem:[%s3021_s15 + $0x20] sm:$0xff] }
  0x20   : > { %2871 = vmatprep.subr.mxu0 %v2931_v2  ;;  %2904 = vmatprep.mubr.msk.f32.mxu1 %vm2932_vm1, %v2931_v2  ;;  %v583_v11 = vld [vmem:[%s3016_s30 + $0x10] sm:$0xff]  ;;  %v667_v12 = vld [vmem:[%s3021_s15 + $0x18] sm:$0xff]  ;;  %v582_v13 = vld [vmem:[%s3016_s30 + $0x8] sm:$0xff] }
  0x21   : > { %2872 = vmatpush3.msra.mxu0 %v587_v3  ;;  %2889 = vmatpush3.msra.mxu1 %v671_v5  ;;  %v666_v14 = vld [vmem:[%s3021_s15 + $0x10] sm:$0xff]  ;;  %v581_v15 = vld [vmem:[%s3016_s30] sm:$0xff]  ;;  %v665_v17 = vld [vmem:[%s3021_s15 + $0x8] sm:$0xff] }
  0x22   : > { %2873 = vmatprep.subr.mxu0 %v2931_v2  ;;  %2890 = vmatprep.subr.mxu1 %v2931_v2  ;;  %v664_v18 = vld [vmem:[%s3021_s15] sm:$0xff]  ;;  %v879_v34 = vld [vmem:[%s3039_s1 + $0x388] sm:$0xff]  ;;  %v881_v35 = vld [vmem:[%s3039_s1 + $0x398] sm:$0xff] }
  0x23   : > { %2874 = vmatpush3.msra.mxu0 %v586_v4  ;;  %2891 = vmatpush3.msra.mxu1 %v670_v6  ;;  %v580_v16 = vld [vmem:[%s3669_s12] sm:$0x1]  ;;  %v880_v37 = vld [vmem:[%s3039_s1 + $0x390] sm:$0xff]  ;;  %v863_v38 = vld [vmem:[%s3039_s1 + $0x308] sm:$0xff] }
  0x24   : > { %2875 = vmatprep.subr.mxu0 %v2931_v2  ;;  %2892 = vmatprep.subr.mxu1 %v2931_v2  ;;  %s3679_s17 = scalar_lea.vmem %s3678_s14, %s3006_s23  ;;  %v672_v23 = vld [vmem:[%s3680_s26] sm:$0x1]  ;;  %v865_v39 = vld [vmem:[%s3039_s1 + $0x318] sm:$0xff]  ;;  %v864_v41 = vld [vmem:[%s3039_s1 + $0x310] sm:$0xff] }
  0x25   : > { %2876 = vmatpush3.msra.mxu0 %v585_v7  ;;  %2893 = vmatpush3.msra.mxu1 %v669_v8  ;;  %v589_v19 = vld [vmem:[%s3679_s17] sm:$0x1]  ;;  %v847_v42 = vld [vmem:[%s3039_s1 + $0x288] sm:$0xff]  ;;  %v849_v43 = vld [vmem:[%s3039_s1 + $0x298] sm:$0xff] }
  0x26   : > { %2877 = vmatprep.subr.mxu0 %v2931_v2  ;;  %2894 = vmatprep.subr.mxu1 %v2931_v2  ;;  %v878_v36 = vld [vmem:[%s3039_s1 + $0x380] sm:$0xff]  ;;  %v848_v45 = vld [vmem:[%s3039_s1 + $0x290] sm:$0xff]  ;;  %v831_v46 = vld [vmem:[%s3039_s1 + $0x208] sm:$0xff] }
  0x27   : > { %2878 = vmatpush3.msra.mxu0 %v584_v9  ;;  %2895 = vmatpush3.msra.mxu1 %v668_v10  ;;  %v862_v40 = vld [vmem:[%s3039_s1 + $0x300] sm:$0xff]  ;;  %v833_v47 = vld [vmem:[%s3039_s1 + $0x218] sm:$0xff]  ;;  %v832_v49 = vld [vmem:[%s3039_s1 + $0x210] sm:$0xff] }
  0x28   : > { %2879 = vmatprep.subr.mxu0 %v2931_v2  ;;  %2896 = vmatprep.subr.mxu1 %v2931_v2  ;;  %v846_v44 = vld [vmem:[%s3039_s1 + $0x280] sm:$0xff]  ;;  %v815_v50 = vld [vmem:[%s3039_s1 + $0x188] sm:$0xff]  ;;  %v817_v51 = vld [vmem:[%s3039_s1 + $0x198] sm:$0xff] }
  0x29   : > { %2880 = vmatpush3.msra.mxu0 %v583_v11  ;;  %2897 = vmatpush3.msra.mxu1 %v667_v12  ;;  %v830_v48 = vld [vmem:[%s3039_s1 + $0x200] sm:$0xff]  ;;  %v816_v53 = vld [vmem:[%s3039_s1 + $0x190] sm:$0xff]  ;;  %v799_v54 = vld [vmem:[%s3039_s1 + $0x108] sm:$0xff] }
  0x2a   : > { %2881 = vmatprep.subr.mxu0 %v2931_v2  ;;  %2898 = vmatprep.subr.mxu1 %v2931_v2  ;;  %v814_v52 = vld [vmem:[%s3039_s1 + $0x180] sm:$0xff]  ;;  %v801_v55 = vld [vmem:[%s3039_s1 + $0x118] sm:$0xff]  ;;  %v800_v57 = vld [vmem:[%s3039_s1 + $0x110] sm:$0xff] }
  0x2b   : > { %2882 = vmatpush3.msra.mxu0 %v582_v13  ;;  %2899 = vmatpush3.msra.mxu1 %v666_v14  ;;  %v798_v56 = vld [vmem:[%s3039_s1 + $0x100] sm:$0xff]  ;;  %v783_v58 = vld [vmem:[%s3039_s1 + $0x88] sm:$0xff]  ;;  %v785_v59 = vld [vmem:[%s3039_s1 + $0x98] sm:$0xff] }
  0x2c   : > { %2883 = vmatprep.subr.mxu0 %v2931_v2  ;;  %2900 = vmatprep.subr.mxu1 %v2931_v2  ;;  %v782_v60 = vld [vmem:[%s3039_s1 + $0x80] sm:$0xff]  ;;  %v784_v61 = vld [vmem:[%s3039_s1 + $0x90] sm:$0xff]  ;;  %v767_v62 = vld [vmem:[%s3039_s1 + $0x8] sm:$0xff] }
  0x2d   : > { %2884 = vmatpush3.msra.mxu0 %v581_v15  ;;  %2901 = vmatpush3.msra.mxu1 %v665_v17  ;;  %v769_v63 = vld [vmem:[%s3039_s1 + $0x18] sm:$0xff]  ;;  %v766_v0 = vld [vmem:[%s3039_s1] sm:$0xff]  ;;  %v768_v1 = vld [vmem:[%s3039_s1 + $0x10] sm:$0xff] }
  0x2e   : > { %2886 = vmatmul.mubr.msk.f32.vlgmr.msra.gmra.mxu0 %vm590_vm2, %v580_v16  ;;  %2902 = vmatprep.subr.mxu1 %v2931_v2  ;;  %v883_v3 = vld [vmem:[%s3039_s1 + $0x3a8] sm:$0xff]  ;;  %v885_v4 = vld [vmem:[%s3039_s1 + $0x3b8] sm:$0xff]  ;;  %v747_v9 = vld [vmem:[%s3681_s29] sm:$0x1] }
  0x2f   : > { %1045 = vmatprep.mubr.f32.mxu0 %v2931_v2  ;;  %2903 = vmatpush3.msra.mxu1 %v664_v18  ;;  %v748_v11 = vld [vmem:[%s3682_s2] sm:$0x1]  ;;  %v884_v15 = vld [vmem:[%s3039_s1 + $0x3b0] sm:$0xff]  ;;  %v869_v17 = vld [vmem:[%s3039_s1 + $0x338] sm:$0xff] }
  0x30   : > { %997 = vmatprep.subr.mxu0 %v879_v34  ;;  %1068 = vmatprep.subr.mxu1 %v881_v35  ;;  %v882_v14 = vld [vmem:[%s3039_s1 + $0x3a0] sm:$0xff]  ;;  %v804_v35 = vld [vmem:[%s3039_s1 + $0x130] sm:$0xff] }
  0x31   : > { %998 = vmatpush1.msra.mxu0 %v878_v36  ;;  %v866_v18 = vld [vmem:[%s3039_s1 + $0x320] sm:$0xff]  ;;  %v787_v36 = vld [vmem:[%s3039_s1 + $0xa8] sm:$0xff] }
  0x32   : > { %999 = vmatprep.subr.mxu0 %v863_v38  ;;  %v802_v34 = vld [vmem:[%s3039_s1 + $0x120] sm:$0xff] }
  0x33   : > { %1000 = vmatpush1.msra.mxu0 %v862_v40  ;;  %v786_v38 = vld [vmem:[%s3039_s1 + $0xa0] sm:$0xff]  ;;  %v771_v40 = vld [vmem:[%s3039_s1 + $0x28] sm:$0xff] }
  0x34   : > { %1001 = vmatprep.subr.mxu0 %v847_v42  ;;  %v770_v42 = vld [vmem:[%s3039_s1 + $0x20] sm:$0xff] }
  0x35   : > { %1002 = vmatpush1.msra.mxu0 %v846_v44  ;;  %v887_v44 = vld [vmem:[%s3039_s1 + $0x3c8] sm:$0xff] }
  0x36   : > { %1003 = vmatprep.subr.mxu0 %v831_v46  ;;  %v886_v46 = vld [vmem:[%s3039_s1 + $0x3c0] sm:$0xff] }
  0x37   : > { %1004 = vmatpush1.msra.mxu0 %v830_v48  ;;  %v871_v48 = vld [vmem:[%s3039_s1 + $0x348] sm:$0xff] }
  0x38   : > { %1005 = vmatprep.subr.mxu0 %v815_v50  ;;  %v870_v50 = vld [vmem:[%s3039_s1 + $0x340] sm:$0xff] }
  0x39   : > { %1006 = vmatpush1.msra.mxu0 %v814_v52  ;;  %v855_v52 = vld [vmem:[%s3039_s1 + $0x2c8] sm:$0xff] }
  0x3a   : > { %1007 = vmatprep.subr.mxu0 %v799_v54  ;;  %v854_v54 = vld [vmem:[%s3039_s1 + $0x2c0] sm:$0xff] }
  0x3b   : > { %1008 = vmatpush1.msra.mxu0 %v798_v56  ;;  %v839_v56 = vld [vmem:[%s3039_s1 + $0x248] sm:$0xff] }
  0x3c   : > { %1009 = vmatprep.subr.mxu0 %v783_v58  ;;  %v838_v58 = vld [vmem:[%s3039_s1 + $0x240] sm:$0xff] }
  0x3d   : > { %1010 = vmatpush1.msra.mxu0 %v782_v60  ;;  %v823_v60 = vld [vmem:[%s3039_s1 + $0x1c8] sm:$0xff] }
  0x3e   : > { %1011 = vmatprep.subr.mxu0 %v767_v62  ;;  %v822_v62 = vld [vmem:[%s3039_s1 + $0x1c0] sm:$0xff] }
  0x3f   : > { %1012 = vmatpush1.msra.mxu0 %v766_v0  ;;  %v807_v0 = vld [vmem:[%s3039_s1 + $0x148] sm:$0xff] }
  0x40   : > { %1139 = vmatprep.subr.mxu0 %v883_v3  ;;  %v806_v3 = vld [vmem:[%s3039_s1 + $0x140] sm:$0xff] }
  0xee   : > { %v660_v20 = vpop.f32.mrf.mxu0 }
  0xef   : > { %v661_v21 = vadd.f32 %v660_v20, %v589_v19  ;;  %v868_v19 = vld [vmem:[%s3039_s1 + $0x330] sm:$0xff]  ;;  %v851_v20 = vld [vmem:[%s3039_s1 + $0x2a8] sm:$0xff] }
  0xf0   : > { %v2887_v22 = vpop.f32.mrf.mxu0 }
  0xf1   : > { %2905 = vmatmul.mubr.msk.f32.vlgmr.msra.gmra.mxu1 %vm590_vm2, %v661_v21  ;;  %v853_v21 = vld [vmem:[%s3039_s1 + $0x2b8] sm:$0xff]  ;;  %v850_v22 = vld [vmem:[%s3039_s1 + $0x2a0] sm:$0xff] }
  0xf2   : > { %1116 = vmatprep.mubr.f32.mxu1 %v2931_v2  ;;  %1069 = vmatpush1.msra.mxu1 %v880_v37  ;;  %v789_v37 = vld [vmem:[%s3039_s1 + $0xb8] sm:$0xff] }
  0xf3   : > { %1070 = vmatprep.subr.mxu1 %v865_v39  ;;  %v788_v39 = vld [vmem:[%s3039_s1 + $0xb0] sm:$0xff] }
  0xf4   : > { %1071 = vmatpush1.msra.mxu1 %v864_v41  ;;  %v773_v41 = vld [vmem:[%s3039_s1 + $0x38] sm:$0xff] }
  0xf5   : > { %1072 = vmatprep.subr.mxu1 %v849_v43  ;;  %v772_v43 = vld [vmem:[%s3039_s1 + $0x30] sm:$0xff] }
  0xf6   : > { %1073 = vmatpush1.msra.mxu1 %v848_v45  ;;  %v889_v45 = vld [vmem:[%s3039_s1 + $0x3d8] sm:$0xff] }
  0xf7   : > { %1074 = vmatprep.subr.mxu1 %v833_v47  ;;  %v888_v47 = vld [vmem:[%s3039_s1 + $0x3d0] sm:$0xff] }
  0xf8   : > { %1075 = vmatpush1.msra.mxu1 %v832_v49  ;;  %v873_v49 = vld [vmem:[%s3039_s1 + $0x358] sm:$0xff] }
  0xf9   : > { %1076 = vmatprep.subr.mxu1 %v817_v51  ;;  %v872_v51 = vld [vmem:[%s3039_s1 + $0x350] sm:$0xff] }
  0xfa   : > { %1077 = vmatpush1.msra.mxu1 %v816_v53  ;;  %v857_v53 = vld [vmem:[%s3039_s1 + $0x2d8] sm:$0xff] }
  0xfb   : > { %1078 = vmatprep.subr.mxu1 %v801_v55  ;;  %v856_v55 = vld [vmem:[%s3039_s1 + $0x2d0] sm:$0xff] }
  0xfc   : > { %1079 = vmatpush1.msra.mxu1 %v800_v57  ;;  %v841_v57 = vld [vmem:[%s3039_s1 + $0x258] sm:$0xff] }
  0xfd   : > { %1080 = vmatprep.subr.mxu1 %v785_v59  ;;  %v840_v59 = vld [vmem:[%s3039_s1 + $0x250] sm:$0xff] }
  0xfe   : > { %1081 = vmatpush1.msra.mxu1 %v784_v61  ;;  %v825_v61 = vld [vmem:[%s3039_s1 + $0x1d8] sm:$0xff] }
  0xff   : > { %1082 = vmatprep.subr.mxu1 %v769_v63  ;;  %v824_v63 = vld [vmem:[%s3039_s1 + $0x1d0] sm:$0xff] }
 0x100   : > { %1083 = vmatpush1.msra.mxu1 %v768_v1  ;;  %v809_v1 = vld [vmem:[%s3039_s1 + $0x158] sm:$0xff] }
 0x101   : > { %1210 = vmatprep.subr.mxu1 %v885_v4  ;;  %v808_v4 = vld [vmem:[%s3039_s1 + $0x150] sm:$0xff] }
 0x1b1   : > { %v742_v24 = vpop.f32.mrf.mxu1 }
 0x1b2   : > { %v743_v25 = vadd.f32 %v742_v24, %v672_v23  ;;  %v852_v23 = vld [vmem:[%s3039_s1 + $0x2b0] sm:$0xff]  ;;  %v835_v24 = vld [vmem:[%s3039_s1 + $0x228] sm:$0xff] }
 0x1b3   : > { %v2906_v26 = vpop.f32.mrf.mxu1 }
 0x1b4   : > { %v746_v27 = vadd.f32 %v743_v25, %v580_v16  ;;  %v867_v16 = vld [vmem:[%s3039_s1 + $0x328] sm:$0xff]  ;;  %v837_v25 = vld [vmem:[%s3039_s1 + $0x238] sm:$0xff]  ;;  %v834_v26 = vld [vmem:[%s3039_s1 + $0x220] sm:$0xff] }
 0x1b6   : > { %v750_v28 = vsel %vm749_vm3, %v746_v27, 0.0 }
 0x1b7   : > { %751 = vadd.xlane.f32.xlu0 %v750_v28  ;;  %v819_v28 = vld [vmem:[%s3039_s1 + $0x1a8] sm:$0xff] }
 0x240   : > { %v752_v29 = vpop.xlane.xlu0 %751 }
 0x241   : > { %v754_v30 = vmul.f32 0.015625, %v752_v29  ;;  %v821_v29 = vld [vmem:[%s3039_s1 + $0x1b8] sm:$0xff] }
 0x243   : > { %v3120_v31 = vsub.f32 %v746_v27, %v754_v30  ;;  %v836_v27 = vld [vmem:[%s3039_s1 + $0x230] sm:$0xff]  ;;  %v818_v30 = vld [vmem:[%s3039_s1 + $0x1a0] sm:$0xff] }
 0x245   : > { %v756_v32 = vmul.f32 %v3120_v31, %v3120_v31 }
 0x247   : > { %v757_v33 = vsel %vm749_vm3, %v756_v32, 0.0  ;;  %v803_v32 = vld [vmem:[%s3039_s1 + $0x128] sm:$0xff] }
 0x248   : > { %758 = vadd.xlane.f32.xlu0 %v757_v33  ;;  %v805_v33 = vld [vmem:[%s3039_s1 + $0x138] sm:$0xff] }
 0x2d1   : > { %v759_v5 = vpop.xlane.xlu0 %758 }
 0x2d2   : > { %v760_v6 = vmul.f32 0.015625, %v759_v5  ;;  %v791_v5 = vld [vmem:[%s3039_s1 + $0xc8] sm:$0xff] }
 0x2d4   : > { %v761_v7 = vadd.f32 1e-05, %v760_v6  ;;  %v793_v6 = vld [vmem:[%s3039_s1 + $0xd8] sm:$0xff] }
 0x2d6   : > { %2918 = vrsqrt.f32 %v761_v7  ;;  %v790_v7 = vld [vmem:[%s3039_s1 + $0xc0] sm:$0xff] }
 0x2e3   : > { %v2919_v8 = vpop.eup %2918 }
 0x2e4   : > { %v763_v10 = vmul.f32 %v2919_v8, %v3120_v31  ;;  %v820_v31 = vld [vmem:[%s3039_s1 + $0x1b0] sm:$0xff] }
 0x2e5   : > { %v792_v8 = vld [vmem:[%s3039_s1 + $0xd0] sm:$0xff] }
 0x2e6   : > { %v764_v12 = vmul.f32 %v763_v10, %v747_v9  ;;  %v775_v9 = vld [vmem:[%s3039_s1 + $0x48] sm:$0xff]  ;;  %v777_v10 = vld [vmem:[%s3039_s1 + $0x58] sm:$0xff] }
 0x2e8   : > { %v3170_v13 = vadd.f32 %v764_v12, %v748_v11  ;;  %v774_v11 = vld [vmem:[%s3039_s1 + $0x40] sm:$0xff]  ;;  %v776_v12 = vld [vmem:[%s3039_s1 + $0x50] sm:$0xff] }
 0x2ea   : > { %2557 = vmatmul.mubr.msk.f32.vlgmr.msra.gmra.mxu0 %vm590_vm2, %v3170_v13  ;;  %2558 = vmatmul.mubr.msk.f32.vlgmr.msra.gmra.mxu1 %vm590_vm2, %v3170_v13 }
 0x2eb   : > { %1140 = vmatpush1.msra.mxu0 %v882_v14  ;;  %1211 = vmatpush1.msra.mxu1 %v884_v15  ;;  %v891_v14 = vld [vmem:[%s3039_s1 + $0x3e8] sm:$0xff]  ;;  %v893_v15 = vld [vmem:[%s3039_s1 + $0x3f8] sm:$0xff] }
 0x2ec   : > { %1141 = vmatprep.subr.mxu0 %v867_v16  ;;  %1212 = vmatprep.subr.mxu1 %v869_v17  ;;  %v890_v16 = vld [vmem:[%s3039_s1 + $0x3e0] sm:$0xff]  ;;  %v892_v17 = vld [vmem:[%s3039_s1 + $0x3f0] sm:$0xff] }
 0x2ed   : > { %1142 = vmatpush1.msra.mxu0 %v866_v18  ;;  %1213 = vmatpush1.msra.mxu1 %v868_v19  ;;  %v875_v18 = vld [vmem:[%s3039_s1 + $0x368] sm:$0xff]  ;;  %v877_v19 = vld [vmem:[%s3039_s1 + $0x378] sm:$0xff] }
 0x2ee   : > { %1143 = vmatprep.subr.mxu0 %v851_v20  ;;  %1214 = vmatprep.subr.mxu1 %v853_v21  ;;  %v874_v20 = vld [vmem:[%s3039_s1 + $0x360] sm:$0xff]  ;;  %v876_v21 = vld [vmem:[%s3039_s1 + $0x370] sm:$0xff] }
 0x2ef   : > { %1144 = vmatpush1.msra.mxu0 %v850_v22  ;;  %1215 = vmatpush1.msra.mxu1 %v852_v23  ;;  %v859_v22 = vld [vmem:[%s3039_s1 + $0x2e8] sm:$0xff]  ;;  %v861_v23 = vld [vmem:[%s3039_s1 + $0x2f8] sm:$0xff] }
 0x2f0   : > { %1145 = vmatprep.subr.mxu0 %v835_v24  ;;  %1216 = vmatprep.subr.mxu1 %v837_v25  ;;  %v858_v24 = vld [vmem:[%s3039_s1 + $0x2e0] sm:$0xff]  ;;  %v860_v25 = vld [vmem:[%s3039_s1 + $0x2f0] sm:$0xff] }
 0x2f1   : > { %1146 = vmatpush1.msra.mxu0 %v834_v26  ;;  %1217 = vmatpush1.msra.mxu1 %v836_v27  ;;  %v843_v26 = vld [vmem:[%s3039_s1 + $0x268] sm:$0xff]  ;;  %v845_v27 = vld [vmem:[%s3039_s1 + $0x278] sm:$0xff] }
 0x2f2   : > { %1147 = vmatprep.subr.mxu0 %v819_v28  ;;  %1218 = vmatprep.subr.mxu1 %v821_v29  ;;  %v842_v28 = vld [vmem:[%s3039_s1 + $0x260] sm:$0xff]  ;;  %v844_v29 = vld [vmem:[%s3039_s1 + $0x270] sm:$0xff] }
 0x2f3   : > { %1148 = vmatpush1.msra.mxu0 %v818_v30  ;;  %1219 = vmatpush1.msra.mxu1 %v820_v31  ;;  %v827_v30 = vld [vmem:[%s3039_s1 + $0x1e8] sm:$0xff]  ;;  %v829_v31 = vld [vmem:[%s3039_s1 + $0x1f8] sm:$0xff] }
 0x2f4   : > { %1149 = vmatprep.subr.mxu0 %v803_v32  ;;  %1220 = vmatprep.subr.mxu1 %v805_v33  ;;  %v826_v32 = vld [vmem:[%s3039_s1 + $0x1e0] sm:$0xff]  ;;  %v828_v33 = vld [vmem:[%s3039_s1 + $0x1f0] sm:$0xff] }
 0x2f5   : > { %1150 = vmatpush1.msra.mxu0 %v802_v34  ;;  %1221 = vmatpush1.msra.mxu1 %v804_v35  ;;  %v811_v34 = vld [vmem:[%s3039_s1 + $0x168] sm:$0xff]  ;;  %v813_v35 = vld [vmem:[%s3039_s1 + $0x178] sm:$0xff] }
 0x2f6   : > { %1151 = vmatprep.subr.mxu0 %v787_v36  ;;  %1222 = vmatprep.subr.mxu1 %v789_v37  ;;  %v810_v36 = vld [vmem:[%s3039_s1 + $0x160] sm:$0xff]  ;;  %v812_v37 = vld [vmem:[%s3039_s1 + $0x170] sm:$0xff] }
 0x2f7   : > { %1152 = vmatpush1.msra.mxu0 %v786_v38  ;;  %1223 = vmatpush1.msra.mxu1 %v788_v39  ;;  %v795_v38 = vld [vmem:[%s3039_s1 + $0xe8] sm:$0xff]  ;;  %v797_v39 = vld [vmem:[%s3039_s1 + $0xf8] sm:$0xff] }
 0x2f8   : > { %1153 = vmatprep.subr.mxu0 %v771_v40  ;;  %1224 = vmatprep.subr.mxu1 %v773_v41  ;;  %v794_v40 = vld [vmem:[%s3039_s1 + $0xe0] sm:$0xff]  ;;  %v796_v41 = vld [vmem:[%s3039_s1 + $0xf0] sm:$0xff] }
 0x2f9   : > { %1154 = vmatpush1.msra.mxu0 %v770_v42  ;;  %1187 = vmatprep.mubr.f32.mxu0 %v2931_v2  ;;  %v779_v42 = vld [vmem:[%s3039_s1 + $0x68] sm:$0xff] }
 0x2fa   : > { %1225 = vmatpush1.msra.mxu1 %v772_v43  ;;  %1258 = vmatprep.mubr.f32.mxu1 %v2931_v2  ;;  %v781_v43 = vld [vmem:[%s3039_s1 + $0x78] sm:$0xff] }
 0x2fb   : > { %2559 = vmatmul.mubr.msk.f32.vlgmr.msra.gmra.mxu0 %vm590_vm2, %v3170_v13  ;;  %2560 = vmatmul.mubr.msk.f32.vlgmr.msra.gmra.mxu1 %vm590_vm2, %v3170_v13 }
 0x2fc   : > { %1281 = vmatprep.subr.mxu0 %v887_v44  ;;  %1352 = vmatprep.subr.mxu1 %v889_v45  ;;  %v778_v44 = vld [vmem:[%s3039_s1 + $0x60] sm:$0xff]  ;;  %v780_v45 = vld [vmem:[%s3039_s1 + $0x70] sm:$0xff] }
 0x2fd   : > { %1282 = vmatpush1.msra.mxu0 %v886_v46  ;;  %1353 = vmatpush1.msra.mxu1 %v888_v47  ;;  %v1596_v46 = vld [vmem:[%s3051_s20 + $0xf8] sm:$0xff] }
 0x2fe   : > { %1283 = vmatprep.subr.mxu0 %v871_v48  ;;  %1354 = vmatprep.subr.mxu1 %v873_v49  ;;  %v1628_v47 = vld [vmem:[%s3051_s20 + $0x1f8] sm:$0xff] }
 0x2ff   : > { %1284 = vmatpush1.msra.mxu0 %v870_v50  ;;  %1355 = vmatpush1.msra.mxu1 %v872_v51  ;;  %v1580_v48 = vld [vmem:[%s3051_s20 + $0x78] sm:$0xff]  ;;  %v1595_v50 = vld [vmem:[%s3051_s20 + $0xf0] sm:$0xff] }
 0x300   : > { %1285 = vmatprep.subr.mxu0 %v855_v52  ;;  %1356 = vmatprep.subr.mxu1 %v857_v53  ;;  %v1612_v49 = vld [vmem:[%s3051_s20 + $0x178] sm:$0xff]  ;;  %v1627_v51 = vld [vmem:[%s3051_s20 + $0x1f0] sm:$0xff] }
 0x301   : > { %1286 = vmatpush1.msra.mxu0 %v854_v54  ;;  %1357 = vmatpush1.msra.mxu1 %v856_v55  ;;  %v1579_v52 = vld [vmem:[%s3051_s20 + $0x70] sm:$0xff]  ;;  %v1626_v54 = vld [vmem:[%s3051_s20 + $0x1e8] sm:$0xff] }
 0x302   : > { %1287 = vmatprep.subr.mxu0 %v839_v56  ;;  %1358 = vmatprep.subr.mxu1 %v841_v57  ;;  %v1611_v53 = vld [vmem:[%s3051_s20 + $0x170] sm:$0xff]  ;;  %v1578_v55 = vld [vmem:[%s3051_s20 + $0x68] sm:$0xff]  ;;  %v1593_v57 = vld [vmem:[%s3051_s20 + $0xe0] sm:$0xff] }
 0x303   : > { %1288 = vmatpush1.msra.mxu0 %v838_v58  ;;  %1359 = vmatpush1.msra.mxu1 %v840_v59  ;;  %v1610_v56 = vld [vmem:[%s3051_s20 + $0x168] sm:$0xff]  ;;  %v1625_v58 = vld [vmem:[%s3051_s20 + $0x1e0] sm:$0xff] }
 0x304   : > { %1289 = vmatprep.subr.mxu0 %v823_v60  ;;  %1360 = vmatprep.subr.mxu1 %v825_v61  ;;  %v1577_v59 = vld [vmem:[%s3051_s20 + $0x60] sm:$0xff]  ;;  %v1592_v61 = vld [vmem:[%s3051_s20 + $0xd8] sm:$0xff] }
 0x305   : > { %1290 = vmatpush1.msra.mxu0 %v822_v62  ;;  %1361 = vmatpush1.msra.mxu1 %v824_v63  ;;  %v1609_v60 = vld [vmem:[%s3051_s20 + $0x160] sm:$0xff]  ;;  %v1624_v62 = vld [vmem:[%s3051_s20 + $0x1d8] sm:$0xff] }
 0x306   : > { %1291 = vmatprep.subr.mxu0 %v807_v0  ;;  %1362 = vmatprep.subr.mxu1 %v809_v1  ;;  %v1576_v63 = vld [vmem:[%s3051_s20 + $0x58] sm:$0xff]  ;;  %v1591_v1 = vld [vmem:[%s3051_s20 + $0xd0] sm:$0xff] }
 0x307   : > { %1292 = vmatpush1.msra.mxu0 %v806_v3  ;;  %1363 = vmatpush1.msra.mxu1 %v808_v4  ;;  %v1608_v0 = vld [vmem:[%s3051_s20 + $0x158] sm:$0xff]  ;;  %v1623_v3 = vld [vmem:[%s3051_s20 + $0x1d0] sm:$0xff] }
 0x308   : > { %1293 = vmatprep.subr.mxu0 %v791_v5  ;;  %1364 = vmatprep.subr.mxu1 %v793_v6  ;;  %v1575_v4 = vld [vmem:[%s3051_s20 + $0x50] sm:$0xff]  ;;  %v1590_v6 = vld [vmem:[%s3051_s20 + $0xc8] sm:$0xff] }
 0x309   : > { %1294 = vmatpush1.msra.mxu0 %v790_v7  ;;  %1365 = vmatpush1.msra.mxu1 %v792_v8  ;;  %v1607_v5 = vld [vmem:[%s3051_s20 + $0x150] sm:$0xff]  ;;  %v1622_v7 = vld [vmem:[%s3051_s20 + $0x1c8] sm:$0xff] }
 0x30a   : > { %1295 = vmatprep.subr.mxu0 %v775_v9  ;;  %1366 = vmatprep.subr.mxu1 %v777_v10  ;;  %v1574_v8 = vld [vmem:[%s3051_s20 + $0x48] sm:$0xff]  ;;  %v1589_v10 = vld [vmem:[%s3051_s20 + $0xc0] sm:$0xff] }
 0x30b   : > { %1296 = vmatpush1.msra.mxu0 %v774_v11  ;;  %1329 = vmatprep.mubr.f32.mxu0 %v2931_v2  ;;  %v1606_v9 = vld [vmem:[%s3051_s20 + $0x148] sm:$0xff]  ;;  %v1621_v11 = vld [vmem:[%s3051_s20 + $0x1c0] sm:$0xff] }
 0x30c   : > { %1367 = vmatpush1.msra.mxu1 %v776_v12  ;;  %1400 = vmatprep.mubr.f32.mxu1 %v2931_v2  ;;  %v1573_v12 = vld [vmem:[%s3051_s20 + $0x40] sm:$0xff] }
 0x30d   : > { %2561 = vmatmul.mubr.msk.f32.vlgmr.msra.gmra.mxu0 %vm590_vm2, %v3170_v13  ;;  %2562 = vmatmul.mubr.msk.f32.vlgmr.msra.gmra.mxu1 %vm590_vm2, %v3170_v13 }
 0x30e   : > { %1423 = vmatprep.subr.mxu0 %v891_v14  ;;  %1494 = vmatprep.subr.mxu1 %v893_v15  ;;  %v1605_v14 = vld [vmem:[%s3051_s20 + $0x140] sm:$0xff]  ;;  %v1588_v15 = vld [vmem:[%s3051_s20 + $0xb8] sm:$0xff] }
 0x30f   : > { %1424 = vmatpush1.msra.mxu0 %v890_v16  ;;  %1495 = vmatpush1.msra.mxu1 %v892_v17  ;;  %v1620_v16 = vld [vmem:[%s3051_s20 + $0x1b8] sm:$0xff] }
 0x310   : > { %1425 = vmatprep.subr.mxu0 %v875_v18  ;;  %1496 = vmatprep.subr.mxu1 %v877_v19  ;;  %v1572_v17 = vld [vmem:[%s3051_s20 + $0x38] sm:$0xff]  ;;  %v1587_v19 = vld [vmem:[%s3051_s20 + $0xb0] sm:$0xff] }
 0x311   : > { %1426 = vmatpush1.msra.mxu0 %v874_v20  ;;  %1497 = vmatpush1.msra.mxu1 %v876_v21  ;;  %v1604_v18 = vld [vmem:[%s3051_s20 + $0x138] sm:$0xff]  ;;  %v1619_v20 = vld [vmem:[%s3051_s20 + $0x1b0] sm:$0xff] }
 0x312   : > { %1427 = vmatprep.subr.mxu0 %v859_v22  ;;  %1498 = vmatprep.subr.mxu1 %v861_v23  ;;  %v1571_v21 = vld [vmem:[%s3051_s20 + $0x30] sm:$0xff]  ;;  %v1586_v23 = vld [vmem:[%s3051_s20 + $0xa8] sm:$0xff] }
 0x313   : > { %1428 = vmatpush1.msra.mxu0 %v858_v24  ;;  %1499 = vmatpush1.msra.mxu1 %v860_v25  ;;  %v1603_v22 = vld [vmem:[%s3051_s20 + $0x130] sm:$0xff]  ;;  %v1618_v24 = vld [vmem:[%s3051_s20 + $0x1a8] sm:$0xff] }
 0x314   : > { %1429 = vmatprep.subr.mxu0 %v843_v26  ;;  %1500 = vmatprep.subr.mxu1 %v845_v27  ;;  %v1570_v25 = vld [vmem:[%s3051_s20 + $0x28] sm:$0xff]  ;;  %v1585_v27 = vld [vmem:[%s3051_s20 + $0xa0] sm:$0xff] }
 0x315   : > { %1430 = vmatpush1.msra.mxu0 %v842_v28  ;;  %1501 = vmatpush1.msra.mxu1 %v844_v29  ;;  %v1602_v26 = vld [vmem:[%s3051_s20 + $0x128] sm:$0xff]  ;;  %v1617_v28 = vld [vmem:[%s3051_s20 + $0x1a0] sm:$0xff] }
 0x316   : > { %1431 = vmatprep.subr.mxu0 %v827_v30  ;;  %1502 = vmatprep.subr.mxu1 %v829_v31  ;;  %v1569_v29 = vld [vmem:[%s3051_s20 + $0x20] sm:$0xff]  ;;  %v1584_v31 = vld [vmem:[%s3051_s20 + $0x98] sm:$0xff] }
 0x317   : > { %1432 = vmatpush1.msra.mxu0 %v826_v32  ;;  %1503 = vmatpush1.msra.mxu1 %v828_v33  ;;  %v1601_v30 = vld [vmem:[%s3051_s20 + $0x120] sm:$0xff]  ;;  %v1616_v32 = vld [vmem:[%s3051_s20 + $0x198] sm:$0xff] }
 0x318   : > { %1433 = vmatprep.subr.mxu0 %v811_v34  ;;  %1504 = vmatprep.subr.mxu1 %v813_v35  ;;  %v1568_v33 = vld [vmem:[%s3051_s20 + $0x18] sm:$0xff]  ;;  %v1583_v35 = vld [vmem:[%s3051_s20 + $0x90] sm:$0xff] }
 0x319   : > { %1434 = vmatpush1.msra.mxu0 %v810_v36  ;;  %1505 = vmatpush1.msra.mxu1 %v812_v37  ;;  %v1600_v34 = vld [vmem:[%s3051_s20 + $0x118] sm:$0xff]  ;;  %v1615_v36 = vld [vmem:[%s3051_s20 + $0x190] sm:$0xff] }
 0x31a   : > { %1435 = vmatprep.subr.mxu0 %v795_v38  ;;  %1506 = vmatprep.subr.mxu1 %v797_v39  ;;  %v1567_v37 = vld [vmem:[%s3051_s20 + $0x10] sm:$0xff]  ;;  %v1582_v39 = vld [vmem:[%s3051_s20 + $0x88] sm:$0xff] }
 0x31b   : > { %1436 = vmatpush1.msra.mxu0 %v794_v40  ;;  %1507 = vmatpush1.msra.mxu1 %v796_v41  ;;  %v1599_v38 = vld [vmem:[%s3051_s20 + $0x110] sm:$0xff]  ;;  %v1614_v40 = vld [vmem:[%s3051_s20 + $0x188] sm:$0xff] }
 0x31c   : > { %1437 = vmatprep.subr.mxu0 %v779_v42  ;;  %1508 = vmatprep.subr.mxu1 %v781_v43  ;;  %v1566_v41 = vld [vmem:[%s3051_s20 + $0x8] sm:$0xff]  ;;  %v1581_v43 = vld [vmem:[%s3051_s20 + $0x80] sm:$0xff] }
 0x31d   : > { %1438 = vmatpush1.msra.mxu0 %v778_v44  ;;  %1471 = vmatprep.mubr.f32.mxu0 %v2931_v2  ;;  %v1598_v42 = vld [vmem:[%s3051_s20 + $0x108] sm:$0xff]  ;;  %v1613_v44 = vld [vmem:[%s3051_s20 + $0x180] sm:$0xff] }
 0x31e   : > { %1509 = vmatpush1.msra.mxu1 %v780_v45  ;;  %1542 = vmatprep.mubr.f32.mxu1 %v2931_v2  ;;  %v1594_v2 = vld [vmem:[%s3051_s20 + $0xe8] sm:$0xff]  ;;  %v1565_v45 = vld [vmem:[%s3051_s20] sm:$0xff] }
 0x31f   : > { %2563 = vmatmul.mubr.msk.f32.vlgmr.msra.gmra.mxu0 %vm590_vm2, %v3170_v13  ;;  %2564 = vmatmul.mubr.msk.f32.vlgmr.msra.gmra.mxu1 %vm590_vm2, %v3170_v13 }
 0x320   : > { %2589 = vmatprep.subr.mxu0 %v1596_v46  ;;  %2624 = vmatprep.subr.mxu1 %v1628_v47  ;;  %v1597_v46 = vld [vmem:[%s3051_s20 + $0x100] sm:$0xff]  ;;  %v1660_v47 = vld [vmem:[%s3051_s20 + $0x2f8] sm:$0xff] }
 0x321   : > { %2590 = vmatpush3.msra.mxu0 %v1580_v48  ;;  %2625 = vmatpush3.msra.mxu1 %v1612_v49  ;;  %v1692_v48 = vld [vmem:[%s3051_s20 + $0x3f8] sm:$0xff]  ;;  %v898_v49 = vlaneseq }
 0x322   : > { %2591 = vmatprep.subr.mxu0 %v1595_v50  ;;  %2626 = vmatprep.subr.mxu1 %v1627_v51 }
 0x323   : > { %2592 = vmatpush3.msra.mxu0 %v1579_v52  ;;  %2627 = vmatpush3.msra.mxu1 %v1611_v53  ;;  %v3354_v50 = vshrl.u32 %v898_v49, 7  ;;  %v3358_v52 = vld [vmem:[%s3045_s16 + $0x8] sm:$0xff]  ;;  %v1685_v49 = vld [vmem:[%s3051_s20 + $0x3c0] sm:$0xff] }
 0x324   : > { %2593 = vmatprep.subr.mxu0 %v1594_v2  ;;  %2628 = vmatprep.subr.mxu1 %v1626_v54 }
 0x325   : > { %2594 = vmatpush3.msra.mxu0 %v1578_v55  ;;  %2629 = vmatpush3.msra.mxu1 %v1610_v56  ;;  %v916_v51 = vsub.s32 4, %v3354_v50  ;;  %v924_v53 = vsub.s32 6, %v3354_v50  ;;  %v900_v55 = vsub.s32 0, %v3354_v50  ;;  %v908_v56 = vsub.s32 2, %v3354_v50 }
 0x326   : > { %2595 = vmatprep.subr.mxu0 %v1593_v57  ;;  %2630 = vmatprep.subr.mxu1 %v1625_v58  ;;  %v3374_v57 = vld [vmem:[%s3045_s16] sm:$0xff]  ;;  %v904_v58 = vsub.s32 1, %v3354_v50 }
 0x327   : > { %2596 = vmatpush3.msra.mxu0 %v1577_v59  ;;  %2631 = vmatpush3.msra.mxu1 %v1609_v60  ;;  %v3364_v2 = vrot.slane %v3358_v52, %v916_v51  ;;  %v3369_v54 = vrot.slane %v3358_v52, %v924_v53  ;;  %v912_v59 = vsub.s32 3, %v3354_v50  ;;  %v901_v60 = vrot.slane %v3374_v57, %v900_v55 }
 0x328   : > { %2597 = vmatprep.subr.mxu0 %v1592_v61  ;;  %2632 = vmatprep.subr.mxu1 %v1624_v62  ;;  %v909_v61 = vrot.slane %v3374_v57, %v908_v56  ;;  %v905_v62 = vrot.slane %v3374_v57, %v904_v58 }
 0x329   : > { %2598 = vmatpush3.msra.mxu0 %v1576_v63  ;;  %2633 = vmatpush3.msra.mxu1 %v1608_v0  ;;  %v913_v63 = vrot.slane %v3374_v57, %v912_v59 }
 0x32a   : > { %2599 = vmatprep.subr.mxu0 %v1591_v1  ;;  %2634 = vmatprep.subr.mxu1 %v1623_v3 }
 0x32b   : > { %2600 = vmatpush3.msra.mxu0 %v1575_v4  ;;  %2635 = vmatpush3.msra.mxu1 %v1607_v5 }
 0x32c   : > { %2601 = vmatprep.subr.mxu0 %v1590_v6  ;;  %2636 = vmatprep.subr.mxu1 %v1622_v7 }
 0x32d   : > { %2602 = vmatpush3.msra.mxu0 %v1574_v8  ;;  %2637 = vmatpush3.msra.mxu1 %v1606_v9 }
 0x32e   : > { %2603 = vmatprep.subr.mxu0 %v1589_v10  ;;  %2638 = vmatprep.subr.mxu1 %v1621_v11 }
 0x32f   : > { %2604 = vmatpush3.msra.mxu0 %v1573_v12  ;;  %2639 = vmatpush3.msra.mxu1 %v1605_v14  ;;  %v1644_v14 = vld [vmem:[%s3051_s20 + $0x278] sm:$0xff] }
 0x330   : > { %2605 = vmatprep.subr.mxu0 %v1588_v15  ;;  %2640 = vmatprep.subr.mxu1 %v1620_v16  ;;  %v1676_v15 = vld [vmem:[%s3051_s20 + $0x378] sm:$0xff]  ;;  %v1659_v16 = vld [vmem:[%s3051_s20 + $0x2f0] sm:$0xff] }
 0x331   : > { %2606 = vmatpush3.msra.mxu0 %v1572_v17  ;;  %2641 = vmatpush3.msra.mxu1 %v1604_v18  ;;  %v1691_v17 = vld [vmem:[%s3051_s20 + $0x3f0] sm:$0xff] }
 0x332   : > { %2607 = vmatprep.subr.mxu0 %v1587_v19  ;;  %2642 = vmatprep.subr.mxu1 %v1619_v20  ;;  %v1643_v18 = vld [vmem:[%s3051_s20 + $0x270] sm:$0xff]  ;;  %v1658_v20 = vld [vmem:[%s3051_s20 + $0x2e8] sm:$0xff] }
 0x333   : > { %2608 = vmatpush3.msra.mxu0 %v1571_v21  ;;  %2643 = vmatpush3.msra.mxu1 %v1603_v22  ;;  %v1675_v19 = vld [vmem:[%s3051_s20 + $0x370] sm:$0xff]  ;;  %v1690_v21 = vld [vmem:[%s3051_s20 + $0x3e8] sm:$0xff] }
 0x334   : > { %2609 = vmatprep.subr.mxu0 %v1586_v23  ;;  %2644 = vmatprep.subr.mxu1 %v1618_v24  ;;  %v1642_v22 = vld [vmem:[%s3051_s20 + $0x268] sm:$0xff]  ;;  %v1657_v24 = vld [vmem:[%s3051_s20 + $0x2e0] sm:$0xff] }
 0x335   : > { %2610 = vmatpush3.msra.mxu0 %v1570_v25  ;;  %2645 = vmatpush3.msra.mxu1 %v1602_v26  ;;  %v1674_v23 = vld [vmem:[%s3051_s20 + $0x368] sm:$0xff]  ;;  %v1689_v25 = vld [vmem:[%s3051_s20 + $0x3e0] sm:$0xff] }
 0x336   : > { %2611 = vmatprep.subr.mxu0 %v1585_v27  ;;  %2646 = vmatprep.subr.mxu1 %v1617_v28  ;;  %v1641_v26 = vld [vmem:[%s3051_s20 + $0x260] sm:$0xff]  ;;  %v920_v28 = vsub.s32 5, %v3354_v50 }
 0x337   : > { %2612 = vmatpush3.msra.mxu0 %v1569_v29  ;;  %2647 = vmatpush3.msra.mxu1 %v1601_v30  ;;  %v1673_v27 = vld [vmem:[%s3051_s20 + $0x360] sm:$0xff]  ;;  %v928_v29 = vsub.s32 7, %v3354_v50  ;;  %v1656_v30 = vld [vmem:[%s3051_s20 + $0x2d8] sm:$0xff] }
 0x338   : > { %2613 = vmatprep.subr.mxu0 %v1584_v31  ;;  %2648 = vmatprep.subr.mxu1 %v1616_v32  ;;  %v1688_v31 = vld [vmem:[%s3051_s20 + $0x3d8] sm:$0xff]  ;;  %v1709_v50 = vld [vmem:[%s3051_s20 + $0x480] sm:$0xff] }
 0x339   : > { %2614 = vmatpush3.msra.mxu0 %v1568_v33  ;;  %2649 = vmatpush3.msra.mxu1 %v1600_v34  ;;  %v1640_v32 = vld [vmem:[%s3051_s20 + $0x258] sm:$0xff]  ;;  %v1655_v34 = vld [vmem:[%s3051_s20 + $0x2d0] sm:$0xff] }
 0x33a   : > { %2615 = vmatprep.subr.mxu0 %v1583_v35  ;;  %2650 = vmatprep.subr.mxu1 %v1615_v36  ;;  %v1672_v33 = vld [vmem:[%s3051_s20 + $0x358] sm:$0xff]  ;;  %v1687_v35 = vld [vmem:[%s3051_s20 + $0x3d0] sm:$0xff]  ;;  %v921_v36 = vrot.slane %v3374_v57, %v920_v28 }
 0x33b   : > { %2616 = vmatpush3.msra.mxu0 %v1567_v37  ;;  %2651 = vmatpush3.msra.mxu1 %v1599_v38  ;;  %v929_v37 = vrot.slane %v3374_v57, %v928_v29  ;;  %v1639_v38 = vld [vmem:[%s3051_s20 + $0x250] sm:$0xff] }
 0x33c   : > { %2617 = vmatprep.subr.mxu0 %v1582_v39  ;;  %2652 = vmatprep.subr.mxu1 %v1614_v40  ;;  %v1671_v39 = vld [vmem:[%s3051_s20 + $0x350] sm:$0xff] }
 0x33d   : > { %2618 = vmatpush3.msra.mxu0 %v1566_v41  ;;  %2653 = vmatpush3.msra.mxu1 %v1598_v42  ;;  %v1654_v42 = vld [vmem:[%s3051_s20 + $0x2c8] sm:$0xff] }
 0x33e   : > { %2619 = vmatprep.subr.mxu0 %v1581_v43  ;;  %2654 = vmatprep.subr.mxu1 %v1613_v44  ;;  %v1686_v43 = vld [vmem:[%s3051_s20 + $0x3c8] sm:$0xff] }
 0x33f   : > { %2620 = vmatpush3.msra.mxu0 %v1565_v45  ;;  %2655 = vmatpush3.msra.mxu1 %v1597_v46  ;;  %v1638_v44 = vld [vmem:[%s3051_s20 + $0x248] sm:$0xff] }
 0x340   : > { %2659 = vmatprep.subr.mxu0 %v1660_v47  ;;  %2694 = vmatprep.subr.mxu1 %v1692_v48  ;;  %v1670_v45 = vld [vmem:[%s3051_s20 + $0x348] sm:$0xff]  ;;  %v1653_v48 = vld [vmem:[%s3051_s20 + $0x2c0] sm:$0xff] }
 0x3aa   : > { %v1047_v0 = vpop.f32.mrf.mxu0  ;;  %v1118_v1 = vpop.f32.mrf.mxu1 }
 0x3ab   : > { %v1048_v3 = vadd.f32 %v1047_v0, %v901_v60  ;;  %v1119_v4 = vadd.f32 %v1118_v1, %v909_v61 }
 0x3ac   : > { %v1049_v5 = vpop.f32.mrf.mxu0  ;;  %v1120_v6 = vpop.f32.mrf.mxu1 }
 0x3ad   : > { %v1050_v7 = vadd.f32 %v1049_v5, %v905_v62  ;;  %v1121_v8 = vadd.f32 %v1120_v6, %v913_v63  ;;  %v1549_v11 = vmax.f32 %v1048_v3, 0.0  ;;  %v1551_v12 = vmax.f32 %v1119_v4, 0.0  ;;  %v1637_v62 = vld [vmem:[%s3051_s20 + $0x240] sm:$0xff]  ;;  %v1652_v3 = vld [vmem:[%s3051_s20 + $0x2b8] sm:$0xff] }
 0x3ae   : > { %v1669_v63 = vld [vmem:[%s3051_s20 + $0x340] sm:$0xff]  ;;  %v1684_v4 = vld [vmem:[%s3051_s20 + $0x3b8] sm:$0xff] }
 0x3af   : > { %v1550_v9 = vmax.f32 %v1050_v7, 0.0  ;;  %v1552_v10 = vmax.f32 %v1121_v8, 0.0  ;;  %v1636_v5 = vld [vmem:[%s3051_s20 + $0x238] sm:$0xff]  ;;  %v1651_v7 = vld [vmem:[%s3051_s20 + $0x2b0] sm:$0xff] }
 0x3b0   : > { %v1668_v6 = vld [vmem:[%s3051_s20 + $0x338] sm:$0xff]  ;;  %v1683_v8 = vld [vmem:[%s3051_s20 + $0x3b0] sm:$0xff] }
 0x3b1   : > { %1885 = vmatprep.mubr.f32.mxu0 %v1550_v9  ;;  %1955 = vmatprep.mubr.f32.mxu1 %v1552_v10  ;;  %v1635_v9 = vld [vmem:[%s3051_s20 + $0x230] sm:$0xff] }
 0x3b2   : > { %1886 = vmatmul.mubr.f32.vlgmr.msra.gmra.mxu0 %v1549_v11  ;;  %1956 = vmatmul.mubr.f32.vlgmr.msra.gmra.mxu1 %v1551_v12  ;;  %v1667_v10 = vld [vmem:[%s3051_s20 + $0x330] sm:$0xff]  ;;  %v1650_v11 = vld [vmem:[%s3051_s20 + $0x2a8] sm:$0xff] }
 0x3b3   : > { %2660 = vmatpush3.msra.mxu0 %v1644_v14  ;;  %2695 = vmatpush3.msra.mxu1 %v1676_v15  ;;  %v1682_v12 = vld [vmem:[%s3051_s20 + $0x3a8] sm:$0xff] }
 0x3b4   : > { %2661 = vmatprep.subr.mxu0 %v1659_v16  ;;  %2696 = vmatprep.subr.mxu1 %v1691_v17  ;;  %v1634_v14 = vld [vmem:[%s3051_s20 + $0x228] sm:$0xff]  ;;  %v1649_v16 = vld [vmem:[%s3051_s20 + $0x2a0] sm:$0xff] }
 0x3b5   : > { %2662 = vmatpush3.msra.mxu0 %v1643_v18  ;;  %2697 = vmatpush3.msra.mxu1 %v1675_v19  ;;  %v1666_v15 = vld [vmem:[%s3051_s20 + $0x328] sm:$0xff]  ;;  %v1681_v17 = vld [vmem:[%s3051_s20 + $0x3a0] sm:$0xff] }
 0x3b6   : > { %2663 = vmatprep.subr.mxu0 %v1658_v20  ;;  %2698 = vmatprep.subr.mxu1 %v1690_v21  ;;  %v1633_v18 = vld [vmem:[%s3051_s20 + $0x220] sm:$0xff]  ;;  %v1648_v20 = vld [vmem:[%s3051_s20 + $0x298] sm:$0xff] }
 0x3b7   : > { %2664 = vmatpush3.msra.mxu0 %v1642_v22  ;;  %2699 = vmatpush3.msra.mxu1 %v1674_v23  ;;  %v1665_v19 = vld [vmem:[%s3051_s20 + $0x320] sm:$0xff]  ;;  %v1680_v21 = vld [vmem:[%s3051_s20 + $0x398] sm:$0xff]  ;;  %v917_v22 = vrot.slane %v3374_v57, %v916_v51  ;;  %v925_v23 = vrot.slane %v3374_v57, %v924_v53  ;;  %v1663_v51 = vld [vmem:[%s3051_s20 + $0x310] sm:$0xff]  ;;  %v937_v53 = vrot.slane %v3358_v52, %v904_v58 }
 0x3b8   : > { %2665 = vmatprep.subr.mxu0 %v1657_v24  ;;  %2700 = vmatprep.subr.mxu1 %v1689_v25  ;;  %v1632_v24 = vld [vmem:[%s3051_s20 + $0x218] sm:$0xff]  ;;  %v945_v57 = vrot.slane %v3358_v52, %v912_v59  ;;  %v1662_v58 = vld [vmem:[%s3051_s20 + $0x308] sm:$0xff]  ;;  %v1677_v59 = vld [vmem:[%s3051_s20 + $0x380] sm:$0xff] }
 0x3b9   : > { %2666 = vmatpush3.msra.mxu0 %v1641_v26  ;;  %2701 = vmatpush3.msra.mxu1 %v1673_v27  ;;  %v1664_v25 = vld [vmem:[%s3051_s20 + $0x318] sm:$0xff]  ;;  %v1647_v26 = vld [vmem:[%s3051_s20 + $0x290] sm:$0xff] }
 0x3ba   : > { %2667 = vmatprep.subr.mxu0 %v1656_v30  ;;  %2702 = vmatprep.subr.mxu1 %v1688_v31  ;;  %v1679_v27 = vld [vmem:[%s3051_s20 + $0x390] sm:$0xff]  ;;  %v1646_v31 = vld [vmem:[%s3051_s20 + $0x288] sm:$0xff] }
 0x3bb   : > { %v3420_v40 = vpop.f32.mrf.mxu0  ;;  %v3422_v41 = vpop.f32.mrf.mxu1  ;;  %2668 = vmatpush3.msra.mxu0 %v1640_v32  ;;  %2703 = vmatpush3.msra.mxu1 %v1672_v33  ;;  %v1631_v30 = vld [vmem:[%s3051_s20 + $0x210] sm:$0xff]  ;;  %v1678_v32 = vld [vmem:[%s3051_s20 + $0x388] sm:$0xff] }
 0x3bc   : > { %2669 = vmatprep.subr.mxu0 %v1655_v34  ;;  %2704 = vmatprep.subr.mxu1 %v1687_v35  ;;  %v1190_v33 = vadd.f32 %v3420_v40, %v917_v22  ;;  %v1261_v34 = vadd.f32 %v3422_v41, %v925_v23  ;;  %v1629_v41 = vld [vmem:[%s3051_s20 + $0x200] sm:$0xff]  ;;  %v1750_v22 = vld [vmem:[%s3051_s20 + $0x5c8] sm:$0xff] }
 0x3bd   : > { %v1191_v46 = vpop.f32.mrf.mxu0  ;;  %v1262_v47 = vpop.f32.mrf.mxu1  ;;  %2670 = vmatpush3.msra.mxu0 %v1639_v38  ;;  %2705 = vmatpush3.msra.mxu1 %v1671_v39  ;;  %v1645_v38 = vld [vmem:[%s3051_s20 + $0x280] sm:$0xff]  ;;  %v1702_v23 = vld [vmem:[%s3051_s20 + $0x448] sm:$0xff] }
 0x3be   : > { %v1192_v60 = vadd.f32 %v1191_v46, %v921_v36  ;;  %v1263_v61 = vadd.f32 %v1262_v47, %v929_v37  ;;  %2671 = vmatprep.subr.mxu0 %v1654_v42  ;;  %2706 = vmatprep.subr.mxu1 %v1686_v43  ;;  %v1630_v37 = vld [vmem:[%s3051_s20 + $0x208] sm:$0xff]  ;;  %v1661_v42 = vld [vmem:[%s3051_s20 + $0x300] sm:$0xff]  ;;  %v1555_v46 = vmax.f32 %v1261_v34, 0.0  ;;  %v1724_v47 = vld [vmem:[%s3051_s20 + $0x4f8] sm:$0xff] }
 0x3bf   : > { %2672 = vmatpush3.msra.mxu0 %v1638_v44  ;;  %2707 = vmatpush3.msra.mxu1 %v1670_v45  ;;  %v1553_v45 = vmax.f32 %v1190_v33, 0.0  ;;  %v1747_v33 = vld [vmem:[%s3051_s20 + $0x5b0] sm:$0xff] }
 0x3c0   : > { %v1554_v0 = vmax.f32 %v1192_v60, 0.0  ;;  %v1556_v1 = vmax.f32 %v1263_v61, 0.0  ;;  %2673 = vmatprep.subr.mxu0 %v1653_v48  ;;  %2708 = vmatprep.subr.mxu1 %v1685_v49  ;;  %v1756_v48 = vld [vmem:[%s3051_s20 + $0x5f8] sm:$0xff]  ;;  %v1699_v34 = vld [vmem:[%s3051_s20 + $0x430] sm:$0xff] }
 0x3c1   : > { %2674 = vmatpush3.msra.mxu0 %v1637_v62  ;;  %2709 = vmatpush3.msra.mxu1 %v1669_v63  ;;  %v1708_v49 = vld [vmem:[%s3051_s20 + $0x478] sm:$0xff]  ;;  %v1723_v63 = vld [vmem:[%s3051_s20 + $0x4f0] sm:$0xff] }
 0x3c2   : > { %2025 = vmatprep.mubr.f32.mxu0 %v1554_v0  ;;  %2095 = vmatprep.mubr.f32.mxu1 %v1556_v1  ;;  %v1740_v61 = vld [vmem:[%s3051_s20 + $0x578] sm:$0xff]  ;;  %v1755_v0 = vld [vmem:[%s3051_s20 + $0x5f0] sm:$0xff] }
 0x3c3   : > { %2675 = vmatprep.subr.mxu0 %v1652_v3  ;;  %2710 = vmatprep.subr.mxu1 %v1684_v4  ;;  %v1707_v1 = vld [vmem:[%s3051_s20 + $0x470] sm:$0xff]  ;;  %v1722_v4 = vld [vmem:[%s3051_s20 + $0x4e8] sm:$0xff] }
 0x3c4   : > { %2676 = vmatpush3.msra.mxu0 %v1636_v5  ;;  %2711 = vmatpush3.msra.mxu1 %v1668_v6  ;;  %v1739_v3 = vld [vmem:[%s3051_s20 + $0x570] sm:$0xff]  ;;  %v1754_v5 = vld [vmem:[%s3051_s20 + $0x5e8] sm:$0xff] }
 0x3c5   : > { %2677 = vmatprep.subr.mxu0 %v1651_v7  ;;  %2712 = vmatprep.subr.mxu1 %v1683_v8  ;;  %v1706_v6 = vld [vmem:[%s3051_s20 + $0x468] sm:$0xff]  ;;  %v1721_v8 = vld [vmem:[%s3051_s20 + $0x4e0] sm:$0xff] }
 0x3c6   : > { %2678 = vmatpush3.msra.mxu0 %v1635_v9  ;;  %2713 = vmatpush3.msra.mxu1 %v1667_v10  ;;  %v1738_v7 = vld [vmem:[%s3051_s20 + $0x568] sm:$0xff]  ;;  %v1753_v9 = vld [vmem:[%s3051_s20 + $0x5e0] sm:$0xff] }
 0x3c7   : > { %2679 = vmatprep.subr.mxu0 %v1650_v11  ;;  %2714 = vmatprep.subr.mxu1 %v1682_v12  ;;  %v1705_v10 = vld [vmem:[%s3051_s20 + $0x460] sm:$0xff]  ;;  %v1720_v12 = vld [vmem:[%s3051_s20 + $0x4d8] sm:$0xff] }
 0x3c8   : > { %2680 = vmatpush3.msra.mxu0 %v1634_v14  ;;  %2715 = vmatpush3.msra.mxu1 %v1666_v15  ;;  %v1737_v11 = vld [vmem:[%s3051_s20 + $0x560] sm:$0xff]  ;;  %v1752_v14 = vld [vmem:[%s3051_s20 + $0x5d8] sm:$0xff] }
 0x3c9   : > { %2681 = vmatprep.subr.mxu0 %v1649_v16  ;;  %2716 = vmatprep.subr.mxu1 %v1681_v17  ;;  %v1704_v15 = vld [vmem:[%s3051_s20 + $0x458] sm:$0xff]  ;;  %v1719_v17 = vld [vmem:[%s3051_s20 + $0x4d0] sm:$0xff] }
 0x3ca   : > { %2682 = vmatpush3.msra.mxu0 %v1633_v18  ;;  %2717 = vmatpush3.msra.mxu1 %v1665_v19  ;;  %v1736_v16 = vld [vmem:[%s3051_s20 + $0x558] sm:$0xff]  ;;  %v1751_v18 = vld [vmem:[%s3051_s20 + $0x5d0] sm:$0xff] }
 0x3cb   : > { %2683 = vmatprep.subr.mxu0 %v1648_v20  ;;  %2718 = vmatprep.subr.mxu1 %v1680_v21  ;;  %v1703_v19 = vld [vmem:[%s3051_s20 + $0x450] sm:$0xff]  ;;  %v1718_v21 = vld [vmem:[%s3051_s20 + $0x4c8] sm:$0xff] }
 0x3cc   : > { %2684 = vmatpush3.msra.mxu0 %v1632_v24  ;;  %2719 = vmatpush3.msra.mxu1 %v1664_v25  ;;  %v1735_v20 = vld [vmem:[%s3051_s20 + $0x550] sm:$0xff]  ;;  %v1734_v24 = vld [vmem:[%s3051_s20 + $0x548] sm:$0xff]  ;;  %v1717_v25 = vld [vmem:[%s3051_s20 + $0x4c0] sm:$0xff] }
 0x3cd   : > { %v3472_v35 = vpop.f32.mrf.mxu0  ;;  %v3474_v36 = vpop.f32.mrf.mxu1  ;;  %2685 = vmatprep.subr.mxu0 %v1647_v26  ;;  %2720 = vmatprep.subr.mxu1 %v1679_v27  ;;  %v1749_v26 = vld [vmem:[%s3051_s20 + $0x5c0] sm:$0xff] }
 0x3ce   : > { %2686 = vmatpush3.msra.mxu0 %v1631_v30  ;;  %2721 = vmatpush3.msra.mxu1 %v1663_v51  ;;  %v1701_v27 = vld [vmem:[%s3051_s20 + $0x440] sm:$0xff]  ;;  %v1716_v51 = vld [vmem:[%s3051_s20 + $0x4b8] sm:$0xff] }
 0x3cf   : > { %v1333_v39 = vpop.f32.mrf.mxu0  ;;  %v1404_v40 = vpop.f32.mrf.mxu1  ;;  %2687 = vmatprep.subr.mxu0 %v1646_v31  ;;  %2722 = vmatprep.subr.mxu1 %v1678_v32  ;;  %v1733_v30 = vld [vmem:[%s3051_s20 + $0x540] sm:$0xff]  ;;  %v1732_v31 = vld [vmem:[%s3051_s20 + $0x538] sm:$0xff]  ;;  %v1715_v32 = vld [vmem:[%s3051_s20 + $0x4b0] sm:$0xff] }
 0x3d0   : > { %v1334_v43 = vadd.f32 %v1333_v39, %v937_v53  ;;  %v1405_v44 = vadd.f32 %v1404_v40, %v945_v57  ;;  %2688 = vmatpush3.msra.mxu0 %v1630_v37  ;;  %2723 = vmatpush3.msra.mxu1 %v1662_v58  ;;  %v1748_v53 = vld [vmem:[%s3051_s20 + $0x5b8] sm:$0xff]  ;;  %v1731_v37 = vld [vmem:[%s3051_s20 + $0x530] sm:$0xff]  ;;  %v1714_v58 = vld [vmem:[%s3051_s20 + $0x4a8] sm:$0xff] }
 0x3d1   : > { %2689 = vmatprep.subr.mxu0 %v1645_v38  ;;  %2724 = vmatprep.subr.mxu1 %v1677_v59  ;;  %v1700_v57 = vld [vmem:[%s3051_s20 + $0x438] sm:$0xff]  ;;  %v1746_v38 = vld [vmem:[%s3051_s20 + $0x5a8] sm:$0xff]  ;;  %v1713_v40 = vld [vmem:[%s3051_s20 + $0x4a0] sm:$0xff] }
 0x3d2   : > { %2690 = vmatpush3.msra.mxu0 %v1629_v41  ;;  %2725 = vmatpush3.msra.mxu1 %v1661_v42  ;;  %v1558_v60 = vmax.f32 %v1334_v43, 0.0  ;;  %v1560_v62 = vmax.f32 %v1405_v44, 0.0  ;;  %v1698_v59 = vld [vmem:[%s3051_s20 + $0x428] sm:$0xff]  ;;  %v1745_v41 = vld [vmem:[%s3051_s20 + $0x5a0] sm:$0xff] }
 0x3d3   : > { %2026 = vmatmul.mubr.f32.vlgmr.msra.gmra.mxu0 %v1553_v45  ;;  %2096 = vmatmul.mubr.f32.vlgmr.msra.gmra.mxu1 %v1555_v46  ;;  %v1730_v39 = vld [vmem:[%s3051_s20 + $0x528] sm:$0xff]  ;;  %v1697_v42 = vld [vmem:[%s3051_s20 + $0x420] sm:$0xff]  ;;  %v1712_v45 = vld [vmem:[%s3051_s20 + $0x498] sm:$0xff] }
 0x3d4   : > { %2729 = vmatprep.subr.mxu0 %v1724_v47  ;;  %2764 = vmatprep.subr.mxu1 %v1756_v48  ;;  %v1729_v43 = vld [vmem:[%s3051_s20 + $0x520] sm:$0xff]  ;;  %v1744_v46 = vld [vmem:[%s3051_s20 + $0x598] sm:$0xff]  ;;  %v933_v47 = vrot.slane %v3358_v52, %v900_v55  ;;  %v941_v48 = vrot.slane %v3358_v52, %v908_v56  ;;  %v953_v55 = vrot.slane %v3358_v52, %v920_v28  ;;  %v1695_v56 = vld [vmem:[%s3051_s20 + $0x410] sm:$0xff] }
 0x3d5   : > { %2730 = vmatpush3.msra.mxu0 %v1708_v49  ;;  %2165 = vmatprep.mubr.f32.mxu0 %v1558_v60  ;;  %v1696_v60 = vld [vmem:[%s3051_s20 + $0x418] sm:$0xff] }
 0x3d6   : > { %2765 = vmatpush3.msra.mxu1 %v1740_v61  ;;  %2235 = vmatprep.mubr.f32.mxu1 %v1560_v62  ;;  %v1728_v61 = vld [vmem:[%s3051_s20 + $0x518] sm:$0xff]  ;;  %v1711_v62 = vld [vmem:[%s3051_s20 + $0x490] sm:$0xff]  ;;  %v1332_v28 = vadd.f32 %v3472_v35, %v933_v47  ;;  %v1797_v47 = vld [vmem:[%s3051_s20 + $0x740] sm:$0xff] }
 0x3d7   : > { %2731 = vmatprep.subr.mxu0 %v1723_v63  ;;  %2766 = vmatprep.subr.mxu1 %v1755_v0  ;;  %v1743_v63 = vld [vmem:[%s3051_s20 + $0x590] sm:$0xff] }
 0x3d8   : > { %2732 = vmatpush3.msra.mxu0 %v1707_v1  ;;  %2767 = vmatpush3.msra.mxu1 %v1739_v3  ;;  %v1727_v0 = vld [vmem:[%s3051_s20 + $0x510] sm:$0xff]  ;;  %v961_v3 = vrot.slane %v3358_v52, %v928_v29  ;;  %v1741_v52 = vld [vmem:[%s3051_s20 + $0x580] sm:$0xff] }
 0x3d9   : > { %2733 = vmatprep.subr.mxu0 %v1722_v4  ;;  %2768 = vmatprep.subr.mxu1 %v1754_v5  ;;  %v1710_v4 = vld [vmem:[%s3051_s20 + $0x488] sm:$0xff] }
 0x3da   : > { %2734 = vmatpush3.msra.mxu0 %v1706_v6  ;;  %2769 = vmatpush3.msra.mxu1 %v1738_v7  ;;  %v1742_v5 = vld [vmem:[%s3051_s20 + $0x588] sm:$0xff]  ;;  %v1403_v6 = vadd.f32 %v3474_v36, %v941_v48  ;;  %v1557_v36 = vmax.f32 %v1332_v28, 0.0  ;;  %v1780_v48 = vld [vmem:[%s3051_s20 + $0x6b8] sm:$0xff]  ;;  %v1777_v28 = vld [vmem:[%s3051_s20 + $0x6a0] sm:$0xff] }
 0x3db   : > { %2735 = vmatprep.subr.mxu0 %v1721_v8  ;;  %2770 = vmatprep.subr.mxu1 %v1753_v9  ;;  %v1694_v8 = vld [vmem:[%s3051_s20 + $0x408] sm:$0xff] }
 0x3dc   : > { %2736 = vmatpush3.msra.mxu0 %v1705_v10  ;;  %2771 = vmatpush3.msra.mxu1 %v1737_v11  ;;  %v1726_v9 = vld [vmem:[%s3051_s20 + $0x508] sm:$0xff]  ;;  %v1693_v10 = vld [vmem:[%s3051_s20 + $0x400] sm:$0xff] }
 0x3dd   : > { %2737 = vmatprep.subr.mxu0 %v1720_v12  ;;  %2772 = vmatprep.subr.mxu1 %v1752_v14  ;;  %v1725_v11 = vld [vmem:[%s3051_s20 + $0x500] sm:$0xff]  ;;  %v1559_v12 = vmax.f32 %v1403_v6, 0.0  ;;  %v1788_v14 = vld [vmem:[%s3051_s20 + $0x6f8] sm:$0xff] }
 0x3de   : > { %2738 = vmatpush3.msra.mxu0 %v1704_v15  ;;  %2773 = vmatpush3.msra.mxu1 %v1736_v16  ;;  %v1820_v15 = vld [vmem:[%s3051_s20 + $0x7f8] sm:$0xff]  ;;  %v1809_v6 = vld [vmem:[%s3051_s20 + $0x7a0] sm:$0xff] }
 0x3df   : > { %2739 = vmatprep.subr.mxu0 %v1719_v17  ;;  %2774 = vmatprep.subr.mxu1 %v1751_v18  ;;  %v3530_v44 = vpop.f32.mrf.mxu0  ;;  %v3540_v49 = vpop.f32.mrf.mxu1  ;;  %v1772_v16 = vld [vmem:[%s3051_s20 + $0x678] sm:$0xff] }
 0x3e0   : > { %2740 = vmatpush3.msra.mxu0 %v1703_v19  ;;  %2775 = vmatpush3.msra.mxu1 %v1735_v20  ;;  %v1804_v18 = vld [vmem:[%s3051_s20 + $0x778] sm:$0xff]  ;;  %v1787_v20 = vld [vmem:[%s3051_s20 + $0x6f0] sm:$0xff] }
 0x3e1   : > { %2741 = vmatprep.subr.mxu0 %v1718_v21  ;;  %2776 = vmatprep.subr.mxu1 %v1750_v22  ;;  %v1475_v1 = vpop.f32.mrf.mxu0  ;;  %v1546_v7 = vpop.f32.mrf.mxu1  ;;  %v1819_v21 = vld [vmem:[%s3051_s20 + $0x7f0] sm:$0xff] }
 0x3e2   : > { %2742 = vmatpush3.msra.mxu0 %v1702_v23  ;;  %2777 = vmatpush3.msra.mxu1 %v1734_v24  ;;  %v1476_v29 = vadd.f32 %v1475_v1, %v953_v55  ;;  %v1547_v35 = vadd.f32 %v1546_v7, %v961_v3  ;;  %v1771_v22 = vld [vmem:[%s3051_s20 + $0x670] sm:$0xff]  ;;  %v1786_v24 = vld [vmem:[%s3051_s20 + $0x6e8] sm:$0xff]  ;;  %v1761_v7 = vld [vmem:[%s3051_s20 + $0x620] sm:$0xff] }
 0x3e3   : > { %2743 = vmatprep.subr.mxu0 %v1717_v25  ;;  %2778 = vmatprep.subr.mxu1 %v1749_v26  ;;  %v1803_v23 = vld [vmem:[%s3051_s20 + $0x770] sm:$0xff]  ;;  %v1818_v25 = vld [vmem:[%s3051_s20 + $0x7e8] sm:$0xff] }
 0x3e4   : > { %2744 = vmatpush3.msra.mxu0 %v1701_v27  ;;  %2779 = vmatpush3.msra.mxu1 %v1733_v30  ;;  %v1562_v17 = vmax.f32 %v1476_v29, 0.0  ;;  %v1564_v19 = vmax.f32 %v1547_v35, 0.0  ;;  %v1770_v26 = vld [vmem:[%s3051_s20 + $0x668] sm:$0xff]  ;;  %v1785_v30 = vld [vmem:[%s3051_s20 + $0x6e0] sm:$0xff]  ;;  %v1811_v55 = vld [vmem:[%s3051_s20 + $0x7b0] sm:$0xff] }
 0x3e5   : > { %2745 = vmatprep.subr.mxu0 %v1716_v51  ;;  %2780 = vmatprep.subr.mxu1 %v1748_v53  ;;  %v1802_v27 = vld [vmem:[%s3051_s20 + $0x768] sm:$0xff]  ;;  %v1817_v51 = vld [vmem:[%s3051_s20 + $0x7e0] sm:$0xff]  ;;  %v1792_v29 = vld [vmem:[%s3051_s20 + $0x718] sm:$0xff] }
 0x3e6   : > { %2746 = vmatpush3.msra.mxu0 %v1700_v57  ;;  %2781 = vmatpush3.msra.mxu1 %v1732_v31  ;;  %v1769_v53 = vld [vmem:[%s3051_s20 + $0x660] sm:$0xff]  ;;  %v1784_v31 = vld [vmem:[%s3051_s20 + $0x6d8] sm:$0xff]  ;;  %v1778_v1 = vld [vmem:[%s3051_s20 + $0x6a8] sm:$0xff] }
 0x3e7   : > { %2747 = vmatprep.subr.mxu0 %v1715_v32  ;;  %2782 = vmatprep.subr.mxu1 %v1747_v33  ;;  %v1801_v57 = vld [vmem:[%s3051_s20 + $0x760] sm:$0xff]  ;;  %v1816_v32 = vld [vmem:[%s3051_s20 + $0x7d8] sm:$0xff]  ;;  %v1810_v3 = vld [vmem:[%s3051_s20 + $0x7a8] sm:$0xff] }
 0x3e8   : > { %2748 = vmatpush3.msra.mxu0 %v1699_v34  ;;  %2783 = vmatpush3.msra.mxu1 %v1731_v37  ;;  %v1768_v33 = vld [vmem:[%s3051_s20 + $0x658] sm:$0xff]  ;;  %v1783_v37 = vld [vmem:[%s3051_s20 + $0x6d0] sm:$0xff] }
 0x3e9   : > { %2749 = vmatprep.subr.mxu0 %v1714_v58  ;;  %2784 = vmatprep.subr.mxu1 %v1746_v38  ;;  %v1800_v34 = vld [vmem:[%s3051_s20 + $0x758] sm:$0xff]  ;;  %v1815_v58 = vld [vmem:[%s3051_s20 + $0x7d0] sm:$0xff] }
 0x3ea   : > { %2750 = vmatpush3.msra.mxu0 %v1698_v59  ;;  %2785 = vmatpush3.msra.mxu1 %v1730_v39  ;;  %v1767_v38 = vld [vmem:[%s3051_s20 + $0x650] sm:$0xff]  ;;  %v1782_v39 = vld [vmem:[%s3051_s20 + $0x6c8] sm:$0xff] }
 0x3eb   : > { %2751 = vmatprep.subr.mxu0 %v1713_v40  ;;  %2786 = vmatprep.subr.mxu1 %v1745_v41  ;;  %v1799_v59 = vld [vmem:[%s3051_s20 + $0x750] sm:$0xff]  ;;  %v1814_v40 = vld [vmem:[%s3051_s20 + $0x7c8] sm:$0xff] }
 0x3ec   : > { %2752 = vmatpush3.msra.mxu0 %v1697_v42  ;;  %2787 = vmatpush3.msra.mxu1 %v1729_v43  ;;  %v1766_v41 = vld [vmem:[%s3051_s20 + $0x648] sm:$0xff]  ;;  %v1781_v43 = vld [vmem:[%s3051_s20 + $0x6c0] sm:$0xff]  ;;  %v1759_v35 = vld [vmem:[%s3051_s20 + $0x610] sm:$0xff] }
 0x3ed   : > { %2753 = vmatprep.subr.mxu0 %v1712_v45  ;;  %2788 = vmatprep.subr.mxu1 %v1744_v46  ;;  %v1798_v42 = vld [vmem:[%s3051_s20 + $0x748] sm:$0xff]  ;;  %v1813_v45 = vld [vmem:[%s3051_s20 + $0x7c0] sm:$0xff] }
 0x3ee   : > { %2754 = vmatpush3.msra.mxu0 %v1696_v60  ;;  %2789 = vmatpush3.msra.mxu1 %v1728_v61  ;;  %v1765_v46 = vld [vmem:[%s3051_s20 + $0x640] sm:$0xff]  ;;  %v1812_v60 = vld [vmem:[%s3051_s20 + $0x7b8] sm:$0xff] }
 0x3ef   : > { %2755 = vmatprep.subr.mxu0 %v1711_v62  ;;  %2790 = vmatprep.subr.mxu1 %v1743_v63  ;;  %v1764_v61 = vld [vmem:[%s3051_s20 + $0x638] sm:$0xff]  ;;  %v1779_v63 = vld [vmem:[%s3051_s20 + $0x6b0] sm:$0xff] }
 0x3f0   : > { %2756 = vmatpush3.msra.mxu0 %v1695_v56  ;;  %2791 = vmatpush3.msra.mxu1 %v1727_v0  ;;  %v1796_v62 = vld [vmem:[%s3051_s20 + $0x738] sm:$0xff]  ;;  %v1763_v56 = vld [vmem:[%s3051_s20 + $0x630] sm:$0xff] }
 0x3f1   : > { %2757 = vmatprep.subr.mxu0 %v1710_v4  ;;  %2792 = vmatprep.subr.mxu1 %v1742_v5  ;;  %v1795_v0 = vld [vmem:[%s3051_s20 + $0x730] sm:$0xff]  ;;  %v1762_v4 = vld [vmem:[%s3051_s20 + $0x628] sm:$0xff] }
 0x3f2   : > { %2758 = vmatpush3.msra.mxu0 %v1694_v8  ;;  %2793 = vmatpush3.msra.mxu1 %v1726_v9  ;;  %v1794_v5 = vld [vmem:[%s3051_s20 + $0x728] sm:$0xff]  ;;  %v1793_v8 = vld [vmem:[%s3051_s20 + $0x720] sm:$0xff]  ;;  %v1776_v9 = vld [vmem:[%s3051_s20 + $0x698] sm:$0xff] }
 0x3f3   : > { %2759 = vmatprep.subr.mxu0 %v1709_v50  ;;  %2794 = vmatprep.subr.mxu1 %v1741_v52  ;;  %v1808_v50 = vld [vmem:[%s3051_s20 + $0x798] sm:$0xff] }
 0x3f4   : > { %2760 = vmatpush3.msra.mxu0 %v1693_v10  ;;  %2795 = vmatpush3.msra.mxu1 %v1725_v11  ;;  %v1760_v52 = vld [vmem:[%s3051_s20 + $0x618] sm:$0xff]  ;;  %v1775_v10 = vld [vmem:[%s3051_s20 + $0x690] sm:$0xff] }
 0x3f5   : > { %2166 = vmatmul.mubr.f32.vlgmr.msra.gmra.mxu0 %v1557_v36  ;;  %2236 = vmatmul.mubr.f32.vlgmr.msra.gmra.mxu1 %v1559_v12  ;;  %v1807_v11 = vld [vmem:[%s3051_s20 + $0x790] sm:$0xff]  ;;  %v1774_v12 = vld [vmem:[%s3051_s20 + $0x688] sm:$0xff] }
 0x3f6   : > { %2799 = vmatprep.subr.mxu0 %v1788_v14  ;;  %2834 = vmatprep.subr.mxu1 %v1820_v15  ;;  %v1791_v36 = vld [vmem:[%s3051_s20 + $0x710] sm:$0xff]  ;;  %v1806_v14 = vld [vmem:[%s3051_s20 + $0x788] sm:$0xff]  ;;  %v1474_v15 = vadd.f32 %v3530_v44, %v3364_v2 }
 0x3f7   : > { %2800 = vmatpush3.msra.mxu0 %v1772_v16  ;;  %2305 = vmatprep.mubr.f32.mxu0 %v1562_v17  ;;  %v1545_v16 = vadd.f32 %v3540_v49, %v3369_v54  ;;  %v1758_v17 = vld [vmem:[%s3051_s20 + $0x608] sm:$0xff] }
 0x3f8   : > { %2835 = vmatpush3.msra.mxu1 %v1804_v18  ;;  %2375 = vmatprep.mubr.f32.mxu1 %v1564_v19  ;;  %v1790_v18 = vld [vmem:[%s3051_s20 + $0x708] sm:$0xff]  ;;  %v1773_v19 = vld [vmem:[%s3051_s20 + $0x680] sm:$0xff] }
 0x3f9   : > { %2801 = vmatprep.subr.mxu0 %v1787_v20  ;;  %2836 = vmatprep.subr.mxu1 %v1819_v21  ;;  %v1805_v20 = vld [vmem:[%s3051_s20 + $0x780] sm:$0xff] }
 0x3fa   : > { %2802 = vmatpush3.msra.mxu0 %v1771_v22  ;;  %2837 = vmatpush3.msra.mxu1 %v1803_v23  ;;  %v1757_v21 = vld [vmem:[%s3051_s20 + $0x600] sm:$0xff]  ;;  %v1561_v23 = vmax.f32 %v1474_v15, 0.0 }
 0x3fb   : > { %2803 = vmatprep.subr.mxu0 %v1786_v24  ;;  %2838 = vmatprep.subr.mxu1 %v1818_v25  ;;  %v1789_v22 = vld [vmem:[%s3051_s20 + $0x700] sm:$0xff]  ;;  %v1563_v24 = vmax.f32 %v1545_v16, 0.0 }
 0x3fc   : > { %2804 = vmatpush3.msra.mxu0 %v1770_v26  ;;  %2839 = vmatpush3.msra.mxu1 %v1802_v27 }
 0x3fd   : > { %2805 = vmatprep.subr.mxu0 %v1785_v30  ;;  %2840 = vmatprep.subr.mxu1 %v1817_v51 }
 0x3fe   : > { %2806 = vmatpush3.msra.mxu0 %v1769_v53  ;;  %2841 = vmatpush3.msra.mxu1 %v1801_v57 }
 0x3ff   : > { %2807 = vmatprep.subr.mxu0 %v1784_v31  ;;  %2842 = vmatprep.subr.mxu1 %v1816_v32 }
 0x400   : > { %2808 = vmatpush3.msra.mxu0 %v1768_v33  ;;  %2843 = vmatpush3.msra.mxu1 %v1800_v34 }
 0x401   : > { %2809 = vmatprep.subr.mxu0 %v1783_v37  ;;  %2844 = vmatprep.subr.mxu1 %v1815_v58 }
 0x402   : > { %2810 = vmatpush3.msra.mxu0 %v1767_v38  ;;  %2845 = vmatpush3.msra.mxu1 %v1799_v59 }
 0x403   : > { %2811 = vmatprep.subr.mxu0 %v1782_v39  ;;  %2846 = vmatprep.subr.mxu1 %v1814_v40 }
 0x404   : > { %2812 = vmatpush3.msra.mxu0 %v1766_v41  ;;  %2847 = vmatpush3.msra.mxu1 %v1798_v42 }
 0x405   : > { %2813 = vmatprep.subr.mxu0 %v1781_v43  ;;  %2848 = vmatprep.subr.mxu1 %v1813_v45 }
 0x406   : > { %2814 = vmatpush3.msra.mxu0 %v1765_v46  ;;  %2849 = vmatpush3.msra.mxu1 %v1797_v47 }
 0x407   : > { %2815 = vmatprep.subr.mxu0 %v1780_v48  ;;  %2850 = vmatprep.subr.mxu1 %v1812_v60 }
 0x408   : > { %2816 = vmatpush3.msra.mxu0 %v1764_v61  ;;  %2851 = vmatpush3.msra.mxu1 %v1796_v62 }
 0x409   : > { %2817 = vmatprep.subr.mxu0 %v1779_v63  ;;  %2852 = vmatprep.subr.mxu1 %v1811_v55  ;;  %v2382_v63 = vld [vmem:[%s567_s27] sm:$0x1] }
 0x40a   : > { %2818 = vmatpush3.msra.mxu0 %v1763_v56  ;;  %2853 = vmatpush3.msra.mxu1 %v1795_v0 }
 0x40b   : > { %2819 = vmatprep.subr.mxu0 %v1778_v1  ;;  %2854 = vmatprep.subr.mxu1 %v1810_v3 }
 0x40c   : > { %2820 = vmatpush3.msra.mxu0 %v1762_v4  ;;  %2855 = vmatpush3.msra.mxu1 %v1794_v5 }
 0x40d   : > { %2821 = vmatprep.subr.mxu0 %v1777_v28  ;;  %2856 = vmatprep.subr.mxu1 %v1809_v6 }
 0x40e   : > { %2822 = vmatpush3.msra.mxu0 %v1761_v7  ;;  %2857 = vmatpush3.msra.mxu1 %v1793_v8 }
 0x40f   : > { %2823 = vmatprep.subr.mxu0 %v1776_v9  ;;  %2858 = vmatprep.subr.mxu1 %v1808_v50 }
 0x410   : > { %2824 = vmatpush3.msra.mxu0 %v1760_v52  ;;  %2859 = vmatpush3.msra.mxu1 %v1792_v29  ;;  %v2385_v52 = vld [vmem:[%s573_s13] sm:$0x1] }
 0x411   : > { %2825 = vmatprep.subr.mxu0 %v1775_v10  ;;  %2860 = vmatprep.subr.mxu1 %v1807_v11 }
 0x412   : > { %2826 = vmatpush3.msra.mxu0 %v1759_v35  ;;  %2861 = vmatpush3.msra.mxu1 %v1791_v36 }
 0x413   : > { %2827 = vmatprep.subr.mxu0 %v1774_v12  ;;  %2862 = vmatprep.subr.mxu1 %v1806_v14 }
 0x414   : > { %2828 = vmatpush3.msra.mxu0 %v1758_v17  ;;  %2863 = vmatpush3.msra.mxu1 %v1790_v18 }
 0x415   : > { %2829 = vmatprep.subr.mxu0 %v1773_v19  ;;  %2864 = vmatprep.subr.mxu1 %v1805_v20 }
 0x416   : > { %2830 = vmatpush3.msra.mxu0 %v1757_v21  ;;  %2865 = vmatpush3.msra.mxu1 %v1789_v22 }
 0x417   : > { %2306 = vmatmul.mubr.f32.vlgmr.msra.gmra.mxu0 %v1561_v23  ;;  %2376 = vmatmul.mubr.f32.vlgmr.msra.gmra.mxu1 %v1563_v24 }
 0x472   : > { %v2621_v2 = vpop.f32.mrf.mxu0  ;;  %v2656_v54 = vpop.f32.mrf.mxu1 }
 0x474   : > { %v2622_v44 = vpop.f32.mrf.mxu0  ;;  %v2657_v25 = vpop.f32.mrf.mxu1 }
 0x475   : > { %v2623_v27 = vadd.f32 %v2622_v44, %v2621_v2  ;;  %v2658_v30 = vadd.f32 %v2657_v25, %v2656_v54 }
 0x477   : > { %v1958_v31 = vadd.f32 %v2658_v30, %v2623_v27 }
 0x493   : > { %v2691_v49 = vpop.f32.mrf.mxu0  ;;  %v2726_v51 = vpop.f32.mrf.mxu1 }
 0x495   : > { %v2692_v26 = vpop.f32.mrf.mxu0  ;;  %v2727_v32 = vpop.f32.mrf.mxu1 }
 0x496   : > { %v2693_v57 = vadd.f32 %v2692_v26, %v2691_v49  ;;  %v2728_v58 = vadd.f32 %v2727_v32, %v2726_v51 }
 0x498   : > { %v2028_v34 = vadd.f32 %v2693_v57, %v1958_v31 }
 0x49a   : > { %v2098_v59 = vadd.f32 %v2728_v58, %v2028_v34 }
 0x4b5   : > { %v2761_v53 = vpop.f32.mrf.mxu0  ;;  %v2796_v37 = vpop.f32.mrf.mxu1 }
 0x4b7   : > { %v2762_v33 = vpop.f32.mrf.mxu0  ;;  %v2797_v39 = vpop.f32.mrf.mxu1 }
 0x4b8   : > { %v2763_v38 = vadd.f32 %v2762_v33, %v2761_v53  ;;  %v2798_v43 = vadd.f32 %v2797_v39, %v2796_v37 }
 0x4ba   : > { %v2168_v40 = vadd.f32 %v2763_v38, %v2098_v59 }
 0x4bc   : > { %v2238_v47 = vadd.f32 %v2798_v43, %v2168_v40 }
 0x4d7   : > { %v2831_v41 = vpop.f32.mrf.mxu0  ;;  %v2866_v42 = vpop.f32.mrf.mxu1 }
 0x4d9   : > { %v2832_v45 = vpop.f32.mrf.mxu0  ;;  %v2867_v46 = vpop.f32.mrf.mxu1 }
 0x4da   : > { %v2833_v48 = vadd.f32 %v2832_v45, %v2831_v41  ;;  %v2868_v61 = vadd.f32 %v2867_v46, %v2866_v42 }
 0x4dc   : > { %v2308_v60 = vadd.f32 %v2833_v48, %v2238_v47 }
 0x4de   : > { %v2378_v62 = vadd.f32 %v2868_v61, %v2308_v60 }
 0x4e0   : > { %v2381_v55 = vadd.f32 %v2378_v62, %v3170_v13  ;;  %v2384_v13 = vld [vmem:[%s570_s28] sm:$0x1] }
 0x4e2   : > { %v2383_v56 = vadd.f32 %v2382_v63, %v2381_v55 }
 0x4e4   : > { %v2386_v0 = vsel %vm749_vm3, %v2383_v56, 0.0 }
 0x4e5   : > { %2387 = vadd.xlane.f32.xlu1 %v2386_v0 }
 0x56e   : > { %v2388_v1 = vpop.xlane.xlu1 %2387 }
 0x56f   : > { %v2389_v3 = vmul.f32 0.015625, %v2388_v1 }
 0x571   : > { %v2390_v4 = vsub.f32 %v2383_v56, %v2389_v3 }
 0x573   : > { %v2391_v5 = vmul.f32 %v2390_v4, %v2390_v4 }
 0x575   : > { %v2392_v28 = vsel %vm749_vm3, %v2391_v5, 0.0 }
 0x576   : > { %2393 = vadd.xlane.f32.xlu1 %v2392_v28 }
 0x5ff   : > { %v2394_v6 = vpop.xlane.xlu1 %2393 }
 0x600   : > { %v2395_v7 = vmul.f32 0.015625, %v2394_v6 }
 0x602   : > { %v2396_v8 = vadd.f32 1e-05, %v2395_v7 }
 0x604   : > { %2920 = vrsqrt.f32 %v2396_v8 }
 0x611   : > { %v2921_v9 = vpop.eup %2920 }
 0x612   : > { %v2398_v50 = vmul.f32 %v2921_v9, %v2390_v4 }
 0x614   : > { %v2399_v29 = vmul.f32 %v2398_v50, %v2384_v13 }
 0x616   : > { %v2400_v10 = vadd.f32 %v2399_v29, %v2385_v52 }
 0x618   : > { %2401 = vst.msk [vmem:[%s3669_s12] sm:$0x1] %vm749_vm3, %v2400_v10 }
 0x619 PF: > { %s3683_s17 = sld [smem:[#allocation2_spill]] }
 0x61f   : > { %s22_s21 = sadd.s32 1, %s3683_s17  }
 0x620   : > { %p19_p5 = scmp.ge.s32.totalorder %s22_s21, 8  }
 0x622   :  { %21 = sbr.rel (!%p19_p5) target bundleno = 4 (0x4), region = 131 }

// kernel: _lambda_.11
= control target key start
LH: loop header
LB: loop body
LE: loop exit
PB: predicated region body
PF: predicated region fallthrough
CT: control target
= control target key end

     0   :  { %10 = vsyncpa [#allocation3], 0  ;;  %s360_s0 = inlined_call_operand.vmem [shape: f32[2,64], index: 0, kind: input, shape index: {}]   ;;  %s361_s1 = inlined_call_operand.hbm [shape: f32[1,64], index: 1, kind: input, shape index: {}]   ;;  %s362_s2 = inlined_call_operand.hbm [shape: f32[1,64], index: 2, kind: input, shape index: {}]   ;;  %s363_s3 = inlined_call_operand.vmem [shape: f32[64,128], index: 3, kind: input, shape index: {}]   ;;  %s364_s4 = inlined_call_operand.hbm [shape: f32[1,128], index: 4, kind: input, shape index: {}]   ;;  %s365_s5 = inlined_call_operand.vmem [shape: f32[2,128], index: 5, kind: output, shape index: {}]  }
   0x1   :  { %11 = vsyncpa [#allocation5], 0  ;;  %s286_s18 = smov [#allocation4]   ;;  %s287_s20 = smov [#allocation2]  }
   0x2   :  { %s30_s19 = sshll.u32 %s286_s18, 4  ;;  %s20_s21 = sshll.u32 %s287_s20, 4  ;;  %s31_s19 = int_to_ptr.vmem [resolvable:$true] %s30_s19  ;;  %s21_s21 = int_to_ptr.vmem [resolvable:$true] %s20_s21 }
   0x3   :  { %s230_s22 = scalar_lea.vmem %s31_s19, 16  ;;  %s234_s23 = scalar_lea.vmem %s31_s19, 32 }
   0x4   :  { %p231_p0 = scmp.ne.s32.totalorder %s31_s19, %s230_s22  ;;  %p235_p1 = scmp.lt.s32.totalorder %s31_s19, %s31_s19 }
   0x5   :  { %p236_p2 = scmp.lt.s32.totalorder %s234_s23, %s230_s22 }
   0x7   :  { %p237_p3 = por %p236_p2, %p235_p1 }
   0x9   :  { %p238_p4 = pnand %p237_p3, %p231_p0 }
   0xb   :  { %241 = shalt.err (!%p238_p4)
}
   0xc   :  { %33 = dma.hbm_to_vmem [thread:$0]  %s362_s2, 16, %s31_s19, [#allocation5]  }
   0xd   :  { %s250_s26 = scalar_lea.vmem %s21_s21, 16  ;;  %s254_s27 = scalar_lea.vmem %s21_s21, 32 }
   0xe   :  { %p251_p5 = scmp.ne.s32.totalorder %s21_s21, %s250_s26  ;;  %p255_p6 = scmp.lt.s32.totalorder %s21_s21, %s21_s21 }
   0xf   :  { %p256_p7 = scmp.lt.s32.totalorder %s254_s27, %s250_s26 }
  0x11   :  { %p257_p8 = por %p256_p7, %p255_p6 }
  0x13   :  { %p258_p9 = pnand %p257_p8, %p251_p5 }
  0x15   :  { %261 = shalt.err (!%p258_p9)
}
  0x16   :  { %23 = dma.hbm_to_vmem [thread:$0]  %s361_s1, 16, %s21_s21, [#allocation3]  }
  0x17   :  { %s288_s30 = smov [#allocation6]  }
  0x18   :  { %s42_s6 = sshll.u32 %s288_s30, 4  ;;  %s43_s6 = int_to_ptr.vmem [resolvable:$true] %s42_s6 }
  0x19   :  { %s270_s7 = scalar_lea.vmem %s43_s6, 16  ;;  %s274_s8 = scalar_lea.vmem %s43_s6, 32 }
  0x1a   :  { %p271_p10 = scmp.ne.s32.totalorder %s43_s6, %s270_s7  ;;  %p275_p11 = scmp.lt.s32.totalorder %s43_s6, %s43_s6 }
  0x1b   :  { %p276_p12 = scmp.lt.s32.totalorder %s274_s8, %s270_s7 }
  0x1d   :  { %p277_p13 = por %p276_p12, %p275_p11 }
  0x1f   :  { %p278_p0 = pnand %p277_p13, %p271_p10 }
  0x21   :  { %281 = shalt.err (!%p278_p0)
}
  0x22   :  { %45 = dma.hbm_to_vmem [thread:$0]  %s364_s4, 16, %s43_s6, [#allocation5]  }
  0x23   :  { %282 = dma.done.wait [#allocation3], 16  }
  0x24   :  { %283 = vsyncadd [#allocation3], 4294967280 }
  0x25   :  { %284 = dma.done.wait [#allocation5], 32  }
  0x26   :  { %285 = vsyncadd [#allocation5], 4294967264  ;;  %vm58_vm0 = vcmask 517120   ;;  %v55_v0 = vld [vmem:[%s360_s0] sm:$0x3]  ;;  %v94_v7 = vld [vmem:[%s363_s3 + $0x38] sm:$0xff] }
  0x27   :  { %v59_v1 = vsel %vm58_vm0, %v55_v0, 0.0  ;;  %v289_v8 = vmov 0.0   ;;  %v93_v9 = vld [vmem:[%s363_s3 + $0x30] sm:$0xff]  ;;  %vm290_vm1 = vmmov 0   ;;  %v92_v10 = vld [vmem:[%s363_s3 + $0x28] sm:$0xff]  ;;  %v91_v11 = vld [vmem:[%s363_s3 + $0x20] sm:$0xff] }
  0x28   :  { %60 = vadd.xlane.f32.xlu0 %v59_v1  ;;  %196 = vmatprep.subr.mxu0 %v289_v8  ;;  %v90_v12 = vld [vmem:[%s363_s3 + $0x18] sm:$0xff]  ;;  %v89_v13 = vld [vmem:[%s363_s3 + $0x10] sm:$0xff]  ;;  %v88_v14 = vld [vmem:[%s363_s3 + $0x8] sm:$0xff]  ;;  %vm102_vm2 = vcmask 523264  }
  0x29   :  { %212 = vmatprep.mubr.msk.f32.mxu0 %vm290_vm1, %v289_v8  ;;  %197 = vmatpush3.msra.mxu0 %v94_v7  ;;  %v87_v15 = vld [vmem:[%s363_s3] sm:$0xff] }
  0x2a   :  { %198 = vmatprep.subr.mxu0 %v289_v8  ;;  %v183_v20 = vld [vmem:[#allocation2] ss:$0 sm:$0xff]  ;;  %v184_v22 = vld [vmem:[#allocation4] ss:$0 sm:$0xff]  ;;  %v185_v25 = vld [vmem:[#allocation6] ss:$0 sm:$0xff] }
  0x2b   :  { %199 = vmatpush3.msra.mxu0 %v93_v9 }
  0x2c   :  { %200 = vmatprep.subr.mxu0 %v289_v8 }
  0x2d   :  { %201 = vmatpush3.msra.mxu0 %v92_v10 }
  0x2e   :  { %202 = vmatprep.subr.mxu0 %v289_v8 }
  0x2f   :  { %203 = vmatpush3.msra.mxu0 %v91_v11 }
  0x30   :  { %204 = vmatprep.subr.mxu0 %v289_v8 }
  0x31   :  { %205 = vmatpush3.msra.mxu0 %v90_v12 }
  0x32   :  { %206 = vmatprep.subr.mxu0 %v289_v8 }
  0x33   :  { %207 = vmatpush3.msra.mxu0 %v89_v13 }
  0x34   :  { %208 = vmatprep.subr.mxu0 %v289_v8 }
  0x35   :  { %209 = vmatpush3.msra.mxu0 %v88_v14 }
  0x36   :  { %210 = vmatprep.subr.mxu0 %v289_v8 }
  0x37   :  { %211 = vmatpush3.msra.mxu0 %v87_v15 }
  0xb1   :  { %v61_v2 = vpop.xlane.xlu0 %60 }
  0xb2   :  { %v63_v3 = vmul.f32 0.015625, %v61_v2 }
  0xb4   :  { %v64_v4 = vsub.f32 %v55_v0, %v63_v3 }
  0xb6   :  { %v65_v5 = vmul.f32 %v64_v4, %v64_v4 }
  0xb8   :  { %v66_v6 = vsel %vm58_vm0, %v65_v5, 0.0 }
  0xb9   :  { %67 = vadd.xlane.f32.xlu0 %v66_v6 }
 0x142   :  { %v68_v16 = vpop.xlane.xlu0 %67 }
 0x143   :  { %v69_v17 = vmul.f32 0.015625, %v68_v16 }
 0x145   :  { %v70_v18 = vadd.f32 1e-05, %v69_v17 }
 0x147   :  { %220 = vrsqrt.f32 %v70_v18 }
 0x154   :  { %v221_v19 = vpop.eup %220 }
 0x155   :  { %v72_v21 = vmul.f32 %v221_v19, %v64_v4 }
 0x157   :  { %v79_v23 = vmul.f32 %v183_v20, %v72_v21 }
 0x159   :  { %v86_v24 = vadd.f32 %v184_v22, %v79_v23 }
 0x15b   :  { %213 = vmatmul.mubr.msk.f32.vlgmr.msra.gmra.mxu0 %vm102_vm2, %v86_v24 }
 0x21b   :  { %v172_v26 = vpop.f32.mrf.mxu0 }
 0x21c   :  { %v173_v27 = vadd.f32 %v185_v25, %v172_v26 }
 0x21d   :  { %v214_v28 = vpop.f32.mrf.mxu0 }
 0x21e   :  { %176 = vst [vmem:[%s365_s5] sm:$0x3] %v173_v27 }
 0x21f   :  { %181 = vsyncpa [#allocation3], 1 }
 0x220   :  { %182 = vsyncpa [#allocation5], 1 }

// kernel: _lambda_.8
= control target key start
LH: loop header
LB: loop body
LE: loop exit
PB: predicated region body
PF: predicated region fallthrough
CT: control target
= control target key end

     0   :  { %vm31_vm0 = vcmask 523264   ;;  %s212_s1 = inlined_call_operand.vmem [shape: f32[64,128], index: 1, kind: input, shape index: {}]   ;;  %s213_s0 = inlined_call_operand.vmem [shape: f32[16,64], index: 0, kind: input, shape index: {}]   ;;  %s214_s2 = inlined_call_operand.vmem [shape: f32[1,128], index: 2, kind: input, shape index: {}]   ;;  %s215_s3 = inlined_call_operand.vmem [shape: f32[16,128], index: 3, kind: output, shape index: {}]  }
   0x1   :  { %v23_v0 = vld [vmem:[%s212_s1 + $0x38] sm:$0xff]  ;;  %v22_v1 = vld [vmem:[%s212_s1 + $0x30] sm:$0xff]  ;;  %v21_v2 = vld [vmem:[%s212_s1 + $0x28] sm:$0xff] }
   0x2   :  { %132 = vmatprep.subr.mxu0 %v23_v0  ;;  %v14_v3 = vld [vmem:[%s213_s0] sm:$0xff]  ;;  %v19_v5 = vld [vmem:[%s212_s1 + $0x18] sm:$0xff]  ;;  %v18_v6 = vld [vmem:[%s212_s1 + $0x10] sm:$0xff] }
   0x3   :  { %133 = vmatpush3.msra.mxu0 %v23_v0  ;;  %148 = vmatprep.mubr.msk.f32.mxu0 %vm31_vm0, %v14_v3  ;;  %v20_v4 = vld [vmem:[%s212_s1 + $0x20] sm:$0xff]  ;;  %v17_v7 = vld [vmem:[%s212_s1 + $0x8] sm:$0xff] }
   0x4   :  { %134 = vmatprep.subr.mxu0 %v22_v1  ;;  %v16_v8 = vld [vmem:[%s212_s1] sm:$0xff]  ;;  %v15_v9 = vld [vmem:[%s213_s0 + $0x8] sm:$0xff] }
   0x5   :  { %135 = vmatpush3.msra.mxu0 %v22_v1  ;;  %v119_v10 = vld [vmem:[%s214_s2] ss:$0 sm:$0xff] }
   0x6   :  { %136 = vmatprep.subr.mxu0 %v21_v2 }
   0x7   :  { %137 = vmatpush3.msra.mxu0 %v21_v2 }
   0x8   :  { %138 = vmatprep.subr.mxu0 %v20_v4 }
   0x9   :  { %139 = vmatpush3.msra.mxu0 %v20_v4 }
   0xa   :  { %140 = vmatprep.subr.mxu0 %v19_v5 }
   0xb   :  { %141 = vmatpush3.msra.mxu0 %v19_v5 }
   0xc   :  { %142 = vmatprep.subr.mxu0 %v18_v6 }
   0xd   :  { %143 = vmatpush3.msra.mxu0 %v18_v6 }
   0xe   :  { %144 = vmatprep.subr.mxu0 %v17_v7 }
   0xf   :  { %145 = vmatpush3.msra.mxu0 %v17_v7 }
  0x10   :  { %146 = vmatprep.subr.mxu0 %v16_v8 }
  0x11   :  { %147 = vmatpush3.msra.mxu0 %v16_v8 }
  0x12   :  { %149 = vmatmul.mubr.msk.f32.vlgmr.msra.gmra.mxu0 %vm31_vm0, %v15_v9 }
  0xd2   :  { %v150_v11 = vpop.f32.mrf.mxu0 }
  0xd3   :  { %v110_v12 = vadd.f32 %v150_v11, %v119_v10 }
  0xd4   :  { %v104_v13 = vpop.f32.mrf.mxu0 }
  0xd5   :  { %114 = vst [vmem:[%s215_s3 + $0x8] sm:$0xff] %v110_v12  ;;  %v105_v14 = vadd.f32 %v119_v10, %v104_v13 }
  0xd7   :  { %113 = vst [vmem:[%s215_s3] sm:$0xff] %v105_v14 }

// kernel: _lambda_.10
= control target key start
LH: loop header
LB: loop body
LE: loop exit
PB: predicated region body
PF: predicated region fallthrough
CT: control target
= control target key end

     0   :  { %s4756_s0 = inlined_call_operand.vmem [shape: f32[2,64], index: 0, kind: input, shape index: {}]   ;;  %s4757_s1 = inlined_call_operand.vmem [shape: f32[1,64], index: 1, kind: input, shape index: {}]   ;;  %s4758_s2 = inlined_call_operand.hbm [shape: f32[1,64], index: 2, kind: input, shape index: {}]   ;;  %s4759_s3 = inlined_call_operand.hbm [shape: f32[1,64], index: 3, kind: input, shape index: {}]   ;;  %s4760_s4 = inlined_call_operand.vmem [shape: f32[6,64,64], index: 4, kind: input, shape index: {}]   ;;  %s4761_s5 = inlined_call_operand.vmem [shape: f32[6,1,64], index: 5, kind: input, shape index: {}]   ;;  %s4762_s6 = inlined_call_operand.vmem [shape: f32[6,64,64], index: 6, kind: input, shape index: {}]   ;;  %s4763_s7 = inlined_call_operand.vmem [shape: f32[6,1,64], index: 7, kind: input, shape index: {}]   ;;  %s4764_s8 = inlined_call_operand.vmem [shape: f32[6,1,64], index: 8, kind: input, shape index: {}]   ;;  %s4765_s9 = inlined_call_operand.vmem [shape: f32[6,1,64], index: 9, kind: input, shape index: {}]   ;;  %s4766_s10 = inlined_call_operand.vmem [shape: f32[6,64,64], index: 10, kind: input, shape index: {}]   ;;  %s4767_s11 = inlined_call_operand.vmem [shape: f32[6,1,64], index: 11, kind: input, shape index: {}]   ;;  %s4768_s12 = inlined_call_operand.vmem [shape: f32[6,64,64], index: 12, kind: input, shape index: {}]   ;;  %s4769_s13 = inlined_call_operand.vmem [shape: f32[6,1,64], index: 13, kind: input, shape index: {}]   ;;  %s4770_s14 = inlined_call_operand.vmem [shape: f32[6,1,64], index: 14, kind: input, shape index: {}]   ;;  %s4771_s15 = inlined_call_operand.vmem [shape: f32[6,1,64], index: 15, kind: input, shape index: {}]   ;;  %s4772_s16 = inlined_call_operand.vmem [shape: f32[6,64,2048], index: 16, kind: input, shape index: {}]   ;;  %s4773_s17 = inlined_call_operand.vmem [shape: f32[6,1,2048], index: 17, kind: input, shape index: {}]   ;;  %s4774_s18 = inlined_call_operand.vmem [shape: f32[6,2048,64], index: 18, kind: input, shape index: {}]   ;;  %s4775_s19 = inlined_call_operand.vmem [shape: f32[6,1,64], index: 19, kind: input, shape index: {}]   ;;  %s4776_s20 = inlined_call_operand.vmem [shape: f32[6,1,64], index: 20, kind: input, shape index: {}]   ;;  %s4777_s21 = inlined_call_operand.vmem [shape: f32[6,1,64], index: 21, kind: input, shape index: {}]   ;;  %s4778_s22 = inlined_call_operand.vmem [shape: f32[2,64], index: 22, kind: output, shape index: {}]  }
   0x1   :  { %4783 = sst [smem:[#allocation10_spill]] %s4756_s0 }
   0x2   :  { %4784 = sst [smem:[#allocation11_spill]] %s4757_s1 }
   0x3   :  { %4785 = sst [smem:[#allocation12_spill]] %s4758_s2 }
   0x4   :  { %4786 = sst [smem:[#allocation13_spill]] %s4759_s3 }
   0x5   :  { %4787 = sst [smem:[#allocation14_spill]] %s4760_s4 }
   0x6   :  { %4788 = sst [smem:[#allocation15_spill]] %s4761_s5 }
   0x7   :  { %4789 = sst [smem:[#allocation16_spill]] %s4762_s6 }
   0x8   :  { %4790 = sst [smem:[#allocation17_spill]] %s4765_s9 }
   0x9   :  { %4791 = sst [smem:[#allocation18_spill]] %s4766_s10 }
   0xa   :  { %4792 = sst [smem:[#allocation19_spill]] %s4768_s12 }
   0xb   :  { %4793 = sst [smem:[#allocation20_spill]] %s4770_s14 }
   0xc   :  { %4794 = sst [smem:[#allocation21_spill]] %s4771_s15 }
   0xd   :  { %4795 = sst [smem:[#allocation22_spill]] %s4772_s16 }
   0xe   :  { %4796 = sst [smem:[#allocation23_spill]] %s4773_s17 }
   0xf   :  { %4797 = sst [smem:[#allocation24_spill]] %s4775_s19 }
  0x10   :  { %4798 = sst [smem:[#allocation25_spill]] %s4776_s20 }
  0x11   :  { %4799 = sst [smem:[#allocation26_spill]] %s4777_s21 }
  0x12   :  { %4800 = sst [smem:[#allocation27_spill]] %s4778_s22 }
  0x13   :  { %27 = vsyncpa [#allocation3], 0 }
  0x14   :  { %28 = vsyncpa [#allocation5], 0  ;;  %s3944_s3 = smov 0  }
  0x15 LB: > { %4801 = sst [smem:[#allocation8_spill]] %s3823_s3  ;;  %s3950_s28 = sadd.s32 4294967295, %s3823_s3   ;;  %s3823_s3 = sphi %s3944_s3, %s34_s3  }
  0x16   : > { %4802 = sst [smem:[#allocation9_spill]] %s3950_s28  ;;  %p3276_p0 = scmp.ge.s32.totalorder %s3823_s3, 1 }
  0x17   : > { %p612_p1 = scmp.lt.s32.totalorder %s3823_s3, 7  ;;  %p4779_p3 = scmp.eq.s32.totalorder %s3950_s28, 0 }
  0x18   : > { %s3825_s30 = smov [#allocation2]   ;;  %s3826_s0 = smov [#allocation4]  }
  0x19   : > { %p3956_p4 = pnand %p3276_p0, %p612_p1  ;;  %s631_s4 = sshll.u32 %s3825_s30, 4  ;;  %s632_s4 = int_to_ptr.vmem [resolvable:$true] %s631_s4 }
  0x1a   : > { %s642_s23 = sshll.u32 %s3826_s0, 4  ;;  %s3768_s5 = scalar_lea.vmem %s632_s4, 16  ;;  %s643_s23 = int_to_ptr.vmem [resolvable:$true] %s642_s23 }
  0x1b   : > { %p3726_p5 = pneg %p3956_p4  ;;  %p3769_p8 = scmp.ne.s32.totalorder %s632_s4, %s3768_s5 }
  0x1c   : > { %s3775_s24 = scalar_lea.vmem %s632_s4, 32  ;;  %p3776_p11 = scmp.lt.s32.totalorder %s632_s4, %s632_s4 }
  0x1d   : > { %p3964_p6 = pnand %p4779_p3, %p3726_p5  ;;  %p3777_p12 = scmp.lt.s32.totalorder %s3775_s24, %s3768_s5 }
  0x1f   : > { %p3759_p7 = pneg %p3964_p6  ;;  %p3778_p13 = por %p3777_p12, %p3776_p11 }
  0x21   : > { %p3771_p9 = pnand %p3769_p8, %p3759_p7 }
  0x23   : > { %p3772_p10 = pneg %p3771_p9 }
  0x25   : > { %p3779_p0 = pnand %p3778_p13, %p3772_p10 }
  0x27   : > { %3782 = shalt.err (!%p3779_p0)
}
  0x28   : > { %s4805_s26 = sld [smem:[#allocation12_spill]]  ;;  %s3794_s2 = scalar_lea.vmem %s643_s23, 16 }
  0x29   : > { %p3795_p1 = scmp.ne.s32.totalorder %s643_s23, %s3794_s2  ;;  %s3801_s27 = scalar_lea.vmem %s643_s23, 32 }
  0x2a   : > { %p3802_p9 = scmp.lt.s32.totalorder %s643_s23, %s643_s23  ;;  %p3803_p2 = scmp.lt.s32.totalorder %s3801_s27, %s3794_s2 }
  0x2b   : > { %p3797_p5 = pnand %p3795_p1, %p3759_p7 }
  0x2c   : > { %p3804_p3 = por %p3803_p2, %p3802_p9 }
  0x2d   : > { %p3798_p8 = pneg %p3797_p5 }
  0x2e   : > { %3729 = dma.hbm_to_vmem [thread:$0]  (!%p3964_p6), %s4805_s26, 16, %s632_s4, [#allocation3]  }
  0x2f   : > { %p3805_p11 = pnand %p3804_p3, %p3798_p8 }
  0x31   : > { %3808 = shalt.err (!%p3805_p11)
}
  0x32   : > { %s4806_s5 = sld [smem:[#allocation13_spill]]  ;;  %p4807_p10 = scmp.eq.s32.totalorder (!%p3956_p4), %s3950_s28, 0 }
  0x34   : > { %776 = sbr.rel (%p3956_p4) target bundleno = 1932 (0x78c), region = 108 }
  0x38   : > { %3732 = dma.hbm_to_vmem [thread:$0]  (!%p3964_p6), %s4806_s5, 16, %s643_s23, [#allocation5]  }
  0x39   : > { %3814 = dma.done.wait (%p4807_p10), [#allocation3], 16   ;;  %p4808_p7 = pmov %p4807_p10 }
  0x3b   : > { %3816 = vsyncadd (%p4808_p7), [#allocation3], 4294967280  ;;  %p4809_p12 = pmov %p4808_p7 }
  0x3c   : > { %p4810_p2 = pmov %p4808_p7 }
  0x3d   : > { %3818 = dma.done.wait (%p4809_p12), [#allocation5], 16  }
  0x3e   : > { %3820 = vsyncadd (%p4810_p2), [#allocation5], 4294967280  ;;  %p899_p3 = scmp.lt.s32.totalorder %s3950_s28, 5  ;;  %s4812_s2 = sld [smem:[#allocation14_spill]] }
  0x3f   : > { %s4813_s5 = sld [smem:[#allocation16_spill]] }
  0x40   : > { %s3998_s4 = scalar_select %p899_p3, %s3950_s28, 5 }
  0x41   : > { %s4815_s10 = sld [smem:[#allocation18_spill]] }
  0x42   : > { %s3320_s29 = sshll.u32 %s3998_s4, 6  ;;  %s4816_s12 = sld [smem:[#allocation19_spill]] }
  0x43   : > { %s3324_s9 = sshll.u32 %s3998_s4, 10  ;;  %s4819_s16 = sld [smem:[#allocation22_spill]] }
  0x44   : > { %s4008_s27 = scalar_lea.vmem %s4812_s2, %s3320_s29  ;;  %s3293_s21 = sshll.u32 %s3998_s4, 4 }
  0x45   : > { %s4013_s3 = scalar_lea.vmem %s4813_s5, %s3320_s29  ;;  %s4820_s17 = sld [smem:[#allocation23_spill]] }
  0x46   : > { %s3325_s20 = sshll.u32 %s3998_s4, 11  ;;  %s4823_s14 = sld [smem:[#allocation26_spill]] }
  0x47   : > { %s4030_s30 = scalar_lea.vmem %s4815_s10, %s3320_s29  ;;  %s4069_s24 = scalar_lea.vmem %s4774_s18, %s3325_s20 }
  0x48   : > { %s4039_s19 = scalar_lea.vmem %s4816_s12, %s3320_s29  ;;  %s4821_s10 = sld [smem:[#allocation24_spill]] }
  0x49   : > { %s4057_s22 = scalar_lea.vmem %s4819_s16, %s3324_s9  ;;  %s4822_s9 = sld [smem:[#allocation25_spill]] }
  0x4b   : > { %s4063_s23 = scalar_lea.vmem %s4820_s17, %s3293_s21  ;;  %s4824_s21 = sld [smem:[#allocation9_spill]] }
  0x4c   : > { %s965_s29 = scalar_lea.vmem %s4823_s14, %s3998_s4 }
  0x4e   : > { %s959_s6 = scalar_lea.vmem %s4821_s10, %s3998_s4 }
  0x4f   : > { %s962_s5 = scalar_lea.vmem %s4822_s9, %s3998_s4 }
  0x51   : > { %p4825_p4 = scmp.ne.s32.totalorder %s4824_s21, 0 }
  0x52   : > { %s4826_s1 = sld [smem:[#allocation10_spill]] (!%p4825_p4) }
  0x53   : > { %969 = sbr.rel (%p4825_p4) target bundleno = 90 (0x5a), region = 120  ;;  %s4827_s26 = sld [smem:[#allocation27_spill]] (!%p4825_p4) }
  0x58   : > { %v970_v0 = vld [vmem:[%s4826_s1] sm:$0x3]  ;;  %vm971_vm0 = vcmask 517120  }
  0x59   : > { %972 = vst.msk [vmem:[%s4827_s26] sm:$0x3] %vm971_vm0, %v970_v0 }
  0x5a PF: > { %v1001_v1 = vld [vmem:[%s4008_s27 + $0x38] sm:$0xff]  ;;  %s4828_s14 = sld [smem:[#allocation11_spill]]  ;;  %vm977_vm1 = vcmask 516096   ;;  %v3827_v3 = vmov 0.0   ;;  %v1000_v5 = vld [vmem:[%s4008_s27 + $0x30] sm:$0xff]  ;;  %v999_v6 = vld [vmem:[%s4008_s27 + $0x28] sm:$0xff]  ;;  %s4832_s21 = scalar_lea.vmem %s4763_s7, %s3998_s4 }
  0x5b   : > { %3642 = vmatprep.subr.mxu0 %v3827_v3  ;;  %3661 = vmatprep.subr.mxu1 %v3827_v3  ;;  %vm3828_vm2 = vmmov 0   ;;  %v998_v7 = vld [vmem:[%s4008_s27 + $0x20] sm:$0xff]  ;;  %v997_v8 = vld [vmem:[%s4008_s27 + $0x18] sm:$0xff]  ;;  %v996_v9 = vld [vmem:[%s4008_s27 + $0x10] sm:$0xff]  ;;  %s4829_s17 = sld [smem:[#allocation27_spill]]  ;;  %vm1009_vm3 = vcmask 523264   ;;  %s4833_s20 = scalar_lea.vmem %s4767_s11, %s3998_s4 }
  0x5c   : > { %3643 = vmatpush3.msra.mxu0 %v1001_v1  ;;  %3658 = vmatprep.mubr.msk.f32.mxu0 %vm3828_vm2, %v3827_v3  ;;  %v995_v10 = vld [vmem:[%s4008_s27 + $0x8] sm:$0xff]  ;;  %v994_v11 = vld [vmem:[%s4008_s27] sm:$0xff]  ;;  %v1090_v13 = vld [vmem:[%s4013_s3 + $0x38] sm:$0xff]  ;;  %s4830_s2 = sld [smem:[#allocation15_spill]]  ;;  %vm1174_vm4 = vcmask 517120   ;;  %s4834_s26 = scalar_lea.vmem %s4769_s13, %s3998_s4 }
  0x5d   : > { %3644 = vmatprep.subr.mxu0 %v3827_v3  ;;  %3677 = vmatprep.mubr.msk.f32.mxu1 %vm3828_vm2, %v3827_v3  ;;  %v1089_v14 = vld [vmem:[%s4013_s3 + $0x30] sm:$0xff]  ;;  %v1088_v15 = vld [vmem:[%s4013_s3 + $0x28] sm:$0xff]  ;;  %v1087_v16 = vld [vmem:[%s4013_s3 + $0x20] sm:$0xff]  ;;  %s4840_s1 = sld [smem:[#allocation21_spill]] }
  0x5e   : > { %3645 = vmatpush3.msra.mxu0 %v1000_v5  ;;  %3662 = vmatpush3.msra.mxu1 %v1090_v13  ;;  %v1086_v17 = vld [vmem:[%s4013_s3 + $0x18] sm:$0xff]  ;;  %v1085_v18 = vld [vmem:[%s4013_s3 + $0x10] sm:$0xff]  ;;  %v1084_v19 = vld [vmem:[%s4013_s3 + $0x8] sm:$0xff] }
  0x5f   : > { %3646 = vmatprep.subr.mxu0 %v3827_v3  ;;  %3663 = vmatprep.subr.mxu1 %v3827_v3  ;;  %v1083_v20 = vld [vmem:[%s4013_s3] sm:$0xff]  ;;  %v1209_v26 = vld [vmem:[%s4030_s30 + $0x38] sm:$0xff]  ;;  %v1208_v27 = vld [vmem:[%s4030_s30 + $0x30] sm:$0xff]  ;;  %s4836_s3 = sld [smem:[#allocation17_spill]] }
  0x60   : > { %v4095_v2 = vld [vmem:[%s4828_s14] sm:$0x1]  ;;  %3647 = vmatpush3.msra.mxu0 %v999_v6  ;;  %3664 = vmatpush3.msra.mxu1 %v1089_v14  ;;  %v1207_v28 = vld [vmem:[%s4030_s30 + $0x28] sm:$0xff]  ;;  %v1205_v30 = vld [vmem:[%s4030_s30 + $0x18] sm:$0xff]  ;;  %s4835_s14 = scalar_lea.vmem %s4764_s8, %s3998_s4 }
  0x61   : > { %v978_v4 = vsel %vm977_vm1, %v4095_v2, 0.0  ;;  %3648 = vmatprep.subr.mxu0 %v3827_v3  ;;  %v4121_v12 = vld [vmem:[%s4829_s17] sm:$0x3]  ;;  %3665 = vmatprep.subr.mxu1 %v3827_v3  ;;  %v1204_v31 = vld [vmem:[%s4030_s30 + $0x10] sm:$0xff]  ;;  %v1203_v32 = vld [vmem:[%s4030_s30 + $0x8] sm:$0xff] }
  0x62   : > { %979 = vadd.xlane.f32.xlu0 %v978_v4  ;;  %3649 = vmatpush3.msra.mxu0 %v998_v7  ;;  %v1206_v29 = vld [vmem:[%s4030_s30 + $0x20] sm:$0xff]  ;;  %s4831_s0 = scalar_lea.vmem %s4830_s2, %s3998_s4  ;;  %v1291_v38 = vld [vmem:[%s4039_s19 + $0x38] sm:$0xff]  ;;  %v1290_v39 = vld [vmem:[%s4039_s19 + $0x30] sm:$0xff] }
  0x63   : > { %3650 = vmatprep.subr.mxu0 %v3827_v3  ;;  %3666 = vmatpush3.msra.mxu1 %v1088_v15  ;;  %v1202_v33 = vld [vmem:[%s4030_s30] sm:$0xff]  ;;  %v1289_v41 = vld [vmem:[%s4039_s19 + $0x28] sm:$0xff]  ;;  %v1287_v45 = vld [vmem:[%s4039_s19 + $0x18] sm:$0xff]  ;;  %s4838_s30 = sld [smem:[#allocation20_spill]] }
  0x64   : > { %3651 = vmatpush3.msra.mxu0 %v997_v8  ;;  %3667 = vmatprep.subr.mxu1 %v3827_v3  ;;  %v3297_v34 = vld [vmem:[%s4831_s0] ss:$0 sm:$0xff]  ;;  %v1286_v46 = vld [vmem:[%s4039_s19 + $0x10] sm:$0xff]  ;;  %v976_v50 = vld [vmem:[#allocation4] sm:$0x1] }
  0x65   : > { %3652 = vmatprep.subr.mxu0 %v3827_v3  ;;  %3668 = vmatpush3.msra.mxu1 %v1087_v16  ;;  %v1288_v43 = vld [vmem:[%s4039_s19 + $0x20] sm:$0xff]  ;;  %v1285_v53 = vld [vmem:[%s4039_s19 + $0x8] sm:$0xff]  ;;  %s4837_s27 = scalar_lea.vmem %s4836_s3, %s3998_s4 }
  0x66   : > { %3653 = vmatpush3.msra.mxu0 %v996_v9  ;;  %3669 = vmatprep.subr.mxu1 %v3827_v3  ;;  %v975_v48 = vld [vmem:[#allocation2] sm:$0x1] }
  0x67   : > { %3654 = vmatprep.subr.mxu0 %v3827_v3  ;;  %3670 = vmatpush3.msra.mxu1 %v1086_v17  ;;  %v1284_v54 = vld [vmem:[%s4039_s19] sm:$0xff] }
  0x68   : > { %3655 = vmatpush3.msra.mxu0 %v995_v10  ;;  %3671 = vmatprep.subr.mxu1 %v3827_v3  ;;  %v3299_v55 = vld [vmem:[%s4832_s21] ss:$0 sm:$0xff] }
  0x69   : > { %3656 = vmatprep.subr.mxu0 %v3827_v3  ;;  %3672 = vmatpush3.msra.mxu1 %v1085_v18  ;;  %v1210_v61 = vld [vmem:[%s4833_s20] sm:$0x1]  ;;  %s4839_s9 = scalar_lea.vmem %s4838_s30, %s3998_s4  ;;  %s4841_s20 = scalar_lea.vmem %s4840_s1, %s3998_s4 }
  0x6a   : > { %3657 = vmatpush3.msra.mxu0 %v994_v11  ;;  %3673 = vmatprep.subr.mxu1 %v3827_v3  ;;  %v1292_v14 = vld [vmem:[%s4834_s26] sm:$0x1] }
  0x6b   : > { %3659 = vmatmul.mubr.msk.f32.vlgmr.msra.gmra.mxu0 %vm1009_vm3, %v4121_v12  ;;  %3680 = vmatprep.subr.mxu0 %v3827_v3  ;;  %v3301_v16 = vld [vmem:[%s4835_s14] ss:$0 sm:$0xff] }
  0x6c   : > { %3696 = vmatprep.mubr.msk.f32.mxu0 %vm3828_vm2, %v3827_v3  ;;  %3674 = vmatpush3.msra.mxu1 %v1084_v19 }
  0x6d   : > { %3675 = vmatprep.subr.mxu1 %v3827_v3  ;;  %3681 = vmatpush3.msra.mxu0 %v1209_v26 }
  0x6e   : > { %3676 = vmatpush3.msra.mxu1 %v1083_v20  ;;  %3682 = vmatprep.subr.mxu0 %v3827_v3  ;;  %v3302_v20 = vld [vmem:[%s4837_s27] ss:$0 sm:$0xff] }
  0x6f   : > { %3699 = vmatprep.subr.mxu1 %v3827_v3  ;;  %3683 = vmatpush3.msra.mxu0 %v1208_v27 }
  0x70   : > { %3684 = vmatprep.subr.mxu0 %v3827_v3 }
  0x71   : > { %3685 = vmatpush3.msra.mxu0 %v1207_v28 }
  0x72   : > { %3686 = vmatprep.subr.mxu0 %v3827_v3 }
  0x73   : > { %3687 = vmatpush3.msra.mxu0 %v1206_v29 }
  0x74   : > { %3688 = vmatprep.subr.mxu0 %v3827_v3 }
  0x75   : > { %3689 = vmatpush3.msra.mxu0 %v1205_v30 }
  0x76   : > { %3690 = vmatprep.subr.mxu0 %v3827_v3 }
  0x77   : > { %3691 = vmatpush3.msra.mxu0 %v1204_v31  ;;  %v1513_v31 = vld [vmem:[%s4057_s22 + $0x388] sm:$0xff] }
  0x78   : > { %3692 = vmatprep.subr.mxu0 %v3827_v3 }
  0x79   : > { %3693 = vmatpush3.msra.mxu0 %v1203_v32  ;;  %v1515_v32 = vld [vmem:[%s4057_s22 + $0x398] sm:$0xff] }
  0x7a   : > { %3694 = vmatprep.subr.mxu0 %v3827_v3 }
  0x7b   : > { %3695 = vmatpush3.msra.mxu0 %v1202_v33  ;;  %v1512_v33 = vld [vmem:[%s4057_s22 + $0x380] sm:$0xff] }
  0x7c   : > { %1631 = vmatprep.subr.mxu0 %v1513_v31  ;;  %v1437_v31 = vld [vmem:[%s4057_s22 + $0x128] sm:$0xff] }
  0xeb   : > { %v980_v21 = vpop.xlane.xlu0 %979 }
  0xec   : > { %v982_v22 = vmul.f32 0.015625, %v980_v21 }
  0xee   : > { %v983_v23 = vsub.f32 %v4095_v2, %v982_v22 }
  0xf0   : > { %v984_v24 = vmul.f32 %v983_v23, %v983_v23 }
  0xf2   : > { %v985_v25 = vsel %vm977_vm1, %v984_v24, 0.0 }
  0xf3   : > { %986 = vadd.xlane.f32.xlu0 %v985_v25 }
 0x12b   : > { %v1079_v35 = vpop.f32.mrf.mxu0 }
 0x12c   : > { %v1080_v36 = vadd.f32 %v3297_v34, %v1079_v35  ;;  %v1514_v34 = vld [vmem:[%s4057_s22 + $0x390] sm:$0xff]  ;;  %v1497_v35 = vld [vmem:[%s4057_s22 + $0x308] sm:$0xff] }
 0x12d   : > { %v3660_v37 = vpop.f32.mrf.mxu0 }
 0x12e   : > { %3678 = vmatmul.mubr.msk.f32.vlgmr.msra.gmra.mxu1 %vm1009_vm3, %v1080_v36  ;;  %v1499_v36 = vld [vmem:[%s4057_s22 + $0x318] sm:$0xff]  ;;  %v1496_v37 = vld [vmem:[%s4057_s22 + $0x300] sm:$0xff] }
 0x12f   : > { %3715 = vmatprep.mubr.msk.f32.mxu1 %vm3828_vm2, %v3827_v3  ;;  %3700 = vmatpush3.msra.mxu1 %v1291_v38  ;;  %v1498_v38 = vld [vmem:[%s4057_s22 + $0x310] sm:$0xff] }
 0x130   : > { %3701 = vmatprep.subr.mxu1 %v3827_v3 }
 0x131   : > { %3702 = vmatpush3.msra.mxu1 %v1290_v39  ;;  %v1481_v39 = vld [vmem:[%s4057_s22 + $0x288] sm:$0xff] }
 0x132   : > { %3703 = vmatprep.subr.mxu1 %v3827_v3 }
 0x133   : > { %3704 = vmatpush3.msra.mxu1 %v1289_v41  ;;  %v1480_v41 = vld [vmem:[%s4057_s22 + $0x280] sm:$0xff] }
 0x134   : > { %3705 = vmatprep.subr.mxu1 %v3827_v3 }
 0x135   : > { %3706 = vmatpush3.msra.mxu1 %v1288_v43  ;;  %v1465_v43 = vld [vmem:[%s4057_s22 + $0x208] sm:$0xff] }
 0x136   : > { %3707 = vmatprep.subr.mxu1 %v3827_v3 }
 0x137   : > { %3708 = vmatpush3.msra.mxu1 %v1287_v45  ;;  %v1464_v45 = vld [vmem:[%s4057_s22 + $0x200] sm:$0xff] }
 0x138   : > { %3709 = vmatprep.subr.mxu1 %v3827_v3 }
 0x139   : > { %3710 = vmatpush3.msra.mxu1 %v1286_v46  ;;  %v1466_v46 = vld [vmem:[%s4057_s22 + $0x210] sm:$0xff] }
 0x13a   : > { %3711 = vmatprep.subr.mxu1 %v3827_v3 }
 0x13b   : > { %3712 = vmatpush3.msra.mxu1 %v1285_v53  ;;  %v1432_v53 = vld [vmem:[%s4057_s22 + $0x100] sm:$0xff] }
 0x13c   : > { %3713 = vmatprep.subr.mxu1 %v3827_v3 }
 0x13d   : > { %3714 = vmatpush3.msra.mxu1 %v1284_v54  ;;  %v1434_v54 = vld [vmem:[%s4057_s22 + $0x110] sm:$0xff] }
 0x13e   : > { %1702 = vmatprep.subr.mxu1 %v1515_v32  ;;  %v1439_v32 = vld [vmem:[%s4057_s22 + $0x138] sm:$0xff] }
 0x17c   : > { %v987_v40 = vpop.xlane.xlu0 %986 }
 0x17d   : > { %v988_v42 = vmul.f32 0.015625, %v987_v40  ;;  %v1483_v40 = vld [vmem:[%s4057_s22 + $0x298] sm:$0xff] }
 0x17f   : > { %v989_v44 = vadd.f32 1e-05, %v988_v42  ;;  %v1482_v42 = vld [vmem:[%s4057_s22 + $0x290] sm:$0xff] }
 0x181   : > { %3749 = vrsqrt.f32 %v989_v44  ;;  %v1467_v44 = vld [vmem:[%s4057_s22 + $0x218] sm:$0xff] }
 0x18e   : > { %v3750_v47 = vpop.eup %3749 }
 0x18f   : > { %v991_v49 = vmul.f32 %v3750_v47, %v983_v23  ;;  %v1449_v47 = vld [vmem:[%s4057_s22 + $0x188] sm:$0xff] }
 0x191   : > { %v992_v51 = vmul.f32 %v991_v49, %v975_v48  ;;  %v1451_v48 = vld [vmem:[%s4057_s22 + $0x198] sm:$0xff]  ;;  %v1448_v49 = vld [vmem:[%s4057_s22 + $0x180] sm:$0xff] }
 0x193   : > { %v993_v52 = vadd.f32 %v992_v51, %v976_v50  ;;  %v1450_v50 = vld [vmem:[%s4057_s22 + $0x190] sm:$0xff]  ;;  %v1433_v51 = vld [vmem:[%s4057_s22 + $0x108] sm:$0xff] }
 0x195   : > { %3697 = vmatmul.mubr.msk.f32.vlgmr.msra.gmra.mxu0 %vm1009_vm3, %v993_v52  ;;  %v1435_v52 = vld [vmem:[%s4057_s22 + $0x118] sm:$0xff] }
 0x196   : > { %1679 = vmatprep.mubr.f32.mxu0 %v3827_v3  ;;  %1632 = vmatpush1.msra.mxu0 %v1512_v33  ;;  %v1436_v33 = vld [vmem:[%s4057_s22 + $0x120] sm:$0xff] }
 0x197   : > { %1633 = vmatprep.subr.mxu0 %v1497_v35  ;;  %v1421_v35 = vld [vmem:[%s4057_s22 + $0xa8] sm:$0xff] }
 0x198   : > { %1634 = vmatpush1.msra.mxu0 %v1496_v37  ;;  %v1420_v37 = vld [vmem:[%s4057_s22 + $0xa0] sm:$0xff] }
 0x199   : > { %1635 = vmatprep.subr.mxu0 %v1481_v39  ;;  %v1405_v39 = vld [vmem:[%s4057_s22 + $0x28] sm:$0xff] }
 0x19a   : > { %1636 = vmatpush1.msra.mxu0 %v1480_v41  ;;  %v1404_v41 = vld [vmem:[%s4057_s22 + $0x20] sm:$0xff] }
 0x19b   : > { %1637 = vmatprep.subr.mxu0 %v1465_v43  ;;  %v1521_v43 = vld [vmem:[%s4057_s22 + $0x3c8] sm:$0xff] }
 0x19c   : > { %1638 = vmatpush1.msra.mxu0 %v1464_v45  ;;  %v1520_v45 = vld [vmem:[%s4057_s22 + $0x3c0] sm:$0xff] }
 0x19d   : > { %1639 = vmatprep.subr.mxu0 %v1449_v47  ;;  %v1505_v47 = vld [vmem:[%s4057_s22 + $0x348] sm:$0xff] }
 0x19e   : > { %1640 = vmatpush1.msra.mxu0 %v1448_v49  ;;  %v1504_v49 = vld [vmem:[%s4057_s22 + $0x340] sm:$0xff] }
 0x19f   : > { %1641 = vmatprep.subr.mxu0 %v1433_v51  ;;  %v1489_v51 = vld [vmem:[%s4057_s22 + $0x2c8] sm:$0xff] }
 0x1a0   : > { %1642 = vmatpush1.msra.mxu0 %v1432_v53  ;;  %v1488_v53 = vld [vmem:[%s4057_s22 + $0x2c0] sm:$0xff] }
 0x1ee   : > { %v1167_v56 = vpop.f32.mrf.mxu1 }
 0x1ef   : > { %v1168_v57 = vadd.f32 %v3299_v55, %v1167_v56  ;;  %v1417_v55 = vld [vmem:[%s4057_s22 + $0x88] sm:$0xff]  ;;  %v1419_v56 = vld [vmem:[%s4057_s22 + $0x98] sm:$0xff] }
 0x1f0   : > { %v3679_v58 = vpop.f32.mrf.mxu1  ;;  %1643 = vmatprep.subr.mxu0 %v1417_v55  ;;  %v1473_v55 = vld [vmem:[%s4057_s22 + $0x248] sm:$0xff] }
 0x1f1   : > { %v1171_v59 = vadd.f32 %v1168_v57, %v4121_v12  ;;  %v1366_v12 = vlaneseq  ;;  %v1416_v57 = vld [vmem:[%s4057_s22 + $0x80] sm:$0xff]  ;;  %v1418_v58 = vld [vmem:[%s4057_s22 + $0x90] sm:$0xff] }
 0x1f2   : > { %1644 = vmatpush1.msra.mxu0 %v1416_v57  ;;  %v1472_v57 = vld [vmem:[%s4057_s22 + $0x240] sm:$0xff] }
 0x1f3   : > { %v1175_v60 = vsel %vm1174_vm4, %v1171_v59, 0.0  ;;  %v4202_v13 = vshrl.u32 %v1366_v12, 7  ;;  %v1518_v12 = vld [vmem:[%s4057_s22 + $0x3b0] sm:$0xff] }
 0x1f4   : > { %1176 = vadd.xlane.f32.xlu1 %v1175_v60  ;;  %v1403_v60 = vld [vmem:[%s4057_s22 + $0x18] sm:$0xff] }
 0x1f5   : > { %v4215_v18 = vsub.s32 0, %v4202_v13 }
 0x255   : > { %v1280_v62 = vpop.f32.mrf.mxu0 }
 0x256   : > { %v1281_v63 = vadd.f32 %v1280_v62, %v1210_v61  ;;  %v1400_v61 = vld [vmem:[%s4057_s22] sm:$0xff]  ;;  %v1402_v62 = vld [vmem:[%s4057_s22 + $0x10] sm:$0xff] }
 0x257   : > { %v3698_v0 = vpop.f32.mrf.mxu0 }
 0x258   : > { %3716 = vmatmul.mubr.msk.f32.vlgmr.msra.gmra.mxu1 %vm1009_vm3, %v1281_v63  ;;  %v1517_v63 = vld [vmem:[%s4057_s22 + $0x3a8] sm:$0xff]  ;;  %v1519_v0 = vld [vmem:[%s4057_s22 + $0x3b8] sm:$0xff] }
 0x259   : > { %1750 = vmatprep.mubr.f32.mxu1 %v3827_v3  ;;  %1703 = vmatpush1.msra.mxu1 %v1514_v34  ;;  %v1438_v34 = vld [vmem:[%s4057_s22 + $0x130] sm:$0xff] }
 0x25a   : > { %1704 = vmatprep.subr.mxu1 %v1499_v36  ;;  %v1423_v36 = vld [vmem:[%s4057_s22 + $0xb8] sm:$0xff] }
 0x25b   : > { %1705 = vmatpush1.msra.mxu1 %v1498_v38  ;;  %v1422_v38 = vld [vmem:[%s4057_s22 + $0xb0] sm:$0xff] }
 0x25c   : > { %1706 = vmatprep.subr.mxu1 %v1483_v40  ;;  %v1407_v40 = vld [vmem:[%s4057_s22 + $0x38] sm:$0xff] }
 0x25d   : > { %1707 = vmatpush1.msra.mxu1 %v1482_v42  ;;  %v1406_v42 = vld [vmem:[%s4057_s22 + $0x30] sm:$0xff] }
 0x25e   : > { %1708 = vmatprep.subr.mxu1 %v1467_v44  ;;  %v1523_v44 = vld [vmem:[%s4057_s22 + $0x3d8] sm:$0xff] }
 0x25f   : > { %1709 = vmatpush1.msra.mxu1 %v1466_v46  ;;  %v1522_v46 = vld [vmem:[%s4057_s22 + $0x3d0] sm:$0xff] }
 0x260   : > { %1710 = vmatprep.subr.mxu1 %v1451_v48  ;;  %v1507_v48 = vld [vmem:[%s4057_s22 + $0x358] sm:$0xff] }
 0x261   : > { %1711 = vmatpush1.msra.mxu1 %v1450_v50  ;;  %v1506_v50 = vld [vmem:[%s4057_s22 + $0x350] sm:$0xff] }
 0x262   : > { %1712 = vmatprep.subr.mxu1 %v1435_v52  ;;  %v1491_v52 = vld [vmem:[%s4057_s22 + $0x2d8] sm:$0xff] }
 0x263   : > { %1713 = vmatpush1.msra.mxu1 %v1434_v54  ;;  %v1490_v54 = vld [vmem:[%s4057_s22 + $0x2d0] sm:$0xff] }
 0x264   : > { %1714 = vmatprep.subr.mxu1 %v1419_v56  ;;  %v1475_v56 = vld [vmem:[%s4057_s22 + $0x258] sm:$0xff] }
 0x265   : > { %1715 = vmatpush1.msra.mxu1 %v1418_v58  ;;  %v1474_v58 = vld [vmem:[%s4057_s22 + $0x250] sm:$0xff] }
 0x266   : > { %1716 = vmatprep.subr.mxu1 %v1403_v60  ;;  %v1459_v60 = vld [vmem:[%s4057_s22 + $0x1d8] sm:$0xff] }
 0x267   : > { %1717 = vmatpush1.msra.mxu1 %v1402_v62  ;;  %v1458_v62 = vld [vmem:[%s4057_s22 + $0x1d0] sm:$0xff] }
 0x268   : > { %1844 = vmatprep.subr.mxu1 %v1519_v0  ;;  %v1443_v0 = vld [vmem:[%s4057_s22 + $0x158] sm:$0xff] }
 0x27d   : > { %v1177_v1 = vpop.xlane.xlu1 %1176 }
 0x27e   : > { %v1178_v2 = vmul.f32 0.015625, %v1177_v1 }
 0x280   : > { %v1179_v4 = vsub.f32 %v1171_v59, %v1178_v2  ;;  %v1401_v59 = vld [vmem:[%s4057_s22 + $0x8] sm:$0xff] }
 0x281   : > { %1645 = vmatprep.subr.mxu0 %v1401_v59  ;;  %v1457_v59 = vld [vmem:[%s4057_s22 + $0x1c8] sm:$0xff] }
 0x282   : > { %v1180_v5 = vmul.f32 %v1179_v4, %v1179_v4  ;;  %1646 = vmatpush1.msra.mxu0 %v1400_v61  ;;  %v1456_v61 = vld [vmem:[%s4057_s22 + $0x1c0] sm:$0xff] }
 0x283   : > { %1773 = vmatprep.subr.mxu0 %v1517_v63  ;;  %v1441_v63 = vld [vmem:[%s4057_s22 + $0x148] sm:$0xff] }
 0x284   : > { %v1181_v6 = vsel %vm1174_vm4, %v1180_v5, 0.0 }
 0x285   : > { %1182 = vadd.xlane.f32.xlu1 %v1181_v6  ;;  %v3305_v6 = vld [vmem:[%s4839_s9] ss:$0 sm:$0xff] }
 0x30e   : > { %v1183_v7 = vpop.xlane.xlu1 %1182 }
 0x30f   : > { %v1184_v8 = vmul.f32 0.015625, %v1183_v7 }
 0x311   : > { %v1185_v9 = vadd.f32 1e-05, %v1184_v8  ;;  %v3306_v8 = vld [vmem:[%s4841_s20] ss:$0 sm:$0xff] }
 0x313   : > { %3751 = vrsqrt.f32 %v1185_v9 }
 0x318   : > { %v1362_v10 = vpop.f32.mrf.mxu1 }
 0x319   : > { %v1363_v17 = vadd.f32 %v1362_v10, %v1292_v14  ;;  %v1501_v14 = vld [vmem:[%s4057_s22 + $0x328] sm:$0xff] }
 0x31a   : > { %v3717_v11 = vpop.f32.mrf.mxu1 }
 0x31b   : > { %v1369_v22 = vrot.slane %v1363_v17, %v4215_v18  ;;  %v1516_v11 = vld [vmem:[%s4057_s22 + $0x3a0] sm:$0xff]  ;;  %v1502_v17 = vld [vmem:[%s4057_s22 + $0x330] sm:$0xff] }
 0x320   : > { %v3752_v15 = vpop.eup %3751 }
 0x321   : > { %v1187_v19 = vmul.f32 %v3752_v15, %v1179_v4  ;;  %v1503_v15 = vld [vmem:[%s4057_s22 + $0x338] sm:$0xff] }
 0x323   : > { %v1194_v21 = vmul.f32 %v3301_v16, %v1187_v19  ;;  %v1500_v16 = vld [vmem:[%s4057_s22 + $0x320] sm:$0xff]  ;;  %v1485_v19 = vld [vmem:[%s4057_s22 + $0x2a8] sm:$0xff] }
 0x325   : > { %v1201_v23 = vadd.f32 %v3302_v20, %v1194_v21  ;;  %v1487_v20 = vld [vmem:[%s4057_s22 + $0x2b8] sm:$0xff]  ;;  %v1484_v21 = vld [vmem:[%s4057_s22 + $0x2a0] sm:$0xff] }
 0x327   : > { %v1370_v24 = vadd.f32 %v1369_v22, %v1201_v23  ;;  %v1486_v22 = vld [vmem:[%s4057_s22 + $0x2b0] sm:$0xff]  ;;  %v1469_v23 = vld [vmem:[%s4057_s22 + $0x228] sm:$0xff] }
 0x329   : > { %v1373_v25 = vsel %vm1174_vm4, %v1370_v24, 0.0 }
 0x32a   : > { %1374 = vadd.xlane.f32.xlu0 %v1373_v25  ;;  %v1468_v25 = vld [vmem:[%s4057_s22 + $0x220] sm:$0xff] }
 0x3b3   : > { %v1375_v26 = vpop.xlane.xlu0 %1374 }
 0x3b4   : > { %v1376_v27 = vmul.f32 0.015625, %v1375_v26  ;;  %v1470_v26 = vld [vmem:[%s4057_s22 + $0x230] sm:$0xff] }
 0x3b6   : > { %v4224_v28 = vsub.f32 %v1370_v24, %v1376_v27  ;;  %v1471_v24 = vld [vmem:[%s4057_s22 + $0x238] sm:$0xff]  ;;  %v1453_v27 = vld [vmem:[%s4057_s22 + $0x1a8] sm:$0xff] }
 0x3b8   : > { %v1378_v29 = vmul.f32 %v4224_v28, %v4224_v28 }
 0x3ba   : > { %v1379_v30 = vsel %vm1174_vm4, %v1378_v29, 0.0  ;;  %v1452_v29 = vld [vmem:[%s4057_s22 + $0x1a0] sm:$0xff] }
 0x3bb   : > { %1380 = vadd.xlane.f32.xlu1 %v1379_v30  ;;  %v1454_v30 = vld [vmem:[%s4057_s22 + $0x1b0] sm:$0xff] }
 0x444   : > { %v1381_v1 = vpop.xlane.xlu1 %1380 }
 0x445   : > { %v1382_v2 = vmul.f32 0.015625, %v1381_v1  ;;  %v1440_v1 = vld [vmem:[%s4057_s22 + $0x140] sm:$0xff] }
 0x447   : > { %v1383_v4 = vadd.f32 1e-05, %v1382_v2  ;;  %v1442_v2 = vld [vmem:[%s4057_s22 + $0x150] sm:$0xff] }
 0x449   : > { %3753 = vrsqrt.f32 %v1383_v4  ;;  %v1425_v4 = vld [vmem:[%s4057_s22 + $0xc8] sm:$0xff] }
 0x456   : > { %v3754_v5 = vpop.eup %3753 }
 0x457   : > { %v1385_v7 = vmul.f32 %v3754_v5, %v4224_v28  ;;  %v1455_v28 = vld [vmem:[%s4057_s22 + $0x1b8] sm:$0xff] }
 0x458   : > { %v1427_v5 = vld [vmem:[%s4057_s22 + $0xd8] sm:$0xff] }
 0x459   : > { %v1392_v9 = vmul.f32 %v3305_v6, %v1385_v7  ;;  %v1424_v6 = vld [vmem:[%s4057_s22 + $0xc0] sm:$0xff]  ;;  %v1426_v7 = vld [vmem:[%s4057_s22 + $0xd0] sm:$0xff] }
 0x45b   : > { %v4274_v10 = vadd.f32 %v3306_v8, %v1392_v9  ;;  %v1409_v8 = vld [vmem:[%s4057_s22 + $0x48] sm:$0xff]  ;;  %v1411_v9 = vld [vmem:[%s4057_s22 + $0x58] sm:$0xff] }
 0x45d   : > { %3307 = vmatmul.mubr.msk.f32.vlgmr.msra.gmra.mxu0 %vm1009_vm3, %v4274_v10  ;;  %3308 = vmatmul.mubr.msk.f32.vlgmr.msra.gmra.mxu1 %vm1009_vm3, %v4274_v10 }
 0x45e   : > { %1774 = vmatpush1.msra.mxu0 %v1516_v11  ;;  %1845 = vmatpush1.msra.mxu1 %v1518_v12  ;;  %v1408_v11 = vld [vmem:[%s4057_s22 + $0x40] sm:$0xff]  ;;  %v1410_v12 = vld [vmem:[%s4057_s22 + $0x50] sm:$0xff] }
 0x45f   : > { %1775 = vmatprep.subr.mxu0 %v1501_v14  ;;  %1846 = vmatprep.subr.mxu1 %v1503_v15  ;;  %v1525_v14 = vld [vmem:[%s4057_s22 + $0x3e8] sm:$0xff]  ;;  %v1527_v15 = vld [vmem:[%s4057_s22 + $0x3f8] sm:$0xff] }
 0x460   : > { %1776 = vmatpush1.msra.mxu0 %v1500_v16  ;;  %1847 = vmatpush1.msra.mxu1 %v1502_v17  ;;  %v1524_v16 = vld [vmem:[%s4057_s22 + $0x3e0] sm:$0xff]  ;;  %v1526_v17 = vld [vmem:[%s4057_s22 + $0x3f0] sm:$0xff] }
 0x461   : > { %1777 = vmatprep.subr.mxu0 %v1485_v19  ;;  %1848 = vmatprep.subr.mxu1 %v1487_v20  ;;  %v1509_v19 = vld [vmem:[%s4057_s22 + $0x368] sm:$0xff]  ;;  %v1511_v20 = vld [vmem:[%s4057_s22 + $0x378] sm:$0xff] }
 0x462   : > { %1778 = vmatpush1.msra.mxu0 %v1484_v21  ;;  %1849 = vmatpush1.msra.mxu1 %v1486_v22  ;;  %v1508_v21 = vld [vmem:[%s4057_s22 + $0x360] sm:$0xff]  ;;  %v1510_v22 = vld [vmem:[%s4057_s22 + $0x370] sm:$0xff] }
 0x463   : > { %1779 = vmatprep.subr.mxu0 %v1469_v23  ;;  %1850 = vmatprep.subr.mxu1 %v1471_v24  ;;  %v1493_v23 = vld [vmem:[%s4057_s22 + $0x2e8] sm:$0xff]  ;;  %v1495_v24 = vld [vmem:[%s4057_s22 + $0x2f8] sm:$0xff] }
 0x464   : > { %1780 = vmatpush1.msra.mxu0 %v1468_v25  ;;  %1851 = vmatpush1.msra.mxu1 %v1470_v26  ;;  %v1492_v25 = vld [vmem:[%s4057_s22 + $0x2e0] sm:$0xff]  ;;  %v1494_v26 = vld [vmem:[%s4057_s22 + $0x2f0] sm:$0xff] }
 0x465   : > { %1781 = vmatprep.subr.mxu0 %v1453_v27  ;;  %1852 = vmatprep.subr.mxu1 %v1455_v28  ;;  %v1477_v27 = vld [vmem:[%s4057_s22 + $0x268] sm:$0xff]  ;;  %v1479_v28 = vld [vmem:[%s4057_s22 + $0x278] sm:$0xff] }
 0x466   : > { %1782 = vmatpush1.msra.mxu0 %v1452_v29  ;;  %1853 = vmatpush1.msra.mxu1 %v1454_v30  ;;  %v1476_v29 = vld [vmem:[%s4057_s22 + $0x260] sm:$0xff]  ;;  %v1478_v30 = vld [vmem:[%s4057_s22 + $0x270] sm:$0xff] }
 0x467   : > { %1783 = vmatprep.subr.mxu0 %v1437_v31  ;;  %1854 = vmatprep.subr.mxu1 %v1439_v32  ;;  %v1461_v31 = vld [vmem:[%s4057_s22 + $0x1e8] sm:$0xff]  ;;  %v1463_v32 = vld [vmem:[%s4057_s22 + $0x1f8] sm:$0xff] }
 0x468   : > { %1784 = vmatpush1.msra.mxu0 %v1436_v33  ;;  %1855 = vmatpush1.msra.mxu1 %v1438_v34  ;;  %v1460_v33 = vld [vmem:[%s4057_s22 + $0x1e0] sm:$0xff]  ;;  %v1462_v34 = vld [vmem:[%s4057_s22 + $0x1f0] sm:$0xff] }
 0x469   : > { %1785 = vmatprep.subr.mxu0 %v1421_v35  ;;  %1856 = vmatprep.subr.mxu1 %v1423_v36  ;;  %v1445_v35 = vld [vmem:[%s4057_s22 + $0x168] sm:$0xff]  ;;  %v1447_v36 = vld [vmem:[%s4057_s22 + $0x178] sm:$0xff] }
 0x46a   : > { %1786 = vmatpush1.msra.mxu0 %v1420_v37  ;;  %1857 = vmatpush1.msra.mxu1 %v1422_v38  ;;  %v1444_v37 = vld [vmem:[%s4057_s22 + $0x160] sm:$0xff]  ;;  %v1446_v38 = vld [vmem:[%s4057_s22 + $0x170] sm:$0xff] }
 0x46b   : > { %1787 = vmatprep.subr.mxu0 %v1405_v39  ;;  %1858 = vmatprep.subr.mxu1 %v1407_v40  ;;  %v1429_v39 = vld [vmem:[%s4057_s22 + $0xe8] sm:$0xff]  ;;  %v1431_v40 = vld [vmem:[%s4057_s22 + $0xf8] sm:$0xff] }
 0x46c   : > { %1788 = vmatpush1.msra.mxu0 %v1404_v41  ;;  %1821 = vmatprep.mubr.f32.mxu0 %v3827_v3  ;;  %v1428_v41 = vld [vmem:[%s4057_s22 + $0xe0] sm:$0xff] }
 0x46d   : > { %1859 = vmatpush1.msra.mxu1 %v1406_v42  ;;  %1892 = vmatprep.mubr.f32.mxu1 %v3827_v3  ;;  %v1430_v42 = vld [vmem:[%s4057_s22 + $0xf0] sm:$0xff] }
 0x46e   : > { %3309 = vmatmul.mubr.msk.f32.vlgmr.msra.gmra.mxu0 %vm1009_vm3, %v4274_v10  ;;  %3310 = vmatmul.mubr.msk.f32.vlgmr.msra.gmra.mxu1 %vm1009_vm3, %v4274_v10 }
 0x46f   : > { %1915 = vmatprep.subr.mxu0 %v1521_v43  ;;  %1986 = vmatprep.subr.mxu1 %v1523_v44  ;;  %v1413_v43 = vld [vmem:[%s4057_s22 + $0x68] sm:$0xff]  ;;  %v1415_v44 = vld [vmem:[%s4057_s22 + $0x78] sm:$0xff] }
 0x470   : > { %1916 = vmatpush1.msra.mxu0 %v1520_v45  ;;  %1987 = vmatpush1.msra.mxu1 %v1522_v46  ;;  %v1412_v45 = vld [vmem:[%s4057_s22 + $0x60] sm:$0xff]  ;;  %v1414_v46 = vld [vmem:[%s4057_s22 + $0x70] sm:$0xff] }
 0x471   : > { %1917 = vmatprep.subr.mxu0 %v1505_v47  ;;  %1988 = vmatprep.subr.mxu1 %v1507_v48  ;;  %v2230_v47 = vld [vmem:[%s4069_s24 + $0xf8] sm:$0xff] }
 0x472   : > { %1918 = vmatpush1.msra.mxu0 %v1504_v49  ;;  %1989 = vmatpush1.msra.mxu1 %v1506_v50  ;;  %v2262_v48 = vld [vmem:[%s4069_s24 + $0x1f8] sm:$0xff] }
 0x473   : > { %1919 = vmatprep.subr.mxu0 %v1489_v51  ;;  %1990 = vmatprep.subr.mxu1 %v1491_v52  ;;  %v2214_v49 = vld [vmem:[%s4069_s24 + $0x78] sm:$0xff]  ;;  %v2229_v51 = vld [vmem:[%s4069_s24 + $0xf0] sm:$0xff] }
 0x474   : > { %1920 = vmatpush1.msra.mxu0 %v1488_v53  ;;  %1991 = vmatpush1.msra.mxu1 %v1490_v54  ;;  %v2246_v50 = vld [vmem:[%s4069_s24 + $0x178] sm:$0xff]  ;;  %v2261_v52 = vld [vmem:[%s4069_s24 + $0x1f0] sm:$0xff] }
 0x475   : > { %1921 = vmatprep.subr.mxu0 %v1473_v55  ;;  %1992 = vmatprep.subr.mxu1 %v1475_v56  ;;  %v2213_v53 = vld [vmem:[%s4069_s24 + $0x70] sm:$0xff]  ;;  %v2260_v55 = vld [vmem:[%s4069_s24 + $0x1e8] sm:$0xff] }
 0x476   : > { %1922 = vmatpush1.msra.mxu0 %v1472_v57  ;;  %1993 = vmatpush1.msra.mxu1 %v1474_v58  ;;  %v2245_v54 = vld [vmem:[%s4069_s24 + $0x170] sm:$0xff]  ;;  %v2212_v56 = vld [vmem:[%s4069_s24 + $0x68] sm:$0xff]  ;;  %v2227_v58 = vld [vmem:[%s4069_s24 + $0xe0] sm:$0xff] }
 0x477   : > { %1923 = vmatprep.subr.mxu0 %v1457_v59  ;;  %1994 = vmatprep.subr.mxu1 %v1459_v60  ;;  %v2244_v57 = vld [vmem:[%s4069_s24 + $0x168] sm:$0xff]  ;;  %v2259_v59 = vld [vmem:[%s4069_s24 + $0x1e0] sm:$0xff] }
 0x478   : > { %1924 = vmatpush1.msra.mxu0 %v1456_v61  ;;  %1995 = vmatpush1.msra.mxu1 %v1458_v62  ;;  %v2211_v60 = vld [vmem:[%s4069_s24 + $0x60] sm:$0xff]  ;;  %v2226_v62 = vld [vmem:[%s4069_s24 + $0xd8] sm:$0xff] }
 0x479   : > { %1925 = vmatprep.subr.mxu0 %v1441_v63  ;;  %1996 = vmatprep.subr.mxu1 %v1443_v0  ;;  %v2243_v61 = vld [vmem:[%s4069_s24 + $0x160] sm:$0xff]  ;;  %v2258_v63 = vld [vmem:[%s4069_s24 + $0x1d8] sm:$0xff] }
 0x47a   : > { %1926 = vmatpush1.msra.mxu0 %v1440_v1  ;;  %1997 = vmatpush1.msra.mxu1 %v1442_v2  ;;  %v2210_v0 = vld [vmem:[%s4069_s24 + $0x58] sm:$0xff]  ;;  %v2225_v2 = vld [vmem:[%s4069_s24 + $0xd0] sm:$0xff] }
 0x47b   : > { %1927 = vmatprep.subr.mxu0 %v1425_v4  ;;  %1998 = vmatprep.subr.mxu1 %v1427_v5  ;;  %v2242_v1 = vld [vmem:[%s4069_s24 + $0x158] sm:$0xff]  ;;  %v2257_v4 = vld [vmem:[%s4069_s24 + $0x1d0] sm:$0xff] }
 0x47c   : > { %1928 = vmatpush1.msra.mxu0 %v1424_v6  ;;  %1999 = vmatpush1.msra.mxu1 %v1426_v7  ;;  %v2209_v5 = vld [vmem:[%s4069_s24 + $0x50] sm:$0xff]  ;;  %v2224_v7 = vld [vmem:[%s4069_s24 + $0xc8] sm:$0xff] }
 0x47d   : > { %1929 = vmatprep.subr.mxu0 %v1409_v8  ;;  %2000 = vmatprep.subr.mxu1 %v1411_v9  ;;  %v2241_v6 = vld [vmem:[%s4069_s24 + $0x150] sm:$0xff]  ;;  %v2256_v8 = vld [vmem:[%s4069_s24 + $0x1c8] sm:$0xff] }
 0x47e   : > { %1930 = vmatpush1.msra.mxu0 %v1408_v11  ;;  %1963 = vmatprep.mubr.f32.mxu0 %v3827_v3  ;;  %v2208_v9 = vld [vmem:[%s4069_s24 + $0x48] sm:$0xff] }
 0x47f   : > { %2001 = vmatpush1.msra.mxu1 %v1410_v12  ;;  %2034 = vmatprep.mubr.f32.mxu1 %v3827_v3  ;;  %v2240_v11 = vld [vmem:[%s4069_s24 + $0x148] sm:$0xff]  ;;  %v2223_v12 = vld [vmem:[%s4069_s24 + $0xc0] sm:$0xff] }
 0x480   : > { %3311 = vmatmul.mubr.msk.f32.vlgmr.msra.gmra.mxu0 %vm1009_vm3, %v4274_v10  ;;  %3312 = vmatmul.mubr.msk.f32.vlgmr.msra.gmra.mxu1 %vm1009_vm3, %v4274_v10 }
 0x481   : > { %2057 = vmatprep.subr.mxu0 %v1525_v14  ;;  %2128 = vmatprep.subr.mxu1 %v1527_v15  ;;  %v2255_v14 = vld [vmem:[%s4069_s24 + $0x1c0] sm:$0xff] }
 0x482   : > { %2058 = vmatpush1.msra.mxu0 %v1524_v16  ;;  %2129 = vmatpush1.msra.mxu1 %v1526_v17  ;;  %v2207_v15 = vld [vmem:[%s4069_s24 + $0x40] sm:$0xff]  ;;  %v2222_v17 = vld [vmem:[%s4069_s24 + $0xb8] sm:$0xff] }
 0x483   : > { %2059 = vmatprep.subr.mxu0 %v1509_v19  ;;  %2130 = vmatprep.subr.mxu1 %v1511_v20  ;;  %v2239_v16 = vld [vmem:[%s4069_s24 + $0x140] sm:$0xff]  ;;  %v2254_v19 = vld [vmem:[%s4069_s24 + $0x1b8] sm:$0xff] }
 0x484   : > { %2060 = vmatpush1.msra.mxu0 %v1508_v21  ;;  %2131 = vmatpush1.msra.mxu1 %v1510_v22  ;;  %v2206_v20 = vld [vmem:[%s4069_s24 + $0x38] sm:$0xff]  ;;  %v2221_v22 = vld [vmem:[%s4069_s24 + $0xb0] sm:$0xff] }
 0x485   : > { %2061 = vmatprep.subr.mxu0 %v1493_v23  ;;  %2132 = vmatprep.subr.mxu1 %v1495_v24  ;;  %v2238_v21 = vld [vmem:[%s4069_s24 + $0x138] sm:$0xff]  ;;  %v2253_v23 = vld [vmem:[%s4069_s24 + $0x1b0] sm:$0xff] }
 0x486   : > { %2062 = vmatpush1.msra.mxu0 %v1492_v25  ;;  %2133 = vmatpush1.msra.mxu1 %v1494_v26  ;;  %v2205_v24 = vld [vmem:[%s4069_s24 + $0x30] sm:$0xff]  ;;  %v2220_v26 = vld [vmem:[%s4069_s24 + $0xa8] sm:$0xff] }
 0x487   : > { %2063 = vmatprep.subr.mxu0 %v1477_v27  ;;  %2134 = vmatprep.subr.mxu1 %v1479_v28  ;;  %v2237_v25 = vld [vmem:[%s4069_s24 + $0x130] sm:$0xff]  ;;  %v2252_v27 = vld [vmem:[%s4069_s24 + $0x1a8] sm:$0xff] }
 0x488   : > { %2064 = vmatpush1.msra.mxu0 %v1476_v29  ;;  %2135 = vmatpush1.msra.mxu1 %v1478_v30  ;;  %v2204_v28 = vld [vmem:[%s4069_s24 + $0x28] sm:$0xff]  ;;  %v2219_v30 = vld [vmem:[%s4069_s24 + $0xa0] sm:$0xff] }
 0x489   : > { %2065 = vmatprep.subr.mxu0 %v1461_v31  ;;  %2136 = vmatprep.subr.mxu1 %v1463_v32  ;;  %v2236_v29 = vld [vmem:[%s4069_s24 + $0x128] sm:$0xff]  ;;  %v2251_v31 = vld [vmem:[%s4069_s24 + $0x1a0] sm:$0xff] }
 0x48a   : > { %2066 = vmatpush1.msra.mxu0 %v1460_v33  ;;  %2137 = vmatpush1.msra.mxu1 %v1462_v34  ;;  %v2203_v32 = vld [vmem:[%s4069_s24 + $0x20] sm:$0xff]  ;;  %v2218_v34 = vld [vmem:[%s4069_s24 + $0x98] sm:$0xff] }
 0x48b   : > { %2067 = vmatprep.subr.mxu0 %v1445_v35  ;;  %2138 = vmatprep.subr.mxu1 %v1447_v36  ;;  %v2235_v33 = vld [vmem:[%s4069_s24 + $0x120] sm:$0xff]  ;;  %v2250_v35 = vld [vmem:[%s4069_s24 + $0x198] sm:$0xff] }
 0x48c   : > { %2068 = vmatpush1.msra.mxu0 %v1444_v37  ;;  %2139 = vmatpush1.msra.mxu1 %v1446_v38  ;;  %v2202_v36 = vld [vmem:[%s4069_s24 + $0x18] sm:$0xff]  ;;  %v2217_v38 = vld [vmem:[%s4069_s24 + $0x90] sm:$0xff] }
 0x48d   : > { %2069 = vmatprep.subr.mxu0 %v1429_v39  ;;  %2140 = vmatprep.subr.mxu1 %v1431_v40  ;;  %v2234_v37 = vld [vmem:[%s4069_s24 + $0x118] sm:$0xff]  ;;  %v2249_v39 = vld [vmem:[%s4069_s24 + $0x190] sm:$0xff] }
 0x48e   : > { %2070 = vmatpush1.msra.mxu0 %v1428_v41  ;;  %2141 = vmatpush1.msra.mxu1 %v1430_v42  ;;  %v2201_v40 = vld [vmem:[%s4069_s24 + $0x10] sm:$0xff]  ;;  %v2216_v42 = vld [vmem:[%s4069_s24 + $0x88] sm:$0xff] }
 0x48f   : > { %2071 = vmatprep.subr.mxu0 %v1413_v43  ;;  %2142 = vmatprep.subr.mxu1 %v1415_v44  ;;  %v2233_v41 = vld [vmem:[%s4069_s24 + $0x110] sm:$0xff]  ;;  %v2248_v43 = vld [vmem:[%s4069_s24 + $0x188] sm:$0xff] }
 0x490   : > { %2072 = vmatpush1.msra.mxu0 %v1412_v45  ;;  %2105 = vmatprep.mubr.f32.mxu0 %v3827_v3  ;;  %v2200_v44 = vld [vmem:[%s4069_s24 + $0x8] sm:$0xff] }
 0x491   : > { %2143 = vmatpush1.msra.mxu1 %v1414_v46  ;;  %2176 = vmatprep.mubr.f32.mxu1 %v3827_v3  ;;  %v2228_v3 = vld [vmem:[%s4069_s24 + $0xe8] sm:$0xff]  ;;  %v2215_v46 = vld [vmem:[%s4069_s24 + $0x80] sm:$0xff] }
 0x492   : > { %3313 = vmatmul.mubr.msk.f32.vlgmr.msra.gmra.mxu0 %vm1009_vm3, %v4274_v10  ;;  %3314 = vmatmul.mubr.msk.f32.vlgmr.msra.gmra.mxu1 %vm1009_vm3, %v4274_v10  ;;  %v2232_v45 = vld [vmem:[%s4069_s24 + $0x108] sm:$0xff] }
 0x493   : > { %3362 = vmatprep.subr.mxu0 %v2230_v47  ;;  %3397 = vmatprep.subr.mxu1 %v2262_v48  ;;  %v2247_v47 = vld [vmem:[%s4069_s24 + $0x180] sm:$0xff] }
 0x494   : > { %3363 = vmatpush3.msra.mxu0 %v2214_v49  ;;  %3398 = vmatpush3.msra.mxu1 %v2246_v50  ;;  %v2199_v48 = vld [vmem:[%s4069_s24] sm:$0xff]  ;;  %v2294_v50 = vld [vmem:[%s4069_s24 + $0x2f8] sm:$0xff] }
 0x495   : > { %3364 = vmatprep.subr.mxu0 %v2229_v51  ;;  %3399 = vmatprep.subr.mxu1 %v2261_v52  ;;  %v2231_v49 = vld [vmem:[%s4069_s24 + $0x100] sm:$0xff]  ;;  %v2326_v51 = vld [vmem:[%s4069_s24 + $0x3f8] sm:$0xff]  ;;  %v1550_v52 = vsub.s32 4, %v4202_v13 }
 0x496   : > { %3365 = vmatpush3.msra.mxu0 %v2213_v53  ;;  %3400 = vmatpush3.msra.mxu1 %v2245_v54  ;;  %v4460_v53 = vld [vmem:[%s4063_s23 + $0x8] sm:$0xff]  ;;  %v1558_v54 = vsub.s32 6, %v4202_v13 }
 0x497   : > { %3366 = vmatprep.subr.mxu0 %v2228_v3  ;;  %3401 = vmatprep.subr.mxu1 %v2260_v55  ;;  %v4466_v3 = vrot.slane %v4460_v53, %v1550_v52 }
 0x498   : > { %3367 = vmatpush3.msra.mxu0 %v2212_v56  ;;  %3402 = vmatpush3.msra.mxu1 %v2244_v57  ;;  %v4471_v55 = vrot.slane %v4460_v53, %v1558_v54  ;;  %v1542_v56 = vsub.s32 2, %v4202_v13  ;;  %v4475_v57 = vld [vmem:[%s4063_s23] sm:$0xff] }
 0x499   : > { %3368 = vmatprep.subr.mxu0 %v2227_v58  ;;  %3403 = vmatprep.subr.mxu1 %v2259_v59  ;;  %v1538_v58 = vsub.s32 1, %v4202_v13  ;;  %v1546_v59 = vsub.s32 3, %v4202_v13 }
 0x49a   : > { %3369 = vmatpush3.msra.mxu0 %v2211_v60  ;;  %3404 = vmatpush3.msra.mxu1 %v2243_v61  ;;  %v1535_v60 = vrot.slane %v4475_v57, %v4215_v18  ;;  %v1543_v61 = vrot.slane %v4475_v57, %v1542_v56 }
 0x49b   : > { %3370 = vmatprep.subr.mxu0 %v2226_v62  ;;  %3405 = vmatprep.subr.mxu1 %v2258_v63  ;;  %v1539_v62 = vrot.slane %v4475_v57, %v1538_v58  ;;  %v1547_v63 = vrot.slane %v4475_v57, %v1546_v59 }
 0x49c   : > { %3371 = vmatpush3.msra.mxu0 %v2210_v0  ;;  %3406 = vmatpush3.msra.mxu1 %v2242_v1 }
 0x49d   : > { %3372 = vmatprep.subr.mxu0 %v2225_v2  ;;  %3407 = vmatprep.subr.mxu1 %v2257_v4 }
 0x49e   : > { %3373 = vmatpush3.msra.mxu0 %v2209_v5  ;;  %3408 = vmatpush3.msra.mxu1 %v2241_v6 }
 0x49f   : > { %3374 = vmatprep.subr.mxu0 %v2224_v7  ;;  %3409 = vmatprep.subr.mxu1 %v2256_v8 }
 0x4a0   : > { %3375 = vmatpush3.msra.mxu0 %v2208_v9  ;;  %3410 = vmatpush3.msra.mxu1 %v2240_v11 }
 0x4a1   : > { %3376 = vmatprep.subr.mxu0 %v2223_v12  ;;  %3411 = vmatprep.subr.mxu1 %v2255_v14 }
 0x4a2   : > { %3377 = vmatpush3.msra.mxu0 %v2207_v15  ;;  %3412 = vmatpush3.msra.mxu1 %v2239_v16  ;;  %v2278_v15 = vld [vmem:[%s4069_s24 + $0x278] sm:$0xff] }
 0x4a3   : > { %3378 = vmatprep.subr.mxu0 %v2222_v17  ;;  %3413 = vmatprep.subr.mxu1 %v2254_v19  ;;  %v2310_v16 = vld [vmem:[%s4069_s24 + $0x378] sm:$0xff]  ;;  %v2293_v17 = vld [vmem:[%s4069_s24 + $0x2f0] sm:$0xff] }
 0x4a4   : > { %3379 = vmatpush3.msra.mxu0 %v2206_v20  ;;  %3414 = vmatpush3.msra.mxu1 %v2238_v21  ;;  %v2325_v19 = vld [vmem:[%s4069_s24 + $0x3f0] sm:$0xff] }
 0x4a5   : > { %3380 = vmatprep.subr.mxu0 %v2221_v22  ;;  %3415 = vmatprep.subr.mxu1 %v2253_v23  ;;  %v2277_v20 = vld [vmem:[%s4069_s24 + $0x270] sm:$0xff]  ;;  %v2292_v22 = vld [vmem:[%s4069_s24 + $0x2e8] sm:$0xff] }
 0x4a6   : > { %3381 = vmatpush3.msra.mxu0 %v2205_v24  ;;  %3416 = vmatpush3.msra.mxu1 %v2237_v25  ;;  %v2309_v21 = vld [vmem:[%s4069_s24 + $0x370] sm:$0xff]  ;;  %v2324_v23 = vld [vmem:[%s4069_s24 + $0x3e8] sm:$0xff] }
 0x4a7   : > { %3382 = vmatprep.subr.mxu0 %v2220_v26  ;;  %3417 = vmatprep.subr.mxu1 %v2252_v27  ;;  %v2276_v24 = vld [vmem:[%s4069_s24 + $0x268] sm:$0xff]  ;;  %v2291_v26 = vld [vmem:[%s4069_s24 + $0x2e0] sm:$0xff] }
 0x4a8   : > { %3383 = vmatpush3.msra.mxu0 %v2204_v28  ;;  %3418 = vmatpush3.msra.mxu1 %v2236_v29  ;;  %v2308_v25 = vld [vmem:[%s4069_s24 + $0x368] sm:$0xff]  ;;  %v2323_v27 = vld [vmem:[%s4069_s24 + $0x3e0] sm:$0xff] }
 0x4a9   : > { %3384 = vmatprep.subr.mxu0 %v2219_v30  ;;  %3419 = vmatprep.subr.mxu1 %v2251_v31  ;;  %v2275_v28 = vld [vmem:[%s4069_s24 + $0x260] sm:$0xff]  ;;  %v1554_v30 = vsub.s32 5, %v4202_v13  ;;  %v1562_v31 = vsub.s32 7, %v4202_v13 }
 0x4aa   : > { %3385 = vmatpush3.msra.mxu0 %v2203_v32  ;;  %3420 = vmatpush3.msra.mxu1 %v2235_v33  ;;  %v2307_v29 = vld [vmem:[%s4069_s24 + $0x360] sm:$0xff]  ;;  %v2290_v32 = vld [vmem:[%s4069_s24 + $0x2d8] sm:$0xff] }
 0x4ab   : > { %3386 = vmatprep.subr.mxu0 %v2218_v34  ;;  %3421 = vmatprep.subr.mxu1 %v2250_v35  ;;  %v2322_v33 = vld [vmem:[%s4069_s24 + $0x3d8] sm:$0xff]  ;;  %v2343_v13 = vld [vmem:[%s4069_s24 + $0x480] sm:$0xff] }
 0x4ac   : > { %3387 = vmatpush3.msra.mxu0 %v2202_v36  ;;  %3422 = vmatpush3.msra.mxu1 %v2234_v37  ;;  %v2274_v34 = vld [vmem:[%s4069_s24 + $0x258] sm:$0xff]  ;;  %v2289_v36 = vld [vmem:[%s4069_s24 + $0x2d0] sm:$0xff] }
 0x4ad   : > { %3388 = vmatprep.subr.mxu0 %v2217_v38  ;;  %3423 = vmatprep.subr.mxu1 %v2249_v39  ;;  %v2306_v35 = vld [vmem:[%s4069_s24 + $0x358] sm:$0xff]  ;;  %v2321_v37 = vld [vmem:[%s4069_s24 + $0x3d0] sm:$0xff]  ;;  %v1555_v38 = vrot.slane %v4475_v57, %v1554_v30  ;;  %v1563_v39 = vrot.slane %v4475_v57, %v1562_v31 }
 0x4ae   : > { %3389 = vmatpush3.msra.mxu0 %v2201_v40  ;;  %3424 = vmatpush3.msra.mxu1 %v2233_v41  ;;  %v2273_v40 = vld [vmem:[%s4069_s24 + $0x250] sm:$0xff] }
 0x4af   : > { %3390 = vmatprep.subr.mxu0 %v2216_v42  ;;  %3425 = vmatprep.subr.mxu1 %v2248_v43  ;;  %v2305_v41 = vld [vmem:[%s4069_s24 + $0x350] sm:$0xff] }
 0x4b0   : > { %3391 = vmatpush3.msra.mxu0 %v2200_v44  ;;  %3426 = vmatpush3.msra.mxu1 %v2232_v45  ;;  %v2288_v44 = vld [vmem:[%s4069_s24 + $0x2c8] sm:$0xff] }
 0x4b1   : > { %3392 = vmatprep.subr.mxu0 %v2215_v46  ;;  %3427 = vmatprep.subr.mxu1 %v2247_v47  ;;  %v2320_v45 = vld [vmem:[%s4069_s24 + $0x3c8] sm:$0xff] }
 0x4b2   : > { %3393 = vmatpush3.msra.mxu0 %v2199_v48  ;;  %3428 = vmatpush3.msra.mxu1 %v2231_v49  ;;  %v2272_v46 = vld [vmem:[%s4069_s24 + $0x248] sm:$0xff] }
 0x4b3   : > { %3432 = vmatprep.subr.mxu0 %v2294_v50  ;;  %3467 = vmatprep.subr.mxu1 %v2326_v51  ;;  %v2304_v47 = vld [vmem:[%s4069_s24 + $0x348] sm:$0xff]  ;;  %v2287_v50 = vld [vmem:[%s4069_s24 + $0x2c0] sm:$0xff] }
 0x4b4   : > { %v2319_v51 = vld [vmem:[%s4069_s24 + $0x3c0] sm:$0xff] }
 0x51d   : > { %v1681_v0 = vpop.f32.mrf.mxu0  ;;  %v1752_v1 = vpop.f32.mrf.mxu1 }
 0x51e   : > { %v1682_v2 = vadd.f32 %v1681_v0, %v1535_v60  ;;  %v1753_v4 = vadd.f32 %v1752_v1, %v1543_v61 }
 0x51f   : > { %v1683_v5 = vpop.f32.mrf.mxu0  ;;  %v1754_v6 = vpop.f32.mrf.mxu1 }
 0x520   : > { %v1684_v7 = vadd.f32 %v1683_v5, %v1539_v62  ;;  %v1755_v8 = vadd.f32 %v1754_v6, %v1547_v63  ;;  %v2183_v12 = vmax.f32 %v1682_v2, 0.0  ;;  %v2185_v14 = vmax.f32 %v1753_v4, 0.0  ;;  %v2271_v62 = vld [vmem:[%s4069_s24 + $0x240] sm:$0xff]  ;;  %v2286_v2 = vld [vmem:[%s4069_s24 + $0x2b8] sm:$0xff] }
 0x521   : > { %v2303_v63 = vld [vmem:[%s4069_s24 + $0x340] sm:$0xff]  ;;  %v2318_v4 = vld [vmem:[%s4069_s24 + $0x3b8] sm:$0xff] }
 0x522   : > { %v2184_v9 = vmax.f32 %v1684_v7, 0.0  ;;  %v2186_v11 = vmax.f32 %v1755_v8, 0.0  ;;  %v2270_v5 = vld [vmem:[%s4069_s24 + $0x238] sm:$0xff]  ;;  %v2285_v7 = vld [vmem:[%s4069_s24 + $0x2b0] sm:$0xff] }
 0x523   : > { %v2302_v6 = vld [vmem:[%s4069_s24 + $0x338] sm:$0xff]  ;;  %v2317_v8 = vld [vmem:[%s4069_s24 + $0x3b0] sm:$0xff] }
 0x524   : > { %2519 = vmatprep.mubr.f32.mxu0 %v2184_v9  ;;  %2589 = vmatprep.mubr.f32.mxu1 %v2186_v11  ;;  %v2269_v9 = vld [vmem:[%s4069_s24 + $0x230] sm:$0xff] }
 0x525   : > { %2520 = vmatmul.mubr.f32.vlgmr.msra.gmra.mxu0 %v2183_v12  ;;  %2590 = vmatmul.mubr.f32.vlgmr.msra.gmra.mxu1 %v2185_v14  ;;  %v2301_v11 = vld [vmem:[%s4069_s24 + $0x330] sm:$0xff]  ;;  %v2284_v12 = vld [vmem:[%s4069_s24 + $0x2a8] sm:$0xff] }
 0x526   : > { %3433 = vmatpush3.msra.mxu0 %v2278_v15  ;;  %3468 = vmatpush3.msra.mxu1 %v2310_v16  ;;  %v2316_v14 = vld [vmem:[%s4069_s24 + $0x3a8] sm:$0xff] }
 0x527   : > { %3434 = vmatprep.subr.mxu0 %v2293_v17  ;;  %3469 = vmatprep.subr.mxu1 %v2325_v19  ;;  %v2268_v15 = vld [vmem:[%s4069_s24 + $0x228] sm:$0xff]  ;;  %v2283_v17 = vld [vmem:[%s4069_s24 + $0x2a0] sm:$0xff] }
 0x528   : > { %3435 = vmatpush3.msra.mxu0 %v2277_v20  ;;  %3470 = vmatpush3.msra.mxu1 %v2309_v21  ;;  %v2300_v16 = vld [vmem:[%s4069_s24 + $0x328] sm:$0xff]  ;;  %v2315_v19 = vld [vmem:[%s4069_s24 + $0x3a0] sm:$0xff] }
 0x529   : > { %3436 = vmatprep.subr.mxu0 %v2292_v22  ;;  %3471 = vmatprep.subr.mxu1 %v2324_v23  ;;  %v2267_v20 = vld [vmem:[%s4069_s24 + $0x220] sm:$0xff]  ;;  %v2282_v22 = vld [vmem:[%s4069_s24 + $0x298] sm:$0xff] }
 0x52a   : > { %3437 = vmatpush3.msra.mxu0 %v2276_v24  ;;  %3472 = vmatpush3.msra.mxu1 %v2308_v25  ;;  %v2299_v21 = vld [vmem:[%s4069_s24 + $0x320] sm:$0xff]  ;;  %v2314_v23 = vld [vmem:[%s4069_s24 + $0x398] sm:$0xff]  ;;  %v1551_v24 = vrot.slane %v4475_v57, %v1550_v52  ;;  %v1559_v25 = vrot.slane %v4475_v57, %v1558_v54  ;;  %v2297_v52 = vld [vmem:[%s4069_s24 + $0x310] sm:$0xff]  ;;  %v1571_v54 = vrot.slane %v4460_v53, %v1538_v58 }
 0x52b   : > { %3438 = vmatprep.subr.mxu0 %v2291_v26  ;;  %3473 = vmatprep.subr.mxu1 %v2323_v27  ;;  %v2266_v26 = vld [vmem:[%s4069_s24 + $0x218] sm:$0xff]  ;;  %v1579_v57 = vrot.slane %v4460_v53, %v1546_v59  ;;  %v2296_v58 = vld [vmem:[%s4069_s24 + $0x308] sm:$0xff]  ;;  %v2311_v59 = vld [vmem:[%s4069_s24 + $0x380] sm:$0xff] }
 0x52c   : > { %3439 = vmatpush3.msra.mxu0 %v2275_v28  ;;  %3474 = vmatpush3.msra.mxu1 %v2307_v29  ;;  %v2298_v27 = vld [vmem:[%s4069_s24 + $0x318] sm:$0xff]  ;;  %v2281_v28 = vld [vmem:[%s4069_s24 + $0x290] sm:$0xff] }
 0x52d   : > { %3440 = vmatprep.subr.mxu0 %v2290_v32  ;;  %3475 = vmatprep.subr.mxu1 %v2322_v33  ;;  %v2313_v29 = vld [vmem:[%s4069_s24 + $0x390] sm:$0xff]  ;;  %v2280_v33 = vld [vmem:[%s4069_s24 + $0x288] sm:$0xff] }
 0x52e   : > { %v4520_v42 = vpop.f32.mrf.mxu0  ;;  %v4522_v43 = vpop.f32.mrf.mxu1  ;;  %3441 = vmatpush3.msra.mxu0 %v2274_v34  ;;  %3476 = vmatpush3.msra.mxu1 %v2306_v35  ;;  %v2265_v32 = vld [vmem:[%s4069_s24 + $0x210] sm:$0xff]  ;;  %v2312_v34 = vld [vmem:[%s4069_s24 + $0x388] sm:$0xff] }
 0x52f   : > { %3442 = vmatprep.subr.mxu0 %v2289_v36  ;;  %3477 = vmatprep.subr.mxu1 %v2321_v37  ;;  %v1824_v35 = vadd.f32 %v4520_v42, %v1551_v24  ;;  %v1895_v36 = vadd.f32 %v4522_v43, %v1559_v25  ;;  %v2263_v43 = vld [vmem:[%s4069_s24 + $0x200] sm:$0xff]  ;;  %v2384_v24 = vld [vmem:[%s4069_s24 + $0x5c8] sm:$0xff] }
 0x530   : > { %v1825_v48 = vpop.f32.mrf.mxu0  ;;  %v1896_v49 = vpop.f32.mrf.mxu1  ;;  %3443 = vmatpush3.msra.mxu0 %v2273_v40  ;;  %3478 = vmatpush3.msra.mxu1 %v2305_v41  ;;  %v2279_v40 = vld [vmem:[%s4069_s24 + $0x280] sm:$0xff]  ;;  %v2336_v25 = vld [vmem:[%s4069_s24 + $0x448] sm:$0xff] }
 0x531   : > { %v1826_v60 = vadd.f32 %v1825_v48, %v1555_v38  ;;  %v1897_v61 = vadd.f32 %v1896_v49, %v1563_v39  ;;  %3444 = vmatprep.subr.mxu0 %v2288_v44  ;;  %3479 = vmatprep.subr.mxu1 %v2320_v45  ;;  %v2264_v39 = vld [vmem:[%s4069_s24 + $0x208] sm:$0xff]  ;;  %v2295_v44 = vld [vmem:[%s4069_s24 + $0x300] sm:$0xff]  ;;  %v2189_v48 = vmax.f32 %v1895_v36, 0.0  ;;  %v2358_v49 = vld [vmem:[%s4069_s24 + $0x4f8] sm:$0xff] }
 0x532   : > { %3445 = vmatpush3.msra.mxu0 %v2272_v46  ;;  %3480 = vmatpush3.msra.mxu1 %v2304_v47  ;;  %v2187_v47 = vmax.f32 %v1824_v35, 0.0  ;;  %v2381_v35 = vld [vmem:[%s4069_s24 + $0x5b0] sm:$0xff] }
 0x533   : > { %v2188_v0 = vmax.f32 %v1826_v60, 0.0  ;;  %v2190_v1 = vmax.f32 %v1897_v61, 0.0  ;;  %3446 = vmatprep.subr.mxu0 %v2287_v50  ;;  %3481 = vmatprep.subr.mxu1 %v2319_v51  ;;  %v2390_v50 = vld [vmem:[%s4069_s24 + $0x5f8] sm:$0xff]  ;;  %v2333_v36 = vld [vmem:[%s4069_s24 + $0x430] sm:$0xff] }
 0x534   : > { %3447 = vmatpush3.msra.mxu0 %v2271_v62  ;;  %3482 = vmatpush3.msra.mxu1 %v2303_v63  ;;  %v2342_v51 = vld [vmem:[%s4069_s24 + $0x478] sm:$0xff]  ;;  %v2357_v63 = vld [vmem:[%s4069_s24 + $0x4f0] sm:$0xff] }
 0x535   : > { %2659 = vmatprep.mubr.f32.mxu0 %v2188_v0  ;;  %2729 = vmatprep.mubr.f32.mxu1 %v2190_v1  ;;  %v2374_v61 = vld [vmem:[%s4069_s24 + $0x578] sm:$0xff]  ;;  %v2389_v0 = vld [vmem:[%s4069_s24 + $0x5f0] sm:$0xff] }
 0x536   : > { %3448 = vmatprep.subr.mxu0 %v2286_v2  ;;  %3483 = vmatprep.subr.mxu1 %v2318_v4  ;;  %v2341_v1 = vld [vmem:[%s4069_s24 + $0x470] sm:$0xff]  ;;  %v2356_v4 = vld [vmem:[%s4069_s24 + $0x4e8] sm:$0xff] }
 0x537   : > { %3449 = vmatpush3.msra.mxu0 %v2270_v5  ;;  %3484 = vmatpush3.msra.mxu1 %v2302_v6  ;;  %v2373_v2 = vld [vmem:[%s4069_s24 + $0x570] sm:$0xff]  ;;  %v2388_v5 = vld [vmem:[%s4069_s24 + $0x5e8] sm:$0xff] }
 0x538   : > { %3450 = vmatprep.subr.mxu0 %v2285_v7  ;;  %3485 = vmatprep.subr.mxu1 %v2317_v8  ;;  %v2340_v6 = vld [vmem:[%s4069_s24 + $0x468] sm:$0xff]  ;;  %v2355_v8 = vld [vmem:[%s4069_s24 + $0x4e0] sm:$0xff] }
 0x539   : > { %3451 = vmatpush3.msra.mxu0 %v2269_v9  ;;  %3486 = vmatpush3.msra.mxu1 %v2301_v11  ;;  %v2372_v7 = vld [vmem:[%s4069_s24 + $0x568] sm:$0xff]  ;;  %v2387_v9 = vld [vmem:[%s4069_s24 + $0x5e0] sm:$0xff] }
 0x53a   : > { %3452 = vmatprep.subr.mxu0 %v2284_v12  ;;  %3487 = vmatprep.subr.mxu1 %v2316_v14  ;;  %v2339_v11 = vld [vmem:[%s4069_s24 + $0x460] sm:$0xff]  ;;  %v2354_v14 = vld [vmem:[%s4069_s24 + $0x4d8] sm:$0xff] }
 0x53b   : > { %3453 = vmatpush3.msra.mxu0 %v2268_v15  ;;  %3488 = vmatpush3.msra.mxu1 %v2300_v16  ;;  %v2371_v12 = vld [vmem:[%s4069_s24 + $0x560] sm:$0xff]  ;;  %v2386_v15 = vld [vmem:[%s4069_s24 + $0x5d8] sm:$0xff] }
 0x53c   : > { %3454 = vmatprep.subr.mxu0 %v2283_v17  ;;  %3489 = vmatprep.subr.mxu1 %v2315_v19  ;;  %v2338_v16 = vld [vmem:[%s4069_s24 + $0x458] sm:$0xff]  ;;  %v2353_v19 = vld [vmem:[%s4069_s24 + $0x4d0] sm:$0xff] }
 0x53d   : > { %3455 = vmatpush3.msra.mxu0 %v2267_v20  ;;  %3490 = vmatpush3.msra.mxu1 %v2299_v21  ;;  %v2370_v17 = vld [vmem:[%s4069_s24 + $0x558] sm:$0xff]  ;;  %v2385_v20 = vld [vmem:[%s4069_s24 + $0x5d0] sm:$0xff] }
 0x53e   : > { %3456 = vmatprep.subr.mxu0 %v2282_v22  ;;  %3491 = vmatprep.subr.mxu1 %v2314_v23  ;;  %v2337_v21 = vld [vmem:[%s4069_s24 + $0x450] sm:$0xff]  ;;  %v2352_v23 = vld [vmem:[%s4069_s24 + $0x4c8] sm:$0xff] }
 0x53f   : > { %3457 = vmatpush3.msra.mxu0 %v2266_v26  ;;  %3492 = vmatpush3.msra.mxu1 %v2298_v27  ;;  %v2369_v22 = vld [vmem:[%s4069_s24 + $0x550] sm:$0xff]  ;;  %v2368_v26 = vld [vmem:[%s4069_s24 + $0x548] sm:$0xff]  ;;  %v2351_v27 = vld [vmem:[%s4069_s24 + $0x4c0] sm:$0xff] }
 0x540   : > { %v4572_v37 = vpop.f32.mrf.mxu0  ;;  %v4574_v38 = vpop.f32.mrf.mxu1  ;;  %3458 = vmatprep.subr.mxu0 %v2281_v28  ;;  %3493 = vmatprep.subr.mxu1 %v2313_v29  ;;  %v2383_v28 = vld [vmem:[%s4069_s24 + $0x5c0] sm:$0xff] }
 0x541   : > { %3459 = vmatpush3.msra.mxu0 %v2265_v32  ;;  %3494 = vmatpush3.msra.mxu1 %v2297_v52  ;;  %v2335_v29 = vld [vmem:[%s4069_s24 + $0x440] sm:$0xff]  ;;  %v2350_v52 = vld [vmem:[%s4069_s24 + $0x4b8] sm:$0xff] }
 0x542   : > { %v1967_v41 = vpop.f32.mrf.mxu0  ;;  %v2038_v42 = vpop.f32.mrf.mxu1  ;;  %3460 = vmatprep.subr.mxu0 %v2280_v33  ;;  %3495 = vmatprep.subr.mxu1 %v2312_v34  ;;  %v2367_v32 = vld [vmem:[%s4069_s24 + $0x540] sm:$0xff]  ;;  %v2366_v33 = vld [vmem:[%s4069_s24 + $0x538] sm:$0xff]  ;;  %v2349_v34 = vld [vmem:[%s4069_s24 + $0x4b0] sm:$0xff] }
 0x543   : > { %v1968_v45 = vadd.f32 %v1967_v41, %v1571_v54  ;;  %v2039_v46 = vadd.f32 %v2038_v42, %v1579_v57  ;;  %3461 = vmatpush3.msra.mxu0 %v2264_v39  ;;  %3496 = vmatpush3.msra.mxu1 %v2296_v58  ;;  %v2382_v54 = vld [vmem:[%s4069_s24 + $0x5b8] sm:$0xff]  ;;  %v2365_v39 = vld [vmem:[%s4069_s24 + $0x530] sm:$0xff]  ;;  %v2348_v58 = vld [vmem:[%s4069_s24 + $0x4a8] sm:$0xff] }
 0x544   : > { %3462 = vmatprep.subr.mxu0 %v2279_v40  ;;  %3497 = vmatprep.subr.mxu1 %v2311_v59  ;;  %v2334_v57 = vld [vmem:[%s4069_s24 + $0x438] sm:$0xff]  ;;  %v2380_v40 = vld [vmem:[%s4069_s24 + $0x5a8] sm:$0xff]  ;;  %v2347_v42 = vld [vmem:[%s4069_s24 + $0x4a0] sm:$0xff] }
 0x545   : > { %3463 = vmatpush3.msra.mxu0 %v2263_v43  ;;  %3498 = vmatpush3.msra.mxu1 %v2295_v44  ;;  %v2192_v60 = vmax.f32 %v1968_v45, 0.0  ;;  %v2194_v62 = vmax.f32 %v2039_v46, 0.0  ;;  %v2332_v59 = vld [vmem:[%s4069_s24 + $0x428] sm:$0xff]  ;;  %v2379_v43 = vld [vmem:[%s4069_s24 + $0x5a0] sm:$0xff] }
 0x546   : > { %2660 = vmatmul.mubr.f32.vlgmr.msra.gmra.mxu0 %v2187_v47  ;;  %2730 = vmatmul.mubr.f32.vlgmr.msra.gmra.mxu1 %v2189_v48  ;;  %v2364_v41 = vld [vmem:[%s4069_s24 + $0x528] sm:$0xff]  ;;  %v2331_v44 = vld [vmem:[%s4069_s24 + $0x420] sm:$0xff]  ;;  %v2346_v47 = vld [vmem:[%s4069_s24 + $0x498] sm:$0xff] }
 0x547   : > { %3502 = vmatprep.subr.mxu0 %v2358_v49  ;;  %3537 = vmatprep.subr.mxu1 %v2390_v50  ;;  %v2363_v45 = vld [vmem:[%s4069_s24 + $0x520] sm:$0xff]  ;;  %v2378_v48 = vld [vmem:[%s4069_s24 + $0x598] sm:$0xff]  ;;  %v1567_v49 = vrot.slane %v4460_v53, %v4215_v18  ;;  %v1575_v50 = vrot.slane %v4460_v53, %v1542_v56  ;;  %v1587_v18 = vrot.slane %v4460_v53, %v1554_v30  ;;  %v2329_v56 = vld [vmem:[%s4069_s24 + $0x410] sm:$0xff] }
 0x548   : > { %3503 = vmatpush3.msra.mxu0 %v2342_v51  ;;  %2799 = vmatprep.mubr.f32.mxu0 %v2192_v60  ;;  %v2330_v60 = vld [vmem:[%s4069_s24 + $0x418] sm:$0xff] }
 0x549   : > { %3538 = vmatpush3.msra.mxu1 %v2374_v61  ;;  %2869 = vmatprep.mubr.f32.mxu1 %v2194_v62  ;;  %v2362_v61 = vld [vmem:[%s4069_s24 + $0x518] sm:$0xff]  ;;  %v2345_v62 = vld [vmem:[%s4069_s24 + $0x490] sm:$0xff]  ;;  %v1966_v30 = vadd.f32 %v4572_v37, %v1567_v49  ;;  %v2431_v49 = vld [vmem:[%s4069_s24 + $0x740] sm:$0xff] }
 0x54a   : > { %3504 = vmatprep.subr.mxu0 %v2357_v63  ;;  %3539 = vmatprep.subr.mxu1 %v2389_v0  ;;  %v2377_v63 = vld [vmem:[%s4069_s24 + $0x590] sm:$0xff] }
 0x54b   : > { %3505 = vmatpush3.msra.mxu0 %v2341_v1  ;;  %3540 = vmatpush3.msra.mxu1 %v2373_v2  ;;  %v2361_v0 = vld [vmem:[%s4069_s24 + $0x510] sm:$0xff]  ;;  %v1595_v2 = vrot.slane %v4460_v53, %v1562_v31  ;;  %v2375_v53 = vld [vmem:[%s4069_s24 + $0x580] sm:$0xff] }
 0x54c   : > { %3506 = vmatprep.subr.mxu0 %v2356_v4  ;;  %3541 = vmatprep.subr.mxu1 %v2388_v5  ;;  %v2344_v4 = vld [vmem:[%s4069_s24 + $0x488] sm:$0xff] }
 0x54d   : > { %3507 = vmatpush3.msra.mxu0 %v2340_v6  ;;  %3542 = vmatpush3.msra.mxu1 %v2372_v7  ;;  %v2376_v5 = vld [vmem:[%s4069_s24 + $0x588] sm:$0xff]  ;;  %v2037_v6 = vadd.f32 %v4574_v38, %v1575_v50  ;;  %v2191_v38 = vmax.f32 %v1966_v30, 0.0  ;;  %v2414_v50 = vld [vmem:[%s4069_s24 + $0x6b8] sm:$0xff]  ;;  %v2411_v30 = vld [vmem:[%s4069_s24 + $0x6a0] sm:$0xff] }
 0x54e   : > { %3508 = vmatprep.subr.mxu0 %v2355_v8  ;;  %3543 = vmatprep.subr.mxu1 %v2387_v9  ;;  %v2328_v8 = vld [vmem:[%s4069_s24 + $0x408] sm:$0xff] }
 0x54f   : > { %3509 = vmatpush3.msra.mxu0 %v2339_v11  ;;  %3544 = vmatpush3.msra.mxu1 %v2371_v12  ;;  %v2360_v9 = vld [vmem:[%s4069_s24 + $0x508] sm:$0xff]  ;;  %v2327_v11 = vld [vmem:[%s4069_s24 + $0x400] sm:$0xff] }
 0x550   : > { %3510 = vmatprep.subr.mxu0 %v2354_v14  ;;  %3545 = vmatprep.subr.mxu1 %v2386_v15  ;;  %v2359_v12 = vld [vmem:[%s4069_s24 + $0x500] sm:$0xff]  ;;  %v2193_v14 = vmax.f32 %v2037_v6, 0.0  ;;  %v2422_v15 = vld [vmem:[%s4069_s24 + $0x6f8] sm:$0xff] }
 0x551   : > { %3511 = vmatpush3.msra.mxu0 %v2338_v16  ;;  %3546 = vmatpush3.msra.mxu1 %v2370_v17  ;;  %v2454_v16 = vld [vmem:[%s4069_s24 + $0x7f8] sm:$0xff]  ;;  %v2443_v6 = vld [vmem:[%s4069_s24 + $0x7a0] sm:$0xff] }
 0x552   : > { %3512 = vmatprep.subr.mxu0 %v2353_v19  ;;  %3547 = vmatprep.subr.mxu1 %v2385_v20  ;;  %v4630_v46 = vpop.f32.mrf.mxu0  ;;  %v4639_v51 = vpop.f32.mrf.mxu1  ;;  %v2406_v17 = vld [vmem:[%s4069_s24 + $0x678] sm:$0xff] }
 0x553   : > { %3513 = vmatpush3.msra.mxu0 %v2337_v21  ;;  %3548 = vmatpush3.msra.mxu1 %v2369_v22  ;;  %v2438_v20 = vld [vmem:[%s4069_s24 + $0x778] sm:$0xff]  ;;  %v2421_v22 = vld [vmem:[%s4069_s24 + $0x6f0] sm:$0xff] }
 0x554   : > { %3514 = vmatprep.subr.mxu0 %v2352_v23  ;;  %3549 = vmatprep.subr.mxu1 %v2384_v24  ;;  %v2109_v1 = vpop.f32.mrf.mxu0  ;;  %v2180_v7 = vpop.f32.mrf.mxu1  ;;  %v2453_v23 = vld [vmem:[%s4069_s24 + $0x7f0] sm:$0xff] }
 0x555   : > { %3515 = vmatpush3.msra.mxu0 %v2336_v25  ;;  %3550 = vmatpush3.msra.mxu1 %v2368_v26  ;;  %v2110_v31 = vadd.f32 %v2109_v1, %v1587_v18  ;;  %v2181_v37 = vadd.f32 %v2180_v7, %v1595_v2  ;;  %v2405_v24 = vld [vmem:[%s4069_s24 + $0x670] sm:$0xff]  ;;  %v2420_v26 = vld [vmem:[%s4069_s24 + $0x6e8] sm:$0xff]  ;;  %v2395_v7 = vld [vmem:[%s4069_s24 + $0x620] sm:$0xff] }
 0x556   : > { %3516 = vmatprep.subr.mxu0 %v2351_v27  ;;  %3551 = vmatprep.subr.mxu1 %v2383_v28  ;;  %v2437_v25 = vld [vmem:[%s4069_s24 + $0x770] sm:$0xff]  ;;  %v2452_v27 = vld [vmem:[%s4069_s24 + $0x7e8] sm:$0xff] }
 0x557   : > { %3517 = vmatpush3.msra.mxu0 %v2335_v29  ;;  %3552 = vmatpush3.msra.mxu1 %v2367_v32  ;;  %v2196_v19 = vmax.f32 %v2110_v31, 0.0  ;;  %v2198_v21 = vmax.f32 %v2181_v37, 0.0  ;;  %v2404_v28 = vld [vmem:[%s4069_s24 + $0x668] sm:$0xff]  ;;  %v2419_v32 = vld [vmem:[%s4069_s24 + $0x6e0] sm:$0xff]  ;;  %v2445_v18 = vld [vmem:[%s4069_s24 + $0x7b0] sm:$0xff] }
 0x558   : > { %3518 = vmatprep.subr.mxu0 %v2350_v52  ;;  %3553 = vmatprep.subr.mxu1 %v2382_v54  ;;  %v2436_v29 = vld [vmem:[%s4069_s24 + $0x768] sm:$0xff]  ;;  %v2451_v52 = vld [vmem:[%s4069_s24 + $0x7e0] sm:$0xff]  ;;  %v2426_v31 = vld [vmem:[%s4069_s24 + $0x718] sm:$0xff] }
 0x559   : > { %3519 = vmatpush3.msra.mxu0 %v2334_v57  ;;  %3554 = vmatpush3.msra.mxu1 %v2366_v33  ;;  %v2403_v54 = vld [vmem:[%s4069_s24 + $0x660] sm:$0xff]  ;;  %v2418_v33 = vld [vmem:[%s4069_s24 + $0x6d8] sm:$0xff]  ;;  %v2412_v1 = vld [vmem:[%s4069_s24 + $0x6a8] sm:$0xff] }
 0x55a   : > { %3520 = vmatprep.subr.mxu0 %v2349_v34  ;;  %3555 = vmatprep.subr.mxu1 %v2381_v35  ;;  %v2435_v57 = vld [vmem:[%s4069_s24 + $0x760] sm:$0xff]  ;;  %v2450_v34 = vld [vmem:[%s4069_s24 + $0x7d8] sm:$0xff]  ;;  %v2444_v2 = vld [vmem:[%s4069_s24 + $0x7a8] sm:$0xff] }
 0x55b   : > { %3521 = vmatpush3.msra.mxu0 %v2333_v36  ;;  %3556 = vmatpush3.msra.mxu1 %v2365_v39  ;;  %v2402_v35 = vld [vmem:[%s4069_s24 + $0x658] sm:$0xff]  ;;  %v2417_v39 = vld [vmem:[%s4069_s24 + $0x6d0] sm:$0xff] }
 0x55c   : > { %3522 = vmatprep.subr.mxu0 %v2348_v58  ;;  %3557 = vmatprep.subr.mxu1 %v2380_v40  ;;  %v2434_v36 = vld [vmem:[%s4069_s24 + $0x758] sm:$0xff]  ;;  %v2449_v58 = vld [vmem:[%s4069_s24 + $0x7d0] sm:$0xff] }
 0x55d   : > { %3523 = vmatpush3.msra.mxu0 %v2332_v59  ;;  %3558 = vmatpush3.msra.mxu1 %v2364_v41  ;;  %v2401_v40 = vld [vmem:[%s4069_s24 + $0x650] sm:$0xff]  ;;  %v2416_v41 = vld [vmem:[%s4069_s24 + $0x6c8] sm:$0xff] }
 0x55e   : > { %3524 = vmatprep.subr.mxu0 %v2347_v42  ;;  %3559 = vmatprep.subr.mxu1 %v2379_v43  ;;  %v2433_v59 = vld [vmem:[%s4069_s24 + $0x750] sm:$0xff]  ;;  %v2448_v42 = vld [vmem:[%s4069_s24 + $0x7c8] sm:$0xff] }
 0x55f   : > { %3525 = vmatpush3.msra.mxu0 %v2331_v44  ;;  %3560 = vmatpush3.msra.mxu1 %v2363_v45  ;;  %v2400_v43 = vld [vmem:[%s4069_s24 + $0x648] sm:$0xff]  ;;  %v2415_v45 = vld [vmem:[%s4069_s24 + $0x6c0] sm:$0xff]  ;;  %v2393_v37 = vld [vmem:[%s4069_s24 + $0x610] sm:$0xff] }
 0x560   : > { %3526 = vmatprep.subr.mxu0 %v2346_v47  ;;  %3561 = vmatprep.subr.mxu1 %v2378_v48  ;;  %v2432_v44 = vld [vmem:[%s4069_s24 + $0x748] sm:$0xff]  ;;  %v2447_v47 = vld [vmem:[%s4069_s24 + $0x7c0] sm:$0xff] }
 0x561   : > { %3527 = vmatpush3.msra.mxu0 %v2330_v60  ;;  %3562 = vmatpush3.msra.mxu1 %v2362_v61  ;;  %v2399_v48 = vld [vmem:[%s4069_s24 + $0x640] sm:$0xff]  ;;  %v2446_v60 = vld [vmem:[%s4069_s24 + $0x7b8] sm:$0xff] }
 0x562   : > { %3528 = vmatprep.subr.mxu0 %v2345_v62  ;;  %3563 = vmatprep.subr.mxu1 %v2377_v63  ;;  %v2398_v61 = vld [vmem:[%s4069_s24 + $0x638] sm:$0xff]  ;;  %v2413_v63 = vld [vmem:[%s4069_s24 + $0x6b0] sm:$0xff] }
 0x563   : > { %3529 = vmatpush3.msra.mxu0 %v2329_v56  ;;  %3564 = vmatpush3.msra.mxu1 %v2361_v0  ;;  %v2430_v62 = vld [vmem:[%s4069_s24 + $0x738] sm:$0xff]  ;;  %v2397_v56 = vld [vmem:[%s4069_s24 + $0x630] sm:$0xff] }
 0x564   : > { %3530 = vmatprep.subr.mxu0 %v2344_v4  ;;  %3565 = vmatprep.subr.mxu1 %v2376_v5  ;;  %v2429_v0 = vld [vmem:[%s4069_s24 + $0x730] sm:$0xff]  ;;  %v2396_v4 = vld [vmem:[%s4069_s24 + $0x628] sm:$0xff] }
 0x565   : > { %3531 = vmatpush3.msra.mxu0 %v2328_v8  ;;  %3566 = vmatpush3.msra.mxu1 %v2360_v9  ;;  %v2428_v5 = vld [vmem:[%s4069_s24 + $0x728] sm:$0xff]  ;;  %v2427_v8 = vld [vmem:[%s4069_s24 + $0x720] sm:$0xff]  ;;  %v2410_v9 = vld [vmem:[%s4069_s24 + $0x698] sm:$0xff] }
 0x566   : > { %3532 = vmatprep.subr.mxu0 %v2343_v13  ;;  %3567 = vmatprep.subr.mxu1 %v2375_v53  ;;  %v2442_v13 = vld [vmem:[%s4069_s24 + $0x798] sm:$0xff] }
 0x567   : > { %3533 = vmatpush3.msra.mxu0 %v2327_v11  ;;  %3568 = vmatpush3.msra.mxu1 %v2359_v12  ;;  %v2394_v53 = vld [vmem:[%s4069_s24 + $0x618] sm:$0xff]  ;;  %v2409_v11 = vld [vmem:[%s4069_s24 + $0x690] sm:$0xff] }
 0x568   : > { %2800 = vmatmul.mubr.f32.vlgmr.msra.gmra.mxu0 %v2191_v38  ;;  %2870 = vmatmul.mubr.f32.vlgmr.msra.gmra.mxu1 %v2193_v14  ;;  %v2441_v12 = vld [vmem:[%s4069_s24 + $0x790] sm:$0xff]  ;;  %v2408_v14 = vld [vmem:[%s4069_s24 + $0x688] sm:$0xff] }
 0x569   : > { %3572 = vmatprep.subr.mxu0 %v2422_v15  ;;  %3607 = vmatprep.subr.mxu1 %v2454_v16  ;;  %v2425_v38 = vld [vmem:[%s4069_s24 + $0x710] sm:$0xff]  ;;  %v2440_v15 = vld [vmem:[%s4069_s24 + $0x788] sm:$0xff]  ;;  %v2108_v16 = vadd.f32 %v4630_v46, %v4466_v3 }
 0x56a   : > { %3573 = vmatpush3.msra.mxu0 %v2406_v17  ;;  %2939 = vmatprep.mubr.f32.mxu0 %v2196_v19  ;;  %v2179_v17 = vadd.f32 %v4639_v51, %v4471_v55  ;;  %v2392_v19 = vld [vmem:[%s4069_s24 + $0x608] sm:$0xff] }
 0x56b   : > { %3608 = vmatpush3.msra.mxu1 %v2438_v20  ;;  %3009 = vmatprep.mubr.f32.mxu1 %v2198_v21  ;;  %v2424_v20 = vld [vmem:[%s4069_s24 + $0x708] sm:$0xff]  ;;  %v2407_v21 = vld [vmem:[%s4069_s24 + $0x680] sm:$0xff] }
 0x56c   : > { %3574 = vmatprep.subr.mxu0 %v2421_v22  ;;  %3609 = vmatprep.subr.mxu1 %v2453_v23  ;;  %v2439_v22 = vld [vmem:[%s4069_s24 + $0x780] sm:$0xff] }
 0x56d   : > { %3575 = vmatpush3.msra.mxu0 %v2405_v24  ;;  %3610 = vmatpush3.msra.mxu1 %v2437_v25  ;;  %v2391_v23 = vld [vmem:[%s4069_s24 + $0x600] sm:$0xff]  ;;  %v2195_v25 = vmax.f32 %v2108_v16, 0.0 }
 0x56e   : > { %3576 = vmatprep.subr.mxu0 %v2420_v26  ;;  %3611 = vmatprep.subr.mxu1 %v2452_v27  ;;  %v2423_v24 = vld [vmem:[%s4069_s24 + $0x700] sm:$0xff]  ;;  %v2197_v26 = vmax.f32 %v2179_v17, 0.0 }
 0x56f   : > { %3577 = vmatpush3.msra.mxu0 %v2404_v28  ;;  %3612 = vmatpush3.msra.mxu1 %v2436_v29 }
 0x570   : > { %3578 = vmatprep.subr.mxu0 %v2419_v32  ;;  %3613 = vmatprep.subr.mxu1 %v2451_v52 }
 0x571   : > { %3579 = vmatpush3.msra.mxu0 %v2403_v54  ;;  %3614 = vmatpush3.msra.mxu1 %v2435_v57 }
 0x572   : > { %3580 = vmatprep.subr.mxu0 %v2418_v33  ;;  %3615 = vmatprep.subr.mxu1 %v2450_v34 }
 0x573   : > { %3581 = vmatpush3.msra.mxu0 %v2402_v35  ;;  %3616 = vmatpush3.msra.mxu1 %v2434_v36 }
 0x574   : > { %3582 = vmatprep.subr.mxu0 %v2417_v39  ;;  %3617 = vmatprep.subr.mxu1 %v2449_v58 }
 0x575   : > { %3583 = vmatpush3.msra.mxu0 %v2401_v40  ;;  %3618 = vmatpush3.msra.mxu1 %v2433_v59 }
 0x576   : > { %3584 = vmatprep.subr.mxu0 %v2416_v41  ;;  %3619 = vmatprep.subr.mxu1 %v2448_v42 }
 0x577   : > { %3585 = vmatpush3.msra.mxu0 %v2400_v43  ;;  %3620 = vmatpush3.msra.mxu1 %v2432_v44 }
 0x578   : > { %3586 = vmatprep.subr.mxu0 %v2415_v45  ;;  %3621 = vmatprep.subr.mxu1 %v2447_v47 }
 0x579   : > { %3587 = vmatpush3.msra.mxu0 %v2399_v48  ;;  %3622 = vmatpush3.msra.mxu1 %v2431_v49 }
 0x57a   : > { %3588 = vmatprep.subr.mxu0 %v2414_v50  ;;  %3623 = vmatprep.subr.mxu1 %v2446_v60 }
 0x57b   : > { %3589 = vmatpush3.msra.mxu0 %v2398_v61  ;;  %3624 = vmatpush3.msra.mxu1 %v2430_v62 }
 0x57c   : > { %3590 = vmatprep.subr.mxu0 %v2413_v63  ;;  %3625 = vmatprep.subr.mxu1 %v2445_v18  ;;  %v3315_v63 = vld [vmem:[%s959_s6] ss:$0 sm:$0xff] }
 0x57d   : > { %3591 = vmatpush3.msra.mxu0 %v2397_v56  ;;  %3626 = vmatpush3.msra.mxu1 %v2429_v0 }
 0x57e   : > { %3592 = vmatprep.subr.mxu0 %v2412_v1  ;;  %3627 = vmatprep.subr.mxu1 %v2444_v2 }
 0x57f   : > { %3593 = vmatpush3.msra.mxu0 %v2396_v4  ;;  %3628 = vmatpush3.msra.mxu1 %v2428_v5 }
 0x580   : > { %3594 = vmatprep.subr.mxu0 %v2411_v30  ;;  %3629 = vmatprep.subr.mxu1 %v2443_v6 }
 0x581   : > { %3595 = vmatpush3.msra.mxu0 %v2395_v7  ;;  %3630 = vmatpush3.msra.mxu1 %v2427_v8 }
 0x582   : > { %3596 = vmatprep.subr.mxu0 %v2410_v9  ;;  %3631 = vmatprep.subr.mxu1 %v2442_v13 }
 0x583   : > { %3597 = vmatpush3.msra.mxu0 %v2394_v53  ;;  %3632 = vmatpush3.msra.mxu1 %v2426_v31  ;;  %v3317_v53 = vld [vmem:[%s965_s29] ss:$0 sm:$0xff] }
 0x584   : > { %3598 = vmatprep.subr.mxu0 %v2409_v11  ;;  %3633 = vmatprep.subr.mxu1 %v2441_v12 }
 0x585   : > { %3599 = vmatpush3.msra.mxu0 %v2393_v37  ;;  %3634 = vmatpush3.msra.mxu1 %v2425_v38 }
 0x586   : > { %3600 = vmatprep.subr.mxu0 %v2408_v14  ;;  %3635 = vmatprep.subr.mxu1 %v2440_v15 }
 0x587   : > { %3601 = vmatpush3.msra.mxu0 %v2392_v19  ;;  %3636 = vmatpush3.msra.mxu1 %v2424_v20 }
 0x588   : > { %3602 = vmatprep.subr.mxu0 %v2407_v21  ;;  %3637 = vmatprep.subr.mxu1 %v2439_v22 }
 0x589   : > { %3603 = vmatpush3.msra.mxu0 %v2391_v23  ;;  %3638 = vmatpush3.msra.mxu1 %v2423_v24 }
 0x58a   : > { %2940 = vmatmul.mubr.f32.vlgmr.msra.gmra.mxu0 %v2195_v25  ;;  %3010 = vmatmul.mubr.f32.vlgmr.msra.gmra.mxu1 %v2197_v26 }
 0x5e5   : > { %v3394_v3 = vpop.f32.mrf.mxu0  ;;  %v3429_v55 = vpop.f32.mrf.mxu1 }
 0x5e7   : > { %v3395_v46 = vpop.f32.mrf.mxu0  ;;  %v3430_v27 = vpop.f32.mrf.mxu1 }
 0x5e8   : > { %v3396_v29 = vadd.f32 %v3395_v46, %v3394_v3  ;;  %v3431_v32 = vadd.f32 %v3430_v27, %v3429_v55 }
 0x5ea   : > { %v2592_v33 = vadd.f32 %v3431_v32, %v3396_v29 }
 0x606   : > { %v3464_v51 = vpop.f32.mrf.mxu0  ;;  %v3499_v52 = vpop.f32.mrf.mxu1 }
 0x608   : > { %v3465_v28 = vpop.f32.mrf.mxu0  ;;  %v3500_v34 = vpop.f32.mrf.mxu1 }
 0x609   : > { %v3466_v57 = vadd.f32 %v3465_v28, %v3464_v51  ;;  %v3501_v58 = vadd.f32 %v3500_v34, %v3499_v52 }
 0x60b   : > { %v2662_v36 = vadd.f32 %v3466_v57, %v2592_v33 }
 0x60d   : > { %v2732_v59 = vadd.f32 %v3501_v58, %v2662_v36 }
 0x628   : > { %v3534_v54 = vpop.f32.mrf.mxu0  ;;  %v3569_v39 = vpop.f32.mrf.mxu1 }
 0x62a   : > { %v3535_v35 = vpop.f32.mrf.mxu0  ;;  %v3570_v41 = vpop.f32.mrf.mxu1 }
 0x62b   : > { %v3536_v40 = vadd.f32 %v3535_v35, %v3534_v54  ;;  %v3571_v45 = vadd.f32 %v3570_v41, %v3569_v39 }
 0x62d   : > { %v2802_v42 = vadd.f32 %v3536_v40, %v2732_v59 }
 0x62f   : > { %v2872_v49 = vadd.f32 %v3571_v45, %v2802_v42 }
 0x64a   : > { %v3604_v43 = vpop.f32.mrf.mxu0  ;;  %v3639_v44 = vpop.f32.mrf.mxu1 }
 0x64c   : > { %v3605_v47 = vpop.f32.mrf.mxu0  ;;  %v3640_v48 = vpop.f32.mrf.mxu1 }
 0x64d   : > { %v3606_v50 = vadd.f32 %v3605_v47, %v3604_v43  ;;  %v3641_v61 = vadd.f32 %v3640_v48, %v3639_v44 }
 0x64f   : > { %v2942_v60 = vadd.f32 %v3606_v50, %v2872_v49 }
 0x651   : > { %v3012_v62 = vadd.f32 %v3641_v61, %v2942_v60 }
 0x653   : > { %v3015_v18 = vadd.f32 %v3012_v62, %v4274_v10  ;;  %v3316_v10 = vld [vmem:[%s962_s5] ss:$0 sm:$0xff] }
 0x655   : > { %v3023_v56 = vadd.f32 %v3315_v63, %v3015_v18 }
 0x657   : > { %v3026_v0 = vsel %vm1174_vm4, %v3023_v56, 0.0 }
 0x658   : > { %3027 = vadd.xlane.f32.xlu0 %v3026_v0 }
 0x6e1   : > { %v3028_v1 = vpop.xlane.xlu0 %3027 }
 0x6e2   : > { %v3029_v2 = vmul.f32 0.015625, %v3028_v1 }
 0x6e4   : > { %v3030_v4 = vsub.f32 %v3023_v56, %v3029_v2 }
 0x6e6   : > { %v3031_v5 = vmul.f32 %v3030_v4, %v3030_v4 }
 0x6e8   : > { %v3032_v30 = vsel %vm1174_vm4, %v3031_v5, 0.0 }
 0x6e9   : > { %3033 = vadd.xlane.f32.xlu1 %v3032_v30 }
 0x772   : > { %v3034_v6 = vpop.xlane.xlu1 %3033 }
 0x773   : > { %v3035_v7 = vmul.f32 0.015625, %v3034_v6 }
 0x775   : > { %v3036_v8 = vadd.f32 1e-05, %v3035_v7 }
 0x777   : > { %3755 = vrsqrt.f32 %v3036_v8 }
 0x784   : > { %v3756_v9 = vpop.eup %3755 }
 0x785   : > { %v3038_v13 = vmul.f32 %v3756_v9, %v3030_v4 }
 0x787   : > { %v3045_v31 = vmul.f32 %v3316_v10, %v3038_v13 }
 0x789   : > { %v3052_v11 = vadd.f32 %v3317_v53, %v3045_v31 }
 0x78b   : > { %3053 = vst.msk [vmem:[%s4829_s17] sm:$0x3] %vm1174_vm4, %v3052_v11 }
 0x78c PF: > { %s4845_s16 = sld [smem:[#allocation8_spill]] }
 0x792   : > { %s34_s3 = sadd.s32 1, %s4845_s16  }
 0x793   : > { %p31_p6 = scmp.ge.s32.totalorder %s34_s3, 8  }
 0x795   :  { %33 = sbr.rel (!%p31_p6) target bundleno = 21 (0x15), region = 198 }
 0x79a   :  { %3065 = vsyncpa [#allocation3], 1 }
 0x79b   :  { %3067 = vsyncpa [#allocation3 + $0x1], 1 }
 0x79c   :  { %3068 = vsyncpa [#allocation5], 1 }

// kernel: _lambda_.7
= control target key start
LH: loop header
LB: loop body
LE: loop exit
PB: predicated region body
PF: predicated region fallthrough
CT: control target
= control target key end

     0   :  { %s3584_s27 = smov 0   ;;  %s4042_s0 = inlined_call_operand.vmem [shape: f32[16,64], index: 0, kind: input, shape index: {}]   ;;  %s4043_s1 = inlined_call_operand.vmem [shape: f32[2,64], index: 1, kind: input, shape index: {}]   ;;  %s4044_s2 = inlined_call_operand.vmem [shape: f32[2,1,64], index: 2, kind: input, shape index: {}]   ;;  %s4045_s3 = inlined_call_operand.vmem [shape: f32[2,1,64], index: 3, kind: input, shape index: {}]   ;;  %s4046_s4 = inlined_call_operand.vmem [shape: f32[2,64,192], index: 4, kind: input, shape index: {}]   ;;  %s4047_s5 = inlined_call_operand.vmem [shape: f32[2,1,192], index: 5, kind: input, shape index: {}]   ;;  %s4048_s6 = inlined_call_operand.vmem [shape: f32[2,64,64], index: 6, kind: input, shape index: {}]   ;;  %s4049_s7 = inlined_call_operand.vmem [shape: f32[2,1,64], index: 7, kind: input, shape index: {}]   ;;  %s4050_s8 = inlined_call_operand.vmem [shape: f32[2,64,64], index: 8, kind: input, shape index: {}]   ;;  %s4051_s9 = inlined_call_operand.vmem [shape: f32[2,1,64], index: 9, kind: input, shape index: {}]   ;;  %s4052_s10 = inlined_call_operand.vmem [shape: f32[2,64,64], index: 10, kind: input, shape index: {}]   ;;  %s4053_s11 = inlined_call_operand.vmem [shape: f32[2,1,64], index: 11, kind: input, shape index: {}]   ;;  %s4054_s12 = inlined_call_operand.vmem [shape: f32[2,1,64], index: 12, kind: input, shape index: {}]   ;;  %s4055_s13 = inlined_call_operand.vmem [shape: f32[2,1,64], index: 13, kind: input, shape index: {}]   ;;  %s4056_s14 = inlined_call_operand.vmem [shape: f32[2,64,128], index: 14, kind: input, shape index: {}]   ;;  %s4057_s15 = inlined_call_operand.vmem [shape: f32[2,1,128], index: 15, kind: input, shape index: {}]   ;;  %s4058_s16 = inlined_call_operand.vmem [shape: f32[2,128,64], index: 16, kind: input, shape index: {}]   ;;  %s4059_s17 = inlined_call_operand.vmem [shape: f32[2,1,64], index: 17, kind: input, shape index: {}]   ;;  %s4060_s18 = inlined_call_operand.vmem [shape: f32[16,64], index: 18, kind: output, shape index: {}]  }
   0x1   :  { %4065 = sst [smem:[#allocation3_spill]] %s4042_s0 }
   0x2   :  { %4066 = sst [smem:[#allocation4_spill]] %s4043_s1 }
   0x3   :  { %4067 = sst [smem:[#allocation5_spill]] %s4044_s2 }
   0x4   :  { %4068 = sst [smem:[#allocation6_spill]] %s4045_s3 }
   0x5   :  { %4069 = sst [smem:[#allocation7_spill]] %s4046_s4 }
   0x6   :  { %4070 = sst [smem:[#allocation8_spill]] %s4047_s5 }
   0x7   :  { %4071 = sst [smem:[#allocation9_spill]] %s4048_s6 }
   0x8   :  { %4072 = sst [smem:[#allocation10_spill]] %s4049_s7 }
   0x9   :  { %4073 = sst [smem:[#allocation11_spill]] %s4050_s8 }
   0xa   :  { %4074 = sst [smem:[#allocation12_spill]] %s4052_s10 }
   0xb   :  { %4075 = sst [smem:[#allocation13_spill]] %s4054_s12 }
   0xc   :  { %4076 = sst [smem:[#allocation14_spill]] %s4058_s16 }
   0xd   :  { %4077 = sst [smem:[#allocation15_spill]] %s4059_s17 }
   0xe   :  { %4078 = sst [smem:[#allocation16_spill]] %s4060_s18 }
   0xf LB: > { %4079 = sst [smem:[#allocation2_spill]] %s3477_s27  ;;  %s3067_s28 = sadd.s32 4294967295, %s3477_s27   ;;  %s3477_s27 = sphi %s3584_s27, %s28_s27  }
  0x10   : > { %p3070_p0 = scmp.ge.s32.totalorder %s3477_s27, 1  ;;  %p638_p1 = scmp.lt.s32.totalorder %s3477_s27, 3 }
  0x12   : > { %p639_p2 = pnand %p3070_p0, %p638_p1 }
  0x13   : > { %p743_p3 = scmp.lt.s32.totalorder (!%p639_p2), %s3067_s28, 1  ;;  %s4082_s4 = sld [smem:[#allocation7_spill]] (!%p639_p2) }
  0x14   : > { %642 = sbr.rel (%p639_p2) target bundleno = 3697 (0xe71), region = 92  ;;  %s4083_s5 = sld [smem:[#allocation8_spill]] (!%p639_p2) }
  0x15   : > { %s4085_s6 = sld [smem:[#allocation9_spill]] (!%p639_p2)  ;;  %p3084_p4 = scmp.ne.s32.totalorder (!%p639_p2), %s3067_s28, 0 }
  0x16   : > { %s4086_s8 = sld [smem:[#allocation11_spill]] (!%p639_p2) }
  0x17   : > { %s4087_s10 = sld [smem:[#allocation12_spill]] (!%p639_p2) }
  0x18   : > { %s4089_s19 = sld [smem:[#allocation14_spill]] (!%p639_p2) }
  0x19   : > { %s3592_s29 = scalar_select %p743_p3, %s3067_s28, 1 }
  0x1a   : > { %s4091_s7 = sld [smem:[#allocation3_spill]] (!%p3084_p4) }
  0x1b   : > { %s3128_s2 = sshll.u32 %s3592_s29, 7  ;;  %s3073_s23 = sshll.u32 %s3592_s29, 1 }
  0x1c   : > { %s3607_s26 = scalar_lea.vmem %s4082_s4, %s3128_s2  ;;  %s3612_s27 = scalar_lea.vmem %s4083_s5, %s3073_s23 }
  0x1d   : > { %s3129_s18 = sshll.u32 %s3592_s29, 6  ;;  %s795_s23 = scalar_lea.vmem %s4057_s15, %s3592_s29 }
  0x1e   : > { %s3622_s3 = scalar_lea.vmem %s4085_s6, %s3129_s18  ;;  %s3627_s24 = scalar_lea.vmem %s4086_s8, %s3129_s18 }
  0x1f   : > { %s3636_s5 = scalar_lea.vmem %s4087_s10, %s3129_s18  ;;  %s787_s8 = scalar_lea.vmem %s4055_s13, %s3592_s29 }
  0x20   : > { %s3653_s25 = scalar_lea.vmem %s4056_s14, %s3129_s18  ;;  %s3662_s22 = scalar_lea.vmem %s4089_s19, %s3128_s2 }
  0x21   : > { %s4090_s6 = sld [smem:[#allocation15_spill]] }
  0x22   : > { %s4092_s10 = sld [smem:[#allocation16_spill]] (!%p3084_p4) }
  0x23   : > { %807 = sbr.rel (%p3084_p4) target bundleno = 42 (0x2a), region = 96 }
  0x27   : > { %s803_s12 = scalar_lea.vmem %s4090_s6, %s3592_s29 }
  0x28   : > { %v808_v0 = vld [vmem:[%s4091_s7] sm:$0xff]  ;;  %vm810_vm0 = vcmask 523264   ;;  %v809_v1 = vld [vmem:[%s4091_s7 + $0x8] sm:$0xff] }
  0x29   : > { %811 = vst.msk [vmem:[%s4092_s10] sm:$0xff] %vm810_vm0, %v808_v0  ;;  %812 = vst.msk [vmem:[%s4092_s10 + $0x8] sm:$0xff] %vm810_vm0, %v809_v1 }
  0x2a PF: > { %s4093_s19 = sld [smem:[#allocation16_spill]]  ;;  %vm817_vm1 = vcmask 523264   ;;  %v876_v9 = vld [vmem:[%s3607_s26 + $0x78] sm:$0xff]  ;;  %v875_v10 = vld [vmem:[%s3607_s26 + $0x70] sm:$0xff]  ;;  %v874_v11 = vld [vmem:[%s3607_s26 + $0x68] sm:$0xff]  ;;  %v3479_v13 = vmov 0.0   ;;  %v879_v35 = vlaneseq }
  0x2b   : > { %911 = vmatprep.subr.mxu0 %v876_v9  ;;  %v873_v12 = vld [vmem:[%s3607_s26 + $0x60] sm:$0xff]  ;;  %959 = vmatprep.mubr.f32.mxu0 %v3479_v13  ;;  %v872_v14 = vld [vmem:[%s3607_s26 + $0x58] sm:$0xff]  ;;  %v871_v15 = vld [vmem:[%s3607_s26 + $0x50] sm:$0xff]  ;;  %s4094_s16 = sld [smem:[#allocation5_spill]]  ;;  %vm3480_vm2 = vmmov 0   ;;  %s3481_s0 = smov 48  }
  0x2c   : > { %912 = vmatpush1.msra.mxu0 %v875_v10  ;;  %3222 = vmatprep.subr.mxu1 %v3479_v13  ;;  %v870_v16 = vld [vmem:[%s3607_s26 + $0x48] sm:$0xff]  ;;  %v869_v17 = vld [vmem:[%s3607_s26 + $0x40] sm:$0xff]  ;;  %v868_v18 = vld [vmem:[%s3607_s26 + $0x38] sm:$0xff]  ;;  %s4096_s4 = sld [smem:[#allocation6_spill]]  ;;  %v3726_v36 = vshrl.u32 %v879_v35, 7  ;;  %s3482_s10 = smov 64  }
  0x2d   : > { %913 = vmatprep.subr.mxu0 %v874_v11  ;;  %v867_v19 = vld [vmem:[%s3607_s26 + $0x30] sm:$0xff]  ;;  %v866_v20 = vld [vmem:[%s3607_s26 + $0x28] sm:$0xff]  ;;  %v865_v21 = vld [vmem:[%s3607_s26 + $0x20] sm:$0xff]  ;;  %3224 = vmatprep.mubr.msk.f32.mxu1 %vm3480_vm2, %v3479_v13  ;;  %vm975_vm3 = vcmask 130048   ;;  %vm1051_vm4 = vcmask 64512   ;;  %s3484_s6 = smov 32  }
  0x2e   : > { %914 = vmatpush1.msra.mxu0 %v873_v12  ;;  %v864_v22 = vld [vmem:[%s3607_s26 + $0x18] sm:$0xff]  ;;  %v863_v23 = vld [vmem:[%s3607_s26 + $0x10] sm:$0xff]  ;;  %v862_v24 = vld [vmem:[%s3607_s26 + $0x8] sm:$0xff]  ;;  %v3731_v37 = vsub.s32 0, %v3726_v36  ;;  %v885_v42 = vsub.s32 1, %v3726_v36  ;;  %s3485_s28 = smov 96  }
  0x2f   : > { %915 = vmatprep.subr.mxu0 %v872_v14  ;;  %v861_v25 = vld [vmem:[%s3607_s26] sm:$0xff]  ;;  %s3486_s20 = smov 16   ;;  %s3487_s21 = smov 80   ;;  %vm1648_vm5 = vcmask 261120   ;;  %vm1650_vm6 = vcmask 392192  }
  0x30   : > { %v3683_v2 = vld [vmem:[%s4093_s19] sm:$0xff]  ;;  %916 = vmatpush1.msra.mxu0 %v871_v15  ;;  %v3765_v56 = vld [vmem:[%s4093_s19 + $0x8] sm:$0xff]  ;;  %s4099_s26 = scalar_lea.vmem %s4051_s9, %s3592_s29 }
  0x31   : > { %v818_v3 = vsel %vm817_vm1, %v3683_v2, 0.0  ;;  %917 = vmatprep.subr.mxu0 %v870_v16  ;;  %s4095_s17 = scalar_lea.vmem %s4094_s16, %s3592_s29  ;;  %v877_v38 = vld [vmem:[%s3612_s27] sm:$0x3]  ;;  %s3483_s27 = smov 112   ;;  %v821_v57 = vsel %vm817_vm1, %v3765_v56, 0.0 }
  0x32   : > { %819 = vadd.xlane.f32.xlu0 %v818_v3  ;;  %918 = vmatpush1.msra.mxu0 %v869_v17  ;;  %v3713_v30 = vld [vmem:[%s4095_s17] ss:$0 sm:$0xff]  ;;  %s4097_s30 = scalar_lea.vmem %s4096_s4, %s3592_s29  ;;  %v3735_v39 = vrot.slane %v877_v38, %v3731_v37  ;;  %v3745_v43 = vrot.slane %v877_v38, %v885_v42  ;;  %s4098_s17 = sld [smem:[#allocation4_spill]] }
  0x33   : > { %919 = vmatprep.subr.mxu0 %v868_v18  ;;  %v3720_v32 = vld [vmem:[%s4097_s30] ss:$0 sm:$0xff] }
  0x34   : > { %920 = vmatpush1.msra.mxu0 %v867_v19 }
  0x35   : > { %921 = vmatprep.subr.mxu0 %v866_v20 }
  0x36   : > { %922 = vmatpush1.msra.mxu0 %v865_v21 }
  0x37   : > { %923 = vmatprep.subr.mxu0 %v864_v22 }
  0x38   : > { %924 = vmatpush1.msra.mxu0 %v863_v23 }
  0x39   : > { %925 = vmatprep.subr.mxu0 %v862_v24 }
  0x3a   : > { %926 = vmatpush1.msra.mxu0 %v861_v25 }
  0x3b   : > { %3247 = vmatprep.subr.mxu0 %v3479_v13 }
  0xbb   : > { %v820_v4 = vpop.xlane.xlu0 %819 }
  0xbc   : > { %v825_v5 = vmul.f32 0.015625, %v820_v4 }
  0xbe   : > { %v827_v6 = vsub.f32 %v3683_v2, %v825_v5 }
  0xc0   : > { %v829_v7 = vmul.f32 %v827_v6, %v827_v6 }
  0xc2   : > { %v831_v8 = vsel %vm817_vm1, %v829_v7, 0.0 }
  0xc3   : > { %832 = vadd.xlane.f32.xlu0 %v831_v8 }
 0x14c   : > { %v833_v26 = vpop.xlane.xlu0 %832 }
 0x14d   : > { %v837_v27 = vmul.f32 0.015625, %v833_v26 }
 0x14f   : > { %v839_v28 = vadd.f32 1e-05, %v837_v27 }
 0x151   : > { %3431 = vrsqrt.f32 %v839_v28 }
 0x15e   : > { %v3432_v29 = vpop.eup %3431 }
 0x15f   : > { %v843_v31 = vmul.f32 %v3432_v29, %v827_v6 }
 0x161   : > { %v851_v33 = vmul.f32 %v3713_v30, %v843_v31 }
 0x163   : > { %v859_v34 = vadd.f32 %v3720_v32, %v851_v33 }
 0x165   : > { %3087 = vmatmul.mubr.msk.f32.vlgmr.msra.gmra.mxu0 %vm817_vm1, %v859_v34 }
 0x166   : > { %965 = vmatprep.mubr.f32.mxu0 %v3479_v13 }
 0x225   : > { %v961_v40 = vpop.f32.mrf.mxu0 }
 0x226   : > { %v3738_v41 = vadd.f32 %v961_v40, %v3735_v39 }
 0x227   : > { %v963_v44 = vpop.f32.mrf.mxu0 }
 0x228   : > { %1138 = vrot.lane.b32.xlu0 %v3738_v41, %s3481_s0  ;;  %973 = vrot.lane.b32.xlu1 %v3738_v41, %s3482_s10  ;;  %v3750_v46 = vadd.f32 %v963_v44, %v3745_v43 }
 0x29a   : > { %v974_v45 = vpop.permute.xlu1 %973  ;;  %v1139_v58 = vpop.permute.xlu0 %1138 }
 0x29b   : > { %3223 = vmatpush3.xpose.msk.msra.mxu1 %vm975_vm3, %v974_v45 }
 0x29c   : > { %3227 = vmatprep.subr.mxu1 %v3479_v13 }
 0x29e   : > { %3225 = vmatmul.mubr.msk.f32.vlgmr.msra.gmra.mxu1 %vm975_vm3, %v3738_v41 }
 0x29f   : > { %3228 = vmatpush3.msra.mxu1 %v3750_v46  ;;  %3229 = vmatprep.mubr.msk.f32.mxu1 %vm3480_vm2, %v3479_v13 }
 0x2a0   : > { %3232 = vmatprep.subr.mxu1 %v3479_v13 }
 0x35e   : > { %v1046_v47 = vpop.f32.mrf.mxu1 }
 0x35f   : > { %v1050_v48 = vmul.f32 0.25, %v1046_v47 }
 0x360   : > { %v3226_v49 = vpop.f32.mrf.mxu1 }
 0x361   : > { %v1052_v50 = vsel %vm1051_vm4, %v1050_v48, -inf }
 0x362   : > { %1053 = vmax.xlane.f32.xlu1 %v1052_v50 }
 0x3eb   : > { %v1054_v51 = vpop.xlane.xlu1 %1053 }
 0x3ec   : > { %v1055_v52 = vsub.f32 %v1050_v48, %v1054_v51 }
 0x3ee   : > { %v1056_v53 = vmul.f32 1.442695, %v1055_v52 }
 0x3f0   : > { %3433 = vpow2.f32 %v1056_v53 }
 0x3fd   : > { %v3434_v54 = vpop.eup %3433 }
 0x3fe   : > { %v1058_v55 = vsel %vm1051_vm4, %v3434_v54, 0.0 }
 0x3ff   : > { %1059 = vadd.xlane.f32.xlu0 %v1058_v55 }
 0x415   : > { %1136 = vrot.lane.b32.xlu0 %v3738_v41, %s3483_s27 }
 0x434   : > { %822 = vadd.xlane.f32.xlu0 %v821_v57 }
 0x44a   : > { %1305 = vrot.lane.b32.xlu0 %v3738_v41, %s3484_s6 }
 0x488   : > { %v1060_v59 = vpop.xlane.xlu0 %1059 }
 0x489   : > { %3435 = vrcp.f32 %v1060_v59 }
 0x48c   : > { %v1137_v62 = vpop.permute.xlu0 %1136 }
 0x496   : > { %v3436_v60 = vpop.eup %3435 }
 0x497   : > { %v1062_v61 = vmul.f32 %v3436_v60, %v3434_v54 }
 0x499   : > { %3230 = vmatmul.mubr.msk.f32.vlgmr.msra.gmra.mxu1 %vm1051_vm4, %v1062_v61 }
 0x49a   : > { %3233 = vmatpush3.xpose.msk.msra.mxu1 %vm975_vm3, %v1139_v58  ;;  %3234 = vmatprep.mubr.msk.f32.mxu1 %vm3480_vm2, %v3479_v13 }
 0x49b   : > { %3237 = vmatprep.subr.mxu1 %v3479_v13 }
 0x49d   : > { %3235 = vmatmul.mubr.msk.f32.vlgmr.msra.gmra.mxu1 %vm975_vm3, %v1137_v62 }
 0x49e   : > { %3239 = vmatprep.mubr.msk.f32.mxu1 %vm3480_vm2, %v3479_v13 }
 0x4bd   : > { %v823_v63 = vpop.xlane.xlu0 %822 }
 0x4be   : > { %v826_v0 = vmul.f32 0.015625, %v823_v63 }
 0x4c0   : > { %v828_v1 = vsub.f32 %v3765_v56, %v826_v0 }
 0x4c1   : > { %v1306_v33 = vpop.permute.xlu0 %1305 }
 0x4c2   : > { %v830_v3 = vmul.f32 %v828_v1, %v828_v1 }
 0x4c4   : > { %v834_v4 = vsel %vm817_vm1, %v830_v3, 0.0 }
 0x4c5   : > { %835 = vadd.xlane.f32.xlu1 %v834_v4 }
 0x54e   : > { %v836_v5 = vpop.xlane.xlu1 %835 }
 0x54f   : > { %v838_v6 = vmul.f32 0.015625, %v836_v5 }
 0x551   : > { %v840_v7 = vadd.f32 1e-05, %v838_v6 }
 0x553   : > { %3437 = vrsqrt.f32 %v840_v7 }
 0x559   : > { %v3781_v8 = vpop.f32.mrf.mxu1 }
 0x55b   : > { %v3231_v9 = vpop.f32.mrf.mxu1 }
 0x55d   : > { %v1210_v10 = vpop.f32.mrf.mxu1 }
 0x55e   : > { %v1214_v11 = vmul.f32 0.25, %v1210_v10 }
 0x55f   : > { %v3236_v12 = vpop.f32.mrf.mxu1 }
 0x560   : > { %v3438_v14 = vpop.eup %3437  ;;  %v1215_v15 = vsel %vm1051_vm4, %v1214_v11, -inf }
 0x561   : > { %1216 = vmax.xlane.f32.xlu1 %v1215_v15  ;;  %v844_v16 = vmul.f32 %v3438_v14, %v828_v1 }
 0x563   : > { %v852_v17 = vmul.f32 %v3713_v30, %v844_v16 }
 0x565   : > { %v860_v18 = vadd.f32 %v3720_v32, %v852_v17 }
 0x567   : > { %3088 = vmatmul.mubr.msk.f32.gmra.mxu0 %vm817_vm1, %v860_v18 }
 0x568   : > { %3249 = vmatprep.mubr.msk.f32.mxu0 %vm3480_vm2, %v3479_v13 }
 0x572   : > { %1227 = vrot.lane.b32.xlu1 %v3750_v46, %s3483_s27 }
 0x576   : > { %1303 = vrot.lane.b32.xlu1 %v3738_v41, %s3485_s28 }
 0x57a   : > { %1471 = vrot.lane.b32.xlu1 %v3738_v41, %s3486_s20 }
 0x57e   : > { %1469 = vrot.lane.b32.xlu1 %v3738_v41, %s3487_s21 }
 0x5ea   : > { %v1217_v19 = vpop.xlane.xlu1 %1216 }
 0x5eb   : > { %v1218_v20 = vsub.f32 %v1214_v11, %v1217_v19 }
 0x5ed   : > { %v1219_v21 = vmul.f32 1.442695, %v1218_v20 }
 0x5ee   : > { %v1228_v22 = vpop.permute.xlu1 %1227 }
 0x5ef   : > { %3439 = vpow2.f32 %v1219_v21  ;;  %3238 = vmatpush3.msra.mxu1 %v1228_v22 }
 0x5f0   : > { %3242 = vmatprep.subr.mxu1 %v3479_v13 }
 0x5f2   : > { %v1304_v27 = vpop.permute.xlu1 %1303 }
 0x5f6   : > { %v1472_v28 = vpop.permute.xlu1 %1471 }
 0x5fa   : > { %v1470_v29 = vpop.permute.xlu1 %1469 }
 0x5fc   : > { %v3440_v23 = vpop.eup %3439 }
 0x5fd   : > { %v1221_v24 = vsel %vm1051_vm4, %v3440_v23, 0.0 }
 0x5fe   : > { %1222 = vadd.xlane.f32.xlu1 %v1221_v24 }
 0x627   : > { %v967_v25 = vpop.f32.mrf.mxu0 }
 0x628   : > { %v968_v26 = vadd.f32 %v967_v25, %v3735_v39 }
 0x62a   : > { %1983 = vrot.lane.b32.xlu0 %v968_v26, %s3484_s6  ;;  %1653 = vrot.lane.b32.xlu1 %v968_v26, %s3482_s10 }
 0x62e   : > { %2149 = vrot.lane.b32.xlu0 %v968_v26, %s3486_s20  ;;  %1816 = vrot.lane.b32.xlu1 %v968_v26, %s3481_s0 }
 0x632   : > { %1814 = vrot.lane.b32.xlu1 %v968_v26, %s3483_s27 }
 0x636   : > { %1981 = vrot.lane.b32.xlu1 %v968_v26, %s3485_s28 }
 0x63a   : > { %2147 = vrot.lane.b32.xlu1 %v968_v26, %s3487_s21 }
 0x687   : > { %v1223_v30 = vpop.xlane.xlu1 %1222 }
 0x688   : > { %3441 = vrcp.f32 %v1223_v30 }
 0x695   : > { %v3442_v31 = vpop.eup %3441 }
 0x696   : > { %v1225_v32 = vmul.f32 %v3442_v31, %v3440_v23  ;;  %v969_v23 = vpop.f32.mrf.mxu0 }
 0x697   : > { %v970_v24 = vadd.f32 %v969_v23, %v3745_v43 }
 0x698   : > { %3240 = vmatmul.mubr.msk.f32.vlgmr.msra.gmra.mxu1 %vm1051_vm4, %v1225_v32 }
 0x699   : > { %3243 = vmatpush3.xpose.msk.msra.mxu1 %vm975_vm3, %v1306_v33  ;;  %3244 = vmatprep.mubr.msk.f32.mxu1 %vm3480_vm2, %v3479_v13 }
 0x69a   : > { %3252 = vmatprep.subr.mxu1 %v3479_v13 }
 0x69c   : > { %3245 = vmatmul.mubr.msk.f32.vlgmr.msra.gmra.mxu1 %vm975_vm3, %v1304_v27  ;;  %v1654_v34 = vpop.permute.xlu1 %1653  ;;  %v1984_v39 = vpop.permute.xlu0 %1983 }
 0x69d   : > { %3253 = vmatpush3.xpose.msk.msra.mxu1 %vm975_vm3, %v1472_v28  ;;  %3254 = vmatprep.mubr.msk.f32.mxu1 %vm3480_vm2, %v3479_v13 }
 0x69e   : > { %3262 = vmatprep.subr.mxu1 %v3479_v13 }
 0x6a0   : > { %3255 = vmatmul.mubr.msk.f32.vlgmr.msra.gmra.mxu1 %vm975_vm3, %v1470_v29  ;;  %v1817_v35 = vpop.permute.xlu1 %1816  ;;  %v2150_v41 = vpop.permute.xlu0 %2149 }
 0x6a1   : > { %3263 = vmatpush3.xpose.msk.msra.mxu1 %vm975_vm3, %v1654_v34  ;;  %3264 = vmatprep.mubr.msk.f32.mxu1 %vm3480_vm2, %v3479_v13 }
 0x6a2   : > { %3272 = vmatprep.subr.mxu1 %v3479_v13 }
 0x6a4   : > { %3265 = vmatmul.mubr.msk.f32.vlgmr.msra.gmra.mxu1 %vm975_vm3, %v968_v26  ;;  %v1815_v38 = vpop.permute.xlu1 %1814 }
 0x6a5   : > { %3273 = vmatpush3.xpose.msk.msra.mxu1 %vm975_vm3, %v1817_v35  ;;  %3274 = vmatprep.mubr.msk.f32.mxu1 %vm3480_vm2, %v3479_v13 }
 0x6a6   : > { %3282 = vmatprep.subr.mxu1 %v3479_v13 }
 0x6a8   : > { %3275 = vmatmul.mubr.msk.f32.vlgmr.msra.gmra.mxu1 %vm975_vm3, %v1815_v38  ;;  %v1982_v40 = vpop.permute.xlu1 %1981 }
 0x6a9   : > { %3283 = vmatpush3.xpose.msk.msra.mxu1 %vm975_vm3, %v1984_v39  ;;  %3284 = vmatprep.mubr.msk.f32.mxu1 %vm3480_vm2, %v3479_v13 }
 0x6aa   : > { %3292 = vmatprep.subr.mxu1 %v3479_v13 }
 0x6ac   : > { %3285 = vmatmul.mubr.msk.f32.vlgmr.msra.gmra.mxu1 %vm975_vm3, %v1982_v40  ;;  %v2148_v42 = vpop.permute.xlu1 %2147 }
 0x6ad   : > { %3293 = vmatpush3.xpose.msk.msra.mxu1 %vm975_vm3, %v2150_v41  ;;  %3294 = vmatprep.mubr.msk.f32.mxu1 %vm3480_vm2, %v3479_v13 }
 0x6ae   : > { %3340 = vmatprep.subr.mxu1 %v3479_v13 }
 0x6b0   : > { %3295 = vmatmul.mubr.msk.f32.vlgmr.msra.gmra.mxu1 %vm975_vm3, %v2148_v42 }
 0x6b1   : > { %3356 = vmatprep.mubr.msk.f32.mxu1 %vm3480_vm2, %v3479_v13 }
 0x758   : > { %v3840_v44 = vpop.f32.mrf.mxu1 }
 0x75a   : > { %v3241_v45 = vpop.f32.mrf.mxu1 }
 0x75c   : > { %v1377_v47 = vpop.f32.mrf.mxu1 }
 0x75d   : > { %v1381_v48 = vmul.f32 0.25, %v1377_v47 }
 0x75e   : > { %v3246_v49 = vpop.f32.mrf.mxu1 }
 0x75f   : > { %v1382_v50 = vsel %vm1051_vm4, %v1381_v48, -inf }
 0x760   : > { %1383 = vmax.xlane.f32.xlu0 %v1382_v50  ;;  %v1543_v51 = vpop.f32.mrf.mxu1 }
 0x761   : > { %v1547_v52 = vmul.f32 0.25, %v1543_v51 }
 0x762   : > { %v3256_v53 = vpop.f32.mrf.mxu1 }
 0x763   : > { %v1548_v54 = vsel %vm1051_vm4, %v1547_v52, -inf }
 0x764   : > { %1549 = vmax.xlane.f32.xlu1 %v1548_v54  ;;  %v1725_v55 = vpop.f32.mrf.mxu1 }
 0x765   : > { %v1729_v57 = vmul.f32 0.25, %v1725_v55 }
 0x766   : > { %v3266_v58 = vpop.f32.mrf.mxu1 }
 0x767   : > { %v1730_v59 = vsel %vm1051_vm4, %v1729_v57, -inf }
 0x768   : > { %1731 = vmax.xlane.f32.xlu0 %v1730_v59  ;;  %v1888_v60 = vpop.f32.mrf.mxu1 }
 0x769   : > { %v1892_v61 = vmul.f32 0.25, %v1888_v60 }
 0x76a   : > { %v3276_v62 = vpop.f32.mrf.mxu1 }
 0x76b   : > { %v1893_v63 = vsel %vm1051_vm4, %v1892_v61, -inf }
 0x76c   : > { %1894 = vmax.xlane.f32.xlu0 %v1893_v63  ;;  %v2055_v0 = vpop.f32.mrf.mxu1 }
 0x76d   : > { %v2059_v1 = vmul.f32 0.25, %v2055_v0 }
 0x76e   : > { %v3286_v3 = vpop.f32.mrf.mxu1 }
 0x76f   : > { %v2060_v4 = vsel %vm1051_vm4, %v2059_v1, -inf }
 0x770   : > { %2061 = vmax.xlane.f32.xlu1 %v2060_v4  ;;  %v2221_v5 = vpop.f32.mrf.mxu1 }
 0x771   : > { %v2225_v6 = vmul.f32 0.25, %v2221_v5 }
 0x772   : > { %v3296_v7 = vpop.f32.mrf.mxu1 }
 0x773   : > { %v2226_v9 = vsel %vm1051_vm4, %v2225_v6, -inf  ;;  %v2334_v7 = vld [vmem:[%s3622_s3 + $0x30] sm:$0xff] }
 0x774   : > { %2227 = vmax.xlane.f32.xlu0 %v2226_v9  ;;  %v2333_v9 = vld [vmem:[%s3622_s3 + $0x28] sm:$0xff] }
 0x781   : > { %1393 = vrot.lane.b32.xlu1 %v3750_v46, %s3485_s28 }
 0x7e9   : > { %v1384_v10 = vpop.xlane.xlu0 %1383 }
 0x7ea   : > { %v1385_v11 = vsub.f32 %v1381_v48, %v1384_v10  ;;  %v2332_v10 = vld [vmem:[%s3622_s3 + $0x20] sm:$0xff] }
 0x7ec   : > { %v1386_v12 = vmul.f32 1.442695, %v1385_v11 }
 0x7ed   : > { %v1550_v14 = vpop.xlane.xlu1 %1549 }
 0x7ee   : > { %3443 = vpow2.f32 %v1386_v12  ;;  %v1551_v15 = vsub.f32 %v1547_v52, %v1550_v14 }
 0x7f0   : > { %v1552_v16 = vmul.f32 1.442695, %v1551_v15 }
 0x7f1   : > { %v1732_v25 = vpop.xlane.xlu0 %1731 }
 0x7f2   : > { %3445 = vpow2.f32 %v1552_v16  ;;  %v1733_v26 = vsub.f32 %v1729_v57, %v1732_v25  ;;  %v2331_v16 = vld [vmem:[%s3622_s3 + $0x18] sm:$0xff] }
 0x7f4   : > { %v1734_v29 = vmul.f32 1.442695, %v1733_v26 }
 0x7f5   : > { %v1895_v27 = vpop.xlane.xlu0 %1894 }
 0x7f6   : > { %v1896_v28 = vsub.f32 %v1892_v61, %v1895_v27  ;;  %3447 = vpow2.f32 %v1734_v29 }
 0x7f8   : > { %v1897_v32 = vmul.f32 1.442695, %v1896_v28 }
 0x7f9   : > { %v2062_v17 = vpop.xlane.xlu1 %2061 }
 0x7fa   : > { %v2063_v30 = vsub.f32 %v2059_v1, %v2062_v17  ;;  %3449 = vpow2.f32 %v1897_v32  ;;  %v2330_v17 = vld [vmem:[%s3622_s3 + $0x10] sm:$0xff] }
 0x7fb   : > { %v3444_v18 = vpop.eup %3443 }
 0x7fc   : > { %v1388_v19 = vsel %vm1051_vm4, %v3444_v18, 0.0  ;;  %v2064_v33 = vmul.f32 1.442695, %v2063_v30 }
 0x7fd   : > { %1389 = vadd.xlane.f32.xlu1 %v1388_v19  ;;  %v1394_v20 = vpop.permute.xlu1 %1393  ;;  %v2228_v31 = vpop.xlane.xlu0 %2227  ;;  %v2328_v19 = vld [vmem:[%s3622_s3] sm:$0xff] }
 0x7fe   : > { %3248 = vmatpush3.msra.mxu0 %v1394_v20  ;;  %v2229_v34 = vsub.f32 %v2225_v6, %v2228_v31  ;;  %3451 = vpow2.f32 %v2064_v33  ;;  %v2335_v6 = vld [vmem:[%s3622_s3 + $0x38] sm:$0xff] }
 0x7ff   : > { %v3446_v21 = vpop.eup %3445  ;;  %3257 = vmatprep.subr.mxu0 %v3479_v13 }
 0x800   : > { %v1554_v22 = vsel %vm1051_vm4, %v3446_v21, 0.0  ;;  %v2230_v35 = vmul.f32 1.442695, %v2229_v34 }
 0x801   : > { %1555 = vadd.xlane.f32.xlu0 %v1554_v22 }
 0x802   : > { %3453 = vpow2.f32 %v2230_v35 }
 0x803   : > { %v3448_v43 = vpop.eup %3447 }
 0x804   : > { %v1736_v39 = vsel %vm1051_vm4, %v3448_v43, 0.0 }
 0x807   : > { %v3450_v38 = vpop.eup %3449 }
 0x808   : > { %v1899_v41 = vsel %vm1051_vm4, %v3450_v38, 0.0 }
 0x80b   : > { %v3452_v40 = vpop.eup %3451 }
 0x80e   : > { %1905 = vrot.lane.b32.xlu1 %v970_v24, %s3483_s27  ;;  %s4101_s27 = sld [smem:[#allocation10_spill]] }
 0x80f   : > { %v3454_v42 = vpop.eup %3453 }
 0x810   : > { %v2232_v45 = vsel %vm1051_vm4, %v3454_v42, 0.0 }
 0x814   : > { %s4102_s2 = scalar_lea.vmem %s4101_s27, %s3592_s29 }
 0x817   : > { %1559 = vrot.lane.b32.xlu0 %v3750_v46, %s3487_s21  ;;  %v2066_v46 = vsel %vm1051_vm4, %v3452_v40, 0.0 }
 0x832   : > { %1737 = vadd.xlane.f32.xlu1 %v1736_v39 }
 0x836   : > { %2067 = vadd.xlane.f32.xlu1 %v2066_v46  ;;  %1900 = vadd.xlane.f32.xlu0 %v1899_v41  ;;  %v2434_v41 = vld [vmem:[%s3627_s24 + $0x28] sm:$0xff] }
 0x83a   : > { %2233 = vadd.xlane.f32.xlu0 %v2232_v45  ;;  %v2432_v45 = vld [vmem:[%s3627_s24 + $0x18] sm:$0xff] }
 0x847   : > { %2071 = vrot.lane.b32.xlu1 %v970_v24, %s3485_s28 }
 0x84b   : > { %1636 = vrot.lane.b32.xlu1 %v3840_v44, %s3486_s20 }
 0x850   : > { %2237 = vrot.lane.b32.xlu0 %v970_v24, %s3487_s21 }
 0x886   : > { %v1390_v47 = vpop.xlane.xlu1 %1389 }
 0x887   : > { %3455 = vrcp.f32 %v1390_v47  ;;  %v2431_v47 = vld [vmem:[%s3627_s24 + $0x10] sm:$0xff] }
 0x88a   : > { %v1556_v48 = vpop.xlane.xlu0 %1555  ;;  %v1906_v44 = vpop.permute.xlu1 %1905 }
 0x88b   : > { %3457 = vrcp.f32 %v1556_v48  ;;  %v2430_v48 = vld [vmem:[%s3627_s24 + $0x8] sm:$0xff] }
 0x88e   : > { %v1560_v51 = vpop.permute.xlu0 %1559 }
 0x894   : > { %v3456_v49 = vpop.eup %3455 }
 0x895   : > { %v1392_v50 = vmul.f32 %v3456_v49, %v3444_v18  ;;  %v2329_v18 = vld [vmem:[%s3622_s3 + $0x8] sm:$0xff]  ;;  %v2429_v49 = vld [vmem:[%s3627_s24] sm:$0xff] }
 0x897   : > { %3250 = vmatmul.mubr.msk.f32.vlgmr.msra.gmra.mxu0 %vm1051_vm4, %v1392_v50  ;;  %v2428_v50 = vld [vmem:[%s4098_s17] sm:$0x3] }
 0x898   : > { %v3458_v52 = vpop.eup %3457  ;;  %3258 = vmatpush3.msra.mxu0 %v1560_v51  ;;  %3259 = vmatprep.mubr.msk.f32.mxu0 %vm3480_vm2, %v3479_v13  ;;  %v2524_v51 = vld [vmem:[%s3636_s5 + $0x38] sm:$0xff] }
 0x899   : > { %3267 = vmatprep.subr.mxu0 %v3479_v13  ;;  %v1558_v53 = vmul.f32 %v3458_v52, %v3446_v21  ;;  %3341 = vmatpush3.msra.mxu1 %v2524_v51  ;;  %v2523_v52 = vld [vmem:[%s3636_s5 + $0x30] sm:$0xff] }
 0x89a   : > { %3342 = vmatprep.subr.mxu1 %v3479_v13  ;;  %v2788_v51 = vld [vmem:[%s3662_s22 + $0x30] sm:$0xff] }
 0x89b   : > { %3260 = vmatmul.mubr.msk.f32.vlgmr.msra.gmra.mxu0 %vm1051_vm4, %v1558_v53  ;;  %v2522_v53 = vld [vmem:[%s3636_s5 + $0x28] sm:$0xff]  ;;  %3343 = vmatpush3.msra.mxu1 %v2523_v52 }
 0x89c   : > { %3268 = vmatpush3.msra.mxu0 %v970_v24  ;;  %3269 = vmatprep.mubr.msk.f32.mxu0 %vm3480_vm2, %v3479_v13  ;;  %v2787_v52 = vld [vmem:[%s3662_s22 + $0x28] sm:$0xff] }
 0x89d   : > { %3277 = vmatprep.subr.mxu0 %v3479_v13  ;;  %3344 = vmatprep.subr.mxu1 %v3479_v13 }
 0x89e   : > { %3345 = vmatpush3.msra.mxu1 %v2522_v53  ;;  %v2786_v53 = vld [vmem:[%s3662_s22 + $0x20] sm:$0xff] }
 0x89f   : > { %3346 = vmatprep.subr.mxu1 %v3479_v13 }
 0x8bb   : > { %v1738_v54 = vpop.xlane.xlu1 %1737 }
 0x8bc   : > { %3459 = vrcp.f32 %v1738_v54  ;;  %v2520_v54 = vld [vmem:[%s3636_s5 + $0x18] sm:$0xff] }
 0x8bf   : > { %v1901_v55 = vpop.xlane.xlu0 %1900  ;;  %v2068_v57 = vpop.xlane.xlu1 %2067 }
 0x8c0   : > { %3461 = vrcp.f32 %v1901_v55  ;;  %v2519_v55 = vld [vmem:[%s3636_s5 + $0x10] sm:$0xff] }
 0x8c1   : > { %3463 = vrcp.f32 %v2068_v57  ;;  %v2518_v57 = vld [vmem:[%s3636_s5 + $0x8] sm:$0xff] }
 0x8c3   : > { %v2234_v58 = vpop.xlane.xlu0 %2233  ;;  %v2072_v0 = vpop.permute.xlu1 %2071 }
 0x8c4   : > { %3465 = vrcp.f32 %v2234_v58  ;;  %v2517_v58 = vld [vmem:[%s3636_s5] sm:$0xff] }
 0x8c7   : > { %v2238_v4 = vpop.permute.xlu0 %2237  ;;  %v1637_v28 = vpop.permute.xlu1 %1636 }
 0x8c8   : > { %v1647_v30 = vsel %vm975_vm3, %v3781_v8, %v1637_v28  ;;  %v2435_v8 = vld [vmem:[%s3627_s24 + $0x30] sm:$0xff] }
 0x8c9   : > { %v3460_v59 = vpop.eup %3459 }
 0x8ca   : > { %v1740_v60 = vmul.f32 %v3460_v59, %v3448_v43 }
 0x8cc   : > { %3270 = vmatmul.mubr.msk.f32.vlgmr.msra.gmra.mxu0 %vm1051_vm4, %v1740_v60 }
 0x8cd   : > { %3278 = vmatpush3.msra.mxu0 %v1906_v44  ;;  %3279 = vmatprep.mubr.msk.f32.mxu0 %vm3480_vm2, %v3479_v13  ;;  %v3462_v61 = vpop.eup %3461  ;;  %v2521_v44 = vld [vmem:[%s3636_s5 + $0x20] sm:$0xff]  ;;  %s4100_s5 = scalar_lea.vmem %s4053_s11, %s3592_s29 }
 0x8ce   : > { %3287 = vmatprep.subr.mxu0 %v3479_v13  ;;  %v1903_v62 = vmul.f32 %v3462_v61, %v3450_v38  ;;  %v3464_v63 = vpop.eup %3463  ;;  %3347 = vmatpush3.msra.mxu1 %v2521_v44  ;;  %v3116_v61 = vld [vmem:[%s4099_s26] ss:$0 sm:$0xff] }
 0x8cf   : > { %v2070_v1 = vmul.f32 %v3464_v63, %v3452_v40  ;;  %v2436_v40 = vld [vmem:[%s3627_s24 + $0x38] sm:$0xff]  ;;  %3348 = vmatprep.subr.mxu1 %v3479_v13 }
 0x8d0   : > { %3280 = vmatmul.mubr.msk.f32.vlgmr.msra.gmra.mxu0 %vm1051_vm4, %v1903_v62  ;;  %3349 = vmatpush3.msra.mxu1 %v2520_v54 }
 0x8d1   : > { %3288 = vmatpush3.msra.mxu0 %v2072_v0  ;;  %3289 = vmatprep.mubr.msk.f32.mxu0 %vm3480_vm2, %v3479_v13  ;;  %v3466_v3 = vpop.eup %3465 }
 0x8d2   : > { %3297 = vmatprep.subr.mxu0 %v3479_v13  ;;  %v2236_v5 = vmul.f32 %v3466_v3, %v3454_v42  ;;  %v2433_v42 = vld [vmem:[%s3627_s24 + $0x20] sm:$0xff]  ;;  %3350 = vmatprep.subr.mxu1 %v3479_v13 }
 0x8d3   : > { %3351 = vmatpush3.msra.mxu1 %v2519_v55 }
 0x8d4   : > { %3290 = vmatmul.mubr.msk.f32.vlgmr.msra.gmra.mxu0 %vm1051_vm4, %v2070_v1  ;;  %3352 = vmatprep.subr.mxu1 %v3479_v13  ;;  %v3488_v1 = vmov 1966171168  }
 0x8d5   : > { %3298 = vmatpush3.msra.mxu0 %v2238_v4  ;;  %3299 = vmatprep.mubr.msk.f32.mxu0 %vm3480_vm2, %v3479_v13  ;;  %v2607_v3 = vunpack.c.l.s4 %v3488_v1 }
 0x8d6   : > { %3302 = vmatprep.subr.mxu0 %v2335_v6  ;;  %3353 = vmatpush3.msra.mxu1 %v2518_v57 }
 0x8d7   : > { %3354 = vmatprep.subr.mxu1 %v3479_v13  ;;  %v2608_v4 = vunpack.c.0.s8 %v2607_v3 }
 0x8d8   : > { %3300 = vmatmul.mubr.msk.f32.vlgmr.msra.gmra.mxu0 %vm1051_vm4, %v2236_v5  ;;  %3355 = vmatpush3.msra.mxu1 %v2517_v58 }
 0x8d9   : > { %3303 = vmatpush3.msra.mxu0 %v2335_v6  ;;  %v2611_v5 = vsub.s32 %v2608_v4, %v3726_v36 }
 0x8da   : > { %3304 = vmatprep.subr.mxu0 %v2334_v7 }
 0x8db   : > { %3305 = vmatpush3.msra.mxu0 %v2334_v7 }
 0x8dc   : > { %3306 = vmatprep.subr.mxu0 %v2333_v9 }
 0x8dd   : > { %3307 = vmatpush3.msra.mxu0 %v2333_v9 }
 0x8de   : > { %3308 = vmatprep.subr.mxu0 %v2332_v10 }
 0x8df   : > { %3309 = vmatpush3.msra.mxu0 %v2332_v10 }
 0x8e0   : > { %3310 = vmatprep.subr.mxu0 %v2331_v16 }
 0x8e1   : > { %3311 = vmatpush3.msra.mxu0 %v2331_v16  ;;  %v3115_v16 = vld [vmem:[%s4102_s2] ss:$0 sm:$0xff] }
 0x8e2   : > { %3312 = vmatprep.subr.mxu0 %v2330_v17 }
 0x8e3   : > { %3313 = vmatpush3.msra.mxu0 %v2330_v17 }
 0x8e4   : > { %3314 = vmatprep.subr.mxu0 %v2329_v18 }
 0x8e5   : > { %3315 = vmatpush3.msra.mxu0 %v2329_v18 }
 0x8e6   : > { %3316 = vmatprep.subr.mxu0 %v2328_v19 }
 0x8e7   : > { %3317 = vmatpush3.msra.mxu0 %v2328_v19 }
 0x8e8   : > { %3321 = vmatprep.subr.mxu0 %v3479_v13 }
 0x957   : > { %v1465_v11 = vpop.f32.mrf.mxu0 }
 0x958   : > { %1640 = vrot.lane.b32.xlu0 %v1465_v11, %s3484_s6 }
 0x959   : > { %v3251_v12 = vpop.f32.mrf.mxu0 }
 0x95b   : > { %v1631_v14 = vpop.f32.mrf.mxu0 }
 0x95c   : > { %1644 = vrot.lane.b32.xlu0 %v1631_v14, %s3481_s0 }
 0x95d   : > { %v3261_v15 = vpop.f32.mrf.mxu0 }
 0x98c   : > { %v1810_v20 = vpop.f32.mrf.mxu0 }
 0x98e   : > { %v3271_v21 = vpop.f32.mrf.mxu0 }
 0x990   : > { %v1977_v22 = vpop.f32.mrf.mxu0 }
 0x991   : > { %2314 = vrot.lane.b32.xlu1 %v1977_v22, %s3486_s20 }
 0x992   : > { %v3281_v23 = vpop.f32.mrf.mxu0 }
 0x994   : > { %v2143_v24 = vpop.f32.mrf.mxu0 }
 0x995   : > { %2318 = vrot.lane.b32.xlu1 %v2143_v24, %s3484_s6  ;;  %s4103_s6 = sld [smem:[#allocation13_spill]] }
 0x996   : > { %v3291_v25 = vpop.f32.mrf.mxu0 }
 0x998   : > { %v2309_v26 = vpop.f32.mrf.mxu0 }
 0x999   : > { %2322 = vrot.lane.b32.xlu0 %v2309_v26, %s3481_s0 }
 0x99a   : > { %v3301_v27 = vpop.f32.mrf.mxu0 }
 0x99b   : > { %s4104_s28 = scalar_lea.vmem %s4103_s6, %s3592_s29 }
 0x9ca   : > { %v1641_v29 = vpop.permute.xlu0 %1640 }
 0x9cb   : > { %v1649_v31 = vsel %vm1648_vm5, %v1647_v30, %v1641_v29 }
 0x9ce   : > { %v1645_v32 = vpop.permute.xlu0 %1644 }
 0x9cf   : > { %v1651_v33 = vsel %vm1650_vm6, %v1649_v31, %v1645_v32  ;;  %v2691_v32 = vld [vmem:[%s3653_s25 + $0x38] sm:$0xff] }
 0x9d0   : > { %3318 = vmatprep.mubr.msk.f32.mxu0 %vm817_vm1, %v1651_v33  ;;  %v2690_v33 = vld [vmem:[%s3653_s25 + $0x30] sm:$0xff] }
 0xa03   : > { %v2315_v34 = vpop.permute.xlu1 %2314 }
 0xa04   : > { %v2325_v43 = vsel %vm975_vm3, %v1810_v20, %v2315_v34  ;;  %v2689_v34 = vld [vmem:[%s3653_s25 + $0x28] sm:$0xff] }
 0xa07   : > { %v2319_v35 = vpop.permute.xlu1 %2318 }
 0xa08   : > { %v2326_v38 = vsel %vm1648_vm5, %v2325_v43, %v2319_v35  ;;  %v2688_v35 = vld [vmem:[%s3653_s25 + $0x20] sm:$0xff]  ;;  %v2687_v43 = vld [vmem:[%s3653_s25 + $0x18] sm:$0xff] }
 0xa0b   : > { %v2323_v39 = vpop.permute.xlu0 %2322 }
 0xa0c   : > { %v2327_v46 = vsel %vm1650_vm6, %v2326_v38, %v2323_v39  ;;  %v2686_v38 = vld [vmem:[%s3653_s25 + $0x10] sm:$0xff]  ;;  %v2685_v39 = vld [vmem:[%s3653_s25 + $0x8] sm:$0xff] }
 0xa0d   : > { %3319 = vmatmul.mubr.msk.f32.vlgmr.msra.gmra.mxu0 %vm817_vm1, %v2327_v46  ;;  %v2797_v46 = vld [vmem:[%s3662_s22 + $0x78] sm:$0xff] }
 0xa0e   : > { %3322 = vmatpush3.msra.mxu0 %v2436_v40  ;;  %3337 = vmatprep.mubr.msk.f32.mxu0 %vm3480_vm2, %v3479_v13  ;;  %v2684_v40 = vld [vmem:[%s3653_s25] sm:$0xff] }
 0xa0f   : > { %3323 = vmatprep.subr.mxu0 %v3479_v13  ;;  %3378 = vmatprep.subr.mxu1 %v2797_v46 }
 0xa10   : > { %3324 = vmatpush3.msra.mxu0 %v2435_v8  ;;  %v2796_v8 = vld [vmem:[%s3662_s22 + $0x70] sm:$0xff] }
 0xa11   : > { %3325 = vmatprep.subr.mxu0 %v3479_v13 }
 0xa12   : > { %3326 = vmatpush3.msra.mxu0 %v2434_v41  ;;  %v2795_v41 = vld [vmem:[%s3662_s22 + $0x68] sm:$0xff] }
 0xa13   : > { %3327 = vmatprep.subr.mxu0 %v3479_v13 }
 0xa14   : > { %3328 = vmatpush3.msra.mxu0 %v2433_v42  ;;  %v2794_v42 = vld [vmem:[%s3662_s22 + $0x60] sm:$0xff] }
 0xa15   : > { %3329 = vmatprep.subr.mxu0 %v3479_v13 }
 0xa16   : > { %3330 = vmatpush3.msra.mxu0 %v2432_v45  ;;  %v2793_v45 = vld [vmem:[%s3662_s22 + $0x58] sm:$0xff] }
 0xa17   : > { %3331 = vmatprep.subr.mxu0 %v3479_v13 }
 0xa18   : > { %3332 = vmatpush3.msra.mxu0 %v2431_v47  ;;  %v2792_v47 = vld [vmem:[%s3662_s22 + $0x50] sm:$0xff] }
 0xa19   : > { %3333 = vmatprep.subr.mxu0 %v3479_v13 }
 0xa1a   : > { %3334 = vmatpush3.msra.mxu0 %v2430_v48  ;;  %v2791_v48 = vld [vmem:[%s3662_s22 + $0x48] sm:$0xff] }
 0xa1b   : > { %3335 = vmatprep.subr.mxu0 %v3479_v13  ;;  %v3118_v13 = vld [vmem:[%s4100_s5] ss:$0 sm:$0xff] }
 0xa1c   : > { %3336 = vmatpush3.msra.mxu0 %v2429_v49  ;;  %v2790_v49 = vld [vmem:[%s3662_s22 + $0x40] sm:$0xff] }
 0xa1d   : > { %3338 = vmatmul.mubr.msk.f32.vlgmr.msra.gmra.mxu0 %vm817_vm1, %v2428_v50  ;;  %3359 = vmatprep.subr.mxu0 %v2691_v32  ;;  %v2789_v50 = vld [vmem:[%s3662_s22 + $0x38] sm:$0xff] }
 0xa1e   : > { %3360 = vmatpush3.msra.mxu0 %v2691_v32 }
 0xa1f   : > { %3361 = vmatprep.subr.mxu0 %v2690_v33 }
 0xa20   : > { %3362 = vmatpush3.msra.mxu0 %v2690_v33 }
 0xa21   : > { %3363 = vmatprep.subr.mxu0 %v2689_v34 }
 0xa22   : > { %3364 = vmatpush3.msra.mxu0 %v2689_v34 }
 0xa23   : > { %3365 = vmatprep.subr.mxu0 %v2688_v35 }
 0xa24   : > { %3366 = vmatpush3.msra.mxu0 %v2688_v35 }
 0xa25   : > { %3367 = vmatprep.subr.mxu0 %v2687_v43 }
 0xa26   : > { %3368 = vmatpush3.msra.mxu0 %v2687_v43 }
 0xa27   : > { %3369 = vmatprep.subr.mxu0 %v2686_v38 }
 0xa28   : > { %3370 = vmatpush3.msra.mxu0 %v2686_v38 }
 0xa29   : > { %3371 = vmatprep.subr.mxu0 %v2685_v39 }
 0xa2a   : > { %3372 = vmatpush3.msra.mxu0 %v2685_v39 }
 0xa2b   : > { %3373 = vmatprep.subr.mxu0 %v2684_v40 }
 0xa2c   : > { %3374 = vmatpush3.msra.mxu0 %v2684_v40 }
 0xacd   : > { %v3320_v59 = vpop.f32.mrf.mxu0 }
 0xace   : > { %v2418_v12 = vadd.f32 %v3320_v59, %v3765_v56 }
 0xacf   : > { %v2408_v60 = vpop.f32.mrf.mxu0 }
 0xad0   : > { %v2417_v10 = vadd.f32 %v2408_v60, %v3683_v2  ;;  %v2427_v36 = vadd.f32 %v3115_v16, %v2418_v12 }
 0xad2   : > { %v2426_v17 = vadd.f32 %v3115_v16, %v2417_v10  ;;  %v2782_v10 = vld [vmem:[%s3662_s22] sm:$0xff] }
 0xadd   : > { %v2513_v62 = vpop.f32.mrf.mxu0 }
 0xade   : > { %v2514_v63 = vadd.f32 %v3116_v61, %v2513_v62  ;;  %v3120_v61 = vld [vmem:[%s4104_s28] ss:$0 sm:$0xff] }
 0xadf   : > { %v3339_v0 = vpop.f32.mrf.mxu0 }
 0xae0   : > { %3357 = vmatmul.mubr.msk.f32.vlgmr.msra.gmra.mxu1 %vm817_vm1, %v2514_v63  ;;  %v3121_v0 = vld [vmem:[%s787_s8] ss:$0 sm:$0xff] }
 0xae1   : > { %3379 = vmatpush3.msra.mxu1 %v2797_v46 }
 0xae2   : > { %3380 = vmatprep.subr.mxu1 %v2796_v8 }
 0xae3   : > { %3381 = vmatpush3.msra.mxu1 %v2796_v8 }
 0xae4   : > { %3382 = vmatprep.subr.mxu1 %v2795_v41 }
 0xae5   : > { %3383 = vmatpush3.msra.mxu1 %v2795_v41 }
 0xae6   : > { %3384 = vmatprep.subr.mxu1 %v2794_v42 }
 0xae7   : > { %3385 = vmatpush3.msra.mxu1 %v2794_v42 }
 0xae8   : > { %3386 = vmatprep.subr.mxu1 %v2793_v45 }
 0xae9   : > { %3387 = vmatpush3.msra.mxu1 %v2793_v45 }
 0xaea   : > { %3388 = vmatprep.subr.mxu1 %v2792_v47 }
 0xaeb   : > { %3389 = vmatpush3.msra.mxu1 %v2792_v47 }
 0xaec   : > { %3390 = vmatprep.subr.mxu1 %v2791_v48 }
 0xaed   : > { %3391 = vmatpush3.msra.mxu1 %v2791_v48 }
 0xaee   : > { %3392 = vmatprep.subr.mxu1 %v2790_v49 }
 0xaef   : > { %3393 = vmatpush3.msra.mxu1 %v2790_v49 }
 0xaf0   : > { %3394 = vmatprep.subr.mxu1 %v2789_v50 }
 0xaf1   : > { %3395 = vmatpush3.msra.mxu1 %v2789_v50 }
 0xaf2   : > { %3396 = vmatprep.subr.mxu1 %v2788_v51 }
 0xaf3   : > { %3397 = vmatpush3.msra.mxu1 %v2788_v51 }
 0xaf4   : > { %3398 = vmatprep.subr.mxu1 %v2787_v52 }
 0xaf5   : > { %3399 = vmatpush3.msra.mxu1 %v2787_v52 }
 0xaf6   : > { %3400 = vmatprep.subr.mxu1 %v2786_v53 }
 0xaf7   : > { %3401 = vmatpush3.msra.mxu1 %v2786_v53 }
 0xba0   : > { %v2601_v6 = vpop.f32.mrf.mxu1 }
 0xba1   : > { %v2602_v7 = vadd.f32 %v3118_v13, %v2601_v6  ;;  %v2785_v6 = vld [vmem:[%s3662_s22 + $0x18] sm:$0xff] }
 0xba2   : > { %v3358_v9 = vpop.f32.mrf.mxu1  ;;  %3402 = vmatprep.subr.mxu1 %v2785_v6 }
 0xba3   : > { %v2612_v11 = vrot.slane %v2602_v7, %v2611_v5  ;;  %3403 = vmatpush3.msra.mxu1 %v2785_v6  ;;  %v2784_v7 = vld [vmem:[%s3662_s22 + $0x10] sm:$0xff]  ;;  %v2783_v9 = vld [vmem:[%s3662_s22 + $0x8] sm:$0xff] }
 0xba4   : > { %3404 = vmatprep.subr.mxu1 %v2784_v7 }
 0xba5   : > { %v2613_v14 = vcombine.high %v2612_v11, %v2612_v11  ;;  %v2620_v15 = vrot.slane %v2612_v11, %v2611_v5  ;;  %3405 = vmatpush3.msra.mxu1 %v2784_v7  ;;  %v3122_v11 = vld [vmem:[%s795_s23] ss:$0 sm:$0xff] }
 0xba6   : > { %3406 = vmatprep.subr.mxu1 %v2783_v9 }
 0xba7   : > { %v2627_v18 = vrot.slane %v2613_v14, %v2611_v5  ;;  %v2631_v19 = vrot.slane %v2620_v15, %v3731_v37  ;;  %3407 = vmatpush3.msra.mxu1 %v2783_v9 }
 0xba8   : > { %3408 = vmatprep.subr.mxu1 %v2782_v10 }
 0xba9   : > { %v3960_v20 = vadd.f32 %v2631_v19, %v2426_v17  ;;  %v2635_v21 = vrot.slane %v2627_v18, %v3731_v37  ;;  %3409 = vmatpush3.msra.mxu1 %v2782_v10 }
 0xbab   : > { %v2642_v2 = vsel %vm817_vm1, %v3960_v20, 0.0  ;;  %v3965_v56 = vadd.f32 %v2635_v21, %v2427_v36  ;;  %v3125_v36 = vld [vmem:[%s803_s12] ss:$0 sm:$0xff] }
 0xbac   : > { %2643 = vadd.xlane.f32.xlu1 %v2642_v2 }
 0xbad   : > { %v2645_v22 = vsel %vm817_vm1, %v3965_v56, 0.0 }
 0xbae   : > { %2646 = vadd.xlane.f32.xlu0 %v2645_v22 }
 0xc35   : > { %v2644_v23 = vpop.xlane.xlu1 %2643 }
 0xc36   : > { %v2648_v24 = vmul.f32 0.015625, %v2644_v23 }
 0xc37   : > { %v2647_v25 = vpop.xlane.xlu0 %2646 }
 0xc38   : > { %v3970_v26 = vsub.f32 %v3960_v20, %v2648_v24  ;;  %v2649_v37 = vmul.f32 0.015625, %v2647_v25 }
 0xc3a   : > { %v3973_v27 = vsub.f32 %v3965_v56, %v2649_v37  ;;  %v2652_v28 = vmul.f32 %v3970_v26, %v3970_v26 }
 0xc3c   : > { %v2654_v29 = vsel %vm817_vm1, %v2652_v28, 0.0  ;;  %v2653_v30 = vmul.f32 %v3973_v27, %v3973_v27 }
 0xc3d   : > { %2655 = vadd.xlane.f32.xlu0 %v2654_v29 }
 0xc3e   : > { %v2657_v31 = vsel %vm817_vm1, %v2653_v30, 0.0 }
 0xc3f   : > { %2658 = vadd.xlane.f32.xlu1 %v2657_v31 }
 0xcc6   : > { %v2656_v44 = vpop.xlane.xlu0 %2655 }
 0xcc7   : > { %v2660_v54 = vmul.f32 0.015625, %v2656_v44 }
 0xcc8   : > { %v2659_v55 = vpop.xlane.xlu1 %2658 }
 0xcc9   : > { %v2662_v57 = vadd.f32 1e-05, %v2660_v54  ;;  %v2661_v58 = vmul.f32 0.015625, %v2659_v55 }
 0xccb   : > { %3467 = vrsqrt.f32 %v2662_v57  ;;  %v2663_v59 = vadd.f32 1e-05, %v2661_v58 }
 0xccd   : > { %3469 = vrsqrt.f32 %v2663_v59 }
 0xcd8   : > { %v3468_v60 = vpop.eup %3467 }
 0xcd9   : > { %v2666_v62 = vmul.f32 %v3468_v60, %v3970_v26 }
 0xcda   : > { %v3470_v63 = vpop.eup %3469 }
 0xcdb   : > { %v2667_v1 = vmul.f32 %v3470_v63, %v3973_v27  ;;  %v2674_v3 = vmul.f32 %v3120_v61, %v2666_v62 }
 0xcdd   : > { %v2675_v4 = vmul.f32 %v3120_v61, %v2667_v1  ;;  %v2682_v13 = vadd.f32 %v3121_v0, %v2674_v3 }
 0xcdf   : > { %v2683_v5 = vadd.f32 %v3121_v0, %v2675_v4  ;;  %3375 = vmatprep.mubr.msk.f32.mxu0 %vm817_vm1, %v2682_v13 }
 0xce1   : > { %3376 = vmatmul.mubr.msk.f32.vlgmr.msra.gmra.mxu0 %vm817_vm1, %v2683_v5 }
 0xda1   : > { %v3377_v12 = vpop.f32.mrf.mxu0 }
 0xda2   : > { %v2777_v14 = vadd.f32 %v3377_v12, %v3122_v11 }
 0xda3   : > { %v2771_v15 = vpop.f32.mrf.mxu0 }
 0xda4   : > { %v2772_v16 = vadd.f32 %v3122_v11, %v2771_v15  ;;  %v2781_v18 = vmax.f32 %v2777_v14, 0.0 }
 0xda6   : > { %v2780_v17 = vmax.f32 %v2772_v16, 0.0 }
 0xda8   : > { %3410 = vmatprep.mubr.f32.mxu1 %v2780_v17 }
 0xda9   : > { %3411 = vmatmul.mubr.f32.vlgmr.msra.gmra.mxu1 %v2781_v18 }
 0xe69   : > { %v3412_v19 = vpop.f32.mrf.mxu1 }
 0xe6a   : > { %v2874_v21 = vadd.f32 %v3412_v19, %v3965_v56 }
 0xe6b   : > { %v2864_v2 = vpop.f32.mrf.mxu1 }
 0xe6c   : > { %v2883_v22 = vadd.f32 %v3125_v36, %v2874_v21  ;;  %v2873_v23 = vadd.f32 %v2864_v2, %v3960_v20 }
 0xe6e   : > { %2885 = vst.msk [vmem:[%s4093_s19 + $0x8] sm:$0xff] %vm817_vm1, %v2883_v22  ;;  %v2882_v24 = vadd.f32 %v3125_v36, %v2873_v23 }
 0xe70   : > { %2884 = vst.msk [vmem:[%s4093_s19] sm:$0xff] %vm817_vm1, %v2882_v24 }
 0xe71 PF: > { %s4106_s29 = sld [smem:[#allocation2_spill]] }
 0xe77   : > { %s28_s27 = sadd.s32 1, %s4106_s29  }
 0xe78   : > { %p25_p5 = scmp.ge.s32.totalorder %s28_s27, 4  }
 0xe7a   :  { %27 = sbr.rel (!%p25_p5) target bundleno = 15 (0xf), region = 167 }

</bundles_post_ra>
